<compile_context>
chip_gen: v5e
topology: v5e:2x2
jax: 0.10.0
libtpu: 0.0.40
codegen_flags: <defaults>
</compile_context>

<pallas_src>
import functools

import jax
import jax.numpy as jnp
from jax.experimental import pallas as pl
from jax.experimental.pallas import tpu as pltpu

BN_EPS = 1e-5


def _round_up(v, m):
    return ((v + m - 1) // m) * m


def _conv_block_res_kernel(x_ref, mask_ref, w1_ref, a1_ref, b1_ref,
                           w2_ref, a2_ref, b2_ref, ws_ref, bs_ref,
                           o_ref, h1_ref, *, Wp, Rc, Cout, halo, use_shortcut):
    # x_ref  : (R_full, K1)        bf16  width-3 (kx) packed, zero-padded input
    # h1_ref : (Rc + 2*halo, Cout) bf16  staged conv1 output with zero halo
    # o_ref  : (Rc, Co_pad)        bf16  lane-dense (128-wide) output slab
    lanes = h1_ref.shape[1]
    Co = o_ref.shape[-1]
    Rh = Rc // 2

    # Zero only the halo rows of the staging scratch; the interior is fully
    # overwritten below.  Done unconditionally (cheap: a few vregs) so it is
    # correct even when the "parallel" batch axis is sharded across cores.
    h1_ref[pl.ds(0, halo), :] = jnp.zeros((halo, lanes), h1_ref.dtype)
    h1_ref[pl.ds(halo + Rc, halo), :] = jnp.zeros((halo, lanes), h1_ref.dtype)

    # ---- conv1 (+ folded BN1 + ReLU), two row halves ----------------------
    # Three ky-tap matmuls; the kx taps are already packed along K in the
    # wrapper, so the row shifts are multiples of Wp (8-aligned).
    for half in range(2):
        base = half * Rh
        acc = jnp.zeros((Rh, Cout), jnp.float32)
        for ky in range(3):
            win = x_ref[pl.ds(base + ky * Wp, Rh), :]
            acc = acc + jnp.dot(win, w1_ref[ky],
                                preferred_element_type=jnp.float32)
        h = jnp.maximum(acc * a1_ref[...] + b1_ref[...], 0.0)
        # Re-zero the padding columns so the staged value is a valid
        # zero-padded input for conv2.
        h = h * mask_ref[pl.ds(base, Rh), :]
        h1_ref[pl.ds(halo + base, Rh), :] = h.astype(h1_ref.dtype)

    # ---- conv2 (+ folded BN2 + ReLU) and shortcut, two row halves ----------
    # The kx taps are packed along K at read time (lane concat of the three
    # width-neighbour windows); only these +-1 reads remain odd-offset.
    for half in range(2):
        base = half * Rh
        acc2 = jnp.zeros((Rh, Co), jnp.float32)
        for ky in range(3):
            s = halo + base + (ky - 1) * Wp
            win = jnp.concatenate(
                [h1_ref[pl.ds(s - 1, Rh), :],
                 h1_ref[pl.ds(s, Rh), :],
                 h1_ref[pl.ds(s + 1, Rh), :]], axis=-1)
            acc2 = acc2 + jnp.dot(win, w2_ref[ky],
                                  preferred_element_type=jnp.float32)
        y = jnp.maximum(acc2 * a2_ref[...] + b2_ref[...], 0.0)
        if use_shortcut:
            # 1x1-conv shortcut folded into one matmul against the packed
            # input's center block (ws_ref is zero outside that block).
            xc = x_ref[pl.ds(Wp + base, Rh), :]
            y = y + (jnp.dot(xc, ws_ref[...],
                             preferred_element_type=jnp.float32) + bs_ref[...])
        o_ref[pl.ds(base, Rh), :] = y.astype(o_ref.dtype)


def conv_block_res(x, w1, g1, be1, rm1, rv1, w2, g2, be2, rm2, rv2,
                   ws=None, bs=None):
    """ConvBlockRes forward, NCHW in / NCHW out (BatchNorm in inference mode)."""
    B, Cin, H, W = x.shape
    Cout = w1.shape[0]
    use_shortcut = ws is not None
    if not use_shortcut:
        assert Cin == Cout, "identity residual requires in_channels == out_channels"

    f32, bf16 = jnp.float32, jnp.bfloat16

    Wp = _round_up(W + 2, 8)          # padded-grid row length (sublane aligned)
    Hp = H + 2
    Rc = H * Wp                       # computed rows: only the H interior image rows
    R_full = Hp * Wp                  # packed-input rows (incl. top/bottom pad rows)
    K1 = _round_up(3 * Cin, 128)      # conv1 packed contraction width
    Co_pad = _round_up(Cout, 128)     # lane-dense output width
    halo = _round_up(Wp + 1, 16)      # zero halo rows around the staged conv1 output

    # ---- input: NCHW -> channels-last padded grid, width-3 (kx) K-packing ----
    x_nhwc = jnp.transpose(x, (0, 2, 3, 1))
    x_pad = jnp.pad(x_nhwc, ((0, 0), (1, 1), (1, Wp - W - 1), (0, 0)))
    x_flat = x_pad.reshape(B, R_full, Cin)
    zrow = jnp.zeros((B, 1, Cin), x_flat.dtype)
    x_m1 = jnp.concatenate([zrow, x_flat[:, :-1]], axis=1)        # x(w-1)
    x_p1 = jnp.concatenate([x_flat[:, 1:], zrow], axis=1)         # x(w+1)
    x_packed = jnp.concatenate([x_m1, x_flat, x_p1], axis=-1)     # (B, R_full, 3*Cin)
    x_packed = jnp.pad(x_packed,
                       ((0, 0), (0, 0), (0, K1 - 3 * Cin))).astype(bf16)

    # ---- conv weights -> (ky, 3*C, C) packed along the kx taps, bf16 once ----
    w1t = jnp.transpose(w1, (2, 3, 1, 0)).reshape(3, 3 * Cin, Cout)
    w1t = jnp.pad(w1t, ((0, 0), (0, K1 - 3 * Cin), (0, 0))).astype(bf16)
    w2t = jnp.transpose(w2, (2, 3, 1, 0)).reshape(3, 3 * Cout, Cout)
    w2t = jnp.pad(w2t, ((0, 0), (0, 0), (0, Co_pad - Cout))).astype(bf16)

    # ---- fold BatchNorm (eval) into per-channel scale / shift ----
    inv1 = g1 / jnp.sqrt(rv1 + BN_EPS)
    a1 = inv1.reshape(1, Cout).astype(f32)
    b1 = (be1 - rm1 * inv1).reshape(1, Cout).astype(f32)
    inv2 = g2 / jnp.sqrt(rv2 + BN_EPS)
    a2 = jnp.pad(inv2, (0, Co_pad - Cout)).reshape(1, Co_pad).astype(f32)
    b2 = jnp.pad(be2 - rm2 * inv2,
                 (0, Co_pad - Cout)).reshape(1, Co_pad).astype(f32)

    # ---- projection shortcut lifted onto the packed-input center block ----
    if use_shortcut:
        ws_mat = jnp.transpose(ws.reshape(Cout, Cin), (1, 0))     # (Cin, Cout)
        ws_full = jnp.zeros((K1, Co_pad), f32).at[Cin:2 * Cin, :Cout].set(ws_mat)
        ws_full = ws_full.astype(bf16)
        bs_full = jnp.pad(bs, (0, Co_pad - Cout)).reshape(1, Co_pad).astype(f32)
    else:
        ws_full = jnp.zeros((K1, Co_pad), bf16)                   # unused in-kernel
        bs_full = jnp.zeros((1, Co_pad), f32)

    # ---- mask of valid (interior) columns within each computed row ----
    col = jnp.arange(Wp)
    mask = jnp.tile(((col >= 1) & (col <= W)).astype(f32), H).reshape(Rc, 1)

    kernel = functools.partial(_conv_block_res_kernel, Wp=Wp, Rc=Rc, Cout=Cout,
                               halo=halo, use_shortcut=use_shortcut)
    full = lambda a: pl.BlockSpec(a.shape, lambda b: (0,) * a.ndim)

    out_flat = pl.pallas_call(
        kernel,
        out_shape=jax.ShapeDtypeStruct((B, Rc, Co_pad), bf16),
        grid_spec=pltpu.PrefetchScalarGridSpec(
            num_scalar_prefetch=0,
            grid=(B,),
            in_specs=[
                pl.BlockSpec((None, R_full, K1), lambda b: (b, 0, 0)),   # x_packed
                full(mask),
                full(w1t), full(a1), full(b1),
                full(w2t), full(a2), full(b2),
                full(ws_full), full(bs_full),
            ],
            out_specs=pl.BlockSpec((None, Rc, Co_pad), lambda b: (b, 0, 0)),
            scratch_shapes=[pltpu.VMEM((Rc + 2 * halo, Cout), bf16)],
        ),
        compiler_params=pltpu.CompilerParams(
            dimension_semantics=("parallel",),
        ),
    )(x_packed, mask, w1t, a1, b1, w2t, a2, b2, ws_full, bs_full)

    out = out_flat.reshape(B, H, Wp, Co_pad)[:, :, 1:W + 1, :Cout].astype(f32)
    if not use_shortcut:
        out = out + x_nhwc            # identity residual added in f32 (no MXU eye)
    return jnp.transpose(out, (0, 3, 1, 2))


def reference(x, w1, g1, be1, rm1, rv1, w2, g2, be2, rm2, rv2, ws=None, bs=None):
    """Pure-JAX (f32) reference mirroring the PyTorch module in eval mode."""
    dn = ("NCHW", "OIHW", "NCHW")

    def bn(z, g, b, rm, rv):
        sh = (1, -1, 1, 1)
        return ((z - rm.reshape(sh)) / jnp.sqrt(rv.reshape(sh) + BN_EPS)
                * g.reshape(sh) + b.reshape(sh))

    h = jax.nn.relu(bn(jax.lax.conv_general_dilated(
        x, w1, (1, 1), ((1, 1), (1, 1)), dimension_numbers=dn), g1, be1, rm1, rv1))
    y = jax.nn.relu(bn(jax.lax.conv_general_dilated(
        h, w2, (1, 1), ((1, 1), (1, 1)), dimension_numbers=dn), g2, be2, rm2, rv2))
    if ws is None:
        sc = x
    else:
        sc = (jax.lax.conv_general_dilated(
            x, ws, (1, 1), ((0, 0), (0, 0)), dimension_numbers=dn)
            + bs.reshape(1, -1, 1, 1))
    return y + sc


if __name__ == "__main__":
    # ---- projection-shortcut case (in_channels != out_channels) ----
    B, Cin, Cout, H, W = 2, 32, 64, 16, 16
    ks = jax.random.split(jax.random.PRNGKey(0), 13)

    x = jax.random.normal(ks[0], (B, Cin, H, W), jnp.float32)
    w1 = jax.random.normal(ks[1], (Cout, Cin, 3, 3), jnp.float32) / (3.0 * float(Cin) ** 0.5)
    w2 = jax.random.normal(ks[2], (Cout, Cout, 3, 3), jnp.float32) / (3.0 * float(Cout) ** 0.5)
    ws = jax.random.normal(ks[3], (Cout, Cin, 1, 1), jnp.float32) / float(Cin) ** 0.5
    bs = 0.1 * jax.random.normal(ks[4], (Cout,), jnp.float32)
    g1 = 1.0 + 0.1 * jax.random.normal(ks[5], (Cout,), jnp.float32)
    be1 = 0.1 * jax.random.normal(ks[6], (Cout,), jnp.float32)
    rm1 = 0.1 * jax.random.normal(ks[7], (Cout,), jnp.float32)
    rv1 = jax.random.uniform(ks[8], (Cout,), jnp.float32, 0.5, 1.5)
    g2 = 1.0 + 0.1 * jax.random.normal(ks[9], (Cout,), jnp.float32)
    be2 = 0.1 * jax.random.normal(ks[10], (Cout,), jnp.float32)
    rm2 = 0.1 * jax.random.normal(ks[11], (Cout,), jnp.float32)
    rv2 = jnp.linspace(0.6, 1.4, Cout).astype(jnp.float32)

    out = conv_block_res(x, w1, g1, be1, rm1, rv1, w2, g2, be2, rm2, rv2, ws, bs)
    out = jax.block_until_ready(out)
    ref = reference(x, w1, g1, be1, rm1, rv1, w2, g2, be2, rm2, rv2, ws, bs)
    assert out.shape == (B, Cout, H, W)
    max_err = float(jnp.max(jnp.abs(out - ref)))
    # bf16 matmul operands + bf16 output with f32 accumulation -> loose tolerance.
    assert jnp.allclose(out, ref, rtol=5e-2, atol=8e-2), max_err

    # ---- identity-shortcut case (in_channels == out_channels) ----
    Ci, Hs, Wsz = 32, 8, 8
    kk = jax.random.split(jax.random.PRNGKey(1), 11)
    xi = jax.random.normal(kk[0], (B, Ci, Hs, Wsz), jnp.float32)
    v1 = jax.random.normal(kk[1], (Ci, Ci, 3, 3), jnp.float32) / (3.0 * float(Ci) ** 0.5)
    v2 = jax.random.normal(kk[2], (Ci, Ci, 3, 3), jnp.float32) / (3.0 * float(Ci) ** 0.5)
    ga1 = 1.0 + 0.1 * jax.random.normal(kk[3], (Ci,), jnp.float32)
    bb1 = 0.1 * jax.random.normal(kk[4], (Ci,), jnp.float32)
    m1 = 0.1 * jax.random.normal(kk[5], (Ci,), jnp.float32)
    vv1 = jax.random.uniform(kk[6], (Ci,), jnp.float32, 0.5, 1.5)
    ga2 = 1.0 + 0.1 * jax.random.normal(kk[7], (Ci,), jnp.float32)
    bb2 = 0.1 * jax.random.normal(kk[8], (Ci,), jnp.float32)
    m2 = 0.1 * jax.random.normal(kk[9], (Ci,), jnp.float32)
    vv2 = jax.random.uniform(kk[10], (Ci,), jnp.float32, 0.5, 1.5)

    out_i = conv_block_res(xi, v1, ga1, bb1, m1, vv1, v2, ga2, bb2, m2, vv2)
    out_i = jax.block_until_ready(out_i)
    ref_i = reference(xi, v1, ga1, bb1, m1, vv1, v2, ga2, bb2, m2, vv2)
    assert out_i.shape == (B, Ci, Hs, Wsz)
    max_err_i = float(jnp.max(jnp.abs(out_i - ref_i)))
    assert jnp.allclose(out_i, ref_i, rtol=5e-2, atol=8e-2), max_err_i

    print("KERNEL_OK")
</pallas_src>

<mosaic_0001>
module attributes {stable_mosaic.version = 11 : i64} {
  func.func @_conv_block_res_kernel(%arg0: i32, %arg1: memref<1x432x128xbf16, #tpu.memory_space<vmem>>, %arg2: memref<384x1xf32, #tpu.memory_space<vmem>>, %arg3: memref<3x128x64xbf16, #tpu.memory_space<vmem>>, %arg4: memref<1x64xf32, #tpu.memory_space<vmem>>, %arg5: memref<1x64xf32, #tpu.memory_space<vmem>>, %arg6: memref<3x192x128xbf16, #tpu.memory_space<vmem>>, %arg7: memref<1x128xf32, #tpu.memory_space<vmem>>, %arg8: memref<1x128xf32, #tpu.memory_space<vmem>>, %arg9: memref<128x128xbf16, #tpu.memory_space<vmem>>, %arg10: memref<1x128xf32, #tpu.memory_space<vmem>>, %arg11: memref<1x384x128xbf16, #tpu.memory_space<vmem>>, %arg12: memref<448x64xbf16, #tpu.memory_space<vmem>>) attributes {dimension_semantics = [#tpu.dimension_semantics<parallel>], iteration_bounds = array<i64: 2>, scalar_prefetch = 0 : i64, scratch_operands = 1 : i64, tpu.core_type = #tpu.core_type<tc>, window_params = [{transform_indices = @transform_0, window_bounds = array<i64: 1, 432, 128>}, {pipeline_mode = #tpu.pipeline_mode<synchronous>, transform_indices = @transform_1, window_bounds = array<i64: 384, 1>}, {pipeline_mode = #tpu.pipeline_mode<synchronous>, transform_indices = @transform_2, window_bounds = array<i64: 3, 128, 64>}, {pipeline_mode = #tpu.pipeline_mode<synchronous>, transform_indices = @transform_3, window_bounds = array<i64: 1, 64>}, {pipeline_mode = #tpu.pipeline_mode<synchronous>, transform_indices = @transform_4, window_bounds = array<i64: 1, 64>}, {pipeline_mode = #tpu.pipeline_mode<synchronous>, transform_indices = @transform_5, window_bounds = array<i64: 3, 192, 128>}, {pipeline_mode = #tpu.pipeline_mode<synchronous>, transform_indices = @transform_6, window_bounds = array<i64: 1, 128>}, {pipeline_mode = #tpu.pipeline_mode<synchronous>, transform_indices = @transform_7, window_bounds = array<i64: 1, 128>}, {pipeline_mode = #tpu.pipeline_mode<synchronous>, transform_indices = @transform_8, window_bounds = array<i64: 128, 128>}, {pipeline_mode = #tpu.pipeline_mode<synchronous>, transform_indices = @transform_9, window_bounds = array<i64: 1, 128>}, {transform_indices = @transform_10, window_bounds = array<i64: 1, 384, 128>}]} {
    %cst = arith.constant 0.000000e+00 : bf16
    %0 = vector.broadcast %cst : bf16 to vector<32x64xbf16>
    %c0 = arith.constant 0 : index
    %c0_0 = arith.constant 0 : index
    %1 = vector.load %arg12[%c0, %c0_0] : memref<448x64xbf16, #tpu.memory_space<vmem>>, vector<32x64xbf16>
    tpu.vector_store %arg12[%c0, %c0_0], %0 {strides = array<i32>} : memref<448x64xbf16, #tpu.memory_space<vmem>>, vector<32x64xbf16>,
    %cst_1 = arith.constant 0.000000e+00 : bf16
    %2 = vector.broadcast %cst_1 : bf16 to vector<32x64xbf16>
    %c416 = arith.constant 416 : index
    %c0_2 = arith.constant 0 : index
    %3 = vector.load %arg12[%c416, %c0_2] : memref<448x64xbf16, #tpu.memory_space<vmem>>, vector<32x64xbf16>
    tpu.vector_store %arg12[%c416, %c0_2], %2 {strides = array<i32>} : memref<448x64xbf16, #tpu.memory_space<vmem>>, vector<32x64xbf16>,
    %cst_3 = arith.constant 0.000000e+00 : f32
    %4 = vector.broadcast %cst_3 : f32 to vector<192x64xf32>
    %c0_4 = arith.constant 0 : index
    %c0_5 = arith.constant 0 : index
    %c0_6 = arith.constant 0 : index
    %5 = vector.load %arg1[%c0_4, %c0_5, %c0_6] : memref<1x432x128xbf16, #tpu.memory_space<vmem>>, vector<1x192x128xbf16>
    %6 = vector.shape_cast %5 : vector<1x192x128xbf16> to vector<192x128xbf16>
    %c0_7 = arith.constant 0 : index
    %c0_8 = arith.constant 0 : index
    %c0_9 = arith.constant 0 : index
    %7 = vector.load %arg3[%c0_7, %c0_8, %c0_9] : memref<3x128x64xbf16, #tpu.memory_space<vmem>>, vector<1x128x64xbf16>
    %8 = vector.shape_cast %7 : vector<1x128x64xbf16> to vector<128x64xbf16>
    %cst_10 = arith.constant dense<0.000000e+00> : vector<192x64xf32>
    %9 = tpu.matmul %6, %8, %cst_10 {dimension_numbers = #tpu.dot_dimension_numbers<[1], [0], [0], [1], [0, 0, 1, 1], [], []>} : vector<192x128xbf16>, vector<128x64xbf16>, vector<192x64xf32> -> vector<192x64xf32>
    %10 = arith.addf %4, %9 : vector<192x64xf32>
    %c0_11 = arith.constant 0 : index
    %c24 = arith.constant 24 : index
    %c0_12 = arith.constant 0 : index
    %11 = vector.load %arg1[%c0_11, %c24, %c0_12] : memref<1x432x128xbf16, #tpu.memory_space<vmem>>, vector<1x192x128xbf16>
    %12 = vector.shape_cast %11 : vector<1x192x128xbf16> to vector<192x128xbf16>
    %c1 = arith.constant 1 : index
    %c0_13 = arith.constant 0 : index
    %c0_14 = arith.constant 0 : index
    %13 = vector.load %arg3[%c1, %c0_13, %c0_14] : memref<3x128x64xbf16, #tpu.memory_space<vmem>>, vector<1x128x64xbf16>
    %14 = vector.shape_cast %13 : vector<1x128x64xbf16> to vector<128x64xbf16>
    %cst_15 = arith.constant dense<0.000000e+00> : vector<192x64xf32>
    %15 = tpu.matmul %12, %14, %cst_15 {dimension_numbers = #tpu.dot_dimension_numbers<[1], [0], [0], [1], [0, 0, 1, 1], [], []>} : vector<192x128xbf16>, vector<128x64xbf16>, vector<192x64xf32> -> vector<192x64xf32>
    %16 = arith.addf %10, %15 : vector<192x64xf32>
    %c0_16 = arith.constant 0 : index
    %c48 = arith.constant 48 : index
    %c0_17 = arith.constant 0 : index
    %17 = vector.load %arg1[%c0_16, %c48, %c0_17] : memref<1x432x128xbf16, #tpu.memory_space<vmem>>, vector<1x192x128xbf16>
    %18 = vector.shape_cast %17 : vector<1x192x128xbf16> to vector<192x128xbf16>
    %c2 = arith.constant 2 : index
    %c0_18 = arith.constant 0 : index
    %c0_19 = arith.constant 0 : index
    %19 = vector.load %arg3[%c2, %c0_18, %c0_19] : memref<3x128x64xbf16, #tpu.memory_space<vmem>>, vector<1x128x64xbf16>
    %20 = vector.shape_cast %19 : vector<1x128x64xbf16> to vector<128x64xbf16>
    %cst_20 = arith.constant dense<0.000000e+00> : vector<192x64xf32>
    %21 = tpu.matmul %18, %20, %cst_20 {dimension_numbers = #tpu.dot_dimension_numbers<[1], [0], [0], [1], [0, 0, 1, 1], [], []>} : vector<192x128xbf16>, vector<128x64xbf16>, vector<192x64xf32> -> vector<192x64xf32>
    %22 = arith.addf %16, %21 : vector<192x64xf32>
    %c0_21 = arith.constant 0 : index
    %c0_22 = arith.constant 0 : index
    %23 = vector.load %arg4[%c0_21, %c0_22] : memref<1x64xf32, #tpu.memory_space<vmem>>, vector<1x64xf32>
    %24 = vector.broadcast %23 : vector<1x64xf32> to vector<192x64xf32>
    %25 = arith.mulf %22, %24 : vector<192x64xf32>
    %c0_23 = arith.constant 0 : index
    %c0_24 = arith.constant 0 : index
    %26 = vector.load %arg5[%c0_23, %c0_24] : memref<1x64xf32, #tpu.memory_space<vmem>>, vector<1x64xf32>
    %27 = vector.broadcast %26 : vector<1x64xf32> to vector<192x64xf32>
    %28 = arith.addf %25, %27 : vector<192x64xf32>
    %cst_25 = arith.constant 0.000000e+00 : f32
    %29 = vector.broadcast %cst_25 : f32 to vector<192x64xf32>
    %30 = arith.maximumf %28, %29 : vector<192x64xf32>
    %c0_26 = arith.constant 0 : index
    %c0_27 = arith.constant 0 : index
    %31 = vector.load %arg2[%c0_26, %c0_27] : memref<384x1xf32, #tpu.memory_space<vmem>>, vector<192x1xf32>
    %32 = vector.broadcast %31 : vector<192x1xf32> to vector<192x64xf32>
    %33 = arith.mulf %30, %32 : vector<192x64xf32>
    %34 = arith.truncf %33 : vector<192x64xf32> to vector<192x64xbf16>
    %c32 = arith.constant 32 : index
    %c0_28 = arith.constant 0 : index
    %35 = vector.load %arg12[%c32, %c0_28] : memref<448x64xbf16, #tpu.memory_space<vmem>>, vector<192x64xbf16>
    tpu.vector_store %arg12[%c32, %c0_28], %34 {strides = array<i32>} : memref<448x64xbf16, #tpu.memory_space<vmem>>, vector<192x64xbf16>,
    %cst_29 = arith.constant 0.000000e+00 : f32
    %36 = vector.broadcast %cst_29 : f32 to vector<192x64xf32>
    %c0_30 = arith.constant 0 : index
    %c192 = arith.constant 192 : index
    %c0_31 = arith.constant 0 : index
    %37 = vector.load %arg1[%c0_30, %c192, %c0_31] : memref<1x432x128xbf16, #tpu.memory_space<vmem>>, vector<1x192x128xbf16>
    %38 = vector.shape_cast %37 : vector<1x192x128xbf16> to vector<192x128xbf16>
    %c0_32 = arith.constant 0 : index
    %c0_33 = arith.constant 0 : index
    %c0_34 = arith.constant 0 : index
    %39 = vector.load %arg3[%c0_32, %c0_33, %c0_34] : memref<3x128x64xbf16, #tpu.memory_space<vmem>>, vector<1x128x64xbf16>
    %40 = vector.shape_cast %39 : vector<1x128x64xbf16> to vector<128x64xbf16>
    %cst_35 = arith.constant dense<0.000000e+00> : vector<192x64xf32>
    %41 = tpu.matmul %38, %40, %cst_35 {dimension_numbers = #tpu.dot_dimension_numbers<[1], [0], [0], [1], [0, 0, 1, 1], [], []>} : vector<192x128xbf16>, vector<128x64xbf16>, vector<192x64xf32> -> vector<192x64xf32>
    %42 = arith.addf %36, %41 : vector<192x64xf32>
    %c0_36 = arith.constant 0 : index
    %c216 = arith.constant 216 : index
    %c0_37 = arith.constant 0 : index
    %43 = vector.load %arg1[%c0_36, %c216, %c0_37] : memref<1x432x128xbf16, #tpu.memory_space<vmem>>, vector<1x192x128xbf16>
    %44 = vector.shape_cast %43 : vector<1x192x128xbf16> to vector<192x128xbf16>
    %c1_38 = arith.constant 1 : index
    %c0_39 = arith.constant 0 : index
    %c0_40 = arith.constant 0 : index
    %45 = vector.load %arg3[%c1_38, %c0_39, %c0_40] : memref<3x128x64xbf16, #tpu.memory_space<vmem>>, vector<1x128x64xbf16>
    %46 = vector.shape_cast %45 : vector<1x128x64xbf16> to vector<128x64xbf16>
    %cst_41 = arith.constant dense<0.000000e+00> : vector<192x64xf32>
    %47 = tpu.matmul %44, %46, %cst_41 {dimension_numbers = #tpu.dot_dimension_numbers<[1], [0], [0], [1], [0, 0, 1, 1], [], []>} : vector<192x128xbf16>, vector<128x64xbf16>, vector<192x64xf32> -> vector<192x64xf32>
    %48 = arith.addf %42, %47 : vector<192x64xf32>
    %c0_42 = arith.constant 0 : index
    %c240 = arith.constant 240 : index
    %c0_43 = arith.constant 0 : index
    %49 = vector.load %arg1[%c0_42, %c240, %c0_43] : memref<1x432x128xbf16, #tpu.memory_space<vmem>>, vector<1x192x128xbf16>
    %50 = vector.shape_cast %49 : vector<1x192x128xbf16> to vector<192x128xbf16>
    %c2_44 = arith.constant 2 : index
    %c0_45 = arith.constant 0 : index
    %c0_46 = arith.constant 0 : index
    %51 = vector.load %arg3[%c2_44, %c0_45, %c0_46] : memref<3x128x64xbf16, #tpu.memory_space<vmem>>, vector<1x128x64xbf16>
    %52 = vector.shape_cast %51 : vector<1x128x64xbf16> to vector<128x64xbf16>
    %cst_47 = arith.constant dense<0.000000e+00> : vector<192x64xf32>
    %53 = tpu.matmul %50, %52, %cst_47 {dimension_numbers = #tpu.dot_dimension_numbers<[1], [0], [0], [1], [0, 0, 1, 1], [], []>} : vector<192x128xbf16>, vector<128x64xbf16>, vector<192x64xf32> -> vector<192x64xf32>
    %54 = arith.addf %48, %53 : vector<192x64xf32>
    %c0_48 = arith.constant 0 : index
    %c0_49 = arith.constant 0 : index
    %55 = vector.load %arg4[%c0_48, %c0_49] : memref<1x64xf32, #tpu.memory_space<vmem>>, vector<1x64xf32>
    %56 = vector.broadcast %55 : vector<1x64xf32> to vector<192x64xf32>
    %57 = arith.mulf %54, %56 : vector<192x64xf32>
    %c0_50 = arith.constant 0 : index
    %c0_51 = arith.constant 0 : index
    %58 = vector.load %arg5[%c0_50, %c0_51] : memref<1x64xf32, #tpu.memory_space<vmem>>, vector<1x64xf32>
    %59 = vector.broadcast %58 : vector<1x64xf32> to vector<192x64xf32>
    %60 = arith.addf %57, %59 : vector<192x64xf32>
    %cst_52 = arith.constant 0.000000e+00 : f32
    %61 = vector.broadcast %cst_52 : f32 to vector<192x64xf32>
    %62 = arith.maximumf %60, %61 : vector<192x64xf32>
    %c192_53 = arith.constant 192 : index
    %c0_54 = arith.constant 0 : index
    %63 = vector.load %arg2[%c192_53, %c0_54] : memref<384x1xf32, #tpu.memory_space<vmem>>, vector<192x1xf32>
    %64 = vector.broadcast %63 : vector<192x1xf32> to vector<192x64xf32>
    %65 = arith.mulf %62, %64 : vector<192x64xf32>
    %66 = arith.truncf %65 : vector<192x64xf32> to vector<192x64xbf16>
    %c224 = arith.constant 224 : index
    %c0_55 = arith.constant 0 : index
    %67 = vector.load %arg12[%c224, %c0_55] : memref<448x64xbf16, #tpu.memory_space<vmem>>, vector<192x64xbf16>
    tpu.vector_store %arg12[%c224, %c0_55], %66 {strides = array<i32>} : memref<448x64xbf16, #tpu.memory_space<vmem>>, vector<192x64xbf16>,
    %cst_56 = arith.constant 0.000000e+00 : f32
    %68 = vector.broadcast %cst_56 : f32 to vector<192x128xf32>
    %c7 = arith.constant 7 : index
    %c0_57 = arith.constant 0 : index
    %69 = vector.load %arg12[%c7, %c0_57] : memref<448x64xbf16, #tpu.memory_space<vmem>>, vector<192x64xbf16>
    %c8 = arith.constant 8 : index
    %c0_58 = arith.constant 0 : index
    %70 = vector.load %arg12[%c8, %c0_58] : memref<448x64xbf16, #tpu.memory_space<vmem>>, vector<192x64xbf16>
    %c9 = arith.constant 9 : index
    %c0_59 = arith.constant 0 : index
    %71 = vector.load %arg12[%c9, %c0_59] : memref<448x64xbf16, #tpu.memory_space<vmem>>, vector<192x64xbf16>
    %72 = tpu.concatenate %69, %70, %71 in 1 : vector<192x64xbf16>, vector<192x64xbf16>, vector<192x64xbf16> -> vector<192x192xbf16>
    %c0_60 = arith.constant 0 : index
    %c0_61 = arith.constant 0 : index
    %c0_62 = arith.constant 0 : index
    %73 = vector.load %arg6[%c0_60, %c0_61, %c0_62] : memref<3x192x128xbf16, #tpu.memory_space<vmem>>, vector<1x192x128xbf16>
    %74 = vector.shape_cast %73 : vector<1x192x128xbf16> to vector<192x128xbf16>
    %cst_63 = arith.constant dense<0.000000e+00> : vector<192x128xf32>
    %75 = tpu.matmul %72, %74, %cst_63 {dimension_numbers = #tpu.dot_dimension_numbers<[1], [0], [0], [1], [0, 0, 1, 1], [], []>} : vector<192x192xbf16>, vector<192x128xbf16>, vector<192x128xf32> -> vector<192x128xf32>
    %76 = arith.addf %68, %75 : vector<192x128xf32>
    %c31 = arith.constant 31 : index
    %c0_64 = arith.constant 0 : index
    %77 = vector.load %arg12[%c31, %c0_64] : memref<448x64xbf16, #tpu.memory_space<vmem>>, vector<192x64xbf16>
    %c32_65 = arith.constant 32 : index
    %c0_66 = arith.constant 0 : index
    %78 = vector.load %arg12[%c32_65, %c0_66] : memref<448x64xbf16, #tpu.memory_space<vmem>>, vector<192x64xbf16>
    %c33 = arith.constant 33 : index
    %c0_67 = arith.constant 0 : index
    %79 = vector.load %arg12[%c33, %c0_67] : memref<448x64xbf16, #tpu.memory_space<vmem>>, vector<192x64xbf16>
    %80 = tpu.concatenate %77, %78, %79 in 1 : vector<192x64xbf16>, vector<192x64xbf16>, vector<192x64xbf16> -> vector<192x192xbf16>
    %c1_68 = arith.constant 1 : index
    %c0_69 = arith.constant 0 : index
    %c0_70 = arith.constant 0 : index
    %81 = vector.load %arg6[%c1_68, %c0_69, %c0_70] : memref<3x192x128xbf16, #tpu.memory_space<vmem>>, vector<1x192x128xbf16>
    %82 = vector.shape_cast %81 : vector<1x192x128xbf16> to vector<192x128xbf16>
    %cst_71 = arith.constant dense<0.000000e+00> : vector<192x128xf32>
    %83 = tpu.matmul %80, %82, %cst_71 {dimension_numbers = #tpu.dot_dimension_numbers<[1], [0], [0], [1], [0, 0, 1, 1], [], []>} : vector<192x192xbf16>, vector<192x128xbf16>, vector<192x128xf32> -> vector<192x128xf32>
    %84 = arith.addf %76, %83 : vector<192x128xf32>
    %c55 = arith.constant 55 : index
    %c0_72 = arith.constant 0 : index
    %85 = vector.load %arg12[%c55, %c0_72] : memref<448x64xbf16, #tpu.memory_space<vmem>>, vector<192x64xbf16>
    %c56 = arith.constant 56 : index
    %c0_73 = arith.constant 0 : index
    %86 = vector.load %arg12[%c56, %c0_73] : memref<448x64xbf16, #tpu.memory_space<vmem>>, vector<192x64xbf16>
    %c57 = arith.constant 57 : index
    %c0_74 = arith.constant 0 : index
    %87 = vector.load %arg12[%c57, %c0_74] : memref<448x64xbf16, #tpu.memory_space<vmem>>, vector<192x64xbf16>
    %88 = tpu.concatenate %85, %86, %87 in 1 : vector<192x64xbf16>, vector<192x64xbf16>, vector<192x64xbf16> -> vector<192x192xbf16>
    %c2_75 = arith.constant 2 : index
    %c0_76 = arith.constant 0 : index
    %c0_77 = arith.constant 0 : index
    %89 = vector.load %arg6[%c2_75, %c0_76, %c0_77] : memref<3x192x128xbf16, #tpu.memory_space<vmem>>, vector<1x192x128xbf16>
    %90 = vector.shape_cast %89 : vector<1x192x128xbf16> to vector<192x128xbf16>
    %cst_78 = arith.constant dense<0.000000e+00> : vector<192x128xf32>
    %91 = tpu.matmul %88, %90, %cst_78 {dimension_numbers = #tpu.dot_dimension_numbers<[1], [0], [0], [1], [0, 0, 1, 1], [], []>} : vector<192x192xbf16>, vector<192x128xbf16>, vector<192x128xf32> -> vector<192x128xf32>
    %92 = arith.addf %84, %91 : vector<192x128xf32>
    %c0_79 = arith.constant 0 : index
    %c0_80 = arith.constant 0 : index
    %93 = vector.load %arg7[%c0_79, %c0_80] : memref<1x128xf32, #tpu.memory_space<vmem>>, vector<1x128xf32>
    %94 = vector.broadcast %93 : vector<1x128xf32> to vector<192x128xf32>
    %95 = arith.mulf %92, %94 : vector<192x128xf32>
    %c0_81 = arith.constant 0 : index
    %c0_82 = arith.constant 0 : index
    %96 = vector.load %arg8[%c0_81, %c0_82] : memref<1x128xf32, #tpu.memory_space<vmem>>, vector<1x128xf32>
    %97 = vector.broadcast %96 : vector<1x128xf32> to vector<192x128xf32>
    %98 = arith.addf %95, %97 : vector<192x128xf32>
    %cst_83 = arith.constant 0.000000e+00 : f32
    %99 = vector.broadcast %cst_83 : f32 to vector<192x128xf32>
    %100 = arith.maximumf %98, %99 : vector<192x128xf32>
    %c0_84 = arith.constant 0 : index
    %c24_85 = arith.constant 24 : index
    %c0_86 = arith.constant 0 : index
    %101 = vector.load %arg1[%c0_84, %c24_85, %c0_86] : memref<1x432x128xbf16, #tpu.memory_space<vmem>>, vector<1x192x128xbf16>
    %102 = vector.shape_cast %101 : vector<1x192x128xbf16> to vector<192x128xbf16>
    %c0_87 = arith.constant 0 : index
    %c0_88 = arith.constant 0 : index
    %103 = vector.load %arg9[%c0_87, %c0_88] : memref<128x128xbf16, #tpu.memory_space<vmem>>, vector<128x128xbf16>
    %cst_89 = arith.constant dense<0.000000e+00> : vector<192x128xf32>
    %104 = tpu.matmul %102, %103, %cst_89 {dimension_numbers = #tpu.dot_dimension_numbers<[1], [0], [0], [1], [0, 0, 1, 1], [], []>} : vector<192x128xbf16>, vector<128x128xbf16>, vector<192x128xf32> -> vector<192x128xf32>
    %c0_90 = arith.constant 0 : index
    %c0_91 = arith.constant 0 : index
    %105 = vector.load %arg10[%c0_90, %c0_91] : memref<1x128xf32, #tpu.memory_space<vmem>>, vector<1x128xf32>
    %106 = vector.broadcast %105 : vector<1x128xf32> to vector<192x128xf32>
    %107 = arith.addf %104, %106 : vector<192x128xf32>
    %108 = arith.addf %100, %107 : vector<192x128xf32>
    %109 = arith.truncf %108 : vector<192x128xf32> to vector<192x128xbf16>
    %c0_92 = arith.constant 0 : index
    %c0_93 = arith.constant 0 : index
    %c0_94 = arith.constant 0 : index
    %110 = vector.load %arg11[%c0_92, %c0_93, %c0_94] : memref<1x384x128xbf16, #tpu.memory_space<vmem>>, vector<1x192x128xbf16>
    %111 = vector.shape_cast %110 : vector<1x192x128xbf16> to vector<192x128xbf16>
    %112 = vector.shape_cast %109 : vector<192x128xbf16> to vector<1x192x128xbf16>
    tpu.vector_store %arg11[%c0_92, %c0_93, %c0_94], %112 {strides = array<i32>} : memref<1x384x128xbf16, #tpu.memory_space<vmem>>, vector<1x192x128xbf16>,
    %cst_95 = arith.constant 0.000000e+00 : f32
    %113 = vector.broadcast %cst_95 : f32 to vector<192x128xf32>
    %c199 = arith.constant 199 : index
    %c0_96 = arith.constant 0 : index
    %114 = vector.load %arg12[%c199, %c0_96] : memref<448x64xbf16, #tpu.memory_space<vmem>>, vector<192x64xbf16>
    %c200 = arith.constant 200 : index
    %c0_97 = arith.constant 0 : index
    %115 = vector.load %arg12[%c200, %c0_97] : memref<448x64xbf16, #tpu.memory_space<vmem>>, vector<192x64xbf16>
    %c201 = arith.constant 201 : index
    %c0_98 = arith.constant 0 : index
    %116 = vector.load %arg12[%c201, %c0_98] : memref<448x64xbf16, #tpu.memory_space<vmem>>, vector<192x64xbf16>
    %117 = tpu.concatenate %114, %115, %116 in 1 : vector<192x64xbf16>, vector<192x64xbf16>, vector<192x64xbf16> -> vector<192x192xbf16>
    %c0_99 = arith.constant 0 : index
    %c0_100 = arith.constant 0 : index
    %c0_101 = arith.constant 0 : index
    %118 = vector.load %arg6[%c0_99, %c0_100, %c0_101] : memref<3x192x128xbf16, #tpu.memory_space<vmem>>, vector<1x192x128xbf16>
    %119 = vector.shape_cast %118 : vector<1x192x128xbf16> to vector<192x128xbf16>
    %cst_102 = arith.constant dense<0.000000e+00> : vector<192x128xf32>
    %120 = tpu.matmul %117, %119, %cst_102 {dimension_numbers = #tpu.dot_dimension_numbers<[1], [0], [0], [1], [0, 0, 1, 1], [], []>} : vector<192x192xbf16>, vector<192x128xbf16>, vector<192x128xf32> -> vector<192x128xf32>
    %121 = arith.addf %113, %120 : vector<192x128xf32>
    %c223 = arith.constant 223 : index
    %c0_103 = arith.constant 0 : index
    %122 = vector.load %arg12[%c223, %c0_103] : memref<448x64xbf16, #tpu.memory_space<vmem>>, vector<192x64xbf16>
    %c224_104 = arith.constant 224 : index
    %c0_105 = arith.constant 0 : index
    %123 = vector.load %arg12[%c224_104, %c0_105] : memref<448x64xbf16, #tpu.memory_space<vmem>>, vector<192x64xbf16>
    %c225 = arith.constant 225 : index
    %c0_106 = arith.constant 0 : index
    %124 = vector.load %arg12[%c225, %c0_106] : memref<448x64xbf16, #tpu.memory_space<vmem>>, vector<192x64xbf16>
    %125 = tpu.concatenate %122, %123, %124 in 1 : vector<192x64xbf16>, vector<192x64xbf16>, vector<192x64xbf16> -> vector<192x192xbf16>
    %c1_107 = arith.constant 1 : index
    %c0_108 = arith.constant 0 : index
    %c0_109 = arith.constant 0 : index
    %126 = vector.load %arg6[%c1_107, %c0_108, %c0_109] : memref<3x192x128xbf16, #tpu.memory_space<vmem>>, vector<1x192x128xbf16>
    %127 = vector.shape_cast %126 : vector<1x192x128xbf16> to vector<192x128xbf16>
    %cst_110 = arith.constant dense<0.000000e+00> : vector<192x128xf32>
    %128 = tpu.matmul %125, %127, %cst_110 {dimension_numbers = #tpu.dot_dimension_numbers<[1], [0], [0], [1], [0, 0, 1, 1], [], []>} : vector<192x192xbf16>, vector<192x128xbf16>, vector<192x128xf32> -> vector<192x128xf32>
    %129 = arith.addf %121, %128 : vector<192x128xf32>
    %c247 = arith.constant 247 : index
    %c0_111 = arith.constant 0 : index
    %130 = vector.load %arg12[%c247, %c0_111] : memref<448x64xbf16, #tpu.memory_space<vmem>>, vector<192x64xbf16>
    %c248 = arith.constant 248 : index
    %c0_112 = arith.constant 0 : index
    %131 = vector.load %arg12[%c248, %c0_112] : memref<448x64xbf16, #tpu.memory_space<vmem>>, vector<192x64xbf16>
    %c249 = arith.constant 249 : index
    %c0_113 = arith.constant 0 : index
    %132 = vector.load %arg12[%c249, %c0_113] : memref<448x64xbf16, #tpu.memory_space<vmem>>, vector<192x64xbf16>
    %133 = tpu.concatenate %130, %131, %132 in 1 : vector<192x64xbf16>, vector<192x64xbf16>, vector<192x64xbf16> -> vector<192x192xbf16>
    %c2_114 = arith.constant 2 : index
    %c0_115 = arith.constant 0 : index
    %c0_116 = arith.constant 0 : index
    %134 = vector.load %arg6[%c2_114, %c0_115, %c0_116] : memref<3x192x128xbf16, #tpu.memory_space<vmem>>, vector<1x192x128xbf16>
    %135 = vector.shape_cast %134 : vector<1x192x128xbf16> to vector<192x128xbf16>
    %cst_117 = arith.constant dense<0.000000e+00> : vector<192x128xf32>
    %136 = tpu.matmul %133, %135, %cst_117 {dimension_numbers = #tpu.dot_dimension_numbers<[1], [0], [0], [1], [0, 0, 1, 1], [], []>} : vector<192x192xbf16>, vector<192x128xbf16>, vector<192x128xf32> -> vector<192x128xf32>
    %137 = arith.addf %129, %136 : vector<192x128xf32>
    %c0_118 = arith.constant 0 : index
    %c0_119 = arith.constant 0 : index
    %138 = vector.load %arg7[%c0_118, %c0_119] : memref<1x128xf32, #tpu.memory_space<vmem>>, vector<1x128xf32>
    %139 = vector.broadcast %138 : vector<1x128xf32> to vector<192x128xf32>
    %140 = arith.mulf %137, %139 : vector<192x128xf32>
    %c0_120 = arith.constant 0 : index
    %c0_121 = arith.constant 0 : index
    %141 = vector.load %arg8[%c0_120, %c0_121] : memref<1x128xf32, #tpu.memory_space<vmem>>, vector<1x128xf32>
    %142 = vector.broadcast %141 : vector<1x128xf32> to vector<192x128xf32>
    %143 = arith.addf %140, %142 : vector<192x128xf32>
    %cst_122 = arith.constant 0.000000e+00 : f32
    %144 = vector.broadcast %cst_122 : f32 to vector<192x128xf32>
    %145 = arith.maximumf %143, %144 : vector<192x128xf32>
    %c0_123 = arith.constant 0 : index
    %c216_124 = arith.constant 216 : index
    %c0_125 = arith.constant 0 : index
    %146 = vector.load %arg1[%c0_123, %c216_124, %c0_125] : memref<1x432x128xbf16, #tpu.memory_space<vmem>>, vector<1x192x128xbf16>
    %147 = vector.shape_cast %146 : vector<1x192x128xbf16> to vector<192x128xbf16>
    %c0_126 = arith.constant 0 : index
    %c0_127 = arith.constant 0 : index
    %148 = vector.load %arg9[%c0_126, %c0_127] : memref<128x128xbf16, #tpu.memory_space<vmem>>, vector<128x128xbf16>
    %cst_128 = arith.constant dense<0.000000e+00> : vector<192x128xf32>
    %149 = tpu.matmul %147, %148, %cst_128 {dimension_numbers = #tpu.dot_dimension_numbers<[1], [0], [0], [1], [0, 0, 1, 1], [], []>} : vector<192x128xbf16>, vector<128x128xbf16>, vector<192x128xf32> -> vector<192x128xf32>
    %c0_129 = arith.constant 0 : index
    %c0_130 = arith.constant 0 : index
    %150 = vector.load %arg10[%c0_129, %c0_130] : memref<1x128xf32, #tpu.memory_space<vmem>>, vector<1x128xf32>
    %151 = vector.broadcast %150 : vector<1x128xf32> to vector<192x128xf32>
    %152 = arith.addf %149, %151 : vector<192x128xf32>
    %153 = arith.addf %145, %152 : vector<192x128xf32>
    %154 = arith.truncf %153 : vector<192x128xf32> to vector<192x128xbf16>
    %c0_131 = arith.constant 0 : index
    %c192_132 = arith.constant 192 : index
    %c0_133 = arith.constant 0 : index
    %155 = vector.load %arg11[%c0_131, %c192_132, %c0_133] : memref<1x384x128xbf16, #tpu.memory_space<vmem>>, vector<1x192x128xbf16>
    %156 = vector.shape_cast %155 : vector<1x192x128xbf16> to vector<192x128xbf16>
    %157 = vector.shape_cast %154 : vector<192x128xbf16> to vector<1x192x128xbf16>
    tpu.vector_store %arg11[%c0_131, %c192_132, %c0_133], %157 {strides = array<i32>} : memref<1x384x128xbf16, #tpu.memory_space<vmem>>, vector<1x192x128xbf16>,
    return
  }
  func.func @transform_0(%arg0: i32) -> (i32, i32, i32) {
    %c0_i32 = arith.constant 0 : i32
    %c0_i32_0 = arith.constant 0 : i32
    %c0_i32_1 = arith.constant 0 : i32
    return %arg0, %c0_i32, %c0_i32_0 : i32, i32, i32
  }
  func.func @transform_1(%arg0: i32) -> (i32, i32) {
    %c0_i32 = arith.constant 0 : i32
    %c0_i32_0 = arith.constant 0 : i32
    %c0_i32_1 = arith.constant 0 : i32
    return %c0_i32, %c0_i32_0 : i32, i32
  }
  func.func @transform_2(%arg0: i32) -> (i32, i32, i32) {
    %c0_i32 = arith.constant 0 : i32
    %c0_i32_0 = arith.constant 0 : i32
    %c0_i32_1 = arith.constant 0 : i32
    %c0_i32_2 = arith.constant 0 : i32
    return %c0_i32, %c0_i32_0, %c0_i32_1 : i32, i32, i32
  }
  func.func @transform_3(%arg0: i32) -> (i32, i32) {
    %c0_i32 = arith.constant 0 : i32
    %c0_i32_0 = arith.constant 0 : i32
    %c0_i32_1 = arith.constant 0 : i32
    return %c0_i32, %c0_i32_0 : i32, i32
  }
  func.func @transform_4(%arg0: i32) -> (i32, i32) {
    %c0_i32 = arith.constant 0 : i32
    %c0_i32_0 = arith.constant 0 : i32
    %c0_i32_1 = arith.constant 0 : i32
    return %c0_i32, %c0_i32_0 : i32, i32
  }
  func.func @transform_5(%arg0: i32) -> (i32, i32, i32) {
    %c0_i32 = arith.constant 0 : i32
    %c0_i32_0 = arith.constant 0 : i32
    %c0_i32_1 = arith.constant 0 : i32
    %c0_i32_2 = arith.constant 0 : i32
    return %c0_i32, %c0_i32_0, %c0_i32_1 : i32, i32, i32
  }
  func.func @transform_6(%arg0: i32) -> (i32, i32) {
    %c0_i32 = arith.constant 0 : i32
    %c0_i32_0 = arith.constant 0 : i32
    %c0_i32_1 = arith.constant 0 : i32
    return %c0_i32, %c0_i32_0 : i32, i32
  }
  func.func @transform_7(%arg0: i32) -> (i32, i32) {
    %c0_i32 = arith.constant 0 : i32
    %c0_i32_0 = arith.constant 0 : i32
    %c0_i32_1 = arith.constant 0 : i32
    return %c0_i32, %c0_i32_0 : i32, i32
  }
  func.func @transform_8(%arg0: i32) -> (i32, i32) {
    %c0_i32 = arith.constant 0 : i32
    %c0_i32_0 = arith.constant 0 : i32
    %c0_i32_1 = arith.constant 0 : i32
    return %c0_i32, %c0_i32_0 : i32, i32
  }
  func.func @transform_9(%arg0: i32) -> (i32, i32) {
    %c0_i32 = arith.constant 0 : i32
    %c0_i32_0 = arith.constant 0 : i32
    %c0_i32_1 = arith.constant 0 : i32
    return %c0_i32, %c0_i32_0 : i32, i32
  }
  func.func @transform_10(%arg0: i32) -> (i32, i32, i32) {
    %c0_i32 = arith.constant 0 : i32
    %c0_i32_0 = arith.constant 0 : i32
    %c0_i32_1 = arith.constant 0 : i32
    return %arg0, %c0_i32, %c0_i32_0 : i32, i32, i32
  }
}

</mosaic_0001>

<bundles_post_ra>
// kernel: tpu_custom_call.1
= control target key start
LH: loop header
LB: loop body
LE: loop exit
PB: predicated region body
PF: predicated region fallthrough
CT: control target
= control target key end

     0   :  { %s13789_s0 = inlined_call_operand.vmem [shape: bf16[2,432,128], index: 0, kind: input, shape index: {}]   ;;  %s13790_s1 = inlined_call_operand.vmem [shape: f32[384,1], index: 1, kind: input, shape index: {}]   ;;  %s13791_s2 = inlined_call_operand.vmem [shape: bf16[3,128,64], index: 2, kind: input, shape index: {}]   ;;  %s13792_s3 = inlined_call_operand.vmem [shape: f32[1,64], index: 3, kind: input, shape index: {}]   ;;  %s13793_s4 = inlined_call_operand.vmem [shape: f32[1,64], index: 4, kind: input, shape index: {}]   ;;  %s13794_s5 = inlined_call_operand.hbm [shape: bf16[3,192,128], index: 5, kind: input, shape index: {}]   ;;  %s13795_s6 = inlined_call_operand.vmem [shape: f32[1,128], index: 6, kind: input, shape index: {}]   ;;  %s13796_s7 = inlined_call_operand.vmem [shape: f32[1,128], index: 7, kind: input, shape index: {}]   ;;  %s13797_s8 = inlined_call_operand.vmem [shape: bf16[128,128], index: 8, kind: input, shape index: {}]   ;;  %s13798_s9 = inlined_call_operand.vmem [shape: f32[1,128], index: 9, kind: input, shape index: {}]   ;;  %s13799_s10 = inlined_call_operand.hbm [shape: bf16[2,384,128], index: 10, kind: output, shape index: {}]  }
   0x1   :  { %13841 = sst [smem:[#allocation96_spill]] %s13794_s5 }
   0x2   :  { %15 = vsyncpa [#allocation4], 0 }
   0x3   :  { %16 = vsyncpa [#allocation5], 0 }
   0x4   :  { %18 = vsyncpa [#allocation5 + $0x1], 0  ;;  %s10076_s13 = smov 0   ;;  %s10078_s14 = smov 0  }
   0x5   :  { %s10080_s15 = smov 0   ;;  %s10082_s16 = smov 0  }
   0x6 LB: > { %s10097_s17 = sadd.s32 4294967295, %s10013_s16   ;;  %s7795_s18 = sadd.s32 4294967294, %s10013_s16   ;;  %s10013_s16 = sphi %s10082_s16, %s14193_s16   ;;  %s10009_s15 = sphi %s10080_s15, %s14192_s15   ;;  %s10005_s14 = sphi %s10078_s14, %s14191_s14   ;;  %s10001_s13 = sphi %s10076_s13, %s14190_s13  }
   0x7   : > { %s10101_s19 = sadd.s32 1, %s10013_s16   ;;  %s246_s20 = sadd.s32 1, %s10009_s15 }
   0x8   : > { %s243_s21 = ssub.s32 %s10013_s16, %s10101_s19  ;;  %p256_p0 = scmp.ne.s32.totalorder %s10009_s15, %s10005_s14 }
   0x9   : > { %p244_p1 = scmp.eq.s32.totalorder %s243_s21, 0  ;;  %p257_p2 = scmp.eq.s32.totalorder %s10097_s17, 1 }
   0xa   : > { %p262_p3 = scmp.ne.s32.totalorder %s10005_s14, %s10001_s13  ;;  %p263_p4 = scmp.eq.s32.totalorder %s7795_s18, 1 }
   0xb   : > { %s10112_s22 = scalar_select %p244_p1, %s10009_s15, %s246_s20  }
   0xc   : > { %p10114_p5 = por %p257_p2, %p256_p0  ;;  %p10118_p6 = por %p263_p4, %p262_p3 }
   0xd   : > { %p7796_p7 = scmp.ge.s32.totalorder %s10013_s16, 1  ;;  %p270_p8 = scmp.lt.s32.totalorder %s10013_s16, 3 }
   0xe   : > { %p9801_p9 = scmp.eq.s32.totalorder %s10097_s17, 0  ;;  %s13844_s5 = sld [smem:[#allocation96_spill]] }
   0xf   : > { %p271_p10 = pnand %p7796_p7, %p270_p8  ;;  %s10015_s28 = smov [#allocation3]  }
  0x10   : > { %s295_s29 = sshll.u32 %s10015_s28, 4  ;;  %s10016_s30 = smov 64   ;;  %s296_s29 = int_to_ptr.vmem [resolvable:$true] %s295_s29 }
  0x11   : > { %p9793_p11 = pneg %p271_p10  ;;  %s10017_s11 = smov 4  }
  0x12   : > { %331 = sbr.rel (%p271_p10) target bundleno = 1459 (0x5b3), region = 60 }
  0x13   : > { %p9794_p12 = pnand %p9801_p9, %p9793_p11 }
  0x14   : > { %s293_s27 = sshll.u32 %s13844_s5, 4  ;;  %s294_s27 = int_to_ptr.hbm [resolvable:$true] %s293_s27 }
  0x15   : > { %9796 = dma.hbm_to_vmem [thread:$0]  (!%p9794_p12), %s294_s27, 4608, %s296_s29, [#allocation4], %s10016_s30, %s10016_s30, %s10017_s11  }
  0x17   : > { %9988 = dma.done.wait (%p9801_p9), [#allocation4], 4608  }
  0x18   : > { %9990 = vsyncadd (%p9801_p9), [#allocation4], 4294962688  ;;  %v10018_v0 = vmov 0   ;;  %v1115_v1 = vld [vmem:[%s13790_s1] sm:$0xff]  ;;  %v8710_v2 = vld [vmem:[%s13791_s2 + $0x78] sm:$0xff]  ;;  %p370_p13 = scmp.lt.s32.totalorder %s10097_s17, 1 }
  0x19   : > { %9842 = vset.pattern.permute.xlu0 %v10018_v0  ;;  %9843 = vset.pattern.permute.xlu1 %v10018_v0  ;;  %v8701_v3 = vld [vmem:[%s13791_s2 + $0x38] sm:$0xff]  ;;  %v8709_v6 = vld [vmem:[%s13791_s2 + $0x70] sm:$0xff]  ;;  %v1116_v10 = vld [vmem:[%s13790_s1 + $0x8] sm:$0xff]  ;;  %vm376_vm0 = vcmask 519168   ;;  %s10019_s29 = smov 64   ;;  %vm2513_vm1 = vcmask 1042432  }
  0x1a   : > { %9844 = vset.pattern.permute.xlu2 %v10018_v0  ;;  %1141 = vperm.xlu0 %9842, %v1115_v1   ;;  %v8730_v4 = vld [vmem:[%s13791_s2 + $0xb8] sm:$0xff]  ;;  %v8700_v7 = vld [vmem:[%s13791_s2 + $0x30] sm:$0xff]  ;;  %v8708_v11 = vld [vmem:[%s13791_s2 + $0x68] sm:$0xff]  ;;  %s371_s27 = scalar_select %p370_p13, %s10097_s17, 1  ;;  %377 = vst.msk [vmem:[#allocation2] sm:$0xf] %vm376_vm0, %v10018_v0 }
  0x1b   : > { %v8748_v5 = vld [vmem:[%s13791_s2 + $0x78] sm:$0xff]  ;;  %565 = vmatpush.bf16.msra.mxu0 %v8710_v2  ;;  %712 = vmatpush.bf16.msra.mxu1 %v8701_v3  ;;  %v8729_v8 = vld [vmem:[%s13791_s2 + $0xb0] sm:$0xff]  ;;  %v8699_v12 = vld [vmem:[%s13791_s2 + $0x28] sm:$0xff]  ;;  %378 = vst.msk [vmem:[#allocation2 + $0x4] sm:$0xf] %vm376_vm0, %v10018_v0  ;;  %vm2539_vm3 = vcmask 523264  }
  0x1c   : > { %942 = vmatpush.bf16.msra.mxu2 %v8730_v4  ;;  %1510 = vmatpush.bf16.msra.mxu3 %v8748_v5  ;;  %v8747_v9 = vld [vmem:[%s13791_s2 + $0x70] sm:$0xff]  ;;  %v8728_v13 = vld [vmem:[%s13791_s2 + $0xa8] sm:$0xff]  ;;  %v8707_v15 = vld [vmem:[%s13791_s2 + $0x60] sm:$0xff]  ;;  %s9785_s28 = smul.u32 216, %s371_s27  ;;  %379 = vst.msk [vmem:[#allocation2 + $0x8] sm:$0xf] %vm376_vm0, %v10018_v0 }
  0x1d   : > { %v8746_v14 = vld [vmem:[%s13791_s2 + $0x68] sm:$0xff]  ;;  %v8698_v16 = vld [vmem:[%s13791_s2 + $0x20] sm:$0xff]  ;;  %v1121_v19 = vld [vmem:[%s13790_s1 + $0x30] sm:$0xff]  ;;  %380 = vst.msk [vmem:[#allocation2 + $0xc] sm:$0xf] %vm376_vm0, %v10018_v0  ;;  %s367_s30 = sand.u32 1, %s10005_s14  }
  0x1e   : > { %v8727_v17 = vld [vmem:[%s13791_s2 + $0xa0] sm:$0xff]  ;;  %v8706_v20 = vld [vmem:[%s13791_s2 + $0x58] sm:$0xff]  ;;  %v8705_v24 = vld [vmem:[%s13791_s2 + $0x50] sm:$0xff]  ;;  %s10244_s26 = scalar_lea.vmem %s13789_s0, %s9785_s28  ;;  %381 = vst.msk [vmem:[#allocation2 + $0xd0] sm:$0xf] %vm376_vm0, %v10018_v0  ;;  %s9784_s11 = smul.u32 192, %s367_s30 }
  0x1f   : > { %566 = vmatpush.bf16.msra.mxu0 %v8709_v6  ;;  %713 = vmatpush.bf16.msra.mxu1 %v8700_v7  ;;  %v8745_v18 = vld [vmem:[%s13791_s2 + $0x60] sm:$0xff]  ;;  %v8697_v21 = vld [vmem:[%s13791_s2 + $0x18] sm:$0xff]  ;;  %v8696_v25 = vld [vmem:[%s13791_s2 + $0x10] sm:$0xff]  ;;  %382 = vst.msk [vmem:[#allocation2 + $0xd4] sm:$0xf] %vm376_vm0, %v10018_v0  ;;  %s7706_s27 = scalar_lea.sflag [#allocation5], %s367_s30 }
  0x20   : > { %943 = vmatpush.bf16.msra.mxu2 %v8729_v8  ;;  %1511 = vmatpush.bf16.msra.mxu3 %v8747_v9  ;;  %v8726_v22 = vld [vmem:[%s13791_s2 + $0x98] sm:$0xff]  ;;  %v8725_v26 = vld [vmem:[%s13791_s2 + $0x90] sm:$0xff]  ;;  %v1124_v28 = vld [vmem:[%s13790_s1 + $0x48] sm:$0xff]  ;;  %383 = vst.msk [vmem:[#allocation2 + $0xd8] sm:$0xf] %vm376_vm0, %v10018_v0  ;;  %s12727_s12 = scalar_lea.vmem [#allocation6], %s9784_s11 }
  0x21   : > { %v8744_v23 = vld [vmem:[%s13791_s2 + $0x58] sm:$0xff]  ;;  %v8743_v27 = vld [vmem:[%s13791_s2 + $0x50] sm:$0xff]  ;;  %v8704_v29 = vld [vmem:[%s13791_s2 + $0x48] sm:$0xff]  ;;  %384 = vst.msk [vmem:[#allocation2 + $0xdc] sm:$0xf] %vm376_vm0, %v10018_v0  ;;  %s7718_s21 = sshll.u32 %s12727_s12, 4  ;;  %s7719_s21 = int_to_ptr.vmem [resolvable:$true] %s7718_s21 }
  0x22   : > { %1146 = vperm.xlu0 %9842, %v1116_v10   ;;  %v8695_v30 = vld [vmem:[%s13791_s2 + $0x8] sm:$0xff]  ;;  %v8703_v33 = vld [vmem:[%s13791_s2 + $0x40] sm:$0xff]  ;;  %v1125_v38 = vld [vmem:[%s13790_s1 + $0x50] sm:$0xff]  ;;  %vm2376_vm2 = vsmask.f32 3328  ;;  %s9963_s28 = scalar_lea.hbm %s13799_s10, 384 }
  0x23   : > { %567 = vmatpush.bf16.msra.mxu0 %v8708_v11  ;;  %714 = vmatpush.bf16.msra.mxu1 %v8699_v12  ;;  %v8724_v31 = vld [vmem:[%s13791_s2 + $0x88] sm:$0xff]  ;;  %v8694_v34 = vld [vmem:[%s13791_s2] sm:$0xff]  ;;  %v8711_v40 = vld [vmem:[%s10244_s26 + $0x18] sm:$0xff]  ;;  %vm2826_vm4 = vsmask.f32 4352 }
  0x24   : > { %944 = vmatpush.bf16.msra.mxu2 %v8728_v13  ;;  %1512 = vmatpush.bf16.msra.mxu3 %v8746_v14  ;;  %v8742_v32 = vld [vmem:[%s13791_s2 + $0x48] sm:$0xff]  ;;  %v8723_v35 = vld [vmem:[%s13791_s2 + $0x80] sm:$0xff]  ;;  %v1117_v43 = vld [vmem:[%s13790_s1 + $0x10] sm:$0xff] }
  0x25   : > { %v8741_v36 = vld [vmem:[%s13791_s2 + $0x40] sm:$0xff]  ;;  %v9742_v37 = vld [vmem:[%s10244_s26 + $0xc] sm:$0xff]   ;;  %1151 = vperm.xlu1 %9843, %v1117_v43   ;;  %v9744_v44 = vld [vmem:[%s10244_s26 + $0x14] sm:$0xff]  }
  0x26   : > { %v8693_v39 = vld [vmem:[%s10244_s26] sm:$0xff]  ;;  %v9764_v41 = vld [vmem:[%s10244_s26 + $0x6c] sm:$0xff]   ;;  %v9766_v48 = vld [vmem:[%s10244_s26 + $0x74] sm:$0xff]  }
  0x27   : > { %568 = vmatpush.bf16.msra.mxu0 %v8707_v15  ;;  %715 = vmatpush.bf16.msra.mxu1 %v8698_v16  ;;  %v1127_v42 = vld [vmem:[%s13790_s1 + $0x60] sm:$0xff]  ;;  %v1129_v45 = vld [vmem:[%s13790_s1 + $0x70] sm:$0xff]  ;;  %v9273_v47 = vld [vmem:[%s10244_s26 + $0x8] sm:$0xff]  }
  0x28   : > { %945 = vmatpush.bf16.msra.mxu2 %v8727_v17  ;;  %1513 = vmatpush.bf16.msra.mxu3 %v8745_v18  ;;  %v8712_v46 = vld [vmem:[%s10244_s26 + $0x20] sm:$0xff]  ;;  %v1118_v49 = vld [vmem:[%s13790_s1 + $0x18] sm:$0xff]  ;;  %v1133_v52 = vld [vmem:[%s13790_s1 + $0x90] sm:$0xff] }
  0x29   : > { %v1131_v50 = vld [vmem:[%s13790_s1 + $0x80] sm:$0xff]  ;;  %v8713_v53 = vld [vmem:[%s10244_s26 + $0x28] sm:$0xff]  ;;  %v9274_v54 = vld [vmem:[%s10244_s26 + $0x10] sm:$0xff]  }
  0x2a   : > { %1171 = vperm.xlu0 %9842, %v1121_v19   ;;  %v9746_v51 = vld [vmem:[%s10244_s26 + $0x1c] sm:$0xff]   ;;  %v9748_v57 = vld [vmem:[%s10244_s26 + $0x24] sm:$0xff]   ;;  %v1137_v58 = vld [vmem:[%s13790_s1 + $0xb0] sm:$0xff] }
  0x2b   : > { %569 = vmatpush.bf16.msra.mxu0 %v8706_v20  ;;  %716 = vmatpush.bf16.msra.mxu1 %v8697_v21  ;;  %v9768_v55 = vld [vmem:[%s10244_s26 + $0x7c] sm:$0xff]   ;;  %v8714_v59 = vld [vmem:[%s10244_s26 + $0x30] sm:$0xff]  ;;  %v9770_v61 = vld [vmem:[%s10244_s26 + $0x84] sm:$0xff]  }
  0x2c   : > { %946 = vmatpush.bf16.msra.mxu2 %v8726_v22  ;;  %1514 = vmatpush.bf16.msra.mxu3 %v8744_v23  ;;  %v1135_v56 = vld [vmem:[%s13790_s1 + $0xa0] sm:$0xff]  ;;  %v9275_v60 = vld [vmem:[%s10244_s26 + $0x18] sm:$0xff]   ;;  %v1120_v1 = vld [vmem:[%s13790_s1 + $0x28] sm:$0xff] }
  0x2d   : > { %1156 = vperm.xlu1 %9843, %v1118_v49   ;;  %v1119_v62 = vld [vmem:[%s13790_s1 + $0x20] sm:$0xff]  ;;  %v1122_v63 = vld [vmem:[%s13790_s1 + $0x38] sm:$0xff]  ;;  %v9750_v2 = vld [vmem:[%s10244_s26 + $0x2c] sm:$0xff]  }
  0x2e   : > { %1161 = vperm.xlu2 %9844, %v1119_v62   ;;  %v8715_v3 = vld [vmem:[%s10244_s26 + $0x38] sm:$0xff]  ;;  %v9276_v4 = vld [vmem:[%s10244_s26 + $0x20] sm:$0xff]   ;;  %v9772_v5 = vld [vmem:[%s10244_s26 + $0x8c] sm:$0xff]  }
  0x2f   : > { %570 = vmatpush.bf16.msra.mxu0 %v8705_v24  ;;  %717 = vmatpush.bf16.msra.mxu1 %v8696_v25  ;;  %v9752_v6 = vld [vmem:[%s10244_s26 + $0x34] sm:$0xff]   ;;  %v8716_v7 = vld [vmem:[%s10244_s26 + $0x40] sm:$0xff]  ;;  %v9277_v8 = vld [vmem:[%s10244_s26 + $0x28] sm:$0xff]  }
  0x30   : > { %947 = vmatpush.bf16.msra.mxu2 %v8725_v26  ;;  %1515 = vmatpush.bf16.msra.mxu3 %v8743_v27  ;;  %v9774_v9 = vld [vmem:[%s10244_s26 + $0x94] sm:$0xff]   ;;  %v1123_v10 = vld [vmem:[%s13790_s1 + $0x40] sm:$0xff]  ;;  %v8717_v12 = vld [vmem:[%s10244_s26 + $0x48] sm:$0xff] }
  0x31   : > { %v9754_v11 = vld [vmem:[%s10244_s26 + $0x3c] sm:$0xff]   ;;  %v9278_v13 = vld [vmem:[%s10244_s26 + $0x30] sm:$0xff]   ;;  %v9756_v15 = vld [vmem:[%s10244_s26 + $0x44] sm:$0xff]  }
  0x32   : > { %1186 = vperm.xlu0 %9842, %v1124_v28   ;;  %v9776_v14 = vld [vmem:[%s10244_s26 + $0x9c] sm:$0xff]   ;;  %v8718_v16 = vld [vmem:[%s10244_s26 + $0x50] sm:$0xff]  ;;  %v9778_v18 = vld [vmem:[%s10244_s26 + $0xa4] sm:$0xff]  }
  0x33   : > { %571 = vmatpush.bf16.msra.mxu0 %v8704_v29  ;;  %718 = vmatpush.bf16.msra.mxu1 %v8695_v30  ;;  %v9279_v17 = vld [vmem:[%s10244_s26 + $0x38] sm:$0xff]   ;;  %v9758_v0 = vld [vmem:[%s10244_s26 + $0x4c] sm:$0xff]   ;;  %v9280_v24 = vld [vmem:[%s10244_s26 + $0x40] sm:$0xff]  }
  0x34   : > { %948 = vmatpush.bf16.msra.mxu2 %v8724_v31  ;;  %1516 = vmatpush.bf16.msra.mxu3 %v8742_v32  ;;  %v8739_v19 = vld [vmem:[%s13791_s2 + $0x38] sm:$0xff]  ;;  %v9780_v25 = vld [vmem:[%s10244_s26 + $0xac] sm:$0xff]   ;;  %v10358_v29 = vld [vmem:[%s13792_s3] ss:$0 sm:$0xff] }
  0x35   : > { %1176 = vperm.xlu1 %9843, %v1122_v63   ;;  %v8768_v20 = vld [vmem:[%s13791_s2 + $0xb8] sm:$0xff]  ;;  %v8738_v27 = vld [vmem:[%s13791_s2 + $0x30] sm:$0xff]  ;;  %v10363_v32 = vld [vmem:[%s13793_s4] ss:$0 sm:$0xff] }
  0x36   : > { %1166 = vperm.xlu2 %9844, %v1120_v1   ;;  %v8719_v22 = vld [vmem:[%s10244_s26 + $0x58] sm:$0xff]  ;;  %v8767_v28 = vld [vmem:[%s13791_s2 + $0xb0] sm:$0xff]  ;;  %v9281_v49 = vld [vmem:[%s10244_s26 + $0x48] sm:$0xff]  }
  0x37   : > { %572 = vmatpush.bf16.msra.mxu0 %v8703_v33  ;;  %719 = vmatpush.bf16.msra.mxu1 %v8694_v34  ;;  %v8763_v63 = vld [vmem:[%s13791_s2 + $0x90] sm:$0xff] }
  0x38   : > { %949 = vmatpush.bf16.msra.mxu2 %v8723_v35  ;;  %1517 = vmatpush.bf16.msra.mxu3 %v8741_v36  ;;  %v8791_v1 = vld [vmem:[#allocation3 + $0xb0] sm:$0xff] }
  0x3a   : > { %1191 = vperm.xlu0 %9842, %v1125_v38   ;;  %573 = vmatmul.bf16.vlgmr.msra.gmra.mxu0 %v9742_v37  ;;  %v8766_v37 = vld [vmem:[%s13791_s2 + $0xa8] sm:$0xff] }
  0x3b   : > { %720 = vmatmul.bf16.vlgmr.msra.gmra.mxu1 %v8693_v39  ;;  %950 = vmatmul.bf16.vlgmr.msra.gmra.mxu2 %v8711_v40 }
  0x3c   : > { %1518 = vmatmul.bf16.vlgmr.msra.gmra.mxu3 %v9764_v41  ;;  %1657 = vmatpush.bf16.msrb.mxu0 %v8739_v19 }
  0x3d   : > { %1886 = vmatpush.bf16.msrb.mxu1 %v8768_v20  ;;  %v9282_v20 = vld [vmem:[%s10244_s26 + $0x50] sm:$0xff]  }
  0x3e   : > { %1181 = vperm.xlu2 %9844, %v1123_v10  }
  0x40   : > { %1658 = vmatpush.bf16.msrb.mxu0 %v8738_v27 }
  0x41   : > { %1887 = vmatpush.bf16.msrb.mxu1 %v8767_v28  ;;  %v8737_v28 = vld [vmem:[%s13791_s2 + $0x28] sm:$0xff] }
  0x42   : > { %1201 = vperm.xlu0 %9842, %v1127_v42   ;;  %v9760_v42 = vld [vmem:[%s10244_s26 + $0x54] sm:$0xff]  }
  0x44   : > { %1659 = vmatpush.bf16.msrb.mxu0 %v8737_v28  ;;  %v8736_v28 = vld [vmem:[%s13791_s2 + $0x20] sm:$0xff] }
  0x45   : > { %1888 = vmatpush.bf16.msrb.mxu1 %v8766_v37 }
  0x48   : > { %1660 = vmatpush.bf16.msrb.mxu0 %v8736_v28 }
  0x4a   : > { %1211 = vperm.xlu0 %9842, %v1129_v45   ;;  %578 = vmatmul.bf16.gmra.mxu0 %v9744_v44  ;;  %v8720_v45 = vld [vmem:[%s10244_s26 + $0x60] sm:$0xff] }
  0x4b   : > { %725 = vmatmul.bf16.gmra.mxu1 %v9273_v47  ;;  %955 = vmatmul.bf16.gmra.mxu2 %v8712_v46  ;;  %v8765_v47 = vld [vmem:[%s13791_s2 + $0xa0] sm:$0xff] }
  0x4c   : > { %1523 = vmatmul.bf16.gmra.mxu3 %v9766_v48  ;;  %1889 = vmatpush.bf16.msrb.mxu1 %v8765_v47 }
  0x52   : > { %1221 = vperm.xlu0 %9842, %v1131_v50   ;;  %v9782_v50 = vld [vmem:[%s10244_s26 + $0xb4] sm:$0xff]  }
  0x5a   : > { %1231 = vperm.xlu0 %9842, %v1133_v52   ;;  %583 = vmatmul.bf16.gmra.mxu0 %v9746_v51 }
  0x5b   : > { %730 = vmatmul.bf16.gmra.mxu1 %v9274_v54  ;;  %960 = vmatmul.bf16.gmra.mxu2 %v8713_v53 }
  0x5c   : > { %1528 = vmatmul.bf16.gmra.mxu3 %v9768_v55  ;;  %v8764_v55 = vld [vmem:[%s13791_s2 + $0x98] sm:$0xff] }
  0x5d   : > { %1890 = vmatpush.bf16.msrb.mxu1 %v8764_v55 }
  0x61   : > { %1891 = vmatpush.bf16.msrb.mxu1 %v8763_v63 }
  0x62   : > { %1241 = vperm.xlu0 %9842, %v1135_v56   ;;  %v8792_v56 = vld [vmem:[#allocation3 + $0xb8] sm:$0xff] }
  0x63   : > { %3239 = vmatpush.bf16.msrb.mxu3 %v8792_v56  ;;  %v9283_v56 = vld [vmem:[%s10244_s26 + $0x58] sm:$0xff]  }
  0x67   : > { %3240 = vmatpush.bf16.msrb.mxu3 %v8791_v1 }
  0x6a   : > { %1251 = vperm.xlu0 %9842, %v1137_v58   ;;  %588 = vmatmul.bf16.gmra.mxu0 %v9748_v57 }
  0x6b   : > { %735 = vmatmul.bf16.gmra.mxu1 %v9275_v60  ;;  %965 = vmatmul.bf16.gmra.mxu2 %v8714_v59 }
  0x6c   : > { %1533 = vmatmul.bf16.gmra.mxu3 %v9770_v61 }
  0x7a   : > { %593 = vmatmul.bf16.gmra.mxu0 %v9750_v2 }
  0x7b   : > { %740 = vmatmul.bf16.gmra.mxu1 %v9276_v4  ;;  %970 = vmatmul.bf16.gmra.mxu2 %v8715_v3 }
  0x7c   : > { %1538 = vmatmul.bf16.gmra.mxu3 %v9772_v5 }
  0x8a   : > { %598 = vmatmul.bf16.gmra.mxu0 %v9752_v6 }
  0x8b   : > { %745 = vmatmul.bf16.gmra.mxu1 %v9277_v8  ;;  %975 = vmatmul.bf16.gmra.mxu2 %v8716_v7  ;;  %v8762_v8 = vld [vmem:[%s13791_s2 + $0x88] sm:$0xff] }
  0x8c   : > { %1543 = vmatmul.bf16.gmra.mxu3 %v9774_v9  ;;  %v1142_v38 = vpop.permute.xlu0 %1141  ;;  %v8790_v9 = vld [vmem:[#allocation3 + $0xa8] sm:$0xff]  ;;  %1892 = vmatpush.bf16.msrb.mxu1 %v8762_v8 }
  0x8d   : > { %3241 = vmatpush.bf16.msrb.mxu3 %v8790_v9 }
  0x94   : > { %v1147_v58 = vpop.permute.xlu0 %1146 }
  0x97   : > { %v1152_v5 = vpop.permute.xlu1 %1151 }
  0x9a   : > { %603 = vmatmul.bf16.gmra.mxu0 %v9754_v11 }
  0x9b   : > { %750 = vmatmul.bf16.gmra.mxu1 %v9278_v13  ;;  %980 = vmatmul.bf16.gmra.mxu2 %v8717_v12  ;;  %v9761_v12 = vld [vmem:[%s10244_s26 + $0x5c] sm:$0xff] }
  0x9c   : > { %1548 = vmatmul.bf16.gmra.mxu3 %v9776_v14 }
  0xaa   : > { %608 = vmatmul.bf16.gmra.mxu0 %v9756_v15  ;;  %v8721_v15 = vld [vmem:[%s10244_s26 + $0x68] sm:$0xff] }
  0xab   : > { %755 = vmatmul.bf16.gmra.mxu1 %v9279_v17  ;;  %985 = vmatmul.bf16.gmra.mxu2 %v8718_v16  ;;  %v8761_v17 = vld [vmem:[%s13791_s2 + $0x80] sm:$0xff] }
  0xac   : > { %1553 = vmatmul.bf16.gmra.mxu3 %v9778_v18  ;;  %v8789_v18 = vld [vmem:[#allocation3 + $0xa0] sm:$0xff]  ;;  %1893 = vmatpush.bf16.msrb.mxu1 %v8761_v17 }
  0xad   : > { %3242 = vmatpush.bf16.msrb.mxu3 %v8789_v18 }
  0xb7   : > { %v574_v21 = vpop.f32.mrf.mxu0 }
  0xb8   : > { %v721_v23 = vpop.f32.mrf.mxu1 }
  0xb9   : > { %v722_v26 = vadd.f32 %v721_v23, %v574_v21 }
  0xba   : > { %613 = vmatmul.bf16.gmra.mxu0 %v9758_v0  ;;  %v9783_v0 = vld [vmem:[%s10244_s26 + $0xbc] sm:$0xff] }
  0xbb   : > { %760 = vmatmul.bf16.gmra.mxu1 %v9280_v24  ;;  %990 = vmatmul.bf16.gmra.mxu2 %v8719_v22 }
  0xbc   : > { %1558 = vmatmul.bf16.gmra.mxu3 %v9780_v25 }
  0xbe   : > { %v951_v30 = vpop.f32.mrf.mxu2 }
  0xbf   : > { %v1011_v31 = vadd.f32 %v951_v30, %v722_v26  ;;  %v576_v33 = vpop.f32.mrf.mxu0  ;;  %v1157_v30 = vpop.permute.xlu1 %1156 }
  0xc0   : > { %v723_v34 = vpop.f32.mrf.mxu1 }
  0xc1   : > { %v1039_v35 = vmul.f32 %v10358_v29, %v1011_v31  ;;  %v724_v40 = vadd.f32 %v723_v34, %v576_v33 }
  0xc3   : > { %v1067_v36 = vadd.f32 %v10363_v32, %v1039_v35 }
  0xc5   : > { %v1091_v39 = vmax.f32 %v1067_v36, 0.0 }
  0xc6   : > { %v953_v41 = vpop.f32.mrf.mxu2 }
  0xc7   : > { %v1259_v43 = vmul.f32 %v1142_v38, %v1091_v39  ;;  %v1012_v44 = vadd.f32 %v953_v41, %v724_v40  ;;  %v579_v46 = vpop.f32.mrf.mxu0  ;;  %v10409_v40 = vpop.f32.mrf.mxu3 }
  0xc8   : > { %v726_v48 = vpop.f32.mrf.mxu1 }
  0xc9   : > { %v1283_v51 = vpack.c.bf16 %v1259_v43, %v1259_v43  ;;  %v1040_v52 = vmul.f32 %v10358_v29, %v1012_v44  ;;  %v727_v54 = vadd.f32 %v726_v48, %v579_v46  ;;  %v1162_v44 = vpop.permute.xlu2 %1161 }
  0xca   : > { %618 = vmatmul.bf16.gmra.mxu0 %v9760_v42 }
  0xcb   : > { %1307 = vst.msk [vmem:[#allocation2 + $0x10] sm:$0xf] %vm376_vm0, %v1283_v51  ;;  %v1068_v53 = vadd.f32 %v10363_v32, %v1040_v52  ;;  %765 = vmatmul.bf16.gmra.mxu1 %v9281_v49  ;;  %995 = vmatmul.bf16.gmra.mxu2 %v8720_v45  ;;  %v1126_v49 = vld [vmem:[%s13790_s1 + $0x58] sm:$0xff] }
  0xcc   : > { %1563 = vmatmul.bf16.gmra.mxu3 %v9782_v50  ;;  %v8702_v50 = vld [vmem:[%s10244_s26 + $0x64] sm:$0xff] }
  0xcd   : > { %v1092_v57 = vmax.f32 %v1068_v53, 0.0  ;;  %v8722_v53 = vld [vmem:[%s10244_s26 + $0x70] sm:$0xff] }
  0xce   : > { %v956_v59 = vpop.f32.mrf.mxu2 }
  0xcf   : > { %v1260_v60 = vmul.f32 %v1147_v58, %v1092_v57  ;;  %v1013_v61 = vadd.f32 %v956_v59, %v727_v54  ;;  %v581_v62 = vpop.f32.mrf.mxu0  ;;  %v8740_v57 = vld [vmem:[%s10244_s26 + $0xc4] sm:$0xff] }
  0xd0   : > { %v728_v2 = vpop.f32.mrf.mxu1 }
  0xd1   : > { %v1284_v3 = vpack.c.bf16 %v1260_v60, %v1260_v60  ;;  %v1041_v4 = vmul.f32 %v10358_v29, %v1013_v61  ;;  %v729_v6 = vadd.f32 %v728_v2, %v581_v62  ;;  %v10423_v60 = vpop.f32.mrf.mxu3 }
  0xd3   : > { %1308 = vst.msk [vmem:[#allocation2 + $0x14] sm:$0xf] %vm376_vm0, %v1284_v3  ;;  %v1069_v7 = vadd.f32 %v10363_v32, %v1041_v4 }
  0xd5   : > { %v1093_v10 = vmax.f32 %v1069_v7, 0.0 }
  0xd6   : > { %v958_v11 = vpop.f32.mrf.mxu2 }
  0xd7   : > { %v1261_v13 = vmul.f32 %v1152_v5, %v1093_v10  ;;  %v1014_v14 = vadd.f32 %v958_v11, %v729_v6  ;;  %v584_v16 = vpop.f32.mrf.mxu0  ;;  %v1167_v5 = vpop.permute.xlu2 %1166  ;;  %v1128_v11 = vld [vmem:[%s13790_s1 + $0x68] sm:$0xff] }
  0xd8   : > { %v731_v19 = vpop.f32.mrf.mxu1 }
  0xd9   : > { %v1285_v21 = vpack.c.bf16 %v1261_v13, %v1261_v13  ;;  %v1042_v22 = vmul.f32 %v10358_v29, %v1014_v14  ;;  %v732_v24 = vadd.f32 %v731_v19, %v584_v16 }
  0xda   : > { %623 = vmatmul.bf16.gmra.mxu0 %v9761_v12  ;;  %v10400_v23 = vld [vmem:[#allocation2 + $0x10] sm:$0xff]  }
  0xdb   : > { %1309 = vst.msk [vmem:[#allocation2 + $0x18] sm:$0xf] %vm376_vm0, %v1285_v21  ;;  %770 = vmatmul.bf16.gmra.mxu1 %v9282_v20  ;;  %1000 = vmatmul.bf16.gmra.mxu2 %v8721_v15  ;;  %v1070_v25 = vadd.f32 %v10363_v32, %v1042_v22  ;;  %v2621_v26 = vshrl.u32 %v10400_v23, 16  ;;  %v2624_v27 = vshll.u32 %v10400_v23, 16  ;;  %v2747_v63 = vrot.slane %v10400_v23, 5 }
  0xdc   : > { %1568 = vmatmul.bf16.gmra.mxu3 %v9783_v0 }
  0xdd   : > { %v1094_v31 = vmax.f32 %v1070_v25, 0.0  ;;  %v2623_v33 = vrot.slane %v2621_v26, 4  ;;  %v2626_v34 = vrot.slane %v2624_v27, 5  ;;  %v2843_v19 = vshrl.u32 %v2747_v63, 16 }
  0xde   : > { %v961_v35 = vpop.f32.mrf.mxu2  ;;  %v2846_v20 = vshll.u32 %v2747_v63, 16 }
  0xdf   : > { %v1262_v36 = vmul.f32 %v1157_v30, %v1094_v31  ;;  %v1015_v37 = vadd.f32 %v961_v35, %v732_v24  ;;  %v2627_v38 = vor.u32 %v2626_v34, %v2623_v33  ;;  %v586_v39 = vpop.f32.mrf.mxu0  ;;  %v10450_v30 = vpop.f32.mrf.mxu3  ;;  %v2845_v31 = vrot.slane %v2843_v19, 3  ;;  %v1134_v19 = vld [vmem:[%s13790_s1 + $0x98] sm:$0xff] }
  0xe0   : > { %v733_v41 = vpop.f32.mrf.mxu1  ;;  %v2848_v33 = vrot.slane %v2846_v20, 4  ;;  %v1172_v35 = vpop.permute.xlu0 %1171 }
  0xe1   : > { %v1286_v42 = vpack.c.bf16 %v1262_v36, %v1262_v36  ;;  %v1043_v43 = vmul.f32 %v10358_v29, %v1015_v37  ;;  %2718 = vrot.lane.b32.xlu1 %v2627_v38, %s10019_s29  ;;  %v734_v45 = vadd.f32 %v733_v41, %v586_v39  ;;  %v1130_v37 = vld [vmem:[%s13790_s1 + $0x78] sm:$0xff] }
  0xe3   : > { %1310 = vst.msk [vmem:[#allocation2 + $0x1c] sm:$0xf] %vm376_vm0, %v1286_v42  ;;  %v1071_v46 = vadd.f32 %v10363_v32, %v1043_v43  ;;  %v8749_v42 = vld [vmem:[%s10244_s26 + $0x78] sm:$0xff] }
  0xe5   : > { %v1095_v47 = vmax.f32 %v1071_v46, 0.0 }
  0xe6   : > { %v963_v48 = vpop.f32.mrf.mxu2 }
  0xe7   : > { %v1263_v51 = vmul.f32 %v1162_v44, %v1095_v47  ;;  %v1016_v52 = vadd.f32 %v963_v48, %v734_v45  ;;  %v589_v54 = vpop.f32.mrf.mxu0  ;;  %v2849_v45 = vor.u32 %v2848_v33, %v2845_v31 }
  0xe8   : > { %v736_v55 = vpop.f32.mrf.mxu1 }
  0xe9   : > { %v1287_v58 = vpack.c.bf16 %v1263_v51, %v1263_v51  ;;  %v1044_v59 = vmul.f32 %v10358_v29, %v1016_v52  ;;  %1196 = vperm.xlu1 %9843, %v1126_v49   ;;  %v737_v61 = vadd.f32 %v736_v55, %v589_v54  ;;  %v1177_v55 = vpop.permute.xlu1 %1176 }
  0xea   : > { %628 = vmatmul.bf16.gmra.mxu0 %v8702_v50  ;;  %v10425_v62 = vld [vmem:[#allocation2 + $0x18] sm:$0xff]  }
  0xeb   : > { %1311 = vst.msk [vmem:[#allocation2 + $0x20] sm:$0xf] %vm376_vm0, %v1287_v58  ;;  %775 = vmatmul.bf16.gmra.mxu1 %v9283_v56  ;;  %1005 = vmatmul.bf16.gmra.mxu2 %v8722_v53  ;;  %v1072_v1 = vadd.f32 %v10363_v32, %v1044_v59  ;;  %v2628_v2 = vshrl.u32 %v10425_v62, 16  ;;  %v2631_v3 = vshll.u32 %v10425_v62, 16  ;;  %v2748_v4 = vrot.slane %v10425_v62, 5 }
  0xec   : > { %1573 = vmatmul.bf16.gmra.mxu3 %v8740_v57 }
  0xed   : > { %v1096_v6 = vmax.f32 %v1072_v1, 0.0  ;;  %v2630_v7 = vrot.slane %v2628_v2, 4  ;;  %v2633_v8 = vrot.slane %v2631_v3, 5  ;;  %v2749_v9 = vsel %vm2513_vm1, %v2747_v63, %v2748_v4  ;;  %v1132_v1 = vld [vmem:[%s13790_s1 + $0x88] sm:$0xff] }
  0xee   : > { %v966_v10 = vpop.f32.mrf.mxu2  ;;  %v2851_v12 = vshrl.u32 %v2749_v9, 16  ;;  %v2854_v13 = vshll.u32 %v2749_v9, 16 }
  0xef   : > { %v1264_v14 = vmul.f32 %v1167_v5, %v1096_v6  ;;  %v1017_v15 = vadd.f32 %v966_v10, %v737_v61  ;;  %v10439_v16 = vor.u32 %v2633_v8, %v2630_v7  ;;  %v591_v17 = vpop.f32.mrf.mxu0  ;;  %v10472_v61 = vpop.f32.mrf.mxu3 }
  0xf0   : > { %v738_v18 = vpop.f32.mrf.mxu1  ;;  %v2853_v24 = vrot.slane %v2851_v12, 3  ;;  %v2856_v25 = vrot.slane %v2854_v13, 4  ;;  %13845 = vst [vmem:[#allocation9_spill] sm:$0xff] %v10472_v61 }
  0xf1   : > { %v1288_v0 = vpack.c.bf16 %v1264_v14, %v1264_v14  ;;  %v1045_v21 = vmul.f32 %v10358_v29, %v1017_v15  ;;  %1206 = vperm.xlu1 %9843, %v1128_v11   ;;  %v2635_v22 = vsel %vm2376_vm2, %v2627_v38, %v10439_v16  ;;  %v739_v27 = vadd.f32 %v738_v18, %v591_v17  ;;  %v1182_v15 = vpop.permute.xlu2 %1181 }
  0xf2   : > { %2720 = vrot.lane.b32.xlu2 %v2635_v22, %s10019_s29  ;;  %v10455_v38 = vor.u32 %v2856_v25, %v2853_v24  ;;  %v10489_v24 = vld [vmem:[#allocation2 + $0x1c] sm:$0xf] }
  0xf3   : > { %1312 = vst.msk [vmem:[#allocation2 + $0x24] sm:$0xf] %vm376_vm0, %v1288_v0  ;;  %v1073_v26 = vadd.f32 %v10363_v32, %v1045_v21  ;;  %v8750_v21 = vld [vmem:[%s10244_s26 + $0x80] sm:$0xff] }
  0xf4   : > { %v2858_v48 = vsel %vm2826_vm4, %v2849_v45, %v10455_v38 }
  0xf5   : > { %v1097_v34 = vmax.f32 %v1073_v26, 0.0 }
  0xf6   : > { %v968_v36 = vpop.f32.mrf.mxu2 }
  0xf7   : > { %v1265_v39 = vmul.f32 %v1172_v35, %v1097_v34  ;;  %v1018_v41 = vadd.f32 %v968_v36, %v739_v27  ;;  %v594_v43 = vpop.f32.mrf.mxu0  ;;  %v10491_v25 = vpop.f32.mrf.mxu3  ;;  %v13800_v36 = vunpack.c.l.b16 %v10489_v24 }
  0xf8   : > { %v741_v44 = vpop.f32.mrf.mxu1  ;;  %13846 = vst [vmem:[#allocation10_spill] sm:$0xff] %v10491_v25 }
  0xf9   : > { %v1289_v46 = vpack.c.bf16 %v1265_v39, %v1265_v39  ;;  %v1046_v47 = vmul.f32 %v10358_v29, %v1018_v41  ;;  %1216 = vperm.xlu1 %9843, %v1130_v37   ;;  %v742_v49 = vadd.f32 %v741_v44, %v594_v43  ;;  %v1187_v43 = vpop.permute.xlu0 %1186 }
  0xfa   : > { %v10461_v50 = vld [vmem:[#allocation2 + $0x20] sm:$0xff]  }
  0xfb   : > { %1313 = vst.msk [vmem:[#allocation2 + $0x28] sm:$0xf] %vm376_vm0, %v1289_v46  ;;  %1894 = vmatmul.bf16.vlgmr.msrb.gmra.mxu1 %v8749_v42  ;;  %v1074_v51 = vadd.f32 %v10363_v32, %v1046_v47  ;;  %v2636_v52 = vshrl.u32 %v10461_v50, 16  ;;  %v2639_v53 = vshll.u32 %v10461_v50, 16  ;;  %v2750_v54 = vrot.slane %v10461_v50, 5 }
  0xfc   : > { %8218 = vmatmul.msk.bf16.vlgmr.msrb.gmra.mxu3 %vm2539_vm3, %v2858_v48  ;;  %v9019_v35 = vunpack.c.l.b16 %v10461_v50 }
  0xfd   : > { %v1098_v56 = vmax.f32 %v1074_v51, 0.0  ;;  %v2638_v57 = vrot.slane %v2636_v52, 4  ;;  %v2641_v58 = vrot.slane %v2639_v53, 5  ;;  %v2751_v59 = vsel %vm2513_vm1, %v2748_v4, %v2750_v54 }
  0xfe   : > { %v971_v63 = vpop.f32.mrf.mxu2  ;;  %v2868_v2 = vshrl.u32 %v2751_v59, 16  ;;  %v2871_v3 = vshll.u32 %v2751_v59, 16  ;;  %v10518_v53 = vpack.c.b16 %v9019_v35, %v13800_v36 }
  0xff   : > { %v1266_v5 = vmul.f32 %v1177_v55, %v1098_v56  ;;  %v1019_v6 = vadd.f32 %v971_v63, %v742_v49  ;;  %v2642_v7 = vor.u32 %v2641_v58, %v2638_v57  ;;  %v596_v8 = vpop.f32.mrf.mxu0  ;;  %v1136_v49 = vld [vmem:[%s13790_s1 + $0xa8] sm:$0xff] }
 0x100   : > { %v743_v9 = vpop.f32.mrf.mxu1  ;;  %v2870_v4 = vrot.slane %v2868_v2, 3  ;;  %v2873_v12 = vrot.slane %v2871_v3, 4  ;;  %v10526_v2 = vpop.f32.mrf.mxu3 }
 0x101   : > { %v1290_v10 = vpack.c.bf16 %v1266_v5, %v1266_v5  ;;  %v1047_v11 = vmul.f32 %v10358_v29, %v1019_v6  ;;  %1226 = vperm.xlu1 %9843, %v1132_v1   ;;  %v2643_v62 = vsel %vm2376_vm2, %v10439_v16, %v2642_v7  ;;  %v744_v13 = vadd.f32 %v743_v9, %v596_v8 }
 0x102   : > { %2722 = vrot.lane.b32.xlu2 %v2643_v62, %s10019_s29  ;;  %v10486_v20 = vor.u32 %v2873_v12, %v2870_v4  ;;  %v10514_v52 = vld [vmem:[#allocation2 + $0x24] sm:$0xff]   ;;  %13847 = vst [vmem:[#allocation11_spill] sm:$0xff] %v10526_v2  ;;  %v4018_v6 = vrot.slane %v10518_v53, 5 }
 0x103   : > { %1314 = vst.msk [vmem:[#allocation2 + $0x2c] sm:$0xf] %vm376_vm0, %v1290_v10  ;;  %v1075_v14 = vadd.f32 %v10363_v32, %v1047_v11  ;;  %v4019_v8 = vrot.slane %v10514_v52, 5  ;;  %v1192_v11 = vpop.permute.xlu0 %1191 }
 0x104   : > { %v2875_v31 = vsel %vm2826_vm4, %v10455_v38, %v10486_v20  ;;  %v8735_v38 = vld [vmem:[%s13791_s2 + $0x18] sm:$0xff] }
 0x105   : > { %v1099_v17 = vmax.f32 %v1075_v14, 0.0  ;;  %1661 = vmatpush.bf16.msrb.mxu0 %v8735_v38  ;;  %v4020_v12 = vsel %vm2513_vm1, %v4018_v6, %v4019_v8  ;;  %v8751_v14 = vld [vmem:[%s10244_s26 + $0x88] sm:$0xff] }
 0x106   : > { %v973_v18 = vpop.f32.mrf.mxu2 }
 0x107   : > { %v1267_v0 = vmul.f32 %v1182_v15, %v1099_v17  ;;  %v1020_v16 = vadd.f32 %v973_v18, %v744_v13  ;;  %v599_v22 = vpop.f32.mrf.mxu0 }
 0x108   : > { %v746_v26 = vpop.f32.mrf.mxu1 }
 0x109   : > { %v1291_v27 = vpack.c.bf16 %v1267_v0, %v1267_v0  ;;  %v1048_v28 = vmul.f32 %v10358_v29, %v1020_v16  ;;  %1236 = vperm.xlu1 %9843, %v1134_v19   ;;  %v747_v33 = vadd.f32 %v746_v26, %v599_v22  ;;  %v4123_v19 = vshrl.u32 %v4018_v6, 16 }
 0x10a   : > { %v10497_v34 = vld [vmem:[#allocation2 + $0x28] sm:$0xff]  }
 0x10b   : > { %1315 = vst.msk [vmem:[#allocation2 + $0x30] sm:$0xf] %vm376_vm0, %v1291_v27  ;;  %v1076_v37 = vadd.f32 %v10363_v32, %v1048_v28  ;;  %1899 = vmatmul.bf16.gmra.mxu1 %v8750_v21  ;;  %v2644_v39 = vshrl.u32 %v10497_v34, 16  ;;  %v2647_v41 = vshll.u32 %v10497_v34, 16  ;;  %v2752_v42 = vrot.slane %v10497_v34, 5  ;;  %v8734_v28 = vld [vmem:[%s13791_s2 + $0x10] sm:$0xff] }
 0x10c   : > { %8219 = vmatmul.msk.bf16.gmra.mxu3 %vm2539_vm3, %v2875_v31  ;;  %v10556_v31 = vpop.f32.mrf.mxu3  ;;  %v4131_v34 = vshrl.u32 %v4020_v12, 16  ;;  %1662 = vmatpush.bf16.msrb.mxu0 %v8734_v28 }
 0x10d   : > { %v1100_v44 = vmax.f32 %v1076_v37, 0.0  ;;  %v2646_v45 = vrot.slane %v2644_v39, 4  ;;  %v2649_v46 = vrot.slane %v2647_v41, 5  ;;  %v2753_v47 = vsel %vm2513_vm1, %v2750_v54, %v2752_v42  ;;  %13848 = vst [vmem:[#allocation12_spill] sm:$0xff] %v10556_v31 }
 0x10e   : > { %v976_v48 = vpop.f32.mrf.mxu2  ;;  %v2885_v50 = vshrl.u32 %v2753_v47, 16  ;;  %v2888_v51 = vshll.u32 %v2753_v47, 16  ;;  %v4125_v41 = vrot.slane %v4123_v19, 3 }
 0x10f   : > { %v1268_v55 = vmul.f32 %v1187_v43, %v1100_v44  ;;  %v1021_v56 = vadd.f32 %v976_v48, %v747_v33  ;;  %v2650_v57 = vor.u32 %v2649_v46, %v2646_v45  ;;  %v10520_v58 = vpop.f32.mrf.mxu0  ;;  %v4126_v33 = vshll.u32 %v4018_v6, 16 }
 0x110   : > { %v10522_v54 = vpop.f32.mrf.mxu1  ;;  %v2887_v3 = vrot.slane %v2885_v50, 3  ;;  %v2890_v5 = vrot.slane %v2888_v51, 4  ;;  %v4134_v50 = vshll.u32 %v4020_v12, 16 }
 0x111   : > { %v1292_v59 = vpack.c.bf16 %v1268_v55, %v1268_v55  ;;  %v1049_v63 = vmul.f32 %v10358_v29, %v1021_v56  ;;  %1246 = vperm.xlu1 %9843, %v1136_v49   ;;  %v2651_v1 = vsel %vm2376_vm2, %v2642_v7, %v2650_v57  ;;  %v1138_v7 = vld [vmem:[%s13790_s1 + $0xb8] sm:$0xff]  ;;  %v4128_v45 = vrot.slane %v4126_v33, 4  ;;  %v8787_v55 = vld [vmem:[#allocation3 + $0x90] sm:$0xff] }
 0x112   : > { %2724 = vrot.lane.b32.xlu2 %v2651_v1, %s10019_s29  ;;  %v10538_v4 = vor.u32 %v2890_v5, %v2887_v3  ;;  %v4133_v49 = vrot.slane %v4131_v34, 3  ;;  %v10572_v1 = vld [vmem:[#allocation2 + $0x2c] sm:$0xff]  }
 0x113   : > { %1316 = vst.msk [vmem:[#allocation2 + $0x34] sm:$0xf] %vm376_vm0, %v1292_v59  ;;  %v1077_v9 = vadd.f32 %v10363_v32, %v1049_v63  ;;  %v4129_v59 = vor.u32 %v4128_v45, %v4125_v41  ;;  %v4136_v63 = vrot.slane %v4134_v50, 4 }
 0x114   : > { %v2892_v0 = vsel %vm2826_vm4, %v10486_v20, %v10538_v4  ;;  %v8788_v20 = vld [vmem:[#allocation3 + $0x98] sm:$0xff] }
 0x115   : > { %v1101_v10 = vmax.f32 %v1077_v9, 0.0  ;;  %3166 = vmatpush.bf16.msrb.mxu2 %v8788_v20  ;;  %v4137_v9 = vor.u32 %v4136_v63, %v4133_v49 }
 0x116   : > { %v10533_v62 = vpop.f32.mrf.mxu2 }
 0x117   : > { %v1269_v13 = vmul.f32 %v1192_v11, %v1101_v10  ;;  %v604_v15 = vpop.f32.mrf.mxu0  ;;  %v8786_v10 = vld [vmem:[#allocation3 + $0x88] sm:$0xff]  ;;  %v1202_v11 = vpop.permute.xlu0 %1201  ;;  %v10576_v12 = vsel %vm2826_vm4, %v4129_v59, %v4137_v9 }
 0x118   : > { %v751_v17 = vpop.f32.mrf.mxu1 }
 0x119   : > { %v1293_v18 = vpack.c.bf16 %v1269_v13, %v1269_v13  ;;  %1256 = vperm.xlu1 %9843, %v1138_v7   ;;  %v752_v21 = vadd.f32 %v751_v17, %v604_v15  ;;  %3167 = vmatpush.bf16.msrb.mxu2 %v8787_v55  ;;  %v8752_v17 = vld [vmem:[%s10244_s26 + $0x90] sm:$0xff] }
 0x11a   : > { %v10547_v16 = vld [vmem:[#allocation2 + $0x30] sm:$0xff]  }
 0x11b   : > { %1317 = vst.msk [vmem:[#allocation2 + $0x38] sm:$0xf] %vm376_vm0, %v1293_v18  ;;  %1904 = vmatmul.bf16.gmra.mxu1 %v8751_v14  ;;  %v2652_v22 = vshrl.u32 %v10547_v16, 16  ;;  %v2655_v26 = vshll.u32 %v10547_v16, 16  ;;  %v2754_v27 = vrot.slane %v10547_v16, 5  ;;  %v4021_v14 = vrot.slane %v10572_v1, 5 }
 0x11c   : > { %8220 = vmatmul.msk.bf16.gmra.mxu3 %vm2539_vm3, %v2892_v0 }
 0x11d   : > { %v2654_v35 = vrot.slane %v2652_v22, 4  ;;  %v2657_v37 = vrot.slane %v2655_v26, 5  ;;  %v2755_v39 = vsel %vm2513_vm1, %v2752_v42, %v2754_v27  ;;  %3168 = vmatpush.bf16.msrb.mxu2 %v8786_v10  ;;  %v4022_v22 = vsel %vm2513_vm1, %v4019_v8, %v4021_v14  ;;  %v8753_v10 = vld [vmem:[%s10244_s26 + $0x98] sm:$0xff] }
 0x11e   : > { %v981_v38 = vpop.f32.mrf.mxu2  ;;  %v2902_v43 = vshrl.u32 %v2755_v39, 16  ;;  %v2905_v44 = vshll.u32 %v2755_v39, 16  ;;  %v4148_v28 = vshrl.u32 %v4022_v22, 16  ;;  %v4151_v34 = vshll.u32 %v4022_v22, 16 }
 0x11f   : > { %v1023_v46 = vadd.f32 %v981_v38, %v752_v21  ;;  %v10562_v47 = vor.u32 %v2657_v37, %v2654_v35  ;;  %v10564_v48 = vpop.f32.mrf.mxu0  ;;  %v8785_v21 = vld [vmem:[#allocation3 + $0x80] sm:$0xff]  ;;  %v8784_v35 = vld [vmem:[#allocation3 + $0x78] sm:$0xff]  ;;  %v1212_v63 = vpop.permute.xlu0 %1211 }
 0x120   : > { %v10566_v51 = vpop.f32.mrf.mxu1  ;;  %v2904_v5 = vrot.slane %v2902_v43, 3  ;;  %v2907_v6 = vrot.slane %v2905_v44, 4  ;;  %v4150_v37 = vrot.slane %v4148_v28, 3  ;;  %v4153_v39 = vrot.slane %v4151_v34, 4 }
 0x121   : > { %v1051_v56 = vmul.f32 %v10358_v29, %v1023_v46  ;;  %v2659_v42 = vsel %vm2376_vm2, %v2650_v57, %v10562_v47  ;;  %v10578_v57 = vpop.f32.mrf.mxu3  ;;  %3169 = vmatpush.bf16.msrb.mxu2 %v8785_v21  ;;  %v8783_v46 = vld [vmem:[#allocation3 + $0x70] sm:$0xff] }
 0x122   : > { %2726 = vrot.lane.b32.xlu2 %v2659_v42, %s10019_s29  ;;  %13849 = vst [vmem:[#allocation13_spill] sm:$0xff] %v10578_v57  ;;  %v10584_v18 = vor.u32 %v2907_v6, %v2904_v5  ;;  %v4154_v43 = vor.u32 %v4153_v39, %v4150_v37 }
 0x123   : > { %v1079_v3 = vadd.f32 %v10363_v32, %v1051_v56  ;;  %v8782_v56 = vld [vmem:[#allocation3 + $0x68] sm:$0xff] }
 0x124   : > { %v2909_v20 = vsel %vm2826_vm4, %v10538_v4, %v10584_v18  ;;  %v10600_v4 = vld [vmem:[#allocation2 + $0x34] sm:$0xff]   ;;  %v10604_v50 = vsel %vm2826_vm4, %v4137_v9, %v4154_v43 }
 0x125   : > { %v1103_v7 = vmax.f32 %v1079_v3, 0.0  ;;  %3170 = vmatpush.bf16.msrb.mxu2 %v8784_v35  ;;  %13851 = vst [vmem:[#allocation15_spill] sm:$0xff] %v10604_v50  ;;  %v13801_v42 = vrot.slane %v10600_v4, 5 }
 0x126   : > { %v10580_v13 = vpop.f32.mrf.mxu2 }
 0x127   : > { %v1271_v15 = vmul.f32 %v1202_v11, %v1103_v7  ;;  %v609_v19 = vpop.f32.mrf.mxu0  ;;  %v4024_v5 = vsel %vm2513_vm1, %v4021_v14, %v13801_v42  ;;  %v8733_v14 = vld [vmem:[%s13791_s2 + $0x8] sm:$0xff] }
 0x128   : > { %v756_v0 = vpop.f32.mrf.mxu1  ;;  %v4165_v9 = vshrl.u32 %v4024_v5, 16  ;;  %v4168_v7 = vshll.u32 %v4024_v5, 16  ;;  %1663 = vmatpush.bf16.msrb.mxu0 %v8733_v14  ;;  %v8975_v14 = vunpack.c.l.b16 %v10400_v23  ;;  %v3886_v23 = vshll.u32 %v10518_v53, 16 }
 0x129   : > { %v1295_v26 = vpack.c.bf16 %v1271_v15, %v1271_v15  ;;  %v757_v33 = vadd.f32 %v756_v0, %v609_v19  ;;  %v10596_v44 = vpop.f32.mrf.mxu3  ;;  %3171 = vmatpush.bf16.msrb.mxu2 %v8783_v46 }
 0x12a   : > { %13850 = vst [vmem:[#allocation14_spill] sm:$0xff] %v10596_v44  ;;  %v4167_v0 = vrot.slane %v4165_v9, 3  ;;  %v4170_v22 = vrot.slane %v4168_v7, 4  ;;  %v10644_v7 = vld [vmem:[#allocation2 + $0x14] sm:$0xff]   ;;  %v3903_v44 = vshll.u32 %v10572_v1, 16 }
 0x12b   : > { %1319 = vst.msk [vmem:[#allocation2 + $0x40] sm:$0xf] %vm376_vm0, %v1295_v26  ;;  %1909 = vmatmul.bf16.gmra.mxu1 %v8752_v17  ;;  %v8781_v17 = vld [vmem:[#allocation3 + $0x60] sm:$0xff] }
 0x12c   : > { %8221 = vmatmul.msk.bf16.gmra.mxu3 %vm2539_vm3, %v2909_v20  ;;  %v10620_v28 = vor.u32 %v4170_v22, %v4167_v0 }
 0x12d   : > { %3172 = vmatpush.bf16.msrb.mxu2 %v8782_v56 }
 0x12e   : > { %v986_v41 = vpop.f32.mrf.mxu2 }
 0x12f   : > { %v1025_v8 = vadd.f32 %v986_v41, %v757_v33  ;;  %v10594_v38 = vpop.f32.mrf.mxu0  ;;  %v10624_v33 = vsel %vm2826_vm4, %v4154_v43, %v10620_v28  ;;  %v8732_v41 = vld [vmem:[%s13791_s2] sm:$0xff]  ;;  %v1222_v43 = vpop.permute.xlu0 %1221 }
 0x130   : > { %v10598_v45 = vpop.f32.mrf.mxu1  ;;  %13853 = vst [vmem:[#allocation17_spill] sm:$0xff] %v10624_v33  ;;  %1664 = vmatpush.bf16.msrb.mxu0 %v8732_v41 }
 0x131   : > { %v1053_v49 = vmul.f32 %v10358_v29, %v1025_v8  ;;  %v10614_v21 = vpop.f32.mrf.mxu3  ;;  %3173 = vmatpush.bf16.msrb.mxu2 %v8781_v17 }
 0x132   : > { %13852 = vst [vmem:[#allocation16_spill] sm:$0xff] %v10614_v21 }
 0x133   : > { %v1081_v55 = vadd.f32 %v10363_v32, %v1053_v49 }
 0x135   : > { %v1105_v59 = vmax.f32 %v1081_v55, 0.0  ;;  %v8731_v55 = vld [vmem:[%s10244_s26 + $0x60] sm:$0xff] }
 0x136   : > { %v10608_v3 = vpop.f32.mrf.mxu2  ;;  %1665 = vmatmul.bf16.vlgmr.msrb.gmra.mxu0 %v8731_v55 }
 0x137   : > { %v1273_v6 = vmul.f32 %v1212_v63, %v1105_v59  ;;  %v614_v11 = vpop.f32.mrf.mxu0  ;;  %v8754_v63 = vld [vmem:[%s10244_s26 + $0xa0] sm:$0xff] }
 0x138   : > { %v761_v15 = vpop.f32.mrf.mxu1 }
 0x139   : > { %v1297_v19 = vpack.c.bf16 %v1273_v6, %v1273_v6  ;;  %v762_v26 = vadd.f32 %v761_v15, %v614_v11  ;;  %v10635_v46 = vpop.f32.mrf.mxu3  ;;  %v749_v11 = vadd.f32 %v10522_v54, %v10520_v58  ;;  %v2603_v15 = vld [vmem:[#allocation2 + $0xc] sm:$0x8] }
 0x13a   : > { %13854 = vst [vmem:[#allocation18_spill] sm:$0xff] %v10635_v46 }
 0x13b   : > { %1321 = vst.msk [vmem:[#allocation2 + $0x48] sm:$0xf] %vm376_vm0, %v1297_v19  ;;  %1914 = vmatmul.bf16.gmra.mxu1 %v8753_v10  ;;  %v1022_v0 = vadd.f32 %v10533_v62, %v749_v11  ;;  %v754_v62 = vadd.f32 %v10566_v51, %v10564_v48  ;;  %v9284_v51 = vld [vmem:[%s10244_s26 + $0x68] sm:$0xff]  }
 0x13e   : > { %v991_v20 = vpop.f32.mrf.mxu2 }
 0x13f   : > { %v1027_v34 = vadd.f32 %v991_v20, %v762_v26  ;;  %v10626_v35 = vpop.f32.mrf.mxu0  ;;  %v2612_v20 = vunpack.c.l.b16 %v2603_v15  ;;  %v1232_v15 = vpop.permute.xlu0 %1231 }
 0x140   : > { %v10628_v37 = vpop.f32.mrf.mxu1 }
 0x141   : > { %v1055_v39 = vmul.f32 %v10358_v29, %v1027_v34  ;;  %v10649_v22 = vpop.f32.mrf.mxu3  ;;  %v2616_v55 = vpack.c.b16 %v8975_v14, %v2612_v20 }
 0x142   : > { %13855 = vst [vmem:[#allocation19_spill] sm:$0xff] %v10649_v22 }
 0x143   : > { %v1083_v8 = vadd.f32 %v10363_v32, %v1055_v39 }
 0x145   : > { %v1107_v49 = vmax.f32 %v1083_v8, 0.0 }
 0x146   : > { %v10638_v56 = vpop.f32.mrf.mxu2  ;;  %1670 = vmatmul.bf16.gmra.mxu0 %v9284_v51 }
 0x147   : > { %v1275_v59 = vmul.f32 %v1222_v43, %v1107_v49  ;;  %v619_v5 = vpop.f32.mrf.mxu0  ;;  %v1050_v49 = vmul.f32 %v10358_v29, %v1022_v0 }
 0x148   : > { %v766_v6 = vpop.f32.mrf.mxu1 }
 0x149   : > { %v1299_v10 = vpack.c.bf16 %v1275_v59, %v1275_v59  ;;  %v767_v9 = vadd.f32 %v766_v6, %v619_v5  ;;  %v1078_v48 = vadd.f32 %v10363_v32, %v1050_v49 }
 0x14b   : > { %1323 = vst.msk [vmem:[#allocation2 + $0x50] sm:$0xf] %vm376_vm0, %v1299_v10  ;;  %1919 = vmatmul.bf16.gmra.mxu1 %v8754_v63  ;;  %v1102_v49 = vmax.f32 %v1078_v48, 0.0 }
 0x14c   : > { %v2721_v17 = vpop.permute.xlu2 %2720 }
 0x14d   : > { %v2776_v19 = vsel %vm2539_vm3, %v10644_v7, %v2721_v17  ;;  %v1024_v17 = vadd.f32 %v10580_v13, %v754_v62 }
 0x14e   : > { %v996_v26 = vpop.f32.mrf.mxu2  ;;  %v2834_v34 = vshrl.u32 %v2776_v19, 16  ;;  %v2837_v41 = vshll.u32 %v2776_v19, 16 }
 0x14f   : > { %v1029_v58 = vadd.f32 %v996_v26, %v767_v9  ;;  %v10652_v54 = vpop.f32.mrf.mxu0 }
 0x150   : > { %v10654_v39 = vpop.f32.mrf.mxu1  ;;  %v2836_v63 = vrot.slane %v2834_v34, 3  ;;  %v2839_v6 = vrot.slane %v2837_v41, 4  ;;  %v10670_v34 = vpop.f32.mrf.mxu3 }
 0x151   : > { %v1057_v8 = vmul.f32 %v10358_v29, %v1029_v58  ;;  %v8755_v58 = vld [vmem:[%s10244_s26 + $0xa8] sm:$0xff]  ;;  %13856 = vst [vmem:[#allocation20_spill] sm:$0xff] %v10670_v34  ;;  %v3900_v34 = vshrl.u32 %v10572_v1, 16 }
 0x153   : > { %v1085_v43 = vadd.f32 %v10363_v32, %v1057_v8  ;;  %v2719_v59 = vpop.permute.xlu1 %2718 }
 0x154   : > { %v2774_v5 = vsel %vm2539_vm3, %v2616_v55, %v2719_v59  ;;  %v759_v55 = vadd.f32 %v10598_v45, %v10594_v38  ;;  %v1052_v59 = vmul.f32 %v10358_v29, %v1024_v17 }
 0x155   : > { %v1109_v10 = vmax.f32 %v1085_v43, 0.0  ;;  %v2827_v11 = vshrl.u32 %v2774_v5, 16  ;;  %v2830_v9 = vshll.u32 %v2774_v5, 16  ;;  %v10674_v43 = vor.u32 %v2839_v6, %v2836_v63 }
 0x156   : > { %v10665_v19 = vpop.f32.mrf.mxu2  ;;  %v1026_v38 = vadd.f32 %v10608_v3, %v759_v55  ;;  %v1080_v17 = vadd.f32 %v10363_v32, %v1052_v59  ;;  %v764_v3 = vadd.f32 %v10628_v37, %v10626_v35 }
 0x157   : > { %v1277_v0 = vmul.f32 %v1232_v15, %v1109_v10  ;;  %v2829_v26 = vrot.slane %v2827_v11, 3  ;;  %v2832_v20 = vrot.slane %v2830_v9, 4  ;;  %v624_v8 = vpop.f32.mrf.mxu0  ;;  %v10678_v11 = vld [vmem:[#allocation2 + $0x1c] sm:$0xff]  }
 0x158   : > { %v771_v41 = vpop.f32.mrf.mxu1  ;;  %v10695_v55 = vpop.f32.mrf.mxu3 }
 0x159   : > { %v1301_v13 = vpack.c.bf16 %v1277_v0, %v1277_v0  ;;  %v2833_v62 = vor.u32 %v2832_v20, %v2829_v26  ;;  %v772_v10 = vadd.f32 %v771_v41, %v624_v8  ;;  %v1054_v8 = vmul.f32 %v10358_v29, %v1026_v38  ;;  %13857 = vst [vmem:[#allocation21_spill] sm:$0xff] %v10695_v55  ;;  %v1242_v38 = vpop.permute.xlu0 %1241 }
 0x15b   : > { %1325 = vst.msk [vmem:[#allocation2 + $0x58] sm:$0xf] %vm376_vm0, %v1301_v13  ;;  %1924 = vmatmul.bf16.gmra.mxu1 %v8755_v58  ;;  %v1197_v5 = vpop.permute.xlu1 %1196  ;;  %v2841_v9 = vsel %vm2826_vm4, %v2833_v62, %v10674_v43  ;;  %v1104_v13 = vmax.f32 %v1080_v17, 0.0 }
 0x15c   : > { %v1270_v15 = vmul.f32 %v1197_v5, %v1102_v49  ;;  %v2723_v51 = vpop.permute.xlu2 %2722  ;;  %3174 = vmatmul.bf16.vlgmr.msrb.gmra.mxu2 %v2841_v9  ;;  %v1028_v9 = vadd.f32 %v10638_v56, %v764_v3 }
 0x15d   : > { %v2778_v45 = vsel %vm2539_vm3, %v10678_v11, %v2723_v51  ;;  %v1082_v51 = vadd.f32 %v10363_v32, %v1054_v8 }
 0x15e   : > { %v1294_v63 = vpack.c.bf16 %v1270_v15, %v1270_v15  ;;  %v1001_v6 = vpop.f32.mrf.mxu2  ;;  %v2859_v48 = vshrl.u32 %v2778_v45, 16  ;;  %v2862_v0 = vshll.u32 %v2778_v45, 16  ;;  %v1056_v8 = vmul.f32 %v10358_v29, %v1028_v9 }
 0x15f   : > { %v1031_v26 = vadd.f32 %v1001_v6, %v772_v10  ;;  %v10686_v20 = vpop.f32.mrf.mxu0  ;;  %v8756_v6 = vld [vmem:[%s10244_s26 + $0xb0] sm:$0xff] }
 0x160   : > { %1318 = vst.msk [vmem:[#allocation2 + $0x3c] sm:$0xf] %vm376_vm0, %v1294_v63  ;;  %v10689_v58 = vpop.f32.mrf.mxu1  ;;  %v2861_v62 = vrot.slane %v2859_v48, 3  ;;  %v2864_v59 = vrot.slane %v2862_v0, 4  ;;  %v9285_v48 = vld [vmem:[%s10244_s26 + $0x70] sm:$0xff]  }
 0x161   : > { %v1059_v41 = vmul.f32 %v10358_v29, %v1031_v26  ;;  %1675 = vmatmul.bf16.gmra.mxu0 %v9285_v48 }
 0x162   : > { %v10702_v45 = vor.u32 %v2864_v59, %v2861_v62 }
 0x163   : > { %v1087_v49 = vadd.f32 %v10363_v32, %v1059_v41  ;;  %v1207_v5 = vpop.permute.xlu1 %1206  ;;  %v1106_v41 = vmax.f32 %v1082_v51, 0.0 }
 0x164   : > { %v1272_v10 = vmul.f32 %v1207_v5, %v1104_v13  ;;  %v769_v13 = vadd.f32 %v10654_v39, %v10652_v54  ;;  %v2866_v29 = vsel %vm2826_vm4, %v10674_v43, %v10702_v45  ;;  %v10724_v39 = vpop.f32.mrf.mxu3 }
 0x165   : > { %v1111_v15 = vmax.f32 %v1087_v49, 0.0  ;;  %13858 = vst [vmem:[#allocation22_spill] sm:$0xff] %v10724_v39 }
 0x166   : > { %v1296_v35 = vpack.c.bf16 %v1272_v10, %v1272_v10  ;;  %v10700_v37 = vpop.f32.mrf.mxu2 }
 0x167   : > { %v1279_v63 = vmul.f32 %v1242_v38, %v1111_v15  ;;  %v10705_v17 = vld [vmem:[#allocation2 + $0x38] sm:$0xff]   ;;  %v629_v0 = vpop.f32.mrf.mxu0  ;;  %v10719_v38 = vld [vmem:[#allocation2 + $0x24] sm:$0xff]  }
 0x168   : > { %1320 = vst.msk [vmem:[#allocation2 + $0x44] sm:$0xf] %vm376_vm0, %v1296_v35  ;;  %v2660_v26 = vshrl.u32 %v10705_v17, 16  ;;  %v2663_v56 = vshll.u32 %v10705_v17, 16  ;;  %v2756_v32 = vrot.slane %v10705_v17, 5  ;;  %v776_v62 = vpop.f32.mrf.mxu1  ;;  %v1030_v17 = vadd.f32 %v10665_v19, %v769_v13  ;;  %v10912_v57 = vld [vmem:[#allocation2 + $0x3c] sm:$0xff]  }
 0x169   : > { %v1303_v3 = vpack.c.bf16 %v1279_v63, %v1279_v63  ;;  %v777_v15 = vadd.f32 %v776_v62, %v629_v0  ;;  %v774_v13 = vadd.f32 %v10689_v58, %v10686_v20 }
 0x16a   : > { %v2662_v59 = vrot.slane %v2660_v26, 4  ;;  %v2665_v49 = vrot.slane %v2663_v56, 5  ;;  %v2757_v5 = vsel %vm2513_vm1, %v2754_v27, %v2756_v32  ;;  %v10734_v26 = vld [vmem:[%s13793_s4] ss:$0 sm:$0xff] }
 0x16b   : > { %1327 = vst.msk [vmem:[#allocation2 + $0x60] sm:$0xf] %vm376_vm0, %v1303_v3  ;;  %1929 = vmatmul.bf16.gmra.mxu1 %v8756_v6  ;;  %v1217_v10 = vpop.permute.xlu1 %1216  ;;  %v2919_v9 = vshrl.u32 %v2757_v5, 16  ;;  %v2922_v54 = vshll.u32 %v2757_v5, 16  ;;  %v1084_v56 = vadd.f32 %v10734_v26, %v1056_v8  ;;  %v10750_v8 = vld [vmem:[%s13792_s3] ss:$0 sm:$0xff] }
 0x16c   : > { %v1274_v51 = vmul.f32 %v1217_v10, %v1106_v41  ;;  %v2725_v35 = vpop.permute.xlu2 %2724  ;;  %3179 = vmatmul.bf16.gmra.mxu2 %v2866_v29  ;;  %v2666_v16 = vor.u32 %v2665_v49, %v2662_v59  ;;  %v1058_v20 = vmul.f32 %v10750_v8, %v1030_v17 }
 0x16d   : > { %v2780_v27 = vsel %vm2539_vm3, %v10719_v38, %v2725_v35  ;;  %v2921_v63 = vrot.slane %v2919_v9, 3  ;;  %v2924_v6 = vrot.slane %v2922_v54, 4  ;;  %v1108_v58 = vmax.f32 %v1084_v56, 0.0 }
 0x16e   : > { %v1298_v48 = vpack.c.bf16 %v1274_v51, %v1274_v51  ;;  %v1006_v0 = vpop.f32.mrf.mxu2  ;;  %v2667_v43 = vsel %vm2376_vm2, %v10562_v47, %v2666_v16  ;;  %v2876_v3 = vshrl.u32 %v2780_v27, 16  ;;  %v2879_v41 = vshll.u32 %v2780_v27, 16 }
 0x16f   : > { %v1033_v62 = vadd.f32 %v1006_v0, %v777_v15  ;;  %2728 = vrot.lane.b32.xlu2 %v2667_v43, %s10019_s29  ;;  %v10738_v59 = vor.u32 %v2924_v6, %v2921_v63  ;;  %v10740_v19 = vld [vmem:[#allocation2 + $0x40] sm:$0xff]   ;;  %v631_v0 = vpop.f32.mrf.mxu0 }
 0x170   : > { %1322 = vst.msk [vmem:[#allocation2 + $0x4c] sm:$0xf] %vm376_vm0, %v1298_v48  ;;  %v2668_v47 = vshrl.u32 %v10740_v19, 16  ;;  %v2671_v49 = vshll.u32 %v10740_v19, 16  ;;  %v2758_v15 = vrot.slane %v10740_v19, 5  ;;  %v2878_v54 = vrot.slane %v2876_v3, 3  ;;  %v10765_v3 = vpop.f32.mrf.mxu3 }
 0x171   : > { %v1061_v5 = vmul.f32 %v10750_v8, %v1033_v62  ;;  %v2926_v10 = vsel %vm2826_vm4, %v10584_v18, %v10738_v59  ;;  %v2881_v51 = vrot.slane %v2879_v41, 4  ;;  %v1032_v18 = vadd.f32 %v10700_v37, %v774_v13  ;;  %v9286_v62 = vld [vmem:[%s10244_s26 + $0x78] sm:$0xff]   ;;  %13859 = vst [vmem:[#allocation23_spill] sm:$0xff] %v10765_v3  ;;  %v778_v37 = vpop.f32.mrf.mxu1 }
 0x172   : > { %8222 = vmatmul.msk.bf16.gmra.mxu3 %vm2539_vm3, %v2926_v10  ;;  %v2670_v29 = vrot.slane %v2668_v47, 4  ;;  %v2673_v9 = vrot.slane %v2671_v49, 5  ;;  %v2759_v63 = vsel %vm2513_vm1, %v2756_v32, %v2758_v15  ;;  %v1252_v47 = vpop.permute.xlu0 %1251  ;;  %v8757_v13 = vld [vmem:[%s10244_s26 + $0xb8] sm:$0xff]  ;;  %1680 = vmatmul.bf16.gmra.mxu0 %v9286_v62 }
 0x173   : > { %v1089_v35 = vadd.f32 %v10734_v26, %v1061_v5  ;;  %v1227_v27 = vpop.permute.xlu1 %1226  ;;  %v2936_v43 = vshrl.u32 %v2759_v63, 16  ;;  %v2939_v56 = vshll.u32 %v2759_v63, 16  ;;  %v1086_v5 = vadd.f32 %v10734_v26, %v1058_v20 }
 0x174   : > { %v1276_v6 = vmul.f32 %v1227_v27, %v1108_v58  ;;  %v2674_v17 = vor.u32 %v2673_v9, %v2670_v29  ;;  %v10769_v10 = vor.u32 %v2881_v51, %v2878_v54  ;;  %v1060_v29 = vmul.f32 %v10750_v8, %v1032_v18  ;;  %v10780_v18 = vld [vmem:[#allocation2 + $0x2c] sm:$0xff]  }
 0x175   : > { %v1113_v48 = vmax.f32 %v1089_v35, 0.0  ;;  %v2938_v54 = vrot.slane %v2936_v43, 3  ;;  %v2941_v51 = vrot.slane %v2939_v56, 4  ;;  %v1110_v63 = vmax.f32 %v1086_v5, 0.0 }
 0x176   : > { %v1300_v41 = vpack.c.bf16 %v1276_v6, %v1276_v6  ;;  %v2675_v49 = vsel %vm2376_vm2, %v2666_v16, %v2674_v17  ;;  %v779_v16 = vadd.f32 %v778_v37, %v631_v0  ;;  %v1008_v27 = vpop.f32.mrf.mxu2  ;;  %v1088_v56 = vadd.f32 %v10734_v26, %v1060_v29  ;;  %v9295_v29 = vld [vmem:[#allocation2 + $0x8] sm:$0xff]  }
 0x177   : > { %v1281_v32 = vmul.f32 %v1252_v47, %v1113_v48  ;;  %2730 = vrot.lane.b32.xlu2 %v2675_v49, %s10019_s29  ;;  %v10773_v58 = vld [vmem:[#allocation2 + $0x48] sm:$0xff]  }
 0x178   : > { %1324 = vst.msk [vmem:[#allocation2 + $0x54] sm:$0xf] %vm376_vm0, %v1300_v41  ;;  %v2676_v9 = vshrl.u32 %v10773_v58, 16  ;;  %v2679_v35 = vshll.u32 %v10773_v58, 16  ;;  %v2883_v41 = vsel %vm2826_vm4, %v10702_v45, %v10769_v10  ;;  %v1034_v43 = vadd.f32 %v1008_v27, %v779_v16  ;;  %v10797_v16 = vpop.f32.mrf.mxu3 }
 0x179   : > { %v1305_v20 = vpack.c.bf16 %v1281_v32, %v1281_v32  ;;  %v10788_v32 = vor.u32 %v2941_v51, %v2938_v54  ;;  %13860 = vst [vmem:[#allocation24_spill] sm:$0xff] %v10797_v16  ;;  %v1112_v51 = vmax.f32 %v1088_v56, 0.0  ;;  %v2398_v16 = vshll.u32 %v10644_v7, 16 }
 0x17a   : > { %v2678_v6 = vrot.slane %v2676_v9, 4  ;;  %v2681_v48 = vrot.slane %v2679_v35, 5  ;;  %v2760_v9 = vrot.slane %v10773_v58, 5  ;;  %v1062_v54 = vmul.f32 %v10750_v8, %v1034_v43 }
 0x17b   : > { %1329 = vst.msk [vmem:[#allocation2 + $0x68] sm:$0xf] %vm376_vm0, %v1305_v20  ;;  %1934 = vmatmul.bf16.gmra.mxu1 %v8757_v13  ;;  %v1237_v47 = vpop.permute.xlu1 %1236  ;;  %v8971_v43 = vunpack.c.l.b16 %v9295_v29 }
 0x17c   : > { %v1278_v49 = vmul.f32 %v1237_v47, %v1110_v63  ;;  %v2727_v0 = vpop.permute.xlu2 %2726  ;;  %3184 = vmatmul.bf16.gmra.mxu2 %v2883_v41  ;;  %v2682_v62 = vor.u32 %v2681_v48, %v2678_v6  ;;  %v10795_v63 = vld [vmem:[#allocation2 + $0x4] sm:$0xf]  ;;  %v2943_v6 = vsel %vm2826_vm4, %v10738_v59, %v10788_v32  ;;  %v2761_v8 = vsel %vm2513_vm1, %v2758_v15, %v2760_v9 }
 0x17d   : > { %v2782_v5 = vsel %vm2539_vm3, %v10780_v18, %v2727_v0  ;;  %v13802_v56 = vunpack.c.l.b16 %v10795_v63 }
 0x17e   : > { %v1302_v37 = vpack.c.bf16 %v1278_v49, %v1278_v49  ;;  %v2683_v13 = vsel %vm2376_vm2, %v2674_v17, %v2682_v62  ;;  %v2893_v35 = vshrl.u32 %v2782_v5, 16  ;;  %v2896_v20 = vshll.u32 %v2782_v5, 16  ;;  %v10813_v5 = vpop.f32.mrf.mxu1 }
 0x17f   : > { %2732 = vrot.lane.b32.xlu2 %v2683_v13, %s10019_s29  ;;  %v10793_v45 = vld [vmem:[#allocation2 + $0x50] sm:$0xff]   ;;  %v1090_v13 = vadd.f32 %v10734_v26, %v1062_v54  ;;  %v2364_v42 = vpack.c.b16 %v8971_v43, %v13802_v56 }
 0x180   : > { %1326 = vst.msk [vmem:[#allocation2 + $0x5c] sm:$0xf] %vm376_vm0, %v1302_v37  ;;  %v2684_v17 = vshrl.u32 %v10793_v45, 16  ;;  %v2687_v27 = vshll.u32 %v10793_v45, 16  ;;  %v2895_v41 = vrot.slane %v2893_v35, 3  ;;  %v2898_v49 = vrot.slane %v2896_v20, 4 }
 0x181   : > { %v8758_v35 = vld [vmem:[%s10244_s26 + $0xc0] sm:$0xff] }
 0x182   : > { %8223 = vmatmul.msk.bf16.gmra.mxu3 %vm2539_vm3, %v2943_v6  ;;  %v2686_v48 = vrot.slane %v2684_v17, 4  ;;  %v2689_v47 = vrot.slane %v2687_v27, 5  ;;  %v2953_v17 = vshrl.u32 %v2761_v8, 16  ;;  %v2956_v27 = vshll.u32 %v2761_v8, 16  ;;  %v9287_v6 = vld [vmem:[%s10244_s26 + $0x80] sm:$0xff]  }
 0x183   : > { %v1247_v0 = vpop.permute.xlu1 %1246  ;;  %v10818_v15 = vor.u32 %v2898_v49, %v2895_v41  ;;  %1685 = vmatmul.bf16.gmra.mxu0 %v9287_v6  ;;  %v8972_v8 = vunpack.c.h.b16 %v9295_v29 }
 0x184   : > { %v1280_v59 = vmul.f32 %v1247_v0, %v1112_v51  ;;  %v2690_v37 = vor.u32 %v2689_v47, %v2686_v48  ;;  %v1114_v51 = vmax.f32 %v1090_v13, 0.0  ;;  %v2955_v48 = vrot.slane %v2953_v17, 3  ;;  %v10829_v47 = vpop.f32.mrf.mxu3  ;;  %v8780_v13 = vld [vmem:[#allocation3 + $0x58] sm:$0xff] }
 0x185   : > { %13861 = vst [vmem:[#allocation25_spill] sm:$0xff] %v10829_v47  ;;  %v2900_v43 = vsel %vm2826_vm4, %v10769_v10, %v10818_v15  ;;  %3716 = vmatpush.bf16.msra.mxu1 %v8780_v13  ;;  %v10842_v29 = vpack.c.b16 %v8975_v14, %v8972_v8  ;;  %v3894_v8 = vshll.u32 %v10514_v52, 16  ;;  %v8778_v13 = vld [vmem:[#allocation3 + $0x48] sm:$0xff] }
 0x186   : > { %v1304_v36 = vpack.c.bf16 %v1280_v59, %v1280_v59  ;;  %v2691_v19 = vsel %vm2376_vm2, %v2682_v62, %v2690_v37  ;;  %v2958_v62 = vrot.slane %v2956_v27, 4  ;;  %v2381_v59 = vshll.u32 %v2364_v42, 16  ;;  %v10844_v6 = vpop.f32.mrf.mxu1  ;;  %v10896_v47 = vld [vmem:[#allocation2 + $0x64] sm:$0xf0]  }
 0x187   : > { %2734 = vrot.lane.b32.xlu2 %v2691_v19, %s10019_s29  ;;  %v10822_v20 = vld [vmem:[#allocation2 + $0x58] sm:$0xff]   ;;  %v10838_v27 = vrot.slane %v2364_v42, 5 }
 0x188   : > { %1328 = vst.msk [vmem:[#allocation2 + $0x64] sm:$0xf] %vm376_vm0, %v1304_v36  ;;  %v2692_v26 = vshrl.u32 %v10822_v20, 16  ;;  %v2695_v54 = vshll.u32 %v10822_v20, 16  ;;  %v2378_v36 = vshrl.u32 %v2364_v42, 16  ;;  %v10836_v17 = vor.u32 %v2958_v62, %v2955_v48 }
 0x189   : > { %v3883_v42 = vshrl.u32 %v10518_v53, 16  ;;  %v2383_v48 = vrot.slane %v2381_v59, 5 }
 0x18a   : > { %v2694_v41 = vrot.slane %v2692_v26, 4  ;;  %v2697_v49 = vrot.slane %v2695_v54, 5  ;;  %v2380_v14 = vrot.slane %v2378_v36, 4  ;;  %v3888_v36 = vrot.slane %v3886_v23, 5 }
 0x18b   : > { %1939 = vmatmul.bf16.gmra.mxu1 %v8758_v35  ;;  %v1257_v0 = vpop.permute.xlu1 %1256 }
 0x18c   : > { %v1282_v19 = vmul.f32 %v1257_v0, %v1114_v51  ;;  %3189 = vmatmul.bf16.gmra.mxu2 %v2900_v43  ;;  %v10834_v56 = vor.u32 %v2697_v49, %v2694_v41  ;;  %v13803_v51 = vrot.slane %v10793_v45, 5  ;;  %v8779_v41 = vld [vmem:[#allocation3 + $0x50] sm:$0xff]  ;;  %v2960_v49 = vsel %vm2826_vm4, %v10788_v32, %v10836_v17 }
 0x18d   : > { %v13804_v0 = vrot.slane %v10842_v29, 5  ;;  %3717 = vmatpush.bf16.msra.mxu1 %v8779_v41  ;;  %v10873_v59 = vor.u32 %v2383_v48, %v2380_v14  ;;  %v3896_v41 = vrot.slane %v3894_v8, 5  ;;  %v2386_v14 = vshrl.u32 %v10842_v29, 16 }
 0x18e   : > { %v1306_v35 = vpack.c.bf16 %v1282_v19, %v1282_v19  ;;  %v2699_v10 = vsel %vm2376_vm2, %v2690_v37, %v10834_v56  ;;  %v3891_v37 = vshrl.u32 %v10514_v52, 16  ;;  %v2763_v53 = vsel %vm2513_vm1, %v2760_v9, %v13803_v51  ;;  %v10876_v19 = vpop.f32.mrf.mxu3 }
 0x18f   : > { %2736 = vrot.lane.b32.xlu0 %v2699_v10, %s10019_s29  ;;  %v10850_v26 = vld [vmem:[#allocation2 + $0x60] sm:$0xff]   ;;  %v3885_v52 = vrot.slane %v3883_v42, 4  ;;  %13863 = vst [vmem:[#allocation27_spill] sm:$0xff] %v10876_v19  ;;  %v2970_v42 = vshrl.u32 %v2763_v53, 16  ;;  %v2973_v23 = vshll.u32 %v2763_v53, 16  ;;  %v2389_v48 = vshll.u32 %v10842_v29, 16 }
 0x190   : > { %v10852_v54 = vld [vmem:[#allocation2 + $0x64] sm:$0xf]  ;;  %1330 = vst.msk [vmem:[#allocation2 + $0x6c] sm:$0xf] %vm376_vm0, %v1306_v35  ;;  %v10858_v62 = vunpack.c.l.b16 %v10850_v26  ;;  %v2701_v58 = vshrl.u32 %v10850_v26, 16  ;;  %v2704_v9 = vshll.u32 %v10850_v26, 16  ;;  %v2516_v19 = vsel %vm2513_vm1, %v10838_v27, %v13804_v0 }
 0x191   : > { %v2059_v35 = vld [vmem:[%s13790_s1 + $0xc0] sm:$0xff]  ;;  %v3893_v10 = vrot.slane %v3891_v37, 4  ;;  %v2395_v43 = vshrl.u32 %v10644_v7, 16  ;;  %3718 = vmatpush.bf16.msra.mxu1 %v8778_v13  ;;  %v8759_v37 = vld [vmem:[%s10244_s26 + $0xc8] sm:$0xff]  ;;  %v10892_v8 = vor.u32 %v3888_v36, %v3885_v52  ;;  %v10901_v13 = vpop.f32.mrf.mxu1  ;;  %v2972_v0 = vrot.slane %v2970_v42, 3 }
 0x192   : > { %13862 = vst [vmem:[#allocation26_spill] sm:$0xff] %v10858_v62  ;;  %8224 = vmatmul.msk.bf16.gmra.mxu3 %vm2539_vm3, %v2960_v49  ;;  %v9288_v49 = vld [vmem:[%s10244_s26 + $0x88] sm:$0xff]   ;;  %v2703_v51 = vrot.slane %v2701_v58, 4  ;;  %v2706_v32 = vrot.slane %v2704_v9, 5  ;;  %v2404_v58 = vshrl.u32 %v10678_v11, 16  ;;  %v2407_v9 = vshll.u32 %v10678_v11, 16 }
 0x193   : > { %v10903_v3 = vor.u32 %v3896_v41, %v3893_v10  ;;  %1690 = vmatmul.bf16.gmra.mxu0 %v9288_v49  ;;  %v8777_v36 = vld [vmem:[#allocation3 + $0x40] sm:$0xff]  ;;  %v2975_v55 = vrot.slane %v2973_v23, 4  ;;  %v3328_v10 = vshrl.u32 %v2516_v19, 16  ;;  %v3331_v41 = vshll.u32 %v2516_v19, 16 }
 0x194   : > { %v2707_v39 = vor.u32 %v2706_v32, %v2703_v51  ;;  %v2388_v51 = vrot.slane %v2386_v14, 4  ;;  %v2391_v32 = vrot.slane %v2389_v48, 5  ;;  %v2397_v42 = vrot.slane %v2395_v43, 4  ;;  %v10925_v43 = vld [vmem:[#allocation2 + $0x44] sm:$0xff]  }
 0x195   : > { %3719 = vmatpush.bf16.msra.mxu1 %v8777_v36  ;;  %v2400_v23 = vrot.slane %v2398_v16, 5  ;;  %v2409_v1 = vrot.slane %v2407_v9, 5  ;;  %v3905_v16 = vrot.slane %v3903_v44, 5  ;;  %v13866_v19 = vshll.u32 %v10838_v27, 16 }
 0x196   : > { %v2708_v22 = vsel %vm2376_vm2, %v10834_v56, %v2707_v39  ;;  %v10919_v36 = vpop.f32.mrf.mxu3  ;;  %v2413_v48 = vshrl.u32 %v10719_v38, 16  ;;  %v3330_v44 = vrot.slane %v3328_v10, 3  ;;  %v4025_v9 = vrot.slane %v10912_v57, 5 }
 0x197   : > { %2085 = vperm.xlu0 %9842, %v2059_v35   ;;  %v10894_v53 = vld [vmem:[#allocation2 + $0x68] sm:$0xff]   ;;  %2738 = vrot.lane.b32.xlu1 %v2708_v22, %s10019_s29  ;;  %13864 = vst [vmem:[#allocation28_spill] sm:$0xff] %v10919_v36  ;;  %v3898_v22 = vsel %vm2376_vm2, %v10892_v8, %v10903_v3  ;;  %v10935_v14 = vrot.slane %v13866_v19, 4  ;;  %v3333_v19 = vrot.slane %v3331_v41, 4  ;;  %v4027_v10 = vrot.slane %v10925_v43, 5 }
 0x198   : > { %v2710_v35 = vshrl.u32 %v10894_v53, 16  ;;  %v2713_v52 = vshll.u32 %v10894_v53, 16  ;;  %v3927_v2 = vshrl.u32 %v10925_v43, 16 }
 0x199   : > { %v10949_v56 = vpop.f32.mrf.mxu1 }
 0x19a   : > { %v2712_v46 = vrot.slane %v2710_v35, 4  ;;  %v2715_v21 = vrot.slane %v2713_v52, 5  ;;  %v10916_v35 = vor.u32 %v2975_v55, %v2972_v0  ;;  %v2406_v52 = vrot.slane %v2404_v58, 4  ;;  %13868 = vst [vmem:[#allocation29_spill] sm:$0xff] %v10949_v56 }
 0x19b   : > { %1944 = vmatmul.bf16.gmra.mxu1 %v8759_v37  ;;  %v13806_v37 = vrot.slane %v10822_v20, 5  ;;  %v13865_v55 = vshrl.u32 %v10838_v27, 16  ;;  %v13805_v58 = vrot.slane %v10644_v7, 5  ;;  %v13867_v27 = vrot.slane %v10793_v45, 5 }
 0x19c   : > { %v2716_v49 = vor.u32 %v2715_v21, %v2712_v46  ;;  %v3902_v46 = vrot.slane %v3900_v34, 4  ;;  %v2392_v34 = vor.u32 %v2391_v32, %v2388_v51  ;;  %v10954_v32 = vor.u32 %v2409_v1, %v2406_v52 }
 0x19d   : > { %v10931_v0 = vrot.slane %v13865_v55, 3  ;;  %v2765_v55 = vsel %vm2513_vm1, %v13867_v27, %v13806_v37  ;;  %v2415_v45 = vrot.slane %v2413_v48, 4  ;;  %v13870_v52 = vrot.slane %v10600_v4, 5  ;;  %v9289_v27 = vld [vmem:[%s10244_s26 + $0x90] sm:$0xff]  }
 0x19e   : > { %v2717_v21 = vsel %vm2376_vm2, %v2707_v39, %v2716_v49  ;;  %v2416_v39 = vshll.u32 %v10719_v38, 16  ;;  %v10952_v51 = vor.u32 %v3905_v16, %v3902_v46  ;;  %v2990_v41 = vshll.u32 %v2765_v55, 16  ;;  %v10999_v36 = vpop.f32.mrf.mxu3 }
 0x19f   : > { %3991 = vrot.lane.b32.xlu0 %v3898_v22, %s10019_s29  ;;  %2740 = vrot.lane.b32.xlu2 %v2717_v21, %s10019_s29  ;;  %v2977_v22 = vsel %vm2826_vm4, %v10836_v17, %v10916_v35  ;;  %v2401_v21 = vor.u32 %v2400_v23, %v2397_v42  ;;  %v2987_v23 = vshrl.u32 %v2765_v55, 16  ;;  %v4026_v1 = vsel %vm2513_vm1, %v13870_v52, %v4025_v9  ;;  %v10985_v52 = vld [vmem:[#allocation2 + $0x4c] sm:$0xff]  }
 0x1a0   : > { %2742 = vrot.lane.b32.xlu1 %v2716_v49, %s10019_s29  ;;  %v2418_v42 = vrot.slane %v2416_v39, 5  ;;  %v2393_v49 = vsel %vm2376_vm2, %v10873_v59, %v2392_v34  ;;  %v10975_v48 = vor.u32 %v3333_v19, %v3330_v44  ;;  %v10977_v39 = vld [vmem:[#allocation2 + $0x34] sm:$0xff]   ;;  %v3907_v55 = vsel %vm2376_vm2, %v10903_v3, %v10952_v51  ;;  %13871 = vst [vmem:[#allocation30_spill] sm:$0xff] %v10999_v36 }
 0x1a1   : > { %v10973_v16 = vsel %vm2376_vm2, %v2392_v34, %v2401_v21  ;;  %v4028_v17 = vsel %vm2513_vm1, %v4025_v9, %v4027_v10  ;;  %v8760_v34 = vld [vmem:[%s10244_s26 + $0xd0] sm:$0xff]  ;;  %v3909_v44 = vshrl.u32 %v10600_v4, 16  ;;  %v2992_v9 = vrot.slane %v2990_v41, 4 }
 0x1a2   : > { %8225 = vmatmul.msk.bf16.gmra.mxu3 %vm2539_vm3, %v2977_v22  ;;  %v13869_v22 = vrot.slane %v10842_v29, 5  ;;  %v4182_v29 = vshrl.u32 %v4026_v1, 16  ;;  %v10995_v37 = vor.u32 %v2418_v42, %v2415_v45  ;;  %v2431_v19 = vshrl.u32 %v10977_v39, 16 }
 0x1a3   : > { %1695 = vmatmul.bf16.gmra.mxu0 %v9289_v27  ;;  %v3930_v45 = vshll.u32 %v10925_v43, 16  ;;  %v4199_v42 = vshrl.u32 %v4028_v17, 16  ;;  %v4202_v3 = vshll.u32 %v4028_v17, 16  ;;  %v4029_v50 = vrot.slane %v10985_v52, 5  ;;  %v11016_v17 = vld [vmem:[#allocation2 + $0x5c] sm:$0xff]  }
 0x1a4   : > { %v10965_v46 = vsel %vm2513_vm1, %v13869_v22, %v13805_v58  ;;  %v2411_v22 = vsel %vm2376_vm2, %v2401_v21, %v10954_v32  ;;  %v4185_v58 = vshll.u32 %v4026_v1, 16  ;;  %v10997_v21 = vld [vmem:[#allocation2 + $0x54] sm:$0xff]   ;;  %v2989_v1 = vrot.slane %v2987_v23, 3 }
 0x1a5   : > { %v4184_v31 = vrot.slane %v4182_v29, 3  ;;  %v2434_v23 = vshll.u32 %v10977_v39, 16  ;;  %v4031_v27 = vrot.slane %v10997_v21, 5  ;;  %v11012_v29 = vpop.f32.mrf.mxu1  ;;  %v3911_v43 = vrot.slane %v3909_v44, 4 }
 0x1a6   : > { %v4187_v33 = vrot.slane %v4185_v58, 4  ;;  %13872 = vst [vmem:[#allocation31_spill] sm:$0xff] %v11012_v29  ;;  %v11014_v58 = vor.u32 %v2992_v9, %v2989_v1  ;;  %v4201_v25 = vrot.slane %v4199_v42, 3  ;;  %v13807_v56 = vrot.slane %v10850_v26, 5 }
 0x1a7   : > { %3993 = vrot.lane.b32.xlu0 %v3907_v55, %s10019_s29  ;;  %3989 = vrot.lane.b32.xlu2 %v10892_v8, %s10019_s29  ;;  %v3912_v55 = vshll.u32 %v10600_v4, 16  ;;  %v3918_v8 = vshrl.u32 %v10912_v57, 16  ;;  %v3921_v4 = vshll.u32 %v10912_v57, 16  ;;  %v4030_v61 = vsel %vm2513_vm1, %v4027_v10, %v4029_v50 }
 0x1a8   : > { %2484 = vrot.lane.b32.xlu1 %v10873_v59, %s10019_s29  ;;  %v4188_v41 = vor.u32 %v4187_v33, %v4184_v31  ;;  %v4204_v59 = vrot.slane %v4202_v3, 4  ;;  %v3929_v31 = vrot.slane %v3927_v2, 4  ;;  %v3932_v33 = vrot.slane %v3930_v45, 5  ;;  %v11041_v45 = vpop.f32.mrf.mxu3 }
 0x1a9   : > { %v3914_v36 = vrot.slane %v3912_v55, 5  ;;  %v4032_v1 = vsel %vm2513_vm1, %v4029_v50, %v4031_v27  ;;  %v3923_v44 = vrot.slane %v3921_v4, 5  ;;  %v4216_v55 = vshrl.u32 %v4030_v61, 16  ;;  %13876 = vst [vmem:[#allocation34_spill] sm:$0xff] %v11041_v45 }
 0x1aa   : > { %v11021_v57 = vsel %vm2826_vm4, %v10620_v28, %v4188_v41  ;;  %v4205_v9 = vor.u32 %v4204_v59, %v4201_v25  ;;  %v2994_v28 = vsel %vm2826_vm4, %v10916_v35, %v11014_v58  ;;  %v4233_v42 = vshrl.u32 %v4032_v1, 16 }
 0x1ab   : > { %1949 = vmatmul.bf16.gmra.mxu1 %v8760_v34  ;;  %v3920_v34 = vrot.slane %v3918_v8, 4  ;;  %13873 = vst [vmem:[#allocation32_spill] sm:$0xff] %v11021_v57  ;;  %v4219_v8 = vshll.u32 %v4030_v61, 16  ;;  %v4236_v3 = vshll.u32 %v4032_v1, 16  ;;  %v4033_v2 = vrot.slane %v11016_v17, 5 }
 0x1ac   : > { %v13874_v50 = vrot.slane %v10822_v20, 5  ;;  %v11039_v25 = vsel %vm2826_vm4, %v4188_v41, %v4205_v9  ;;  %v4218_v61 = vrot.slane %v4216_v55, 3  ;;  %v11044_v35 = vor.u32 %v3932_v33, %v3929_v31 }
 0x1ad   : > { %13875 = vst [vmem:[#allocation33_spill] sm:$0xff] %v11039_v25  ;;  %v3915_v4 = vor.u32 %v3914_v36, %v3911_v43  ;;  %v4235_v59 = vrot.slane %v4233_v42, 3  ;;  %v4238_v1 = vrot.slane %v4236_v3, 4  ;;  %v4034_v41 = vsel %vm2513_vm1, %v4031_v27, %v4033_v2  ;;  %v11053_v33 = vpop.f32.mrf.mxu1  ;;  %v9290_v42 = vld [vmem:[%s10244_s26 + $0x98] sm:$0xff]  }
 0x1ae   : > { %v2767_v10 = vsel %vm2513_vm1, %v13874_v50, %v13807_v56  ;;  %v2433_v50 = vrot.slane %v2431_v19, 4  ;;  %v2436_v56 = vrot.slane %v2434_v23, 5  ;;  %v3924_v25 = vor.u32 %v3923_v44, %v3920_v34 }
 0x1af   : > { %2490 = vrot.lane.b32.xlu0 %v2411_v22, %s10019_s29  ;;  %2486 = vrot.lane.b32.xlu2 %v2393_v49, %s10019_s29  ;;  %v11036_v22 = vld [vmem:[#allocation2 + $0x64] sm:$0xff]   ;;  %v4221_v49 = vrot.slane %v4219_v8, 4  ;;  %v3004_v55 = vshrl.u32 %v2767_v10, 16  ;;  %v4239_v8 = vor.u32 %v4238_v1, %v4235_v59  ;;  %v4250_v45 = vshrl.u32 %v4034_v41, 16 }
 0x1b0   : > { %2488 = vrot.lane.b32.xlu1 %v10973_v16, %s10019_s29  ;;  %v3007_v29 = vshll.u32 %v2767_v10, 16  ;;  %v4253_v36 = vshll.u32 %v4034_v41, 16  ;;  %v13808_v43 = vrot.slane %v11036_v22, 5  ;;  %v3934_v16 = vsel %vm2376_vm2, %v3924_v25, %v11044_v35 }
 0x1b1   : > { %v4222_v57 = vor.u32 %v4221_v49, %v4218_v61  ;;  %v3916_v19 = vsel %vm2376_vm2, %v10952_v51, %v3915_v4  ;;  %v4252_v27 = vrot.slane %v4250_v45, 3  ;;  %v13877_v34 = vshrl.u32 %v10780_v18, 16 }
 0x1b2   : > { %8226 = vmatmul.msk.bf16.gmra.mxu3 %vm2539_vm3, %v2994_v28  ;;  %v4255_v3 = vrot.slane %v4253_v36, 4  ;;  %v4036_v51 = vsel %vm2513_vm1, %v4033_v2, %v13808_v43  ;;  %v11072_v10 = vor.u32 %v2436_v56, %v2433_v50  ;;  %v3006_v45 = vrot.slane %v3004_v55, 3 }
 0x1b3   : > { %v11050_v31 = vsel %vm2826_vm4, %v4205_v9, %v4222_v57  ;;  %v11060_v23 = vsel %vm2826_vm4, %v4222_v57, %v4239_v8  ;;  %v2424_v44 = vrot.slane %v13877_v34, 4  ;;  %v13878_v9 = vshll.u32 %v10780_v18, 16  ;;  %1700 = vmatmul.bf16.gmra.mxu0 %v9290_v42  ;;  %v11111_v42 = vld [vmem:[#allocation2 + $0x3c] sm:$0xff]  }
 0x1b4   : > { %v3936_v57 = vshrl.u32 %v10985_v52, 16  ;;  %v4267_v61 = vshrl.u32 %v4036_v51, 16  ;;  %v4270_v49 = vshll.u32 %v4036_v51, 16  ;;  %v3009_v59 = vrot.slane %v3007_v29, 4 }
 0x1b5   : > { %v2427_v28 = vrot.slane %v13878_v9, 5  ;;  %v3939_v1 = vshll.u32 %v10985_v52, 16  ;;  %v4256_v41 = vor.u32 %v4255_v3, %v4252_v27  ;;  %v13879_v36 = vor.u32 %v10935_v14, %v10931_v0  ;;  %v11087_v52 = vpop.f32.mrf.mxu3  ;;  %v11113_v3 = vpop.f32.mrf.mxu1 }
 0x1b6   : > { %v3925_v2 = vsel %vm2376_vm2, %v3915_v4, %v3924_v25  ;;  %v4269_v56 = vrot.slane %v4267_v61, 3  ;;  %v4272_v50 = vrot.slane %v4270_v49, 4  ;;  %13881 = vst [vmem:[#allocation36_spill] sm:$0xff] %v11087_v52  ;;  %v2420_v0 = vsel %vm2376_vm2, %v10954_v32, %v10995_v37  ;;  %v8773_v52 = vld [vmem:[#allocation3 + $0x20] sm:$0xff] }
 0x1b7   : > { %3999 = vrot.lane.b32.xlu0 %v3934_v16, %s10019_s29  ;;  %3995 = vrot.lane.b32.xlu2 %v3916_v19, %s10019_s29  ;;  %v3335_v16 = vsel %vm2826_vm4, %v13879_v36, %v10975_v48  ;;  %v2428_v19 = vor.u32 %v2427_v28, %v2424_v44  ;;  %v11085_v29 = vsel %vm2826_vm4, %v4239_v8, %v4256_v41  ;;  %v3345_v14 = vshrl.u32 %v10965_v46, 16  ;;  %v11100_v44 = vld [vmem:[#allocation2 + $0x44] sm:$0xff]  }
 0x1b8   : > { %3997 = vrot.lane.b32.xlu1 %v3925_v2, %s10019_s29  ;;  %13880 = vst [vmem:[#allocation35_spill] sm:$0xff] %v11085_v29  ;;  %v3348_v25 = vshll.u32 %v10965_v46, 16  ;;  %v11094_v4 = vor.u32 %v4272_v50, %v4269_v56  ;;  %v11098_v27 = vor.u32 %v3009_v59, %v3006_v45  ;;  %v3938_v34 = vrot.slane %v3936_v57, 4  ;;  %v2061_v2 = vld [vmem:[%s13790_s1 + $0xd0] sm:$0xff] }
 0x1b9   : > { %v2438_v55 = vsel %vm2376_vm2, %v2428_v19, %v11072_v10  ;;  %v3941_v8 = vrot.slane %v3939_v1, 5  ;;  %v3945_v9 = vshrl.u32 %v10997_v21, 16  ;;  %v3948_v28 = vshll.u32 %v10997_v21, 16 }
 0x1ba   : > { %v13809_v32 = vrot.slane %v10894_v53, 5  ;;  %v11107_v46 = vsel %vm2826_vm4, %v4256_v41, %v11094_v4  ;;  %v3347_v51 = vrot.slane %v3345_v14, 3  ;;  %v3350_v57 = vrot.slane %v3348_v25, 4 }
 0x1bb   : > { %8278 = vmatmul.msk.bf16.vlgmr.msra.gmra.mxu1 %vm2539_vm3, %v3335_v16  ;;  %13882 = vst [vmem:[#allocation37_spill] sm:$0xff] %v11107_v46  ;;  %v3011_v21 = vsel %vm2826_vm4, %v11014_v58, %v11098_v27  ;;  %v2429_v61 = vsel %vm2376_vm2, %v10995_v37, %v2428_v19  ;;  %v2449_v49 = vshrl.u32 %v11100_v44, 16  ;;  %v2452_v45 = vshll.u32 %v11100_v44, 16 }
 0x1bc   : > { %v3942_v59 = vor.u32 %v3941_v8, %v3938_v34  ;;  %v3947_v1 = vrot.slane %v3945_v9, 4  ;;  %v3950_v41 = vrot.slane %v3948_v28, 5  ;;  %v13883_v36 = vrot.slane %v10850_v26, 5  ;;  %v11144_v28 = vpop.f32.mrf.mxu0 }
 0x1bd   : > { %v2440_v58 = vshrl.u32 %v11111_v42, 16  ;;  %v2443_v37 = vshll.u32 %v11111_v42, 16  ;;  %v11134_v56 = vor.u32 %v3350_v57, %v3347_v51  ;;  %v2519_v50 = vrot.slane %v10678_v11, 5  ;;  %v11137_v25 = vpop.f32.mrf.mxu3  ;;  %v9291_v51 = vld [vmem:[%s10244_s26 + $0xa0] sm:$0xff]  }
 0x1be   : > { %v2769_v16 = vsel %vm2513_vm1, %v13883_v36, %v13809_v32  ;;  %v2451_v19 = vrot.slane %v2449_v49, 4  ;;  %13884 = vst [vmem:[#allocation38_spill] sm:$0xff] %v11137_v25  ;;  %v11141_v34 = vor.u32 %v3950_v41, %v3947_v1  ;;  %v11157_v41 = vpop.f32.mrf.mxu1  ;;  %v2063_v11 = vld [vmem:[%s13790_s1 + $0xe0] sm:$0xff] }
 0x1bf   : > { %2496 = vrot.lane.b32.xlu0 %v2438_v55, %s10019_s29  ;;  %2492 = vrot.lane.b32.xlu2 %v2420_v0, %s10019_s29  ;;  %v2454_v0 = vrot.slane %v2452_v45, 5  ;;  %v3021_v26 = vshrl.u32 %v2769_v16, 16  ;;  %v3024_v14 = vshll.u32 %v2769_v16, 16  ;;  %v3943_v55 = vsel %vm2376_vm2, %v11044_v35, %v3942_v59  ;;  %13886 = vst [vmem:[#allocation39_spill] sm:$0xff] %v11157_v41 }
 0x1c0   : > { %2494 = vrot.lane.b32.xlu1 %v2429_v61, %s10019_s29  ;;  %v2442_v8 = vrot.slane %v2440_v58, 4  ;;  %v2445_v9 = vrot.slane %v2443_v37, 5  ;;  %v3352_v57 = vsel %vm2826_vm4, %v10975_v48, %v11134_v56  ;;  %v13885_v45 = vrot.slane %v10644_v7, 5 }
 0x1c1   : > { %v11150_v61 = vor.u32 %v2454_v0, %v2451_v19  ;;  %v3023_v49 = vrot.slane %v3021_v26, 3  ;;  %v3026_v35 = vrot.slane %v3024_v14, 4  ;;  %v3952_v48 = vsel %vm2376_vm2, %v3942_v59, %v11141_v34  ;;  %v2060_v19 = vld [vmem:[%s13790_s1 + $0xc8] sm:$0xff] }
 0x1c2   : > { %8227 = vmatmul.msk.bf16.gmra.mxu3 %vm2539_vm3, %v3011_v21  ;;  %v2520_v1 = vsel %vm2513_vm1, %v13885_v45, %v2519_v50  ;;  %v3954_v16 = vshrl.u32 %v11016_v17, 16  ;;  %v3957_v58 = vshll.u32 %v11016_v17, 16  ;;  %v2446_v7 = vor.u32 %v2445_v9, %v2442_v8  ;;  %v11174_v17 = vld [vmem:[#allocation2 + $0x4c] sm:$0xff]  }
 0x1c3   : > { %1705 = vmatmul.bf16.gmra.mxu0 %v9291_v51  ;;  %v3362_v0 = vshrl.u32 %v2520_v1, 16  ;;  %v3365_v26 = vshll.u32 %v2520_v1, 16  ;;  %v11172_v51 = vor.u32 %v3026_v35, %v3023_v49  ;;  %v3963_v45 = vshrl.u32 %v11036_v22, 16 }
 0x1c4   : > { %v2456_v59 = vsel %vm2376_vm2, %v2446_v7, %v11150_v61  ;;  %v3966_v8 = vshll.u32 %v11036_v22, 16  ;;  %v11181_v1 = vpop.f32.mrf.mxu0  ;;  %v2447_v49 = vsel %vm2376_vm2, %v11072_v10, %v2446_v7 }
 0x1c5   : > { %v3364_v35 = vrot.slane %v3362_v0, 3  ;;  %v3965_v7 = vrot.slane %v3963_v45, 4 }
 0x1c6   : > { %v3968_v0 = vrot.slane %v3966_v8, 5 }
 0x1c7   : > { %2095 = vperm.xlu0 %9842, %v2061_v2   ;;  %4001 = vrot.lane.b32.xlu2 %v3943_v55, %s10019_s29 }
 0x1c8   : > { %4003 = vrot.lane.b32.xlu1 %v3952_v48, %s10019_s29  ;;  %v3367_v48 = vrot.slane %v3365_v26, 4  ;;  %v11213_v8 = vor.u32 %v3968_v0, %v3965_v7 }
 0x1c9   : > { %v2729_v21 = vpop.permute.xlu2 %2728 }
 0x1ca   : > { %v2784_v36 = vsel %vm2539_vm3, %v10977_v39, %v2729_v21  ;;  %v3956_v21 = vrot.slane %v3954_v16, 4  ;;  %v11204_v26 = vor.u32 %v3367_v48, %v3364_v35 }
 0x1cb   : > { %v2910_v37 = vshrl.u32 %v2784_v36, 16  ;;  %v2913_v2 = vshll.u32 %v2784_v36, 16  ;;  %8279 = vmatmul.msk.bf16.gmra.mxu1 %vm2539_vm3, %v3352_v57  ;;  %v3959_v57 = vrot.slane %v3957_v58, 5  ;;  %v11183_v36 = vpop.f32.mrf.mxu3 }
 0x1cc   : > { %v3369_v35 = vsel %vm2826_vm4, %v11134_v56, %v11204_v26 }
 0x1cd   : > { %v2912_v14 = vrot.slane %v2910_v37, 3  ;;  %v2915_v55 = vrot.slane %v2913_v2, 4  ;;  %v3028_v37 = vsel %vm2826_vm4, %v11098_v27, %v11172_v51  ;;  %v2458_v2 = vshrl.u32 %v11174_v17, 16  ;;  %v2062_v27 = vld [vmem:[%s13790_s1 + $0xd8] sm:$0xff] }
 0x1ce   : > { %v3960_v10 = vor.u32 %v3959_v57, %v3956_v21  ;;  %v11208_v21 = vld [vmem:[#allocation2 + $0x54] sm:$0xff]   ;;  %v9292_v57 = vld [vmem:[%s10244_s26 + $0xa8] sm:$0xff]  }
 0x1cf   : > { %v11178_v9 = vor.u32 %v2915_v55, %v2912_v14  ;;  %2500 = vrot.lane.b32.xlu0 %v2456_v59, %s10019_s29  ;;  %2090 = vperm.xlu2 %9844, %v2060_v19   ;;  %v2461_v19 = vshll.u32 %v11174_v17, 16  ;;  %v9012_v55 = vunpack.c.h.b16 %v10822_v20  ;;  %v13810_v59 = vrot.slane %v10719_v38, 5  ;;  %v11219_v20 = vpop.f32.mrf.mxu0 }
 0x1d0   : > { %2498 = vrot.lane.b32.xlu1 %v2447_v49, %s10019_s29  ;;  %v3961_v45 = vsel %vm2376_vm2, %v11141_v34, %v3960_v10  ;;  %v3970_v0 = vsel %vm2376_vm2, %v3960_v10, %v11213_v8 }
 0x1d1   : > { %v2731_v16 = vpop.permute.xlu2 %2730  ;;  %v2917_v58 = vsel %vm2826_vm4, %v10818_v15, %v11178_v9  ;;  %v11199_v15 = vpop.f32.mrf.mxu1  ;;  %v2463_v49 = vrot.slane %v2461_v19, 5  ;;  %v11216_v43 = vpack.c.b16 %v10858_v62, %v9012_v55  ;;  %v2522_v34 = vsel %vm2513_vm1, %v2519_v50, %v13810_v59 }
 0x1d2   : > { %v2786_v14 = vsel %vm2539_vm3, %v11111_v42, %v2731_v16  ;;  %3194 = vmatmul.bf16.gmra.mxu2 %v2917_v58  ;;  %8228 = vmatmul.msk.bf16.gmra.mxu3 %vm2539_vm3, %v3028_v37  ;;  %13887 = vst [vmem:[#allocation40_spill] sm:$0xff] %v11199_v15  ;;  %v2460_v37 = vrot.slane %v2458_v2, 4  ;;  %v2467_v19 = vshrl.u32 %v11208_v21, 16 }
 0x1d3   : > { %v2927_v16 = vshrl.u32 %v2786_v14, 16  ;;  %v2930_v58 = vshll.u32 %v2786_v14, 16  ;;  %1710 = vmatmul.bf16.gmra.mxu0 %v9292_v57  ;;  %v2470_v14 = vshll.u32 %v11208_v21, 16  ;;  %v11231_v7 = vpop.f32.mrf.mxu3  ;;  %v2476_v56 = vshrl.u32 %v11216_v43, 16 }
 0x1d4   : > { %13888 = vst [vmem:[#allocation41_spill] sm:$0xff] %v11231_v7  ;;  %v2479_v55 = vshll.u32 %v11216_v43, 16  ;;  %v3382_v57 = vshll.u32 %v2522_v34, 16  ;;  %v8771_v7 = vld [vmem:[#allocation3 + $0x10] sm:$0xff] }
 0x1d5   : > { %v2929_v48 = vrot.slane %v2927_v16, 3  ;;  %v2932_v2 = vrot.slane %v2930_v58, 4  ;;  %v2469_v16 = vrot.slane %v2467_v19, 4  ;;  %v3379_v58 = vshrl.u32 %v2522_v34, 16 }
 0x1d6   : > { %v2481_v32 = vrot.slane %v2479_v55, 5 }
 0x1d7   : > { %2100 = vperm.xlu0 %9842, %v2062_v27   ;;  %4005 = vrot.lane.b32.xlu2 %v3961_v45, %s10019_s29  ;;  %v2464_v27 = vor.u32 %v2463_v49, %v2460_v37  ;;  %v2933_v50 = vor.u32 %v2932_v2, %v2929_v48  ;;  %v2472_v37 = vrot.slane %v2470_v14, 5  ;;  %v2478_v49 = vrot.slane %v2476_v56, 4 }
 0x1d8   : > { %4007 = vrot.lane.b32.xlu1 %v3970_v0, %s10019_s29  ;;  %v3381_v2 = vrot.slane %v3379_v58, 3  ;;  %v3384_v14 = vrot.slane %v3382_v57, 4  ;;  %v8776_v57 = vld [vmem:[#allocation3 + $0x38] sm:$0xff] }
 0x1d9   : > { %v11242_v45 = vpop.f32.mrf.mxu1  ;;  %v2465_v10 = vsel %vm2376_vm2, %v11150_v61, %v2464_v27  ;;  %v2733_v59 = vpop.permute.xlu2 %2732  ;;  %v2934_v48 = vsel %vm2826_vm4, %v11178_v9, %v2933_v50  ;;  %v2473_v19 = vor.u32 %v2472_v37, %v2469_v16  ;;  %v11253_v61 = vor.u32 %v2481_v32, %v2478_v49  ;;  %v9293_v32 = vld [vmem:[%s10244_s26 + $0xb0] sm:$0xff]   ;;  %3643 = vmatpush.bf16.msra.mxu0 %v8776_v57 }
 0x1da   : > { %13889 = vst [vmem:[#allocation42_spill] sm:$0xff] %v11242_v45  ;;  %v2788_v34 = vsel %vm2539_vm3, %v11100_v44, %v2733_v59  ;;  %v3385_v9 = vor.u32 %v3384_v14, %v3381_v2  ;;  %v2523_v59 = vrot.slane %v10780_v18, 5 }
 0x1db   : > { %8280 = vmatmul.msk.bf16.gmra.mxu1 %vm2539_vm3, %v3369_v35  ;;  %v11247_v35 = vpop.f32.mrf.mxu0  ;;  %v11255_v0 = vpop.f32.mrf.mxu3  ;;  %v2944_v56 = vshrl.u32 %v2788_v34, 16  ;;  %v2947_v55 = vshll.u32 %v2788_v34, 16 }
 0x1dc   : > { %13890 = vst [vmem:[#allocation43_spill] sm:$0xff] %v11255_v0  ;;  %v9857_v0 = vld [vmem:[#allocation2 + $0x8] sm:$0xff]  }
 0x1dd   : > { %v2946_v37 = vrot.slane %v2944_v56, 3  ;;  %v2949_v49 = vrot.slane %v2947_v55, 4  ;;  %v8775_v56 = vld [vmem:[#allocation3 + $0x30] sm:$0xff] }
 0x1de   : > { %3644 = vmatpush.bf16.msra.mxu0 %v8775_v56 }
 0x1df   : > { %2105 = vperm.xlu0 %9842, %v2063_v11   ;;  %2502 = vrot.lane.b32.xlu2 %v2465_v10, %s10019_s29  ;;  %v2483_v11 = vsel %vm2376_vm2, %v2473_v19, %v11253_v61  ;;  %v2474_v10 = vsel %vm2376_vm2, %v2464_v27, %v2473_v19  ;;  %v13892_v27 = vrot.slane %v10719_v38, 5  ;;  %v2950_v18 = vor.u32 %v2949_v49, %v2946_v37  ;;  %v8774_v37 = vld [vmem:[#allocation3 + $0x28] sm:$0xff] }
 0x1e1   : > { %v11266_v58 = vpop.f32.mrf.mxu1  ;;  %v2524_v2 = vsel %vm2513_vm1, %v13892_v27, %v2523_v59  ;;  %v2951_v55 = vsel %vm2826_vm4, %v2933_v50, %v2950_v18  ;;  %v1667_v50 = vadd.f32 %v11144_v28, %v10409_v40  ;;  %v11302_v28 = vld [vmem:[%s13792_s3] ss:$0 sm:$0xff] }
 0x1e2   : > { %3199 = vmatmul.bf16.gmra.mxu2 %v2934_v48  ;;  %13891 = vst [vmem:[#allocation44_spill] sm:$0xff] %v11266_v58  ;;  %v3386_v48 = vsel %vm2826_vm4, %v11204_v26, %v3385_v9  ;;  %v3396_v19 = vshrl.u32 %v2524_v2, 16  ;;  %v3399_v14 = vshll.u32 %v2524_v2, 16  ;;  %3645 = vmatpush.bf16.msra.mxu0 %v8774_v37  ;;  %v2525_v2 = vrot.slane %v10977_v39, 5 }
 0x1e3   : > { %v11263_v16 = vpop.f32.mrf.mxu0  ;;  %1715 = vmatmul.bf16.gmra.mxu0 %v9293_v32  ;;  %v11274_v34 = vpop.f32.mrf.mxu3  ;;  %v1955_v40 = vadd.f32 %v10813_v5, %v1667_v50  ;;  %v11310_v5 = vld [vmem:[%s13793_s4] ss:$0 sm:$0xff] }
 0x1e4   : > { %13893 = vst [vmem:[#allocation45_spill] sm:$0xff] %v11274_v34  ;;  %v3398_v38 = vrot.slane %v3396_v19, 3  ;;  %v3401_v57 = vrot.slane %v3399_v14, 4  ;;  %v3781_v14 = vld [vmem:[#allocation2 + $0x18] sm:$0x8]  ;;  %v2526_v39 = vsel %vm2513_vm1, %v2523_v59, %v2525_v2  ;;  %v13897_v59 = vunpack.c.l.b16 %v10489_v24 }
 0x1e6   : > { %v3402_v27 = vor.u32 %v3401_v57, %v3398_v38  ;;  %3646 = vmatpush.bf16.msra.mxu0 %v8773_v52  ;;  %v9294_v38 = vld [vmem:[%s10244_s26 + $0xb8] sm:$0xff]   ;;  %v3416_v52 = vshll.u32 %v2526_v39, 16 }
 0x1e7   : > { %2506 = vrot.lane.b32.xlu0 %v2483_v11, %s10019_s29  ;;  %2504 = vrot.lane.b32.xlu2 %v2474_v10, %s10019_s29  ;;  %v2735_v11 = vpop.permute.xlu2 %2734  ;;  %v8772_v57 = vld [vmem:[#allocation3 + $0x18] sm:$0xff] }
 0x1e8   : > { %v2790_v32 = vsel %vm2539_vm3, %v11174_v17, %v2735_v11 }
 0x1e9   : > { %v11279_v26 = vpop.f32.mrf.mxu1  ;;  %v2961_v49 = vshrl.u32 %v2790_v32, 16 }
 0x1ea   : > { %13894 = vst [vmem:[#allocation46_spill] sm:$0xff] %v11279_v26  ;;  %3647 = vmatpush.bf16.msra.mxu0 %v8772_v57  ;;  %v3418_v57 = vrot.slane %v3416_v52, 4 }
 0x1eb   : > { %8281 = vmatmul.msk.bf16.gmra.mxu1 %vm2539_vm3, %v3386_v48  ;;  %v11276_v10 = vpop.f32.mrf.mxu0  ;;  %v2964_v48 = vshll.u32 %v2790_v32, 16  ;;  %v11284_v25 = vpop.f32.mrf.mxu3  ;;  %v2963_v11 = vrot.slane %v2961_v49, 3  ;;  %v3403_v32 = vsel %vm2826_vm4, %v3385_v9, %v3402_v27  ;;  %v3832_v49 = vunpack.c.l.b16 %v3781_v14 }
 0x1ec   : > { %13895 = vst [vmem:[#allocation47_spill] sm:$0xff] %v11284_v25  ;;  %v3413_v9 = vshrl.u32 %v2526_v39, 16 }
 0x1ed   : > { %v3857_v34 = vpack.c.b16 %v13897_v59, %v3832_v49  ;;  %v11323_v59 = vpop.f32.mrf.mxu2 }
 0x1ee   : > { %3648 = vmatpush.bf16.msra.mxu0 %v8771_v7 }
 0x1f1   : > { %v11296_v37 = vpop.f32.mrf.mxu1 }
 0x1f2   : > { %3204 = vmatmul.bf16.gmra.mxu2 %v2951_v55  ;;  %v2966_v55 = vrot.slane %v2964_v48, 4  ;;  %13896 = vst [vmem:[#allocation48_spill] sm:$0xff] %v11296_v37 }
 0x1f3   : > { %v11288_v56 = vpop.f32.mrf.mxu0  ;;  %1720 = vmatmul.bf16.gmra.mxu0 %v9294_v38  ;;  %v3415_v38 = vrot.slane %v3413_v9, 3  ;;  %v8804_v9 = vld [vmem:[#allocation3 + $0x118] sm:$0xff] }
 0x1f4   : > { %v2967_v48 = vor.u32 %v2966_v55, %v2963_v11  ;;  %v11315_v55 = vpop.f32.mrf.mxu3  ;;  %4519 = vmatpush.bf16.msra.mxu3 %v8804_v9 }
 0x1f5   : > { %13898 = vst [vmem:[#allocation49_spill] sm:$0xff] %v11315_v55  ;;  %v3419_v25 = vor.u32 %v3418_v57, %v3415_v38  ;;  %v8803_v38 = vld [vmem:[#allocation3 + $0x110] sm:$0xff] }
 0x1f6   : > { %v2968_v11 = vsel %vm2826_vm4, %v2950_v18, %v2967_v48  ;;  %v2527_v18 = vrot.slane %v11111_v42, 5  ;;  %v8800_v42 = vld [vmem:[#allocation3 + $0xf8] sm:$0xff] }
 0x1f7   : > { %4446 = vmatpush.bf16.msra.mxu2 %v8800_v42  ;;  %v2275_v42 = vld [vmem:[#allocation2] sm:$0x8] }
 0x1f8   : > { %4520 = vmatpush.bf16.msra.mxu3 %v8803_v38 }
 0x1f9   : > { %v11290_v19 = vpop.permute.xlu2 %2740  ;;  %v11326_v55 = vpop.f32.mrf.mxu1 }
 0x1fa   : > { %13899 = vst [vmem:[#allocation50_spill] sm:$0xff] %v11326_v55 }
 0x1fb   : > { %8282 = vmatmul.msk.bf16.gmra.mxu1 %vm2539_vm3, %v3403_v32  ;;  %v1983_v32 = vmul.f32 %v11302_v28, %v1955_v40  ;;  %v11312_v50 = vpop.f32.mrf.mxu0  ;;  %v8770_v40 = vld [vmem:[#allocation3 + $0x8] sm:$0xff] }
 0x1fc   : > { %3649 = vmatpush.bf16.msra.mxu0 %v8770_v40  ;;  %v11333_v57 = vpop.f32.mrf.mxu3 }
 0x1fd   : > { %v2011_v49 = vadd.f32 %v11310_v5, %v1983_v32  ;;  %v2528_v32 = vsel %vm2513_vm1, %v2525_v2, %v2527_v18  ;;  %13901 = vst [vmem:[#allocation52_spill] sm:$0xff] %v11333_v57  ;;  %v11338_v2 = vpop.f32.mrf.mxu2 }
 0x1fe   : > { %v3433_v55 = vshll.u32 %v2528_v32, 16  ;;  %13902 = vst [vmem:[#allocation53_spill] sm:$0xff] %v11338_v2 }
 0x200   : > { %v3435_v9 = vrot.slane %v3433_v55, 4  ;;  %v8801_v55 = vld [vmem:[#allocation3 + $0x100] sm:$0xff] }
 0x201   : > { %v2737_v37 = vpop.permute.xlu0 %2736  ;;  %v3990_v14 = vpop.permute.xlu2 %3989 }
 0x202   : > { %v2792_v39 = vsel %vm2539_vm3, %v11208_v21, %v2737_v37  ;;  %v11320_v24 = vsel %vm2539_vm3, %v3857_v34, %v3990_v14  ;;  %3209 = vmatmul.bf16.gmra.mxu2 %v2968_v11  ;;  %v2035_v37 = vmax.f32 %v2011_v49, 0.0  ;;  %v8769_v14 = vld [vmem:[#allocation3] sm:$0xff]  ;;  %v3430_v49 = vshrl.u32 %v2528_v32, 16 }
 0x203   : > { %v2978_v26 = vshrl.u32 %v2792_v39, 16  ;;  %v2981_v62 = vshll.u32 %v2792_v39, 16  ;;  %v11328_v34 = vpop.f32.mrf.mxu0  ;;  %v3420_v39 = vsel %vm2826_vm4, %v3402_v27, %v3419_v25  ;;  %3650 = vmatpush.bf16.msra.mxu0 %v8769_v14  ;;  %v8802_v27 = vld [vmem:[#allocation3 + $0x108] sm:$0xff]  ;;  %v9016_v32 = vunpack.c.h.b16 %v10894_v53 }
 0x204   : > { %13900 = vst [vmem:[#allocation51_spill] sm:$0xff] %v11328_v34  ;;  %v3432_v14 = vrot.slane %v3430_v49, 3  ;;  %4521 = vmatpush.bf16.msra.mxu3 %v8802_v27  ;;  %v1669_v27 = vadd.f32 %v11181_v1, %v10423_v60 }
 0x205   : > { %v2980_v52 = vrot.slane %v2978_v26, 3  ;;  %v2983_v7 = vrot.slane %v2981_v62, 4 }
 0x207   : > { %v11335_v26 = vor.u32 %v2983_v7, %v2980_v52 }
 0x208   : > { %4522 = vmatpush.bf16.msra.mxu3 %v8801_v55 }
 0x209   : > { %v2086_v11 = vpop.permute.xlu0 %2085  ;;  %v2487_v58 = vpop.permute.xlu2 %2486  ;;  %v2985_v52 = vsel %vm2826_vm4, %v2967_v48, %v11335_v26 }
 0x20a   : > { %v2203_v45 = vmul.f32 %v2086_v11, %v2035_v37  ;;  %v2739_v62 = vpop.permute.xlu1 %2738  ;;  %v11340_v37 = vpop.f32.mrf.mxu1  ;;  %v2545_v38 = vsel %vm2539_vm3, %v9857_v0, %v2487_v58 }
 0x20b   : > { %8283 = vmatmul.msk.bf16.gmra.mxu1 %vm2539_vm3, %v3420_v39  ;;  %13903 = vst [vmem:[#allocation54_spill] sm:$0xff] %v11340_v37  ;;  %v11342_v11 = vpop.f32.mrf.mxu0  ;;  %v2794_v7 = vsel %vm2539_vm3, %v11216_v43, %v2739_v62  ;;  %v11358_v48 = vpop.f32.mrf.mxu3  ;;  %v2326_v62 = vunpack.c.l.b16 %v2275_v42 }
 0x20c   : > { %v2227_v40 = vpack.c.bf16 %v2203_v45, %v2203_v45  ;;  %13904 = vst [vmem:[#allocation55_spill] sm:$0xff] %v11342_v11  ;;  %v2995_v49 = vshrl.u32 %v2794_v7, 16  ;;  %v2998_v37 = vshll.u32 %v2794_v7, 16  ;;  %v2618_v11 = vpack.c.b16 %v9016_v32, %v9016_v32 }
 0x20d   : > { %13905 = vst [vmem:[#allocation56_spill] sm:$0xff] %v11358_v48  ;;  %v13907_v48 = vor.u32 %v10896_v47, %v10852_v54  ;;  %v11382_v47 = vpop.f32.mrf.mxu2  ;;  %v3311_v54 = vshrl.u32 %v2545_v38, 16 }
 0x20e   : > { %2251 = vst.msk [vmem:[#allocation2 + $0x70] sm:$0xf] %vm376_vm0, %v2227_v40  ;;  %v11354_v40 = vor.u32 %v3435_v9, %v3432_v14  ;;  %v13906_v9 = vrot.slane %v11100_v44, 5  ;;  %v2997_v0 = vrot.slane %v2995_v49, 3  ;;  %v3000_v58 = vrot.slane %v2998_v37, 4  ;;  %v8799_v49 = vld [vmem:[#allocation3 + $0xf0] sm:$0xff] }
 0x20f   : > { %v2797_v32 = vsel %vm2539_vm3, %v13907_v48, %v11290_v19  ;;  %13909 = vst [vmem:[#allocation58_spill] sm:$0xff] %v11382_v47  ;;  %v13910_v19 = vunpack.c.l.b16 %v10795_v63  ;;  %v3314_v37 = vshll.u32 %v2545_v38, 16  ;;  %v13912_v47 = vrot.slane %v10894_v53, 5  ;;  %4447 = vmatpush.bf16.msra.mxu2 %v8799_v49 }
 0x210   : > { %v2530_v7 = vsel %vm2513_vm1, %v2527_v18, %v13906_v9 }
 0x211   : > { %v11344_v39 = vpop.permute.xlu0 %3991  ;;  %v11346_v45 = vpop.permute.xlu2 %3995  ;;  %v3316_v53 = vrot.slane %v3314_v37, 4 }
 0x212   : > { %3214 = vmatmul.bf16.gmra.mxu2 %v2985_v52  ;;  %v2743_v2 = vpop.permute.xlu1 %2742 }
 0x213   : > { %v11375_v42 = vpop.f32.mrf.mxu0  ;;  %v2800_v55 = vsel %vm2539_vm3, %v2618_v11, %v2743_v2  ;;  %v3447_v2 = vshrl.u32 %v2530_v7, 16  ;;  %v3450_v11 = vshll.u32 %v2530_v7, 16  ;;  %v11397_v38 = vpop.f32.mrf.mxu3 }
 0x214   : > { %13908 = vst [vmem:[#allocation57_spill] sm:$0xff] %v11375_v42  ;;  %v11387_v42 = vpop.f32.mrf.mxu1  ;;  %v3029_v41 = vshrl.u32 %v2800_v55, 16 }
 0x215   : > { %v11356_v57 = vld [vmem:[#allocation2 + $0x6c] sm:$0xff]   ;;  %13911 = vst [vmem:[#allocation59_spill] sm:$0xff] %v11387_v42 }
 0x216   : > { %v2607_v46 = vld [vmem:[#allocation2 + $0x70] sm:$0x1]  ;;  %v3972_v14 = vshrl.u32 %v11356_v57, 16  ;;  %v3975_v60 = vshll.u32 %v11356_v57, 16  ;;  %13913 = vst [vmem:[#allocation60_spill] sm:$0xff] %v11397_v38 }
 0x217   : > { %v2745_v52 = vunpack.c.l.b16 %v2607_v46  ;;  %v3437_v46 = vsel %vm2826_vm4, %v3419_v25, %v11354_v40  ;;  %v2351_v25 = vpack.c.b16 %v13910_v19, %v2326_v62  ;;  %v3012_v62 = vshrl.u32 %v2797_v32, 16 }
 0x218   : > { %v3974_v9 = vrot.slane %v3972_v14, 4  ;;  %v3977_v48 = vrot.slane %v3975_v60, 5  ;;  %v3032_v14 = vshll.u32 %v2800_v55, 16  ;;  %v3015_v60 = vshll.u32 %v2797_v32, 16 }
 0x219   : > { %v2746_v1 = vpack.c.b16 %v2745_v52, %v2745_v52  ;;  %v11378_v15 = vpop.permute.xlu0 %3993  ;;  %v11380_v18 = vpop.permute.xlu2 %2492  ;;  %v1956_v52 = vadd.f32 %v10844_v6, %v1669_v27 }
 0x21a   : > { %v11390_v29 = vor.u32 %v3977_v48, %v3974_v9  ;;  %v2485_v6 = vpop.permute.xlu1 %2484 }
 0x21b   : > { %v2770_v34 = vrot.slane %v2746_v1, 5  ;;  %8284 = vmatmul.msk.bf16.gmra.mxu1 %vm2539_vm3, %v3437_v46  ;;  %v11395_v1 = vor.u32 %v3000_v58, %v2997_v0  ;;  %v3313_v46 = vrot.slane %v3311_v54, 3  ;;  %v2542_v7 = vsel %vm2539_vm3, %v2351_v25, %v2485_v6  ;;  %v8798_v0 = vld [vmem:[#allocation3 + $0xe8] sm:$0xff]  ;;  %v11405_v54 = vpop.f32.mrf.mxu0 }
 0x21c   : > { %v3979_v55 = vsel %vm2376_vm2, %v11213_v8, %v11390_v29  ;;  %v3304_v19 = vshrl.u32 %v2542_v7, 16  ;;  %v3031_v58 = vrot.slane %v3029_v41, 3  ;;  %v1984_v49 = vmul.f32 %v11302_v28, %v1956_v52  ;;  %4448 = vmatpush.bf16.msra.mxu2 %v8798_v0 }
 0x21d   : > { %v2771_v63 = vsel %vm2513_vm1, %v13912_v47, %v2770_v34  ;;  %v3307_v34 = vshll.u32 %v2542_v7, 16  ;;  %4009 = vrot.lane.b32.xlu1 %v3979_v55, %s10019_s29  ;;  %v3034_v47 = vrot.slane %v3032_v14, 4  ;;  %v3002_v37 = vsel %vm2826_vm4, %v11335_v26, %v11395_v1  ;;  %v2064_v26 = vld [vmem:[%s13790_s1 + $0xe8] sm:$0xff] }
 0x21e   : > { %v3038_v27 = vshrl.u32 %v2771_v63, 16  ;;  %v3041_v9 = vshll.u32 %v2771_v63, 16  ;;  %v3306_v25 = vrot.slane %v3304_v19, 3  ;;  %v3449_v63 = vrot.slane %v3447_v2, 3  ;;  %v11416_v19 = vpop.f32.mrf.mxu2 }
 0x21f   : > { %v3309_v6 = vrot.slane %v3307_v34, 4  ;;  %v3017_v41 = vrot.slane %v3015_v60, 4  ;;  %v3452_v7 = vrot.slane %v3450_v11, 4  ;;  %v11414_v52 = vor.u32 %v3316_v53, %v3313_v46  ;;  %13914 = vst [vmem:[#allocation61_spill] sm:$0xff] %v11416_v19 }
 0x220   : > { %v3040_v32 = vrot.slane %v3038_v27, 3  ;;  %v3043_v48 = vrot.slane %v3041_v9, 4  ;;  %v3014_v27 = vrot.slane %v3012_v62, 3  ;;  %v8797_v9 = vld [vmem:[#allocation3 + $0xe0] sm:$0xff]  ;;  %v3035_v34 = vor.u32 %v3034_v47, %v3031_v58  ;;  %v11424_v62 = vpop.f32.mrf.mxu1  ;;  %v11435_v47 = vpop.f32.mrf.mxu3 }
 0x221   : > { %v11407_v42 = vpop.permute.xlu0 %2490  ;;  %v11409_v8 = vpop.permute.xlu2 %4001  ;;  %v3310_v55 = vor.u32 %v3309_v6, %v3306_v25  ;;  %v2012_v2 = vadd.f32 %v11310_v5, %v1984_v49  ;;  %13915 = vst [vmem:[#allocation62_spill] sm:$0xff] %v11424_v62  ;;  %v2531_v46 = vrot.slane %v11174_v17, 5  ;;  %4449 = vmatpush.bf16.msra.mxu2 %v8797_v9  ;;  %v11431_v0 = vor.u32 %v3452_v7, %v3449_v63  ;;  %v8796_v49 = vld [vmem:[#allocation3 + $0xd8] sm:$0xff]  ;;  %v8795_v7 = vld [vmem:[#allocation3 + $0xd0] sm:$0xff] }
 0x222   : > { %3219 = vmatmul.bf16.gmra.mxu2 %v3002_v37  ;;  %v3044_v14 = vor.u32 %v3043_v48, %v3040_v32  ;;  %v2489_v11 = vpop.permute.xlu1 %2488  ;;  %v3018_v53 = vor.u32 %v3017_v41, %v3014_v27  ;;  %v9858_v32 = vld [vmem:[#allocation2 + $0x10] sm:$0xff]   ;;  %v1672_v58 = vadd.f32 %v11219_v20, %v10450_v30  ;;  %13916 = vst [vmem:[#allocation63_spill] sm:$0xff] %v11435_v47  ;;  %v13917_v27 = vrot.slane %v11100_v44, 5 }
 0x223   : > { %v3318_v60 = vsel %vm2826_vm4, %v3310_v55, %v11414_v52  ;;  %v13812_v41 = vrot.slane %v11208_v21, 5  ;;  %v3454_v30 = vsel %vm2826_vm4, %v11354_v40, %v11431_v0  ;;  %v11450_v20 = vpop.f32.mrf.mxu0  ;;  %v2065_v44 = vld [vmem:[%s13790_s1 + $0xf0] sm:$0xff]  ;;  %v11458_v40 = vld [vmem:[#allocation2 + $0x64] sm:$0xf]  ;;  %v4110_v47 = vshll.u32 %v11320_v24, 16 }
 0x224   : > { %v3045_v38 = vsel %vm2826_vm4, %v11172_v51, %v3044_v14  ;;  %v2548_v51 = vsel %vm2539_vm3, %v9858_v32, %v2489_v11  ;;  %3651 = vmatmul.bf16.vlgmr.msra.gmra.mxu0 %v3318_v60  ;;  %v11438_v48 = vsel %vm2826_vm4, %v3018_v53, %v3035_v34  ;;  %v2532_v63 = vsel %vm2513_vm1, %v13917_v27, %v2531_v46 }
 0x225   : > { %8229 = vmatmul.msk.bf16.gmra.mxu3 %vm2539_vm3, %v3045_v38  ;;  %2110 = vperm.xlu1 %9843, %v2064_v26   ;;  %v2036_v38 = vmax.f32 %v2012_v2, 0.0  ;;  %v3336_v17 = vshrl.u32 %v2548_v51, 16  ;;  %v3339_v25 = vshll.u32 %v2548_v51, 16  ;;  %v1957_v55 = vadd.f32 %v10901_v13, %v1672_v58  ;;  %v11456_v26 = vld [vmem:[#allocation2 + $0x68] sm:$0xff]  }
 0x226   : > { %4450 = vmatpush.bf16.msra.mxu2 %v8796_v49  ;;  %v3464_v34 = vshrl.u32 %v2532_v63, 16  ;;  %v3467_v60 = vshll.u32 %v2532_v63, 16  ;;  %v2534_v32 = vsel %vm2513_vm1, %v2531_v46, %v13812_v41  ;;  %v11463_v51 = vpop.f32.mrf.mxu2  ;;  %v9353_v13 = vld [vmem:[#allocation2 + $0x28] sm:$0xff]   ;;  %v13813_v27 = vunpack.c.l.b16 %v11458_v40 }
 0x227   : > { %v3338_v2 = vrot.slane %v3336_v17, 3  ;;  %v3341_v11 = vrot.slane %v3339_v25, 4  ;;  %v4051_v49 = vsel %vm2539_vm3, %v9353_v13, %v11378_v15  ;;  %v9123_v17 = vunpack.c.l.b16 %v11456_v26  ;;  %v8794_v25 = vld [vmem:[#allocation3 + $0xc8] sm:$0xff] }
 0x228   : > { %v11466_v58 = vpop.f32.mrf.mxu1  ;;  %v3481_v63 = vshrl.u32 %v2534_v32, 16  ;;  %v3466_v15 = vrot.slane %v3464_v34, 3  ;;  %v4139_v13 = vshrl.u32 %v4051_v49, 16  ;;  %v4142_v41 = vshll.u32 %v4051_v49, 16 }
 0x229   : > { %v11440_v6 = vpop.permute.xlu0 %3999  ;;  %v2091_v37 = vpop.permute.xlu2 %2090  ;;  %13918 = vst [vmem:[#allocation64_spill] sm:$0xff] %v11466_v58 }
 0x22a   : > { %v2204_v14 = vmul.f32 %v2091_v37, %v2036_v38  ;;  %4451 = vmatpush.bf16.msra.mxu2 %v8795_v7  ;;  %v9354_v38 = vld [vmem:[#allocation2 + $0x30] sm:$0xff]   ;;  %v1985_v37 = vmul.f32 %v11302_v28, %v1957_v55  ;;  %v3019_v7 = vsel %vm2826_vm4, %v11395_v1, %v3018_v53  ;;  %v13814_v55 = vrot.slane %v11356_v57, 5 }
 0x22b   : > { %8285 = vmatmul.msk.bf16.gmra.mxu1 %vm2539_vm3, %v3454_v30  ;;  %v4054_v46 = vsel %vm2539_vm3, %v9354_v38, %v11346_v45  ;;  %v11486_v38 = vpack.c.b16 %v9123_v17, %v13813_v27  ;;  %v13920_v1 = vrot.slane %v11036_v22, 5  ;;  %v11505_v17 = vpop.f32.mrf.mxu0  ;;  %v4144_v22 = vrot.slane %v4142_v41, 4 }
 0x22c   : > { %v2228_v9 = vpack.c.bf16 %v2204_v14, %v2204_v14  ;;  %v11475_v14 = vor.u32 %v3341_v11, %v3338_v2  ;;  %v4156_v45 = vshrl.u32 %v4054_v46, 16  ;;  %v8793_v2 = vld [vmem:[#allocation3 + $0xc0] sm:$0xff]  ;;  %v4159_v11 = vshll.u32 %v4054_v46, 16  ;;  %13921 = vst [vmem:[#allocation66_spill] sm:$0xff] %v11505_v17 }
 0x22d   : > { %2115 = vperm.xlu1 %9843, %v2065_v44   ;;  %v11481_v44 = vpop.f32.mrf.mxu3  ;;  %v2013_v58 = vadd.f32 %v11310_v5, %v1985_v37  ;;  %v11494_v53 = vsel %vm2513_vm1, %v13920_v1, %v13814_v55  ;;  %v3484_v37 = vshll.u32 %v2534_v32, 16  ;;  %v4141_v46 = vrot.slane %v4139_v13, 3 }
 0x22e   : > { %2252 = vst.msk [vmem:[#allocation2 + $0x74] sm:$0xf] %vm376_vm0, %v2228_v9  ;;  %v3469_v9 = vrot.slane %v3467_v60, 4  ;;  %4452 = vmatpush.bf16.msra.mxu2 %v8794_v25  ;;  %v3343_v34 = vsel %vm2826_vm4, %v11414_v52, %v11475_v14  ;;  %v3483_v25 = vrot.slane %v3481_v63, 3  ;;  %v4158_v55 = vrot.slane %v4156_v45, 3  ;;  %v11515_v32 = vpop.f32.mrf.mxu2  ;;  %v9859_v63 = vld [vmem:[#allocation2 + $0x18] sm:$0xff]  }
 0x22f   : > { %13919 = vst [vmem:[#allocation65_spill] sm:$0xff] %v11481_v44  ;;  %v9124_v52 = vunpack.c.h.b16 %v11456_v26  ;;  %v4161_v41 = vrot.slane %v4159_v11, 4  ;;  %v2037_v13 = vmax.f32 %v2013_v58, 0.0  ;;  %v5098_v62 = vshll.u32 %v11486_v38, 16  ;;  %v13925_v58 = vld [vmem:[#allocation29_spill] sm:$0xff] }
 0x230   : > { %v11501_v60 = vor.u32 %v3469_v9, %v3466_v15  ;;  %v5095_v15 = vshrl.u32 %v11486_v38, 16  ;;  %v2551_v9 = vsel %vm2539_vm3, %v9859_v63, %v11407_v42  ;;  %v3486_v17 = vrot.slane %v3484_v37, 4 }
 0x231   : > { %v11477_v30 = vpop.permute.xlu0 %2496  ;;  %v11523_v44 = vor.u32 %v4144_v22, %v4141_v46  ;;  %v11536_v37 = vor.u32 %v4161_v41, %v4158_v55  ;;  %v9356_v46 = vld [vmem:[#allocation2 + $0x40] sm:$0xff]  }
 0x232   : > { %3224 = vmatmul.bf16.gmra.mxu2 %v3019_v7  ;;  %v3471_v11 = vsel %vm2826_vm4, %v11431_v0, %v11501_v60 }
 0x233   : > { %4453 = vmatpush.bf16.msra.mxu2 %v8793_v2 }
 0x234   : > { %3656 = vmatmul.bf16.gmra.mxu0 %v3343_v34 }
 0x235   : > { %8338 = vmatmul.msk.bf16.vlgmr.msra.gmra.mxu3 %vm2539_vm3, %v10576_v12  ;;  %v11503_v49 = vld [vmem:[#allocation2 + $0x70] sm:$0xff]   ;;  %v13922_v12 = vld [vmem:[#allocation9_spill] sm:$0xff]  ;;  %2508 = vrot.lane.b32.xlu1 %v11253_v61, %s10019_s29 }
 0x236   : > { %v5336_v7 = vshrl.u32 %v11503_v49, 16  ;;  %v5339_v1 = vshll.u32 %v11503_v49, 16  ;;  %v1674_v27 = vadd.f32 %v11247_v35, %v13922_v12  ;;  %13923 = vst [vmem:[#allocation9_spill] sm:$0xff] %v11515_v32  ;;  %v13815_v34 = vunpack.c.l.b16 %v11503_v49  ;;  %v11520_v35 = vpop.f32.mrf.mxu1  ;;  %v11576_v19 = vpop.f32.mrf.mxu2 }
 0x237   : > { %13924 = vst [vmem:[#allocation67_spill] sm:$0xff] %v11520_v35  ;;  %v3353_v35 = vshrl.u32 %v2551_v9, 16  ;;  %v3356_v32 = vshll.u32 %v2551_v9, 16 }
 0x238   : > { %v5338_v12 = vrot.slane %v5336_v7, 4  ;;  %v5341_v61 = vrot.slane %v5339_v1, 5  ;;  %v11530_v42 = vpack.c.b16 %v13815_v34, %v9124_v52  ;;  %v1958_v63 = vadd.f32 %v13925_v58, %v1674_v27  ;;  %v11534_v1 = vpop.f32.mrf.mxu3  ;;  %v9357_v34 = vld [vmem:[#allocation2 + $0x48] sm:$0xff]  }
 0x239   : > { %v2096_v45 = vpop.permute.xlu0 %2095  ;;  %v5097_v7 = vrot.slane %v5095_v15, 4  ;;  %13926 = vst [vmem:[#allocation29_spill] sm:$0xff] %v11534_v1  ;;  %v4060_v27 = vsel %vm2539_vm3, %v9356_v46, %v11440_v6  ;;  %v5100_v15 = vrot.slane %v5098_v62, 5  ;;  %v4063_v55 = vsel %vm2539_vm3, %v9357_v34, %v11409_v8  ;;  %v11558_v62 = vpop.f32.mrf.mxu0 }
 0x23a   : > { %v2205_v2 = vmul.f32 %v2096_v45, %v2037_v13  ;;  %v5103_v13 = vshrl.u32 %v11530_v42, 16  ;;  %v5106_v0 = vshll.u32 %v11530_v42, 16  ;;  %v13927_v45 = vld [vmem:[#allocation10_spill] sm:$0xff]  ;;  %v11544_v9 = vor.u32 %v5341_v61, %v5338_v12 }
 0x23b   : > { %8286 = vmatmul.msk.bf16.gmra.mxu1 %vm2539_vm3, %v3471_v11  ;;  %v1677_v52 = vadd.f32 %v11263_v16, %v13927_v45  ;;  %v11552_v11 = vsel %vm2826_vm4, %v11523_v44, %v11536_v37  ;;  %v9860_v16 = vld [vmem:[#allocation2 + $0x20] sm:$0xff]   ;;  %v3355_v6 = vrot.slane %v3353_v35, 3  ;;  %v3358_v12 = vrot.slane %v3356_v32, 4  ;;  %13928 = vst [vmem:[#allocation10_spill] sm:$0xff] %v11558_v62  ;;  %v13929_v35 = vld [vmem:[#allocation31_spill] sm:$0xff] }
 0x23c   : > { %v2229_v22 = vpack.c.bf16 %v2205_v2, %v2205_v2  ;;  %v5105_v41 = vrot.slane %v5103_v13, 4  ;;  %v5108_v2 = vrot.slane %v5106_v0, 5  ;;  %v4048_v58 = vsel %vm2539_vm3, %v9860_v16, %v11344_v39 }
 0x23d   : > { %5433 = vrot.lane.b32.xlu1 %v11544_v9, %s10019_s29  ;;  %v4190_v8 = vshrl.u32 %v4060_v27, 16  ;;  %v4193_v34 = vshll.u32 %v4060_v27, 16  ;;  %v1986_v61 = vmul.f32 %v11302_v28, %v1958_v63  ;;  %v4284_v46 = vshrl.u32 %v11494_v53, 16 }
 0x23e   : > { %2253 = vst.msk [vmem:[#allocation2 + $0x78] sm:$0xf] %vm376_vm0, %v2229_v22  ;;  %v4207_v22 = vshrl.u32 %v4063_v55, 16  ;;  %v11564_v0 = vor.u32 %v3486_v17, %v3483_v25  ;;  %v4287_v32 = vshll.u32 %v11494_v53, 16  ;;  %v1959_v45 = vadd.f32 %v13929_v35, %v1677_v52  ;;  %v11578_v17 = vpop.f32.mrf.mxu1 }
 0x23f   : > { %v4210_v1 = vshll.u32 %v4063_v55, 16  ;;  %v11570_v62 = vor.u32 %v5100_v15, %v5097_v7  ;;  %v11572_v27 = vor.u32 %v5108_v2, %v5105_v41  ;;  %v4107_v63 = vshrl.u32 %v11320_v24, 16  ;;  %13930 = vst [vmem:[#allocation31_spill] sm:$0xff] %v11578_v17  ;;  %v13931_v41 = vld [vmem:[#allocation15_spill] sm:$0xff] }
 0x240   : > { %v4114_v25 = vshrl.u32 %v4048_v58, 16  ;;  %v11580_v39 = vor.u32 %v3358_v12, %v3355_v6  ;;  %v4192_v53 = vrot.slane %v4190_v8, 3  ;;  %v4195_v52 = vrot.slane %v4193_v34, 4  ;;  %v11588_v17 = vpop.f32.mrf.mxu3 }
 0x241   : > { %v11562_v13 = vpop.permute.xlu0 %2500  ;;  %v2014_v55 = vadd.f32 %v11310_v5, %v1986_v61  ;;  %v4117_v7 = vshll.u32 %v4048_v58, 16  ;;  %v4209_v15 = vrot.slane %v4207_v22, 3  ;;  %v4289_v35 = vrot.slane %v4287_v32, 4  ;;  %13932 = vst [vmem:[#allocation15_spill] sm:$0xff] %v11588_v17  ;;  %v11617_v17 = vpop.f32.mrf.mxu0 }
 0x242   : > { %3229 = vmatmul.bf16.gmra.mxu2 %v11438_v48  ;;  %v4286_v48 = vrot.slane %v4284_v46, 3  ;;  %v3360_v24 = vsel %vm2826_vm4, %v11475_v14, %v11580_v39  ;;  %v4212_v6 = vrot.slane %v4210_v1, 4  ;;  %v5110_v12 = vsel %vm2376_vm2, %v11570_v62, %v11572_v27  ;;  %13935 = vst [vmem:[#allocation68_spill] sm:$0xff] %v11617_v17 }
 0x243   : > { %v9060_v58 = vunpack.c.h.b16 %v11503_v49  ;;  %v1987_v34 = vmul.f32 %v11302_v28, %v1959_v45  ;;  %v2554_v61 = vsel %vm2539_vm3, %v9860_v16, %v11380_v18  ;;  %v3488_v14 = vsel %vm2826_vm4, %v11501_v60, %v11564_v0 }
 0x244   : > { %3661 = vmatmul.bf16.gmra.mxu0 %v3360_v24  ;;  %v13933_v1 = vrot.slane %v11216_v43, 5  ;;  %v13934_v46 = vrot.slane %v11208_v21, 5  ;;  %v11608_v32 = vor.u32 %v4195_v52, %v4192_v53  ;;  %v2038_v28 = vmax.f32 %v2014_v55, 0.0 }
 0x245   : > { %8339 = vmatmul.msk.bf16.gmra.mxu3 %vm2539_vm3, %v13931_v41  ;;  %v3805_v2 = vld [vmem:[#allocation2 + $0x78] sm:$0xf]  ;;  %5203 = vrot.lane.b32.xlu1 %v5110_v12, %s10019_s29  ;;  %v11610_v41 = vpop.permute.xlu1 %3997  ;;  %v11615_v18 = vor.u32 %v4289_v35, %v4286_v48  ;;  %v4109_v16 = vrot.slane %v4107_v63, 3  ;;  %v4112_v24 = vrot.slane %v4110_v47, 4  ;;  %v4119_v60 = vrot.slane %v4117_v7, 4 }
 0x246   : > { %v11594_v8 = vunpack.c.l.b16 %v3805_v2  ;;  %v2536_v22 = vsel %vm2513_vm1, %v13934_v46, %v13933_v1  ;;  %v4116_v2 = vrot.slane %v4114_v25, 3  ;;  %v11619_v21 = vor.u32 %v4212_v6, %v4209_v15  ;;  %v2300_v63 = vld [vmem:[#allocation2 + $0x64] sm:$0x1] }
 0x247   : > { %v3370_v55 = vshrl.u32 %v2554_v61, 16  ;;  %v3373_v46 = vshll.u32 %v2554_v61, 16  ;;  %v2015_v48 = vadd.f32 %v11310_v5, %v1987_v34  ;;  %v11628_v47 = vsel %vm2826_vm4, %v11094_v4, %v11615_v18  ;;  %v11639_v61 = vpop.f32.mrf.mxu1 }
 0x248   : > { %v11613_v45 = vpack.c.b16 %v11594_v8, %v9060_v58  ;;  %v11633_v35 = vsel %vm2826_vm4, %v11608_v32, %v11619_v21  ;;  %v11635_v6 = vor.u32 %v4119_v60, %v4116_v2  ;;  %v11637_v58 = vpop.f32.mrf.mxu2  ;;  %13937 = vst [vmem:[#allocation70_spill] sm:$0xff] %v11639_v61  ;;  %v3498_v34 = vshrl.u32 %v2536_v22, 16 }
 0x249   : > { %v2101_v12 = vpop.permute.xlu0 %2100  ;;  %13936 = vst [vmem:[#allocation69_spill] sm:$0xff] %v11637_v58  ;;  %v3501_v4 = vshll.u32 %v2536_v22, 16 }
 0x24a   : > { %v2206_v1 = vmul.f32 %v2101_v12, %v2038_v28  ;;  %v3981_v53 = vshrl.u32 %v11613_v45, 16  ;;  %v3984_v52 = vshll.u32 %v11613_v45, 16  ;;  %v4113_v28 = vor.u32 %v4112_v24, %v4109_v16 }
 0x24b   : > { %8287 = vmatmul.msk.bf16.gmra.mxu1 %vm2539_vm3, %v3488_v14  ;;  %v2511_v14 = vunpack.c.l.b16 %v2300_v63  ;;  %v3372_v12 = vrot.slane %v3370_v55, 3  ;;  %v3500_v22 = vrot.slane %v3498_v34, 3  ;;  %v3503_v16 = vrot.slane %v3501_v4, 4  ;;  %v11650_v63 = vpop.f32.mrf.mxu0  ;;  %v9861_v34 = vld [vmem:[#allocation2 + $0x28] sm:$0xff]  }
 0x24c   : > { %v2230_v25 = vpack.c.bf16 %v2206_v1, %v2206_v1  ;;  %v3983_v7 = vrot.slane %v3981_v53, 4  ;;  %v3986_v15 = vrot.slane %v3984_v52, 5  ;;  %v3375_v1 = vrot.slane %v3373_v46, 4  ;;  %v11642_v53 = vpop.f32.mrf.mxu3  ;;  %13939 = vst [vmem:[#allocation72_spill] sm:$0xff] %v11650_v63 }
 0x24d   : > { %13938 = vst [vmem:[#allocation71_spill] sm:$0xff] %v11642_v53  ;;  %v2039_v52 = vmax.f32 %v2015_v48, 0.0  ;;  %v2512_v24 = vpack.c.b16 %v2511_v14, %v2511_v14  ;;  %v2495_v46 = vpop.permute.xlu1 %2494  ;;  %v13940_v48 = vld [vmem:[#allocation17_spill] sm:$0xff]  ;;  %v2066_v14 = vld [vmem:[%s13790_s1 + $0xf8] sm:$0xff] }
 0x24e   : > { %2254 = vst.msk [vmem:[#allocation2 + $0x7c] sm:$0xf] %vm376_vm0, %v2230_v25  ;;  %v3987_v5 = vor.u32 %v3986_v15, %v3983_v7  ;;  %v4121_v25 = vsel %vm2826_vm4, %v4113_v28, %v11635_v6  ;;  %v3376_v55 = vor.u32 %v3375_v1, %v3372_v12  ;;  %v2068_v28 = vld [vmem:[%s13790_s1 + $0x108] sm:$0xff]  ;;  %v2557_v4 = vsel %vm2539_vm3, %v9861_v34, %v2495_v46 }
 0x24f   : > { %v11666_v12 = vor.u32 %v3503_v16, %v3500_v22  ;;  %v2537_v1 = vrot.slane %v2512_v24, 5  ;;  %v5231_v46 = vrot.slane %v11530_v42, 5  ;;  %v13943_v22 = vrot.slane %v11216_v43, 5 }
 0x250   : > { %4013 = vrot.lane.b32.xlu0 %v3987_v5, %s10019_s29  ;;  %v3988_v2 = vsel %vm2376_vm2, %v11390_v29, %v3987_v5  ;;  %v3377_v5 = vsel %vm2826_vm4, %v11580_v39, %v3376_v55  ;;  %v3387_v39 = vshrl.u32 %v2557_v4, 16 }
 0x251   : > { %v2106_v60 = vpop.permute.xlu0 %2105  ;;  %4011 = vrot.lane.b32.xlu2 %v3988_v2, %s10019_s29  ;;  %v3390_v2 = vshll.u32 %v2557_v4, 16  ;;  %v2538_v16 = vsel %vm2513_vm1, %v13943_v22, %v2537_v1 }
 0x252   : > { %v2207_v7 = vmul.f32 %v2106_v60, %v2039_v52  ;;  %4454 = vmatmul.bf16.vlgmr.msra.gmra.mxu2 %v4121_v25  ;;  %v11668_v52 = vpop.f32.mrf.mxu1  ;;  %v3518_v42 = vshll.u32 %v2538_v16, 16 }
 0x253   : > { %13941 = vst [vmem:[#allocation17_spill] sm:$0xff] %v11668_v52  ;;  %v11683_v4 = vpop.f32.mrf.mxu0 }
 0x254   : > { %v2231_v15 = vpack.c.bf16 %v2207_v7, %v2207_v7  ;;  %3666 = vmatmul.bf16.gmra.mxu0 %v3377_v5  ;;  %v11670_v25 = vpop.f32.mrf.mxu3  ;;  %v5230_v7 = vrot.slane %v11486_v38, 5  ;;  %v3389_v5 = vrot.slane %v3387_v39, 3  ;;  %13944 = vst [vmem:[#allocation74_spill] sm:$0xff] %v11683_v4  ;;  %v3515_v38 = vshrl.u32 %v2538_v16, 16 }
 0x255   : > { %8340 = vmatmul.msk.bf16.gmra.mxu3 %vm2539_vm3, %v13940_v48  ;;  %v11654_v29 = vpop.f32.mrf.mxu2  ;;  %v9426_v60 = vld [vmem:[#allocation2 + $0x78] sm:$0xff]   ;;  %13942 = vst [vmem:[#allocation73_spill] sm:$0xff] %v11670_v25  ;;  %v4146_v16 = vsel %vm2826_vm4, %v11635_v6, %v11523_v44  ;;  %v3520_v61 = vrot.slane %v3518_v42, 4 }
 0x256   : > { %2255 = vst.msk [vmem:[#allocation2 + $0x80] sm:$0xf] %vm376_vm0, %v2231_v15  ;;  %v3505_v15 = vsel %vm2826_vm4, %v11564_v0, %v11666_v12  ;;  %v5343_v24 = vshrl.u32 %v9426_v60, 16  ;;  %v5346_v48 = vshll.u32 %v9426_v60, 16  ;;  %v2067_v0 = vld [vmem:[%s13790_s1 + $0x100] sm:$0xff]  ;;  %v5232_v43 = vsel %vm2513_vm1, %v5230_v7, %v5231_v46  ;;  %v2070_v6 = vld [vmem:[%s13790_s1 + $0x118] sm:$0xff] }
 0x257   : > { %v6036_v1 = vshll.u32 %v5230_v7, 16  ;;  %v6041_v22 = vshrl.u32 %v5232_v43, 16  ;;  %v3517_v52 = vrot.slane %v3515_v38, 3  ;;  %v6044_v17 = vshll.u32 %v5232_v43, 16  ;;  %v9862_v38 = vld [vmem:[#allocation2 + $0x30] sm:$0xff]  }
 0x258   : > { %2130 = vperm.xlu0 %9842, %v2068_v28   ;;  %v3392_v28 = vrot.slane %v3390_v2, 4  ;;  %v5345_v39 = vrot.slane %v5343_v24, 4  ;;  %v5348_v2 = vrot.slane %v5346_v48, 5  ;;  %v13947_v48 = vld [vmem:[#allocation32_spill] sm:$0xff]  ;;  %v2560_v42 = vsel %vm2539_vm3, %v9862_v38, %v11477_v30 }
 0x259   : > { %2120 = vperm.xlu2 %9844, %v2066_v14   ;;  %v6033_v14 = vshrl.u32 %v5230_v7, 16  ;;  %v6038_v7 = vrot.slane %v6036_v1, 4  ;;  %v6043_v63 = vrot.slane %v6041_v22, 3  ;;  %v6046_v24 = vrot.slane %v6044_v17, 4 }
 0x25a   : > { %v11691_v60 = vpop.f32.mrf.mxu1  ;;  %v3521_v17 = vor.u32 %v3520_v61, %v3517_v52  ;;  %v3407_v61 = vshll.u32 %v2560_v42, 16 }
 0x25b   : > { %8288 = vmatmul.msk.bf16.gmra.mxu1 %vm2539_vm3, %v3505_v15  ;;  %13945 = vst [vmem:[#allocation75_spill] sm:$0xff] %v11691_v60  ;;  %v11693_v15 = vor.u32 %v3392_v28, %v3389_v5  ;;  %v6035_v4 = vrot.slane %v6033_v14, 3  ;;  %v11711_v28 = vld [vmem:[#allocation2 + $0x74] sm:$0xff]   ;;  %v6047_v43 = vor.u32 %v6046_v24, %v6043_v63  ;;  %v11715_v14 = vpop.f32.mrf.mxu0  ;;  %v4039_v63 = vrot.slane %v11613_v45, 5 }
 0x25c   : > { %v11698_v25 = vpop.f32.mrf.mxu3  ;;  %13948 = vst [vmem:[#allocation32_spill] sm:$0xff] %v11711_v28  ;;  %v13816_v30 = vrot.slane %v11711_v28, 5  ;;  %v3522_v52 = vsel %vm2826_vm4, %v11666_v12, %v3521_v17  ;;  %v5112_v24 = vshrl.u32 %v11711_v28, 16  ;;  %v2071_v12 = vld [vmem:[%s13790_s1 + $0x120] sm:$0xff]  ;;  %v3409_v17 = vrot.slane %v3407_v61, 4 }
 0x25d   : > { %v11681_v34 = vpop.f32.mrf.mxu2  ;;  %13946 = vst [vmem:[#allocation76_spill] sm:$0xff] %v11698_v25  ;;  %v3394_v44 = vsel %vm2826_vm4, %v3376_v55, %v11693_v15  ;;  %v9706_v1 = vld [vmem:[#allocation2 + $0x7c] sm:$0xff]  }
 0x25e   : > { %13949 = vst [vmem:[#allocation77_spill] sm:$0xff] %v11715_v14  ;;  %v5114_v61 = vrot.slane %v5112_v24, 4 }
 0x260   : > { %5201 = vrot.lane.b32.xlu0 %v11570_v62, %s10019_s29  ;;  %v11700_v62 = vor.u32 %v5348_v2, %v5345_v39  ;;  %v3404_v39 = vshrl.u32 %v2560_v42, 16  ;;  %v11723_v2 = vpop.permute.xlu1 %4003 }
 0x261   : > { %2125 = vperm.xlu2 %9844, %v2067_v0   ;;  %v6039_v0 = vor.u32 %v6038_v7, %v6035_v4  ;;  %v5234_v7 = vsel %vm2513_vm1, %v5231_v46, %v13816_v30  ;;  %v2069_v46 = vld [vmem:[%s13790_s1 + $0x110] sm:$0xff] }
 0x262   : > { %4459 = vmatmul.bf16.gmra.mxu2 %v4146_v16  ;;  %v5350_v55 = vsel %vm2376_vm2, %v11544_v9, %v11700_v62  ;;  %v11730_v4 = vpop.f32.mrf.mxu1  ;;  %v5121_v9 = vshrl.u32 %v9706_v1, 16  ;;  %v5124_v16 = vshll.u32 %v9706_v1, 16  ;;  %v3406_v38 = vrot.slane %v3404_v39, 3 }
 0x263   : > { %v11721_v22 = vsel %vm2826_vm4, %v6039_v0, %v6047_v43  ;;  %13951 = vst [vmem:[#allocation79_spill] sm:$0xff] %v11730_v4  ;;  %v13954_v1 = vrot.slane %v11356_v57, 5  ;;  %v11755_v25 = vpop.f32.mrf.mxu0 }
 0x264   : > { %3671 = vmatmul.bf16.gmra.mxu0 %v3394_v44  ;;  %13950 = vst [vmem:[#allocation78_spill] sm:$0xff] %v11721_v22  ;;  %v6058_v44 = vshrl.u32 %v5234_v7, 16  ;;  %v11743_v0 = vpop.f32.mrf.mxu3  ;;  %v5126_v30 = vrot.slane %v5124_v16, 5  ;;  %v3410_v16 = vor.u32 %v3409_v17, %v3406_v38 }
 0x265   : > { %8341 = vmatmul.msk.bf16.gmra.mxu3 %vm2539_vm3, %v13947_v48  ;;  %v11704_v5 = vpop.f32.mrf.mxu2  ;;  %v5115_v48 = vshll.u32 %v11711_v28, 16  ;;  %13953 = vst [vmem:[#allocation81_spill] sm:$0xff] %v11743_v0  ;;  %v9355_v0 = vld [vmem:[#allocation2 + $0x38] sm:$0xff]  }
 0x266   : > { %v6060_v39 = vrot.slane %v6058_v44, 3  ;;  %13956 = vst [vmem:[#allocation83_spill] sm:$0xff] %v11755_v25  ;;  %v4057_v57 = vsel %vm2539_vm3, %v9355_v0, %v11610_v41 }
 0x267   : > { %v5117_v60 = vrot.slane %v5115_v48, 5 }
 0x268   : > { %2140 = vperm.xlu0 %9842, %v2070_v6   ;;  %v6061_v6 = vshll.u32 %v5234_v7, 16  ;;  %v5123_v7 = vrot.slane %v5121_v9, 4  ;;  %v2499_v24 = vpop.permute.xlu1 %2498 }
 0x269   : > { %5435 = vrot.lane.b32.xlu2 %v5350_v55, %s10019_s29  ;;  %v4040_v55 = vsel %vm2513_vm1, %v13954_v1, %v4039_v63  ;;  %v13958_v1 = vld [vmem:[#allocation33_spill] sm:$0xff] }
 0x26a   : > { %v4301_v4 = vshrl.u32 %v4040_v55, 16  ;;  %v4304_v22 = vshll.u32 %v4040_v55, 16  ;;  %v11764_v48 = vor.u32 %v5126_v30, %v5123_v7 }
 0x26b   : > { %8289 = vmatmul.msk.bf16.gmra.mxu1 %vm2539_vm3, %v3522_v52  ;;  %v6063_v52 = vrot.slane %v6061_v6, 4  ;;  %v5118_v6 = vor.u32 %v5117_v60, %v5114_v61 }
 0x26c   : > { %v4303_v53 = vrot.slane %v4301_v4, 3  ;;  %v4306_v58 = vrot.slane %v4304_v22, 4  ;;  %v11779_v60 = vpop.f32.mrf.mxu3 }
 0x26d   : > { %v11738_v42 = vpop.f32.mrf.mxu2  ;;  %v11753_v14 = vor.u32 %v6063_v52, %v6060_v39  ;;  %13960 = vst [vmem:[#allocation85_spill] sm:$0xff] %v11779_v60  ;;  %v5119_v4 = vsel %vm2376_vm2, %v11572_v27, %v5118_v6  ;;  %v11785_v39 = vpop.f32.mrf.mxu0  ;;  %v13988_v60 = vld [vmem:[#allocation55_spill] sm:$0xff] }
 0x26e   : > { %13952 = vst [vmem:[#allocation80_spill] sm:$0xff] %v11738_v42  ;;  %v4307_v44 = vor.u32 %v4306_v58, %v4303_v53  ;;  %v5128_v58 = vsel %vm2376_vm2, %v5118_v6, %v11764_v48  ;;  %v3806_v53 = vld [vmem:[#allocation2 + $0x7c] sm:$0x1] }
 0x26f   : > { %13955 = vst [vmem:[#allocation82_spill] sm:$0xff] %v11753_v14  ;;  %v11762_v9 = vsel %vm2826_vm4, %v6047_v43, %v11753_v14  ;;  %v9863_v43 = vld [vmem:[#allocation2 + $0x38] sm:$0xff]  }
 0x270   : > { %2145 = vperm.xlu0 %9842, %v2071_v12   ;;  %13957 = vst [vmem:[#allocation84_spill] sm:$0xff] %v11762_v9  ;;  %v4173_v12 = vshrl.u32 %v4057_v57, 16  ;;  %v11774_v41 = vsel %vm2826_vm4, %v11615_v18, %v4307_v44  ;;  %v2563_v30 = vsel %vm2539_vm3, %v9863_v43, %v2499_v24 }
 0x271   : > { %2135 = vperm.xlu2 %9844, %v2069_v46   ;;  %v4176_v46 = vshll.u32 %v4057_v57, 16  ;;  %v3421_v18 = vshrl.u32 %v2563_v30, 16  ;;  %v3424_v0 = vshll.u32 %v2563_v30, 16  ;;  %13961 = vst [vmem:[#allocation86_spill] sm:$0xff] %v11785_v39  ;;  %v9360_v39 = vld [vmem:[#allocation2 + $0x60] sm:$0xff]  }
 0x272   : > { %4464 = vmatmul.bf16.gmra.mxu2 %v11552_v11  ;;  %v3411_v11 = vsel %vm2826_vm4, %v11693_v15, %v3410_v16  ;;  %v4016_v15 = vunpack.c.l.b16 %v3806_v53  ;;  %v4175_v38 = vrot.slane %v4173_v12, 3 }
 0x273   : > { %v4178_v17 = vrot.slane %v4176_v46, 4  ;;  %v3423_v61 = vrot.slane %v3421_v18, 3  ;;  %v3426_v57 = vrot.slane %v3424_v0, 4  ;;  %v11810_v18 = vpop.permute.xlu1 %4007 }
 0x274   : > { %3676 = vmatmul.bf16.gmra.mxu0 %v3411_v11  ;;  %v4017_v55 = vpack.c.b16 %v4016_v15, %v4016_v15  ;;  %v11794_v30 = vpop.f32.mrf.mxu3 }
 0x275   : > { %8342 = vmatmul.msk.bf16.gmra.mxu3 %vm2539_vm3, %v13958_v1  ;;  %v11768_v22 = vpop.f32.mrf.mxu2  ;;  %v4179_v7 = vor.u32 %v4178_v17, %v4175_v38  ;;  %v3427_v46 = vor.u32 %v3426_v57, %v3423_v61  ;;  %13963 = vst [vmem:[#allocation88_spill] sm:$0xff] %v11794_v30  ;;  %v9864_v38 = vld [vmem:[#allocation2 + $0x40] sm:$0xff]   ;;  %v9869_v30 = vld [vmem:[#allocation2 + $0x58] sm:$0xff]  }
 0x276   : > { %13959 = vst [vmem:[#allocation33_spill] sm:$0xff] %v11768_v22  ;;  %v4041_v52 = vrot.slane %v4017_v55, 5  ;;  %v2566_v17 = vsel %vm2539_vm3, %v9864_v38, %v11562_v13  ;;  %v11826_v13 = vld [vmem:[%s13792_s3] ss:$0 sm:$0xff] }
 0x277   : > { %v4180_v1 = vsel %vm2826_vm4, %v11536_v37, %v4179_v7  ;;  %v3428_v45 = vsel %vm2826_vm4, %v3410_v16, %v3427_v46  ;;  %v13966_v37 = vld [vmem:[#allocation11_spill] sm:$0xff]  ;;  %v3438_v0 = vshrl.u32 %v2566_v17, 16  ;;  %v3441_v55 = vshll.u32 %v2566_v17, 16 }
 0x278   : > { %5207 = vrot.lane.b32.xlu0 %v5128_v58, %s10019_s29  ;;  %v4042_v27 = vsel %vm2513_vm1, %v4039_v63, %v4041_v52  ;;  %v11801_v63 = vpop.f32.mrf.mxu0  ;;  %v1679_v15 = vadd.f32 %v11276_v10, %v13966_v37  ;;  %v13970_v10 = vld [vmem:[#allocation12_spill] sm:$0xff]  ;;  %v11839_v37 = vld [vmem:[%s13793_s4] ss:$0 sm:$0xff] }
 0x279   : > { %5205 = vrot.lane.b32.xlu2 %v5119_v4, %s10019_s29  ;;  %v4318_v6 = vshrl.u32 %v4042_v27, 16  ;;  %v4321_v12 = vshll.u32 %v4042_v27, 16  ;;  %13965 = vst [vmem:[#allocation90_spill] sm:$0xff] %v11801_v63  ;;  %v3440_v61 = vrot.slane %v3438_v0, 3  ;;  %v3443_v57 = vrot.slane %v3441_v55, 4  ;;  %v9867_v0 = vld [vmem:[#allocation2 + $0x48] sm:$0xff]  }
 0x27a   : > { %v1960_v16 = vadd.f32 %v11053_v33, %v1679_v15  ;;  %v4197_v33 = vsel %vm2826_vm4, %v4179_v7, %v11608_v32 }
 0x27b   : > { %v4320_v11 = vrot.slane %v4318_v6, 3  ;;  %v4323_v43 = vrot.slane %v4321_v12, 4  ;;  %v1682_v6 = vadd.f32 %v11288_v56, %v13970_v10  ;;  %v11834_v56 = vpop.f32.mrf.mxu1 }
 0x27c   : > { %v11815_v52 = vpop.f32.mrf.mxu3  ;;  %v1988_v12 = vmul.f32 %v11826_v13, %v1960_v16 }
 0x27d   : > { %v11787_v24 = vpop.f32.mrf.mxu2  ;;  %v4324_v58 = vor.u32 %v4323_v43, %v4320_v11  ;;  %13967 = vst [vmem:[#allocation11_spill] sm:$0xff] %v11815_v52  ;;  %v8844_v11 = vld [vmem:[#allocation3 + $0x98] sm:$0xff]  ;;  %v3444_v43 = vor.u32 %v3443_v57, %v3440_v61  ;;  %v8842_v61 = vld [vmem:[#allocation3 + $0x88] sm:$0xff] }
 0x27e   : > { %13962 = vst [vmem:[#allocation87_spill] sm:$0xff] %v11787_v24  ;;  %5879 = vmatpush.bf16.msrb.mxu1 %v8844_v11  ;;  %v2016_v15 = vadd.f32 %v11839_v37, %v1988_v12  ;;  %v8831_v24 = vld [vmem:[#allocation3 + $0x30] sm:$0xff] }
 0x27f   : > { %v11804_v4 = vsel %vm2826_vm4, %v4307_v44, %v4324_v58  ;;  %v8843_v58 = vld [vmem:[#allocation3 + $0x90] sm:$0xff]  ;;  %v3445_v7 = vsel %vm2826_vm4, %v3427_v46, %v3444_v43 }
 0x280   : > { %v11819_v27 = vpop.f32.mrf.mxu0  ;;  %v2040_v16 = vmax.f32 %v2016_v15, 0.0 }
 0x281   : > { %13969 = vst [vmem:[#allocation92_spill] sm:$0xff] %v11819_v27 }
 0x282   : > { %4469 = vmatmul.bf16.gmra.mxu2 %v4180_v1  ;;  %5880 = vmatpush.bf16.msrb.mxu1 %v8843_v58 }
 0x283   : > { %v11856_v58 = vpop.f32.mrf.mxu1 }
 0x284   : > { %3681 = vmatmul.bf16.gmra.mxu0 %v3428_v45  ;;  %v1961_v45 = vadd.f32 %v11113_v3, %v1682_v6  ;;  %v11847_v17 = vpop.f32.mrf.mxu3 }
 0x285   : > { %8343 = vmatmul.msk.bf16.gmra.mxu3 %vm2539_vm3, %v11050_v31  ;;  %v11798_v53 = vpop.f32.mrf.mxu2  ;;  %v11812_v31 = vpop.permute.xlu2 %4005  ;;  %13972 = vst [vmem:[#allocation93_spill] sm:$0xff] %v11847_v17 }
 0x286   : > { %13964 = vst [vmem:[#allocation89_spill] sm:$0xff] %v11798_v53  ;;  %v1989_v3 = vmul.f32 %v11826_v13, %v1961_v45  ;;  %5881 = vmatpush.bf16.msrb.mxu1 %v8842_v61  ;;  %v3245_v61 = vadd.f32 %v11183_v36, %v11323_v59  ;;  %v13976_v59 = vld [vmem:[#allocation35_spill] sm:$0xff] }
 0x288   : > { %v11851_v10 = vpop.f32.mrf.mxu0  ;;  %v2017_v11 = vadd.f32 %v11839_v37, %v1989_v3 }
 0x289   : > { %13973 = vst [vmem:[#allocation94_spill] sm:$0xff] %v11851_v10 }
 0x28d   : > { %v11817_v44 = vpop.f32.mrf.mxu2  ;;  %v2503_v38 = vpop.permute.xlu2 %2502 }
 0x28e   : > { %13968 = vst [vmem:[#allocation91_spill] sm:$0xff] %v11817_v44  ;;  %v2569_v55 = vsel %vm2539_vm3, %v9867_v0, %v2503_v38  ;;  %v11859_v38 = vpop.f32.mrf.mxu3  ;;  %v2041_v0 = vmax.f32 %v2017_v11, 0.0 }
 0x28f   : > { %v11829_v1 = vpop.permute.xlu1 %4009  ;;  %v3458_v12 = vshll.u32 %v2569_v55, 16 }
 0x291   : > { %v3460_v15 = vrot.slane %v3458_v12, 4 }
 0x292   : > { %4474 = vmatmul.bf16.gmra.mxu2 %v4197_v33  ;;  %v8841_v33 = vld [vmem:[#allocation3 + $0x80] sm:$0xff] }
 0x293   : > { %5882 = vmatpush.bf16.msrb.mxu1 %v8841_v33 }
 0x294   : > { %3686 = vmatmul.bf16.gmra.mxu0 %v3445_v7 }
 0x295   : > { %8344 = vmatmul.msk.bf16.gmra.mxu3 %vm2539_vm3, %v11060_v23  ;;  %v11844_v32 = vpop.f32.mrf.mxu2  ;;  %v3455_v23 = vshrl.u32 %v2569_v55, 16  ;;  %v2505_v12 = vpop.permute.xlu2 %2504 }
 0x296   : > { %13971 = vst [vmem:[#allocation12_spill] sm:$0xff] %v11844_v32 }
 0x297   : > { %v2111_v57 = vpop.permute.xlu1 %2110  ;;  %v3457_v45 = vrot.slane %v3455_v23, 3 }
 0x298   : > { %v2208_v6 = vmul.f32 %v2111_v57, %v2040_v16  ;;  %v8840_v16 = vld [vmem:[#allocation3 + $0x78] sm:$0xff]  ;;  %v9358_v57 = vld [vmem:[#allocation2 + $0x50] sm:$0xff]  }
 0x299   : > { %v4066_v14 = vsel %vm2539_vm3, %v9358_v57, %v11723_v2  ;;  %v11868_v23 = vor.u32 %v3460_v15, %v3457_v45  ;;  %5883 = vmatpush.bf16.msrb.mxu1 %v8840_v16  ;;  %v13979_v45 = vld [vmem:[#allocation39_spill] sm:$0xff]  ;;  %v11885_v57 = vpop.f32.mrf.mxu1 }
 0x29a   : > { %v2232_v46 = vpack.c.bf16 %v2208_v6, %v2208_v6  ;;  %v13975_v6 = vld [vmem:[#allocation13_spill] sm:$0xff]  ;;  %v4224_v27 = vshrl.u32 %v4066_v14, 16  ;;  %v4227_v36 = vshll.u32 %v4066_v14, 16 }
 0x29b   : > { %v1684_v3 = vadd.f32 %v11312_v50, %v13975_v6  ;;  %v3462_v2 = vsel %vm2826_vm4, %v3444_v43, %v11868_v23 }
 0x29c   : > { %2256 = vst.msk [vmem:[#allocation2 + $0x84] sm:$0xf] %vm376_vm0, %v2232_v46  ;;  %v8839_v46 = vld [vmem:[#allocation3 + $0x70] sm:$0xff]  ;;  %v4226_v6 = vrot.slane %v4224_v27, 3  ;;  %v4075_v27 = vsel %vm2539_vm3, %v11456_v26, %v11829_v1  ;;  %v13983_v26 = vld [vmem:[#allocation40_spill] sm:$0xff] }
 0x29d   : > { %v11854_v7 = vpop.f32.mrf.mxu2  ;;  %v1962_v15 = vadd.f32 %v13979_v45, %v1684_v3  ;;  %5884 = vmatpush.bf16.msrb.mxu1 %v8839_v46  ;;  %v8838_v45 = vld [vmem:[#allocation3 + $0x68] sm:$0xff] }
 0x29e   : > { %13974 = vst [vmem:[#allocation95_spill] sm:$0xff] %v11854_v7 }
 0x29f   : > { %v2116_v55 = vpop.permute.xlu1 %2115  ;;  %v1990_v46 = vmul.f32 %v11826_v13, %v1962_v15 }
 0x2a0   : > { %v2209_v9 = vmul.f32 %v2116_v55, %v2041_v0  ;;  %v9868_v0 = vld [vmem:[#allocation2 + $0x50] sm:$0xff]  }
 0x2a1   : > { %v3652_v33 = vpop.f32.mrf.mxu0  ;;  %v2572_v16 = vsel %vm2539_vm3, %v9868_v0, %v2505_v12  ;;  %v8824_v12 = vld [vmem:[%s13797_s8 + $0x38] sm:$0xff]  ;;  %5885 = vmatpush.bf16.msrb.mxu1 %v8838_v45  ;;  %v4275_v45 = vshrl.u32 %v4075_v27, 16  ;;  %v2018_v25 = vadd.f32 %v11839_v37, %v1990_v46 }
 0x2a2   : > { %4479 = vmatmul.bf16.gmra.mxu2 %v11633_v35  ;;  %v2233_v11 = vpack.c.bf16 %v2209_v9, %v2209_v9  ;;  %v11870_v10 = vadd.f32 %v3652_v33, %v3245_v61  ;;  %v4229_v33 = vrot.slane %v4227_v36, 4  ;;  %v3472_v3 = vshrl.u32 %v2572_v16, 16  ;;  %4852 = vmatpush.bf16.msrb.mxu0 %v8824_v12 }
 0x2a3   : > { %v11878_v35 = vld [vmem:[#allocation2 + $0x80] sm:$0xff]   ;;  %v4278_v12 = vshll.u32 %v4075_v27, 16 }
 0x2a4   : > { %13978 = vst [vmem:[#allocation35_spill] sm:$0xff] %v11878_v35  ;;  %3691 = vmatmul.bf16.gmra.mxu0 %v3462_v2  ;;  %v5351_v14 = vshrl.u32 %v11878_v35, 16  ;;  %v5354_v9 = vshll.u32 %v11878_v35, 16  ;;  %v13981_v2 = vld [vmem:[#allocation51_spill] sm:$0xff]  ;;  %v11909_v15 = vor.u32 %v4229_v33, %v4226_v6  ;;  %v13984_v33 = vld [vmem:[#allocation58_spill] sm:$0xff] }
 0x2a5   : > { %8345 = vmatmul.msk.bf16.gmra.mxu3 %vm2539_vm3, %v13976_v59  ;;  %v11874_v50 = vpop.f32.mrf.mxu2  ;;  %2257 = vst.msk [vmem:[#allocation2 + $0x88] sm:$0xf] %vm376_vm0, %v2233_v11  ;;  %v3475_v59 = vshll.u32 %v2572_v16, 16  ;;  %v13980_v11 = vld [vmem:[#allocation14_spill] sm:$0xff]  ;;  %v4280_v52 = vrot.slane %v4278_v12, 4 }
 0x2a6   : > { %13977 = vst [vmem:[#allocation13_spill] sm:$0xff] %v11874_v50  ;;  %v5353_v43 = vrot.slane %v5351_v14, 4  ;;  %v5356_v61 = vrot.slane %v5354_v9, 5  ;;  %v1687_v0 = vadd.f32 %v13981_v2, %v13980_v11  ;;  %v8837_v14 = vld [vmem:[#allocation3 + $0x60] sm:$0xff]  ;;  %v4072_v9 = vsel %vm2539_vm3, %v9360_v39, %v11810_v18  ;;  %v13987_v50 = vld [vmem:[#allocation16_spill] sm:$0xff] }
 0x2a7   : > { %v3477_v11 = vrot.slane %v3475_v59, 4  ;;  %v4258_v17 = vshrl.u32 %v4072_v9, 16  ;;  %5886 = vmatpush.bf16.msrb.mxu1 %v8837_v14  ;;  %v4261_v39 = vshll.u32 %v4072_v9, 16  ;;  %v11919_v18 = vpop.permute.xlu1 %2508  ;;  %v4231_v46 = vsel %vm2826_vm4, %v11619_v21, %v11909_v15  ;;  %v9359_v14 = vld [vmem:[#allocation2 + $0x58] sm:$0xff]  }
 0x2a8   : > { %v11887_v55 = vpop.f32.mrf.mxu3  ;;  %v11894_v63 = vor.u32 %v5356_v61, %v5353_v43  ;;  %v3474_v61 = vrot.slane %v3472_v3, 3  ;;  %v1963_v1 = vadd.f32 %v13983_v26, %v1687_v0  ;;  %v13985_v3 = vld [vmem:[#allocation43_spill] sm:$0xff]  ;;  %v2507_v0 = vpop.permute.xlu0 %2506  ;;  %v4277_v9 = vrot.slane %v4275_v45, 3 }
 0x2a9   : > { %v11902_v16 = vpop.f32.mrf.mxu0  ;;  %v3250_v59 = vadd.f32 %v13985_v3, %v13984_v33  ;;  %v11931_v26 = vpop.f32.mrf.mxu1  ;;  %v4260_v33 = vrot.slane %v4258_v17, 3  ;;  %v2575_v45 = vsel %vm2539_vm3, %v9869_v30, %v2507_v0  ;;  %v1689_v7 = vadd.f32 %v13988_v60, %v13987_v50 }
 0x2aa   : > { %v5358_v43 = vsel %vm2376_vm2, %v11700_v62, %v11894_v63  ;;  %v8823_v62 = vld [vmem:[%s13797_s8 + $0x30] sm:$0xff]  ;;  %v1991_v27 = vmul.f32 %v11826_v13, %v1963_v1  ;;  %v8822_v1 = vld [vmem:[%s13797_s8 + $0x28] sm:$0xff]  ;;  %v11955_v30 = vor.u32 %v4280_v52, %v4277_v9  ;;  %v3489_v60 = vshrl.u32 %v2575_v45, 16  ;;  %v8821_v9 = vld [vmem:[%s13797_s8 + $0x20] sm:$0xff] }
 0x2ab   : > { %v11900_v36 = vpop.permute.xlu2 %4011  ;;  %5437 = vrot.lane.b32.xlu1 %v5358_v43, %s10019_s29  ;;  %v11925_v43 = vor.u32 %v3477_v11, %v3474_v61  ;;  %4853 = vmatpush.bf16.msrb.mxu0 %v8823_v62  ;;  %v2072_v61 = vld [vmem:[%s13790_s1 + $0x128] sm:$0xff]  ;;  %v4069_v11 = vsel %vm2539_vm3, %v9359_v14, %v11812_v31  ;;  %v4263_v62 = vrot.slane %v4261_v39, 4  ;;  %v13989_v31 = vld [vmem:[#allocation37_spill] sm:$0xff]  ;;  %v3492_v50 = vshll.u32 %v2575_v45, 16 }
 0x2ac   : > { %v4241_v14 = vshrl.u32 %v4069_v11, 16  ;;  %v2019_v0 = vadd.f32 %v11839_v37, %v1991_v27  ;;  %v13992_v45 = vld [vmem:[#allocation18_spill] sm:$0xff]  ;;  %v3491_v44 = vrot.slane %v3489_v60, 3 }
 0x2ad   : > { %v11911_v2 = vpop.f32.mrf.mxu2  ;;  %v3479_v39 = vsel %vm2826_vm4, %v11868_v23, %v11925_v43 }
 0x2ae   : > { %13982 = vst [vmem:[#allocation39_spill] sm:$0xff] %v11911_v2  ;;  %v2042_v2 = vmax.f32 %v2018_v25, 0.0 }
 0x2af   : > { %4854 = vmatpush.bf16.msrb.mxu0 %v8822_v1  ;;  %v13993_v1 = vld [vmem:[#allocation57_spill] sm:$0xff] }
 0x2b0   : > { %v11921_v6 = vpop.f32.mrf.mxu3 }
 0x2b1   : > { %v3657_v21 = vpop.f32.mrf.mxu0  ;;  %v11986_v22 = vpop.f32.mrf.mxu1 }
 0x2b2   : > { %4484 = vmatmul.bf16.gmra.mxu2 %v4231_v46  ;;  %v11942_v25 = vadd.f32 %v3657_v21, %v3250_v59  ;;  %v11944_v46 = vld [vmem:[#allocation2 + $0x84] sm:$0xff]   ;;  %v11958_v21 = vor.u32 %v4263_v62, %v4260_v33  ;;  %v1692_v33 = vadd.f32 %v13993_v1, %v13992_v45  ;;  %v5434_v62 = vpop.permute.xlu1 %5433 }
 0x2b3   : > { %v2121_v3 = vpop.permute.xlu2 %2120  ;;  %13986 = vst [vmem:[#allocation14_spill] sm:$0xff] %v11944_v46  ;;  %2150 = vperm.xlu1 %9843, %v2072_v61   ;;  %v5130_v23 = vshrl.u32 %v11944_v46, 16  ;;  %v5133_v52 = vshll.u32 %v11944_v46, 16  ;;  %4855 = vmatpush.bf16.msrb.mxu0 %v8821_v9 }
 0x2b4   : > { %v2210_v12 = vmul.f32 %v2121_v3, %v2042_v2  ;;  %v5318_v2 = vld [vmem:[#allocation2 + $0x6c] sm:$0x8]  ;;  %3696 = vmatmul.bf16.gmra.mxu0 %v3479_v39  ;;  %v4244_v3 = vshll.u32 %v4069_v11, 16  ;;  %v2043_v39 = vmax.f32 %v2019_v0, 0.0  ;;  %v11977_v46 = vsel %vm2826_vm4, %v11958_v21, %v11955_v30  ;;  %v8820_v0 = vld [vmem:[%s13797_s8 + $0x18] sm:$0xff] }
 0x2b5   : > { %8346 = vmatmul.msk.bf16.gmra.mxu3 %vm2539_vm3, %v13989_v31  ;;  %v11950_v17 = vpop.f32.mrf.mxu2  ;;  %v5327_v11 = vunpack.c.l.b16 %v5318_v2  ;;  %v4243_v31 = vrot.slane %v4241_v14, 3  ;;  %v13994_v14 = vunpack.c.l.b16 %v11503_v49  ;;  %v5132_v53 = vrot.slane %v5130_v23, 4  ;;  %v13995_v49 = vld [vmem:[#allocation44_spill] sm:$0xff] }
 0x2b6   : > { %13990 = vst [vmem:[#allocation51_spill] sm:$0xff] %v11950_v17  ;;  %v2234_v59 = vpack.c.bf16 %v2210_v12, %v2210_v12  ;;  %v13991_v12 = vld [vmem:[#allocation42_spill] sm:$0xff]  ;;  %v8832_v17 = vld [vmem:[#allocation3 + $0x38] sm:$0xff]  ;;  %v4246_v32 = vrot.slane %v4244_v3, 4  ;;  %v5135_v35 = vrot.slane %v5133_v52, 5  ;;  %v8819_v52 = vld [vmem:[%s13797_s8 + $0x10] sm:$0xff] }
 0x2b7   : > { %v1964_v27 = vadd.f32 %v13991_v12, %v1689_v7  ;;  %v3494_v7 = vrot.slane %v3492_v50, 4  ;;  %v5331_v2 = vpack.c.b16 %v13994_v14, %v5327_v11  ;;  %6356 = vmatpush.bf16.msrb.mxu3 %v8832_v17  ;;  %v1965_v50 = vadd.f32 %v13995_v49, %v1692_v33  ;;  %4856 = vmatpush.bf16.msrb.mxu0 %v8820_v0  ;;  %v13997_v0 = vld [vmem:[#allocation26_spill] sm:$0xff] }
 0x2b8   : > { %2258 = vst.msk [vmem:[#allocation2 + $0x8c] sm:$0xf] %vm376_vm0, %v2234_v59  ;;  %v11961_v61 = vpop.f32.mrf.mxu3  ;;  %v2073_v59 = vld [vmem:[%s13790_s1 + $0x130] sm:$0xff]  ;;  %v11993_v14 = vor.u32 %v4246_v32, %v4243_v31 }
 0x2b9   : > { %v11981_v45 = vpop.f32.mrf.mxu0  ;;  %v5489_v3 = vsel %vm2539_vm3, %v5331_v2, %v5434_v62  ;;  %v11995_v42 = vor.u32 %v3494_v7, %v3491_v44  ;;  %v1992_v17 = vmul.f32 %v11826_v13, %v1964_v27  ;;  %v1993_v7 = vmul.f32 %v11826_v13, %v1965_v50 }
 0x2ba   : > { %v5540_v62 = vshrl.u32 %v5489_v3, 16  ;;  %v5543_v31 = vshll.u32 %v5489_v3, 16  ;;  %v4248_v27 = vsel %vm2826_vm4, %v11909_v15, %v11993_v14 }
 0x2bb   : > { %v2126_v12 = vpop.permute.xlu2 %2125  ;;  %2155 = vperm.xlu1 %9843, %v2073_v59   ;;  %6357 = vmatpush.bf16.msrb.mxu3 %v8831_v24  ;;  %v3496_v15 = vsel %vm2826_vm4, %v11925_v43, %v11995_v42 }
 0x2bc   : > { %v2211_v1 = vmul.f32 %v2126_v12, %v2043_v39  ;;  %v13996_v39 = vld [vmem:[#allocation47_spill] sm:$0xff]  ;;  %v8830_v12 = vld [vmem:[#allocation3 + $0x28] sm:$0xff]  ;;  %4857 = vmatpush.bf16.msrb.mxu0 %v8819_v52  ;;  %v5542_v49 = vrot.slane %v5540_v62, 3  ;;  %v5545_v43 = vrot.slane %v5543_v31, 4  ;;  %v12045_v31 = vpop.f32.mrf.mxu1 }
 0x2bd   : > { %v3227_v60 = vpop.f32.mrf.mxu2  ;;  %v3255_v59 = vadd.f32 %v13996_v39, %v11463_v51  ;;  %v8818_v51 = vld [vmem:[%s13797_s8 + $0x8] sm:$0xff] }
 0x2be   : > { %v2235_v11 = vpack.c.bf16 %v2211_v1, %v2211_v1  ;;  %v11991_v9 = vadd.f32 %v11859_v38, %v3227_v60  ;;  %v12006_v38 = vor.u32 %v5135_v35, %v5132_v53  ;;  %v2363_v1 = vpack.c.b16 %v13997_v0, %v13997_v0 }
 0x2bf   : > { %v11997_v23 = vld [vmem:[#allocation2 + $0x88] sm:$0xff]   ;;  %v2020_v60 = vadd.f32 %v11839_v37, %v1992_v17  ;;  %6358 = vmatpush.bf16.msrb.mxu3 %v8830_v12 }
 0x2c0   : > { %2259 = vst.msk [vmem:[#allocation2 + $0x90] sm:$0xf] %vm376_vm0, %v2235_v11  ;;  %v12004_v33 = vpop.f32.mrf.mxu3  ;;  %v5359_v32 = vshrl.u32 %v11997_v23, 16  ;;  %v5362_v44 = vshll.u32 %v11997_v23, 16  ;;  %v2578_v39 = vsel %vm2539_vm3, %v2363_v1, %v11919_v18  ;;  %4858 = vmatpush.bf16.msrb.mxu0 %v8818_v51  ;;  %v13998_v18 = vld [vmem:[#allocation19_spill] sm:$0xff] }
 0x2c1   : > { %v3662_v3 = vpop.f32.mrf.mxu0  ;;  %v3506_v1 = vshrl.u32 %v2578_v39, 16 }
 0x2c2   : > { %v12016_v2 = vpop.permute.xlu0 %4013  ;;  %4489 = vmatmul.bf16.gmra.mxu2 %v4248_v27  ;;  %v5361_v53 = vrot.slane %v5359_v32, 4  ;;  %v5364_v35 = vrot.slane %v5362_v44, 5  ;;  %v12029_v11 = vadd.f32 %v3662_v3, %v3255_v59  ;;  %v5137_v32 = vsel %vm2376_vm2, %v11764_v48, %v12006_v38  ;;  %v8829_v44 = vld [vmem:[#allocation3 + $0x20] sm:$0xff] }
 0x2c3   : > { %v5436_v24 = vpop.permute.xlu2 %5435  ;;  %5209 = vrot.lane.b32.xlu1 %v5137_v32, %s10019_s29  ;;  %v2021_v48 = vadd.f32 %v11839_v37, %v1993_v7  ;;  %v2044_v7 = vmax.f32 %v2020_v60, 0.0  ;;  %6359 = vmatpush.bf16.msrb.mxu3 %v8829_v44  ;;  %v5546_v3 = vor.u32 %v5545_v43, %v5542_v49  ;;  %v8848_v32 = vld [vmem:[#allocation3 + $0xb8] sm:$0xff]  ;;  %v8827_v60 = vld [vmem:[#allocation3 + $0x10] sm:$0xff]  ;;  %v13999_v44 = vld [vmem:[#allocation46_spill] sm:$0xff]  ;;  %v3508_v43 = vrot.slane %v3506_v1, 3 }
 0x2c4   : > { %v5491_v50 = vsel %vm2539_vm3, %v11711_v28, %v5436_v24  ;;  %v12037_v62 = vor.u32 %v5364_v35, %v5361_v53  ;;  %3701 = vmatmul.bf16.gmra.mxu0 %v3496_v15  ;;  %v8817_v53 = vld [vmem:[%s13797_s8] sm:$0xff]  ;;  %v3509_v24 = vshll.u32 %v2578_v39, 16  ;;  %5952 = vmatpush.bf16.msrb.mxu2 %v8848_v32  ;;  %v14000_v1 = vld [vmem:[#allocation20_spill] sm:$0xff] }
 0x2c5   : > { %v5547_v27 = vshrl.u32 %v5491_v50, 16  ;;  %v5550_v17 = vshll.u32 %v5491_v50, 16  ;;  %8347 = vmatmul.msk.bf16.gmra.mxu3 %vm2539_vm3, %v11628_v47  ;;  %v3230_v52 = vpop.f32.mrf.mxu2  ;;  %v2045_v51 = vmax.f32 %v2021_v48, 0.0  ;;  %v8828_v50 = vld [vmem:[#allocation3 + $0x18] sm:$0xff]  ;;  %4859 = vmatpush.bf16.msrb.mxu0 %v8817_v53 }
 0x2c6   : > { %v12042_v59 = vadd.f32 %v11887_v55, %v3230_v52  ;;  %v5366_v47 = vsel %vm2376_vm2, %v11894_v63, %v12037_v62  ;;  %v1694_v55 = vadd.f32 %v11405_v54, %v13998_v18  ;;  %v3511_v39 = vrot.slane %v3509_v24, 4 }
 0x2c7   : > { %v5549_v12 = vrot.slane %v5547_v27, 3  ;;  %v5552_v0 = vrot.slane %v5550_v17, 4  ;;  %5439 = vrot.lane.b32.xlu2 %v5366_v47, %s10019_s29  ;;  %6360 = vmatpush.bf16.msrb.mxu3 %v8828_v50  ;;  %v12072_v53 = vld [vmem:[#allocation2 + $0x8c] sm:$0xff]   ;;  %v1697_v24 = vadd.f32 %v11450_v20, %v14000_v1  ;;  %v14001_v50 = vld [vmem:[#allocation52_spill] sm:$0xff] }
 0x2c8   : > { %v12055_v35 = vpop.f32.mrf.mxu3  ;;  %v1966_v49 = vadd.f32 %v13999_v44, %v1694_v55  ;;  %v3260_v32 = vadd.f32 %v14001_v50, %v11576_v19  ;;  %v5142_v20 = vshll.u32 %v12072_v53, 16  ;;  %v8825_v44 = vld [vmem:[#allocation3] sm:$0xff] }
 0x2c9   : > { %v12058_v15 = vor.u32 %v5552_v0, %v5549_v12  ;;  %v12060_v52 = vpop.f32.mrf.mxu0  ;;  %v2074_v0 = vld [vmem:[%s13790_s1 + $0x138] sm:$0xff] }
 0x2ca   : > { %v2131_v63 = vpop.permute.xlu0 %2130 }
 0x2cb   : > { %v2212_v27 = vmul.f32 %v2131_v63, %v2044_v7  ;;  %v2136_v17 = vpop.permute.xlu2 %2135  ;;  %v5554_v54 = vsel %vm2826_vm4, %v5546_v3, %v12058_v15  ;;  %6361 = vmatpush.bf16.msrb.mxu3 %v8827_v60  ;;  %v3736_v3 = vpop.f32.mrf.mxu1  ;;  %v3512_v63 = vor.u32 %v3511_v39, %v3508_v43  ;;  %v14002_v43 = vld [vmem:[#allocation48_spill] sm:$0xff] }
 0x2cc   : > { %v2213_v47 = vmul.f32 %v2136_v17, %v2045_v51  ;;  %5887 = vmatmul.bf16.vlgmr.msrb.gmra.mxu1 %v5554_v54  ;;  %v1994_v51 = vmul.f32 %v11826_v13, %v1966_v49  ;;  %v8826_v17 = vld [vmem:[#allocation3 + $0x8] sm:$0xff]  ;;  %v1967_v39 = vadd.f32 %v14002_v43, %v1697_v24  ;;  %v5144_v24 = vrot.slane %v5142_v20, 5 }
 0x2cd   : > { %v2236_v12 = vpack.c.bf16 %v2212_v27, %v2212_v27  ;;  %v3232_v48 = vpop.f32.mrf.mxu2  ;;  %v3513_v19 = vsel %vm2826_vm4, %v11995_v42, %v3512_v63  ;;  %v14003_v63 = vld [vmem:[#allocation53_spill] sm:$0xff] }
 0x2ce   : > { %v2237_v18 = vpack.c.bf16 %v2213_v47, %v2213_v47  ;;  %v12069_v7 = vadd.f32 %v11921_v6, %v3232_v48  ;;  %v4265_v6 = vsel %vm2826_vm4, %v11993_v14, %v11958_v21  ;;  %v5139_v47 = vshrl.u32 %v12072_v53, 16  ;;  %v2075_v14 = vld [vmem:[%s13790_s1 + $0x140] sm:$0xff] }
 0x2cf   : > { %2260 = vst.msk [vmem:[#allocation2 + $0x94] sm:$0xf] %vm376_vm0, %v2236_v12  ;;  %2160 = vperm.xlu2 %9844, %v2074_v0   ;;  %6362 = vmatpush.bf16.msrb.mxu3 %v8826_v17  ;;  %v2022_v49 = vadd.f32 %v11839_v37, %v1994_v51  ;;  %v3722_v12 = vadd.f32 %v11834_v56, %v11870_v10 }
 0x2d0   : > { %2261 = vst.msk [vmem:[#allocation2 + $0x98] sm:$0xf] %vm376_vm0, %v2237_v18  ;;  %v12075_v55 = vpop.f32.mrf.mxu3  ;;  %v5141_v1 = vrot.slane %v5139_v47, 4  ;;  %v1995_v56 = vmul.f32 %v11826_v13, %v1967_v39  ;;  %v4993_v39 = vld [vmem:[#allocation2 + $0x60] sm:$0x8] }
 0x2d1   : > { %v3667_v54 = vpop.f32.mrf.mxu0  ;;  %v2046_v10 = vmax.f32 %v2022_v49, 0.0 }
 0x2d2   : > { %v12085_v27 = vpop.permute.xlu0 %5201  ;;  %4494 = vmatmul.bf16.gmra.mxu2 %v4265_v6  ;;  %v3668_v60 = vadd.f32 %v3667_v54, %v3260_v32  ;;  %v14004_v6 = vld [vmem:[#allocation41_spill] sm:$0xff] }
 0x2d3   : > { %v3247_v50 = vadd.f32 %v14004_v6, %v14003_v63  ;;  %6363 = vmatpush.bf16.msrb.mxu3 %v8825_v44  ;;  %v2023_v44 = vadd.f32 %v11839_v37, %v1995_v56  ;;  %v9481_v63 = vld [vmem:[#allocation2 + $0x80] sm:$0xff]   ;;  %v14006_v6 = vunpack.c.l.b16 %v11458_v40 }
 0x2d4   : > { %v12100_v48 = vadd.f32 %v3736_v3, %v3668_v60  ;;  %3706 = vmatmul.bf16.gmra.mxu0 %v3513_v19  ;;  %v12115_v60 = vpop.f32.mrf.mxu1 }
 0x2d5   : > { %8348 = vmatmul.msk.bf16.gmra.mxu3 %vm2539_vm3, %v11774_v41  ;;  %v4455_v21 = vpop.f32.mrf.mxu2  ;;  %v3655_v17 = vadd.f32 %v11902_v16, %v3247_v50 }
 0x2d6   : > { %v4525_v0 = vadd.f32 %v11961_v61, %v4455_v21  ;;  %v12103_v18 = vld [vmem:[#allocation2 + $0x90] sm:$0xff]   ;;  %v12121_v21 = vor.u32 %v5144_v24, %v5141_v1 }
 0x2d7   : > { %v5367_v41 = vshrl.u32 %v12103_v18, 16  ;;  %v5370_v42 = vshll.u32 %v12103_v18, 16  ;;  %2165 = vperm.xlu2 %9844, %v2075_v14   ;;  %v3724_v16 = vadd.f32 %v11856_v58, %v3655_v17  ;;  %v5044_v58 = vunpack.c.l.b16 %v4993_v39 }
 0x2d8   : > { %v12109_v51 = vadd.f32 %v4525_v0, %v3722_v12  ;;  %v12111_v32 = vpop.f32.mrf.mxu3  ;;  %v5146_v12 = vsel %vm2376_vm2, %v12006_v38, %v12121_v21  ;;  %v8805_v38 = vld [vmem:[%s10244_s26 + $0xc] sm:$0xff]  ;;  %v3727_v39 = vadd.f32 %v11885_v57, %v11942_v25  ;;  %v9722_v57 = vld [vmem:[#allocation2 + $0x84] sm:$0xff]  }
 0x2d9   : > { %v5369_v61 = vrot.slane %v5367_v41, 4  ;;  %v5372_v3 = vrot.slane %v5370_v42, 5  ;;  %v12117_v20 = vpop.f32.mrf.mxu0  ;;  %v2047_v41 = vmax.f32 %v2023_v44, 0.0  ;;  %v14005_v42 = vld [vmem:[#allocation60_spill] sm:$0xff]  ;;  %v5069_v50 = vpack.c.b16 %v14006_v6, %v5044_v58 }
 0x2da   : > { %v2141_v54 = vpop.permute.xlu0 %2140  ;;  %v3265_v1 = vadd.f32 %v14005_v42, %v11654_v29 }
 0x2db   : > { %v2214_v47 = vmul.f32 %v2141_v54, %v2046_v10  ;;  %v12119_v43 = vor.u32 %v5372_v3, %v5369_v61  ;;  %v14007_v61 = vld [vmem:[#allocation61_spill] sm:$0xff]  ;;  %v5257_v40 = vsel %vm2539_vm3, %v5069_v50, %v12085_v27 }
 0x2dc   : > { %v14008_v3 = vld [vmem:[#allocation45_spill] sm:$0xff] }
 0x2dd   : > { %v2238_v19 = vpack.c.bf16 %v2214_v47, %v2214_v47  ;;  %v4457_v14 = vpop.f32.mrf.mxu2  ;;  %v5374_v13 = vsel %vm2376_vm2, %v12037_v62, %v12119_v43  ;;  %v12137_v62 = vld [vmem:[#allocation2 + $0x70] sm:$0xff]   ;;  %v3252_v17 = vadd.f32 %v14008_v3, %v14007_v61  ;;  %v5204_v47 = vpop.permute.xlu1 %5203 }
 0x2de   : > { %v4527_v49 = vadd.f32 %v12004_v33, %v4457_v14  ;;  %5441 = vrot.lane.b32.xlu0 %v5374_v13, %s10019_s29  ;;  %v4078_v37 = vsel %vm2539_vm3, %v12137_v62, %v11900_v36  ;;  %v2076_v36 = vld [vmem:[%s13790_s1 + $0x148] sm:$0xff] }
 0x2df   : > { %2262 = vst.msk [vmem:[#allocation2 + $0x9c] sm:$0xf] %vm376_vm0, %v2238_v19  ;;  %5211 = vrot.lane.b32.xlu2 %v5146_v12, %s10019_s29  ;;  %v4292_v54 = vshrl.u32 %v4078_v37, 16  ;;  %v12155_v19 = vld [vmem:[#allocation2 + $0x7c] sm:$0xf]  ;;  %v4295_v14 = vshll.u32 %v4078_v37, 16  ;;  %v3660_v3 = vadd.f32 %v11981_v45, %v3252_v17 }
 0x2e0   : > { %v12134_v0 = vadd.f32 %v4527_v49, %v3724_v16  ;;  %v12142_v33 = vpop.f32.mrf.mxu3  ;;  %14009 = vst [vmem:[#allocation40_spill] sm:$0xff] %v12155_v19  ;;  %v9171_v16 = vunpack.c.l.b16 %v9481_v63  ;;  %v9871_v37 = vld [vmem:[#allocation2 + $0x68] sm:$0xff]   ;;  %v13821_v42 = vunpack.c.l.b16 %v12155_v19  ;;  %v14029_v19 = vld [vmem:[#allocation35_spill] sm:$0xff] }
 0x2e1   : > { %v3672_v10 = vpop.f32.mrf.mxu0  ;;  %v5260_v27 = vsel %vm2539_vm3, %v9871_v37, %v5204_v47  ;;  %v4294_v25 = vrot.slane %v4292_v54, 3  ;;  %v8847_v47 = vld [vmem:[#allocation3 + $0xb0] sm:$0xff] }
 0x2e2   : > { %v2146_v24 = vpop.permute.xlu0 %2145  ;;  %4499 = vmatmul.bf16.gmra.mxu2 %v11977_v46  ;;  %v3673_v29 = vadd.f32 %v3672_v10, %v3265_v1  ;;  %v3741_v46 = vpop.f32.mrf.mxu1  ;;  %v6017_v1 = vshrl.u32 %v5257_v40, 16  ;;  %v12177_v50 = vpack.c.b16 %v9171_v16, %v13821_v42  ;;  %v6027_v61 = vshll.u32 %v5260_v27, 16 }
 0x2e3   : > { %v2215_v56 = vmul.f32 %v2146_v24, %v2047_v41  ;;  %v6020_v24 = vshll.u32 %v5257_v40, 16  ;;  %v6732_v40 = vrot.slane %v9722_v57, 5  ;;  %5953 = vmatpush.bf16.msrb.mxu2 %v8847_v47  ;;  %v8846_v57 = vld [vmem:[#allocation3 + $0xa8] sm:$0xff]  ;;  %v8806_v47 = vld [vmem:[%s10244_s26 + $0x14] sm:$0xff] }
 0x2e4   : > { %v12163_v49 = vadd.f32 %v3741_v46, %v3673_v29  ;;  %4860 = vmatmul.bf16.vlgmr.msrb.gmra.mxu0 %v8805_v38  ;;  %v4297_v38 = vrot.slane %v4295_v14, 4  ;;  %14010 = vst [vmem:[#allocation58_spill] sm:$0xff] %v12177_v50  ;;  %v2077_v46 = vld [vmem:[%s13790_s1 + $0x150] sm:$0xff]  ;;  %v12197_v17 = vrot.slane %v12177_v50, 5 }
 0x2e5   : > { %v2239_v13 = vpack.c.bf16 %v2215_v56, %v2215_v56  ;;  %8349 = vmatmul.msk.bf16.gmra.mxu3 %vm2539_vm3, %v11804_v4  ;;  %v4460_v44 = vpop.f32.mrf.mxu2  ;;  %v14011_v56 = vld [vmem:[#allocation63_spill] sm:$0xff] }
 0x2e6   : > { %v4530_v12 = vadd.f32 %v12055_v35, %v4460_v44  ;;  %2170 = vperm.xlu0 %9842, %v2076_v36   ;;  %v12166_v58 = vld [vmem:[#allocation2 + $0x98] sm:$0xff]   ;;  %v3267_v10 = vadd.f32 %v14011_v56, %v11681_v34  ;;  %v6024_v36 = vshrl.u32 %v5260_v27, 16  ;;  %v6022_v44 = vrot.slane %v6020_v24, 4  ;;  %14012 = vst [vmem:[#allocation43_spill] sm:$0xff] %v12197_v17  ;;  %v5206_v56 = vpop.permute.xlu2 %5205 }
 0x2e7   : > { %2263 = vst.msk [vmem:[#allocation2 + $0xa0] sm:$0xf] %vm376_vm0, %v2239_v13  ;;  %v5375_v4 = vshrl.u32 %v12166_v58, 16  ;;  %v5378_v41 = vshll.u32 %v12166_v58, 16  ;;  %v6019_v13 = vrot.slane %v6017_v1, 3  ;;  %v12191_v34 = vor.u32 %v4297_v38, %v4294_v25  ;;  %5954 = vmatpush.bf16.msrb.mxu2 %v8846_v57 }
 0x2e8   : > { %v12173_v35 = vadd.f32 %v4530_v12, %v3727_v39  ;;  %v12182_v54 = vpop.f32.mrf.mxu3  ;;  %v12199_v12 = vld [vmem:[#allocation2 + $0x8c] sm:$0xff]   ;;  %v6026_v37 = vrot.slane %v6024_v36, 3  ;;  %v6029_v27 = vrot.slane %v6027_v61, 4  ;;  %v3869_v25 = vpack.c.b16 %v11594_v8, %v11594_v8 }
 0x2e9   : > { %v5377_v63 = vrot.slane %v5375_v4, 4  ;;  %v5380_v6 = vrot.slane %v5378_v41, 5  ;;  %v3674_v29 = vpop.f32.mrf.mxu0  ;;  %v3729_v4 = vadd.f32 %v11931_v26, %v3660_v3  ;;  %v6023_v1 = vor.u32 %v6022_v44, %v6019_v13 }
 0x2ea   : > { %v12189_v16 = vadd.f32 %v3674_v29, %v3267_v10  ;;  %v4081_v26 = vsel %vm2539_vm3, %v3869_v25, %v12016_v2  ;;  %v6734_v38 = vrot.slane %v12199_v12, 5  ;;  %v8845_v10 = vld [vmem:[#allocation3 + $0xa0] sm:$0xff] }
 0x2eb   : > { %v12187_v14 = vor.u32 %v5380_v6, %v5377_v63  ;;  %v14013_v63 = vld [vmem:[#allocation65_spill] sm:$0xff]  ;;  %v12218_v6 = vor.u32 %v6029_v27, %v6026_v37  ;;  %v4309_v29 = vshrl.u32 %v4081_v26, 16  ;;  %5955 = vmatpush.bf16.msrb.mxu2 %v8845_v10  ;;  %v5263_v37 = vsel %vm2539_vm3, %v12137_v62, %v5206_v56 }
 0x2ec   : > { %v3270_v8 = vadd.f32 %v14013_v63, %v11704_v5  ;;  %v2079_v2 = vld [vmem:[%s13790_s1 + $0x160] sm:$0xff]  ;;  %v6735_v5 = vsel %vm2513_vm1, %v6732_v40, %v6734_v38  ;;  %v6049_v56 = vshrl.u32 %v5263_v37, 16  ;;  %v6052_v10 = vshll.u32 %v5263_v37, 16 }
 0x2ed   : > { %v4462_v39 = vpop.f32.mrf.mxu2  ;;  %v5382_v45 = vsel %vm2376_vm2, %v12119_v43, %v12187_v14  ;;  %v6733_v43 = vsel %vm2513_vm1, %v12197_v17, %v6732_v40  ;;  %v6031_v13 = vsel %vm2826_vm4, %v6023_v1, %v12218_v6  ;;  %v6860_v44 = vshrl.u32 %v6735_v5, 16  ;;  %v8807_v12 = vld [vmem:[%s10244_s26 + $0x1c] sm:$0xff] }
 0x2ee   : > { %v4532_v41 = vadd.f32 %v12075_v55, %v4462_v39  ;;  %2175 = vperm.xlu0 %9842, %v2077_v46   ;;  %5443 = vrot.lane.b32.xlu1 %v5382_v45, %s10019_s29  ;;  %v4299_v55 = vsel %vm2826_vm4, %v11955_v30, %v12191_v34  ;;  %v6843_v36 = vshrl.u32 %v6733_v43, 16  ;;  %v6846_v61 = vshll.u32 %v6733_v43, 16  ;;  %v2078_v30 = vld [vmem:[%s13790_s1 + $0x158] sm:$0xff] }
 0x2ef   : > { %v4312_v39 = vshll.u32 %v4081_v26, 16  ;;  %v3732_v45 = vadd.f32 %v11986_v22, %v12029_v11  ;;  %v9714_v40 = vld [vmem:[#allocation2 + $0x9c] sm:$0xff]   ;;  %v6862_v1 = vrot.slane %v6860_v44, 3  ;;  %v12243_v22 = vld [vmem:[#allocation2 + $0x94] sm:$0xff]  }
 0x2f0   : > { %v12208_v24 = vadd.f32 %v4532_v41, %v3729_v4  ;;  %v12238_v27 = vpop.f32.mrf.mxu3  ;;  %v6863_v41 = vshll.u32 %v6735_v5, 16  ;;  %v6845_v25 = vrot.slane %v6843_v36, 3  ;;  %v6848_v43 = vrot.slane %v6846_v61, 4  ;;  %v14014_v26 = vld [vmem:[#allocation9_spill] sm:$0xff]  ;;  %v14016_v61 = vld [vmem:[#allocation80_spill] sm:$0xff] }
 0x2f1   : > { %v3677_v3 = vpop.f32.mrf.mxu0  ;;  %v4314_v5 = vrot.slane %v4312_v39, 4  ;;  %v2080_v39 = vld [vmem:[%s13790_s1 + $0x168] sm:$0xff]  ;;  %v5148_v37 = vshrl.u32 %v12243_v22, 16  ;;  %v14042_v17 = vld [vmem:[#allocation76_spill] sm:$0xff] }
 0x2f2   : > { %4504 = vmatmul.bf16.gmra.mxu2 %v4299_v55  ;;  %v12230_v46 = vadd.f32 %v3677_v3, %v3270_v8  ;;  %v14015_v55 = vld [vmem:[#allocation49_spill] sm:$0xff]  ;;  %v6865_v11 = vrot.slane %v6863_v41, 4  ;;  %v4311_v8 = vrot.slane %v4309_v29, 3  ;;  %v12256_v41 = vld [vmem:[#allocation2 + $0x78] sm:$0xff]  }
 0x2f3   : > { %v3257_v63 = vadd.f32 %v14015_v55, %v14014_v26 }
 0x2f4   : > { %4865 = vmatmul.bf16.gmra.mxu0 %v8806_v47  ;;  %v12249_v36 = vor.u32 %v6865_v11, %v6862_v1  ;;  %v6054_v1 = vrot.slane %v6052_v10, 4  ;;  %v5462_v10 = vrot.slane %v12137_v62, 5  ;;  %v14020_v62 = vrot.slane %v12256_v41, 5 }
 0x2f5   : > { %6364 = vmatmul.bf16.vlgmr.msrb.gmra.mxu3 %v6031_v13  ;;  %v4465_v4 = vpop.f32.mrf.mxu2  ;;  %v5157_v13 = vshrl.u32 %v9714_v40, 16  ;;  %v3665_v47 = vadd.f32 %v12060_v52, %v3257_v63 }
 0x2f6   : > { %v4535_v57 = vadd.f32 %v12111_v32, %v4465_v4  ;;  %2185 = vperm.xlu0 %9842, %v2079_v2   ;;  %2180 = vperm.xlu1 %9843, %v2078_v30   ;;  %v5160_v32 = vshll.u32 %v9714_v40, 16  ;;  %v12247_v2 = vld [vmem:[#allocation2 + $0x94] sm:$0xff]   ;;  %v14017_v30 = vld [vmem:[#allocation29_spill] sm:$0xff]  ;;  %v12254_v4 = vor.u32 %v6848_v43, %v6845_v25  ;;  %v5151_v40 = vshll.u32 %v12243_v22, 16  ;;  %v12271_v25 = vpop.f32.mrf.mxu1 }
 0x2f7   : > { %v3272_v44 = vadd.f32 %v14017_v30, %v14016_v61  ;;  %v4315_v43 = vor.u32 %v4314_v5, %v4311_v8  ;;  %v5159_v63 = vrot.slane %v5157_v13, 4  ;;  %v13822_v61 = vrot.slane %v12247_v2, 5 }
 0x2f8   : > { %v12245_v3 = vadd.f32 %v4535_v57, %v3732_v45  ;;  %14018 = vst [vmem:[#allocation16_spill] sm:$0xff] %v12254_v4  ;;  %v6051_v57 = vrot.slane %v6049_v56, 3  ;;  %v12269_v52 = vsel %vm2826_vm4, %v12254_v4, %v12249_v36  ;;  %v5162_v11 = vrot.slane %v5160_v32, 5  ;;  %v14021_v32 = vld [vmem:[#allocation33_spill] sm:$0xff]  ;;  %v14040_v4 = vld [vmem:[#allocation50_spill] sm:$0xff] }
 0x2f9   : > { %v3679_v45 = vpop.f32.mrf.mxu0  ;;  %14019 = vst [vmem:[#allocation55_spill] sm:$0xff] %v12269_v52  ;;  %v3734_v30 = vadd.f32 %v12045_v31, %v3665_v47  ;;  %v5153_v42 = vrot.slane %v5151_v40, 5  ;;  %v6737_v31 = vsel %vm2513_vm1, %v6734_v38, %v13822_v61  ;;  %v5464_v13 = vsel %vm2513_vm1, %v5462_v10, %v14020_v62  ;;  %v14022_v47 = vld [vmem:[#allocation15_spill] sm:$0xff] }
 0x2fa   : > { %v12264_v26 = vadd.f32 %v3679_v45, %v3272_v44  ;;  %v12277_v44 = vpop.f32.mrf.mxu3  ;;  %v5150_v45 = vrot.slane %v5148_v37, 4  ;;  %v12279_v29 = vor.u32 %v6054_v1, %v6051_v57  ;;  %v12290_v5 = vor.u32 %v5162_v11, %v5159_v63  ;;  %v5208_v37 = vpop.permute.xlu0 %5207 }
 0x2fb   : > { %v6877_v40 = vshrl.u32 %v6737_v31, 16  ;;  %v6880_v38 = vshll.u32 %v6737_v31, 16  ;;  %v5266_v11 = vsel %vm2539_vm3, %v12256_v41, %v5208_v37  ;;  %v5559_v62 = vshll.u32 %v5462_v10, 16 }
 0x2fc   : > { %v12297_v1 = vor.u32 %v5153_v42, %v5150_v45 }
 0x2fd   : > { %v4467_v55 = vpop.f32.mrf.mxu2  ;;  %v6879_v63 = vrot.slane %v6877_v40, 3  ;;  %v6882_v45 = vrot.slane %v6880_v38, 4  ;;  %v6066_v40 = vshrl.u32 %v5266_v11, 16 }
 0x2fe   : > { %v4537_v56 = vadd.f32 %v12142_v33, %v4467_v55  ;;  %2190 = vperm.xlu1 %9843, %v2080_v39   ;;  %v4316_v33 = vsel %vm2826_vm4, %v12191_v34, %v4315_v43  ;;  %v3275_v39 = vadd.f32 %v14022_v47, %v14021_v32  ;;  %v6056_v34 = vsel %vm2826_vm4, %v12218_v6, %v12279_v29  ;;  %v14023_v47 = vld [vmem:[#allocation69_spill] sm:$0xff] }
 0x2ff   : > { %v5564_v43 = vshrl.u32 %v5464_v13, 16  ;;  %v5164_v42 = vsel %vm2376_vm2, %v12297_v1, %v12290_v5  ;;  %v5556_v6 = vshrl.u32 %v5462_v10, 16  ;;  %v12314_v32 = vor.u32 %v6882_v45, %v6879_v63  ;;  %v14028_v10 = vld [vmem:[#allocation71_spill] sm:$0xff] }
 0x300   : > { %v12281_v8 = vadd.f32 %v4537_v56, %v3734_v30  ;;  %v5567_v56 = vshll.u32 %v5464_v13, 16 }
 0x301   : > { %v3682_v57 = vpop.f32.mrf.mxu0  ;;  %v5566_v38 = vrot.slane %v5564_v43, 3 }
 0x302   : > { %4509 = vmatmul.bf16.gmra.mxu2 %v4316_v33  ;;  %v12300_v55 = vadd.f32 %v3682_v57, %v3275_v39  ;;  %v12312_v33 = vpop.f32.mrf.mxu1  ;;  %v14024_v39 = vld [vmem:[#allocation56_spill] sm:$0xff]  ;;  %v6069_v57 = vshll.u32 %v5266_v11, 16  ;;  %v4546_v13 = vpop.f32.mrf.mxu3  ;;  %v6068_v11 = vrot.slane %v6066_v40, 3  ;;  %v14031_v40 = vld [vmem:[#allocation89_spill] sm:$0xff] }
 0x303   : > { %v3262_v37 = vadd.f32 %v14024_v39, %v14023_v47  ;;  %v5558_v47 = vrot.slane %v5556_v6, 3  ;;  %v5561_v39 = vrot.slane %v5559_v62, 4  ;;  %v12338_v6 = vld [vmem:[#allocation2 + $0x9c] sm:$0xff]  }
 0x304   : > { %4870 = vmatmul.bf16.gmra.mxu0 %v8807_v12  ;;  %v14027_v12 = vld [vmem:[#allocation87_spill] sm:$0xff]  ;;  %v6071_v61 = vrot.slane %v6069_v57, 4  ;;  %v14032_v57 = vld [vmem:[#allocation73_spill] sm:$0xff] }
 0x305   : > { %6369 = vmatmul.bf16.gmra.mxu3 %v6056_v34  ;;  %v4470_v30 = vpop.f32.mrf.mxu2  ;;  %v3277_v63 = vadd.f32 %v14028_v10, %v14027_v12  ;;  %v5562_v52 = vor.u32 %v5561_v39, %v5558_v47  ;;  %v8808_v10 = vld [vmem:[%s10244_s26 + $0x24] sm:$0xff] }
 0x306   : > { %v4540_v31 = vadd.f32 %v12182_v54, %v4470_v30  ;;  %5215 = vrot.lane.b32.xlu1 %v5164_v42, %s10019_s29  ;;  %v5569_v54 = vrot.slane %v5567_v56, 4  ;;  %v12324_v30 = vsel %vm2826_vm4, %v12249_v36, %v12314_v32  ;;  %v3670_v42 = vadd.f32 %v12117_v20, %v3262_v37 }
 0x307   : > { %14026 = vst [vmem:[#allocation42_spill] sm:$0xff] %v12324_v30  ;;  %v13824_v30 = vrot.slane %v14029_v19, 5  ;;  %v12334_v12 = vor.u32 %v6071_v61, %v6068_v11 }
 0x308   : > { %v12319_v34 = vadd.f32 %v4540_v31, %v12100_v48  ;;  %v5570_v43 = vor.u32 %v5569_v54, %v5566_v38  ;;  %v3739_v56 = vadd.f32 %v12115_v60, %v3670_v42  ;;  %v3280_v38 = vadd.f32 %v14032_v57, %v14031_v40 }
 0x309   : > { %v3684_v45 = vpop.f32.mrf.mxu0  ;;  %v14033_v60 = vrot.slane %v12256_v41, 5  ;;  %v14034_v41 = vrot.slane %v12247_v2, 5 }
 0x30a   : > { %14025 = vst [vmem:[#allocation37_spill] sm:$0xff] %v12319_v34  ;;  %v12329_v48 = vadd.f32 %v3684_v45, %v3277_v63  ;;  %v12340_v62 = vpop.f32.mrf.mxu1  ;;  %v5571_v37 = vsel %vm2826_vm4, %v5562_v52, %v5570_v43  ;;  %v12351_v61 = vpop.f32.mrf.mxu3  ;;  %v13826_v63 = vrot.slane %v12338_v6, 5  ;;  %v6073_v52 = vsel %vm2826_vm4, %v12279_v29, %v12334_v12  ;;  %v14038_v29 = vld [vmem:[#allocation68_spill] sm:$0xff] }
 0x30c   : > { %v6739_v11 = vsel %vm2513_vm1, %v14034_v41, %v13826_v63  ;;  %v14041_v63 = vld [vmem:[#allocation91_spill] sm:$0xff] }
 0x30d   : > { %v4472_v31 = vpop.f32.mrf.mxu2  ;;  %v6894_v40 = vshrl.u32 %v6739_v11, 16  ;;  %v6897_v57 = vshll.u32 %v6739_v11, 16  ;;  %v14043_v11 = vld [vmem:[#allocation22_spill] sm:$0xff] }
 0x30e   : > { %v4542_v36 = vadd.f32 %v12238_v27, %v4472_v31  ;;  %v5466_v27 = vsel %vm2513_vm1, %v14033_v60, %v13824_v30  ;;  %v14035_v31 = vld [vmem:[#allocation21_spill] sm:$0xff] }
 0x30f   : > { %v5581_v47 = vshrl.u32 %v5466_v27, 16  ;;  %v5584_v39 = vshll.u32 %v5466_v27, 16  ;;  %v6896_v30 = vrot.slane %v6894_v40, 3  ;;  %v6899_v2 = vrot.slane %v6897_v57, 4 }
 0x310   : > { %v12336_v20 = vadd.f32 %v4542_v36, %v3739_v56  ;;  %v14036_v56 = vld [vmem:[#allocation66_spill] sm:$0xff] }
 0x311   : > { %v3687_v54 = vpop.f32.mrf.mxu0  ;;  %v1699_v36 = vadd.f32 %v14036_v56, %v14035_v31  ;;  %v5583_v27 = vrot.slane %v5581_v47, 3  ;;  %v3282_v31 = vadd.f32 %v14042_v17, %v14041_v63  ;;  %v12399_v63 = vld [vmem:[%s13792_s3] ss:$0 sm:$0xff] }
 0x312   : > { %14030 = vst [vmem:[#allocation18_spill] sm:$0xff] %v12336_v20  ;;  %8478 = vmatmul.msk.bf16.vlgmr.msrb.gmra.mxu2 %vm2539_vm3, %v5571_v37  ;;  %v12355_v42 = vadd.f32 %v3687_v54, %v3280_v38  ;;  %v14037_v38 = vld [vmem:[#allocation23_spill] sm:$0xff]  ;;  %v12376_v56 = vpop.f32.mrf.mxu1 }
 0x313   : > { %v1704_v60 = vadd.f32 %v14038_v29, %v14037_v38  ;;  %v1968_v41 = vadd.f32 %v14040_v4, %v1699_v36  ;;  %v14044_v38 = vld [vmem:[#allocation10_spill] sm:$0xff]  ;;  %v3744_v4 = vadd.f32 %v12271_v25, %v12189_v16 }
 0x314   : > { %4875 = vmatmul.bf16.gmra.mxu0 %v8808_v10  ;;  %v12378_v10 = vor.u32 %v6899_v2, %v6896_v30 }
 0x315   : > { %6374 = vmatmul.bf16.gmra.mxu3 %v6073_v52  ;;  %v4475_v45 = vpop.f32.mrf.mxu2  ;;  %v5586_v52 = vrot.slane %v5584_v39, 4  ;;  %v12385_v39 = vpop.f32.mrf.mxu3  ;;  %v1996_v36 = vmul.f32 %v12399_v63, %v1968_v41  ;;  %v14050_v41 = vld [vmem:[#allocation54_spill] sm:$0xff] }
 0x316   : > { %v4545_v37 = vadd.f32 %v12277_v44, %v4475_v45  ;;  %v12392_v17 = vsel %vm2826_vm4, %v12314_v32, %v12378_v10  ;;  %v9874_v32 = vld [vmem:[#allocation2 + $0x7c] sm:$0xff]  }
 0x317   : > { %v12387_v57 = vor.u32 %v5586_v52, %v5583_v27  ;;  %14046 = vst [vmem:[#allocation44_spill] sm:$0xff] %v12392_v17  ;;  %v14047_v27 = vld [vmem:[#allocation24_spill] sm:$0xff] }
 0x318   : > { %v12371_v54 = vadd.f32 %v4545_v37, %v12163_v49  ;;  %v1702_v49 = vadd.f32 %v14044_v38, %v14043_v11  ;;  %v14045_v37 = vld [vmem:[#allocation59_spill] sm:$0xff]  ;;  %v14048_v52 = vld [vmem:[#allocation72_spill] sm:$0xff] }
 0x319   : > { %v3689_v44 = vpop.f32.mrf.mxu0  ;;  %v1970_v47 = vadd.f32 %v14045_v37, %v1704_v60  ;;  %v1707_v2 = vadd.f32 %v14048_v52, %v14047_v27  ;;  %v14051_v37 = vld [vmem:[#allocation12_spill] sm:$0xff] }
 0x31a   : > { %14039 = vst [vmem:[#allocation57_spill] sm:$0xff] %v12371_v54  ;;  %v12380_v45 = vadd.f32 %v3689_v44, %v3282_v31  ;;  %v5588_v44 = vsel %vm2826_vm4, %v5570_v43, %v12387_v57  ;;  %v1969_v38 = vadd.f32 %v14050_v41, %v1702_v49  ;;  %v14054_v43 = vrot.slane %v14029_v19, 5 }
 0x31b   : > { %v1998_v11 = vmul.f32 %v12399_v63, %v1970_v47 }
 0x31c   : > { %v1997_v19 = vmul.f32 %v12399_v63, %v1969_v38 }
 0x31d   : > { %v4477_v40 = vpop.f32.mrf.mxu2  ;;  %v5438_v60 = vpop.permute.xlu1 %5437 }
 0x31e   : > { %v4547_v30 = vadd.f32 %v4546_v13, %v4477_v40  ;;  %v5493_v16 = vsel %vm2539_vm3, %v9874_v32, %v5438_v60  ;;  %v14052_v40 = vld [vmem:[#allocation81_spill] sm:$0xff]  ;;  %v14053_v60 = vrot.slane %v11997_v23, 5  ;;  %v8809_v32 = vld [vmem:[%s10244_s26 + $0x2c] sm:$0xff] }
 0x31f   : > { %v5572_v25 = vshrl.u32 %v5493_v16, 16  ;;  %v5575_v13 = vshll.u32 %v5493_v16, 16  ;;  %v3285_v29 = vadd.f32 %v14052_v40, %v14051_v37  ;;  %v14055_v16 = vld [vmem:[#allocation62_spill] sm:$0xff]  ;;  %v12430_v37 = vpop.f32.mrf.mxu1 }
 0x320   : > { %v12405_v31 = vadd.f32 %v4547_v30, %v3744_v4  ;;  %v12418_v4 = vld [vmem:[%s13793_s4] ss:$0 sm:$0xff]  ;;  %v5468_v47 = vsel %vm2513_vm1, %v14054_v43, %v14053_v60  ;;  %v1971_v41 = vadd.f32 %v14055_v16, %v1707_v2  ;;  %v4554_v2 = vpop.f32.mrf.mxu3 }
 0x321   : > { %v5440_v17 = vpop.permute.xlu2 %5439  ;;  %v2024_v30 = vadd.f32 %v12418_v4, %v1996_v36  ;;  %v5574_v49 = vrot.slane %v5572_v25, 3  ;;  %v5577_v27 = vrot.slane %v5575_v13, 4  ;;  %v3692_v52 = vpop.f32.mrf.mxu0  ;;  %v2026_v36 = vadd.f32 %v12418_v4, %v1998_v11 }
 0x322   : > { %14049 = vst [vmem:[#allocation47_spill] sm:$0xff] %v12405_v31  ;;  %8479 = vmatmul.msk.bf16.gmra.mxu2 %vm2539_vm3, %v5588_v44  ;;  %v12428_v44 = vadd.f32 %v3692_v52, %v3285_v29  ;;  %v5598_v31 = vshrl.u32 %v5468_v47, 16  ;;  %v5601_v54 = vshll.u32 %v5468_v47, 16  ;;  %v3747_v25 = vadd.f32 %v12312_v33, %v12230_v46 }
 0x323   : > { %v12432_v40 = vor.u32 %v5577_v27, %v5574_v49  ;;  %v2048_v60 = vmax.f32 %v2024_v30, 0.0  ;;  %v14056_v49 = vld [vmem:[#allocation14_spill] sm:$0xff]  ;;  %v1999_v38 = vmul.f32 %v12399_v63, %v1971_v41  ;;  %v2050_v46 = vmax.f32 %v2026_v36, 0.0  ;;  %v14058_v30 = vld [vmem:[#allocation85_spill] sm:$0xff] }
 0x324   : > { %4880 = vmatmul.bf16.gmra.mxu0 %v8809_v32  ;;  %v5495_v11 = vsel %vm2539_vm3, %v14056_v49, %v5440_v17  ;;  %v5600_v33 = vrot.slane %v5598_v31, 3  ;;  %v2025_v20 = vadd.f32 %v12418_v4, %v1997_v19  ;;  %v3749_v36 = vadd.f32 %v12340_v62, %v12264_v26  ;;  %v14060_v62 = vld [vmem:[#allocation88_spill] sm:$0xff] }
 0x325   : > { %v4480_v28 = vpop.f32.mrf.mxu2  ;;  %v2151_v29 = vpop.permute.xlu1 %2150  ;;  %v5579_v43 = vsel %vm2826_vm4, %v12058_v15, %v12432_v40  ;;  %v5589_v15 = vshrl.u32 %v5495_v11, 16  ;;  %v5592_v34 = vshll.u32 %v5495_v11, 16  ;;  %v2027_v31 = vadd.f32 %v12418_v4, %v1999_v38 }
 0x326   : > { %v4550_v13 = vadd.f32 %v12351_v61, %v4480_v28  ;;  %v2216_v47 = vmul.f32 %v2151_v29, %v2048_v60  ;;  %5892 = vmatmul.bf16.gmra.mxu1 %v5579_v43  ;;  %v5603_v28 = vrot.slane %v5601_v54, 4  ;;  %v14057_v61 = vld [vmem:[#allocation95_spill] sm:$0xff]  ;;  %v2049_v19 = vmax.f32 %v2025_v20, 0.0  ;;  %v14059_v20 = vld [vmem:[#allocation13_spill] sm:$0xff] }
 0x327   : > { %v3287_v52 = vadd.f32 %v14058_v30, %v14057_v61  ;;  %v5469_v29 = vrot.slane %v12103_v18, 5  ;;  %v12460_v43 = vpop.f32.mrf.mxu1  ;;  %v5591_v49 = vrot.slane %v5589_v15, 3  ;;  %v5594_v11 = vrot.slane %v5592_v34, 4  ;;  %v8810_v15 = vld [vmem:[%s10244_s26 + $0x34] sm:$0xff] }
 0x328   : > { %v12444_v27 = vadd.f32 %v4550_v13, %v3747_v25  ;;  %v2240_v32 = vpack.c.bf16 %v2216_v47, %v2216_v47  ;;  %v12454_v54 = vor.u32 %v5603_v28, %v5600_v33  ;;  %v2051_v33 = vmax.f32 %v2027_v31, 0.0 }
 0x329   : > { %v2161_v16 = vpop.permute.xlu2 %2160  ;;  %v3694_v17 = vpop.f32.mrf.mxu0  ;;  %v14061_v34 = vrot.slane %v11997_v23, 5 }
 0x32a   : > { %v2218_v50 = vmul.f32 %v2161_v16, %v2050_v46  ;;  %2264 = vst.msk [vmem:[#allocation2 + $0xa4] sm:$0xf] %vm376_vm0, %v2240_v32  ;;  %v12451_v25 = vadd.f32 %v3694_v17, %v3287_v52  ;;  %v4556_v46 = vpop.f32.mrf.mxu3  ;;  %v5605_v26 = vsel %vm2826_vm4, %v12387_v57, %v12454_v54  ;;  %v12476_v52 = vor.u32 %v5594_v11, %v5591_v49 }
 0x32b   : > { %v5470_v30 = vsel %vm2513_vm1, %v14061_v34, %v5469_v29  ;;  %v14062_v34 = vld [vmem:[#allocation39_spill] sm:$0xff] }
 0x32c   : > { %v2242_v13 = vpack.c.bf16 %v2218_v50, %v2218_v50  ;;  %v5615_v23 = vshrl.u32 %v5470_v30, 16 }
 0x32d   : > { %v4482_v41 = vpop.f32.mrf.mxu2  ;;  %v2156_v50 = vpop.permute.xlu1 %2155 }
 0x32e   : > { %v4552_v60 = vadd.f32 %v12385_v39, %v4482_v41  ;;  %2266 = vst.msk [vmem:[#allocation2 + $0xac] sm:$0xf] %vm376_vm0, %v2242_v13  ;;  %v2217_v38 = vmul.f32 %v2156_v50, %v2049_v19  ;;  %v3290_v39 = vadd.f32 %v14060_v62, %v14059_v20  ;;  %v3752_v19 = vadd.f32 %v12376_v56, %v12300_v55  ;;  %v9876_v20 = vld [vmem:[#allocation2 + $0x80] sm:$0xff]  }
 0x330   : > { %v12463_v47 = vadd.f32 %v4552_v60, %v3749_v36  ;;  %v2241_v28 = vpack.c.bf16 %v2217_v38, %v2217_v38  ;;  %v5618_v60 = vshll.u32 %v5470_v30, 16  ;;  %v14063_v30 = vld [vmem:[#allocation11_spill] sm:$0xff] }
 0x331   : > { %v2166_v61 = vpop.permute.xlu2 %2165  ;;  %v3697_v16 = vpop.f32.mrf.mxu0  ;;  %v12479_v17 = vld [vmem:[#allocation2 + $0xa0] sm:$0xff]  }
 0x332   : > { %8480 = vmatmul.msk.bf16.gmra.mxu2 %vm2539_vm3, %v5605_v26  ;;  %v2219_v32 = vmul.f32 %v2166_v61, %v2051_v33  ;;  %2265 = vst.msk [vmem:[#allocation2 + $0xa8] sm:$0xf] %vm376_vm0, %v2241_v28  ;;  %v12482_v57 = vadd.f32 %v3697_v16, %v3290_v39  ;;  %v5383_v13 = vshrl.u32 %v12479_v17, 16  ;;  %v5386_v41 = vshll.u32 %v12479_v17, 16  ;;  %v12495_v28 = vpop.f32.mrf.mxu1 }
 0x333   : > { %v5596_v33 = vsel %vm2826_vm4, %v12432_v40, %v12476_v52  ;;  %v5620_v61 = vrot.slane %v5618_v60, 4  ;;  %v4559_v40 = vpop.f32.mrf.mxu3 }
 0x334   : > { %v2243_v31 = vpack.c.bf16 %v2219_v32, %v2219_v32  ;;  %v5385_v11 = vrot.slane %v5383_v13, 4  ;;  %v5388_v50 = vrot.slane %v5386_v41, 5  ;;  %4885 = vmatmul.bf16.gmra.mxu0 %v8810_v15  ;;  %v3292_v32 = vadd.f32 %v14063_v30, %v14062_v34 }
 0x335   : > { %v4485_v36 = vpop.f32.mrf.mxu2  ;;  %v5210_v38 = vpop.permute.xlu1 %5209 }
 0x336   : > { %v4555_v49 = vadd.f32 %v4554_v2, %v4485_v36  ;;  %2267 = vst.msk [vmem:[#allocation2 + $0xb0] sm:$0xf] %vm376_vm0, %v2243_v31  ;;  %v5269_v62 = vsel %vm2539_vm3, %v9876_v20, %v5210_v38  ;;  %5897 = vmatmul.bf16.gmra.mxu1 %v5596_v33  ;;  %v5389_v39 = vor.u32 %v5388_v50, %v5385_v11  ;;  %v5617_v2 = vrot.slane %v5615_v23, 3 }
 0x337   : > { %v6083_v55 = vshrl.u32 %v5269_v62, 16  ;;  %v6086_v56 = vshll.u32 %v5269_v62, 16  ;;  %v3754_v50 = vadd.f32 %v12430_v37, %v12329_v48  ;;  %v5471_v33 = vrot.slane %v12166_v58, 5 }
 0x338   : > { %v12492_v26 = vadd.f32 %v4555_v49, %v3752_v19  ;;  %v5390_v16 = vsel %vm2376_vm2, %v12187_v14, %v5389_v39  ;;  %v12509_v11 = vor.u32 %v5620_v61, %v5617_v2  ;;  %v14065_v61 = vld [vmem:[#allocation93_spill] sm:$0xff] }
 0x339   : > { %v6085_v15 = vrot.slane %v6083_v55, 3  ;;  %v6088_v13 = vrot.slane %v6086_v56, 4  ;;  %5445 = vrot.lane.b32.xlu2 %v5390_v16, %s10019_s29  ;;  %v3699_v41 = vpop.f32.mrf.mxu0  ;;  %v12502_v31 = vld [vmem:[#allocation2 + $0xa8] sm:$0xff]   ;;  %v5212_v60 = vpop.permute.xlu2 %5211 }
 0x33a   : > { %v12504_v36 = vadd.f32 %v3699_v41, %v3292_v32  ;;  %v5391_v19 = vshrl.u32 %v12502_v31, 16  ;;  %v5394_v14 = vshll.u32 %v12502_v31, 16  ;;  %v9877_v56 = vld [vmem:[#allocation2 + $0x88] sm:$0xff]   ;;  %v5622_v48 = vsel %vm2826_vm4, %v12454_v54, %v12509_v11  ;;  %v12539_v54 = vpop.f32.mrf.mxu1 }
 0x33b   : > { %v12507_v23 = vor.u32 %v6088_v13, %v6085_v15  ;;  %v5272_v34 = vsel %vm2539_vm3, %v9877_v56, %v5212_v60  ;;  %v5472_v32 = vsel %vm2513_vm1, %v5469_v29, %v5471_v33  ;;  %v12537_v16 = vld [vmem:[#allocation2 + $0xa4] sm:$0xff]   ;;  %v8811_v60 = vld [vmem:[%s10244_s26 + $0x3c] sm:$0xff]  ;;  %v4561_v18 = vpop.f32.mrf.mxu3 }
 0x33c   : > { %v5393_v62 = vrot.slane %v5391_v19, 4  ;;  %v5396_v55 = vrot.slane %v5394_v14, 5  ;;  %v6100_v15 = vshrl.u32 %v5272_v34, 16  ;;  %v6103_v13 = vshll.u32 %v5272_v34, 16 }
 0x33d   : > { %v4487_v49 = vpop.f32.mrf.mxu2  ;;  %v6090_v20 = vsel %vm2826_vm4, %v12334_v12, %v12507_v23  ;;  %v5155_v12 = vsel %vm2376_vm2, %v12121_v21, %v12297_v1  ;;  %v5632_v29 = vshrl.u32 %v5472_v32, 16  ;;  %v3757_v14 = vadd.f32 %v12460_v43, %v12355_v42  ;;  %v2082_v42 = vld [vmem:[%s13790_s1 + $0x178] sm:$0xff] }
 0x33e   : > { %v4557_v38 = vadd.f32 %v4556_v46, %v4487_v49  ;;  %6379 = vmatmul.bf16.gmra.mxu3 %v6090_v20  ;;  %v12524_v37 = vor.u32 %v5396_v55, %v5393_v62  ;;  %v14064_v46 = vld [vmem:[#allocation51_spill] sm:$0xff]  ;;  %v5635_v49 = vshll.u32 %v5472_v32, 16  ;;  %v5169_v20 = vshll.u32 %v12537_v16, 16  ;;  %v14067_v62 = vld [vmem:[#allocation25_spill] sm:$0xff] }
 0x33f   : > { %v3295_v30 = vadd.f32 %v14065_v61, %v14064_v46  ;;  %v6102_v56 = vrot.slane %v6100_v15, 3  ;;  %v6105_v34 = vrot.slane %v6103_v13, 4  ;;  %v2081_v46 = vld [vmem:[%s13790_s1 + $0x170] sm:$0xff]  ;;  %v5634_v43 = vrot.slane %v5632_v29, 3 }
 0x340   : > { %v12519_v2 = vadd.f32 %v4557_v38, %v3754_v50  ;;  %v5398_v41 = vsel %vm2376_vm2, %v5389_v39, %v12524_v37  ;;  %v5166_v38 = vshrl.u32 %v12537_v16, 16  ;;  %v14068_v39 = vld [vmem:[#allocation74_spill] sm:$0xff]  ;;  %v3759_v29 = vadd.f32 %v12495_v28, %v12380_v45  ;;  %v14073_v45 = vld [vmem:[#allocation28_spill] sm:$0xff]  ;;  %v14074_v28 = vld [vmem:[#allocation83_spill] sm:$0xff] }
 0x341   : > { %5213 = vrot.lane.b32.xlu2 %v5155_v12, %s10019_s29  ;;  %v3702_v19 = vpop.f32.mrf.mxu0  ;;  %5447 = vrot.lane.b32.xlu0 %v5398_v41, %s10019_s29  ;;  %v1709_v55 = vadd.f32 %v14068_v39, %v14067_v62  ;;  %v14069_v12 = vld [vmem:[#allocation64_spill] sm:$0xff]  ;;  %v12563_v41 = vor.u32 %v6105_v34, %v6102_v56 }
 0x342   : > { %8481 = vmatmul.msk.bf16.gmra.mxu2 %vm2539_vm3, %v5622_v48  ;;  %v12546_v21 = vadd.f32 %v3702_v19, %v3295_v30  ;;  %v5168_v61 = vrot.slane %v5166_v38, 4  ;;  %v5171_v30 = vrot.slane %v5169_v20, 5  ;;  %v12568_v19 = vpop.f32.mrf.mxu1  ;;  %v14071_v38 = vld [vmem:[#allocation27_spill] sm:$0xff]  ;;  %v14072_v20 = vld [vmem:[#allocation77_spill] sm:$0xff] }
 0x343   : > { %v1972_v32 = vadd.f32 %v14069_v12, %v1709_v55  ;;  %v1712_v62 = vadd.f32 %v14072_v20, %v14071_v38  ;;  %v4564_v39 = vpop.f32.mrf.mxu3 }
 0x344   : > { %14066 = vst [vmem:[#allocation26_spill] sm:$0xff] %v12546_v21  ;;  %4890 = vmatmul.bf16.gmra.mxu0 %v8811_v60 }
 0x345   : > { %v4490_v1 = vpop.f32.mrf.mxu2  ;;  %v2000_v55 = vmul.f32 %v12399_v63, %v1972_v32 }
 0x346   : > { %v4560_v50 = vadd.f32 %v4559_v40, %v4490_v1  ;;  %v5637_v40 = vrot.slane %v5635_v49, 4 }
 0x347   : > { %v2028_v32 = vadd.f32 %v12418_v4, %v2000_v55 }
 0x348   : > { %v12554_v48 = vadd.f32 %v4560_v50, %v3757_v14  ;;  %v12570_v1 = vor.u32 %v5637_v40, %v5634_v43  ;;  %v12574_v14 = vor.u32 %v5171_v30, %v5168_v61  ;;  %v5473_v50 = vrot.slane %v12479_v17, 5  ;;  %v14075_v30 = vld [vmem:[#allocation67_spill] sm:$0xff] }
 0x349   : > { %2195 = vperm.xlu2 %9844, %v2081_v46   ;;  %v3704_v15 = vpop.f32.mrf.mxu0  ;;  %2200 = vperm.xlu0 %9842, %v2082_v42  }
 0x34a   : > { %v12566_v13 = vadd.f32 %v3704_v15, %v11991_v9  ;;  %v6107_v9 = vsel %vm2826_vm4, %v12507_v23, %v12563_v41  ;;  %v5639_v42 = vsel %vm2826_vm4, %v12509_v11, %v12570_v1  ;;  %v5173_v23 = vsel %vm2376_vm2, %v12290_v5, %v12574_v14  ;;  %v8812_v11 = vld [vmem:[%s10244_s26 + $0x44] sm:$0xff] }
 0x34b   : > { %v5474_v61 = vsel %vm2513_vm1, %v5471_v33, %v5473_v50  ;;  %v14076_v15 = vld [vmem:[#allocation30_spill] sm:$0xff]  ;;  %v14079_v33 = vld [vmem:[#allocation31_spill] sm:$0xff] }
 0x34c   : > { %14070 = vst [vmem:[#allocation19_spill] sm:$0xff] %v12566_v13  ;;  %v5649_v58 = vshrl.u32 %v5474_v61, 16 }
 0x34d   : > { %v4492_v60 = vpop.f32.mrf.mxu2 }
 0x34e   : > { %v4562_v49 = vadd.f32 %v4561_v18, %v4492_v60  ;;  %6384 = vmatmul.bf16.gmra.mxu3 %v6107_v9  ;;  %v1714_v18 = vadd.f32 %v14074_v28, %v14073_v45  ;;  %v14077_v60 = vld [vmem:[#allocation86_spill] sm:$0xff]  ;;  %v5652_v9 = vshll.u32 %v5474_v61, 16  ;;  %v4566_v61 = vpop.f32.mrf.mxu3 }
 0x350   : > { %v12583_v56 = vadd.f32 %v4562_v49, %v3759_v29  ;;  %v5442_v34 = vpop.permute.xlu0 %5441  ;;  %v1717_v29 = vadd.f32 %v14077_v60, %v14076_v15 }
 0x351   : > { %v5497_v46 = vsel %vm2539_vm3, %v12072_v53, %v5442_v34  ;;  %v1973_v53 = vadd.f32 %v14075_v30, %v1712_v62  ;;  %5217 = vrot.lane.b32.xlu2 %v5173_v23, %s10019_s29  ;;  %v3707_v12 = vpop.f32.mrf.mxu0  ;;  %v1974_v34 = vadd.f32 %v14079_v33, %v1714_v18  ;;  %v3762_v62 = vadd.f32 %v12539_v54, %v12428_v44 }
 0x352   : > { %v5606_v43 = vshrl.u32 %v5497_v46, 16  ;;  %v5609_v40 = vshll.u32 %v5497_v46, 16  ;;  %8482 = vmatmul.msk.bf16.gmra.mxu2 %vm2539_vm3, %v5639_v42  ;;  %v12608_v5 = vadd.f32 %v3707_v12, %v12042_v59  ;;  %v3766_v46 = vpop.f32.mrf.mxu1  ;;  %v2052_v42 = vmax.f32 %v2028_v32, 0.0  ;;  %v14082_v12 = vld [vmem:[#allocation90_spill] sm:$0xff] }
 0x353   : > { %v2001_v55 = vmul.f32 %v12399_v63, %v1973_v53  ;;  %v5651_v44 = vrot.slane %v5649_v58, 3  ;;  %v5654_v54 = vrot.slane %v5652_v9, 4  ;;  %v14081_v53 = vld [vmem:[#allocation34_spill] sm:$0xff]  ;;  %v12637_v58 = vld [vmem:[%s13795_s6] ss:$0 sm:$0xff]  ;;  %v3764_v9 = vadd.f32 %v12568_v19, %v12451_v25 }
 0x354   : > { %v5608_v49 = vrot.slane %v5606_v43, 3  ;;  %v5611_v38 = vrot.slane %v5609_v40, 4  ;;  %14078 = vst [vmem:[#allocation46_spill] sm:$0xff] %v12608_v5  ;;  %4895 = vmatmul.bf16.gmra.mxu0 %v8812_v11  ;;  %v14080_v43 = vld [vmem:[#allocation70_spill] sm:$0xff]  ;;  %v1719_v11 = vadd.f32 %v14082_v12, %v14081_v53 }
 0x355   : > { %v4495_v20 = vpop.f32.mrf.mxu2  ;;  %v1975_v40 = vadd.f32 %v14080_v43, %v1717_v29  ;;  %v2029_v60 = vadd.f32 %v12418_v4, %v2001_v55 }
 0x356   : > { %v12613_v45 = vor.u32 %v5611_v38, %v5608_v49  ;;  %v4565_v28 = vadd.f32 %v4564_v39, %v4495_v20  ;;  %v2002_v39 = vmul.f32 %v12399_v63, %v1974_v34  ;;  %v12631_v38 = vor.u32 %v5654_v54, %v5651_v44  ;;  %v12664_v44 = vld [vmem:[%s13796_s7] ss:$0 sm:$0xff]  ;;  %v9718_v54 = vld [vmem:[#allocation2 + $0xac] sm:$0xff]  }
 0x357   : > { %v2003_v29 = vmul.f32 %v12399_v63, %v1975_v40  ;;  %v13832_v20 = vrot.slane %v12502_v31, 5 }
 0x358   : > { %v12617_v59 = vadd.f32 %v4565_v28, %v3762_v62  ;;  %v2171_v23 = vpop.permute.xlu0 %2170  ;;  %v5613_v18 = vsel %vm2826_vm4, %v12476_v52, %v12613_v45  ;;  %v2030_v34 = vadd.f32 %v12418_v4, %v2002_v39  ;;  %v2053_v28 = vmax.f32 %v2029_v60, 0.0  ;;  %v4569_v39 = vpop.f32.mrf.mxu3 }
 0x359   : > { %v2220_v30 = vmul.f32 %v2171_v23, %v2052_v42  ;;  %5902 = vmatmul.bf16.gmra.mxu1 %v5613_v18  ;;  %v3709_v15 = vpop.f32.mrf.mxu0  ;;  %v2031_v43 = vadd.f32 %v12418_v4, %v2003_v29  ;;  %v5656_v25 = vsel %vm2826_vm4, %v12570_v1, %v12631_v38  ;;  %v5476_v19 = vsel %vm2513_vm1, %v5473_v50, %v13832_v20 }
 0x35a   : > { %v12628_v49 = vadd.f32 %v3709_v15, %v12069_v7  ;;  %v14084_v7 = vld [vmem:[#allocation17_spill] sm:$0xff]  ;;  %v12646_v40 = vpop.f32.mrf.mxu1  ;;  %v2054_v1 = vmax.f32 %v2030_v34, 0.0  ;;  %v5666_v60 = vshrl.u32 %v5476_v19, 16  ;;  %v5669_v29 = vshll.u32 %v5476_v19, 16 }
 0x35b   : > { %v2244_v32 = vpack.c.bf16 %v2220_v30, %v2220_v30  ;;  %v1976_v62 = vadd.f32 %v14084_v7, %v1719_v11  ;;  %v8813_v11 = vld [vmem:[%s10244_s26 + $0x4c] sm:$0xff] }
 0x35c   : > { %14083 = vst [vmem:[#allocation20_spill] sm:$0xff] %v12628_v49 }
 0x35d   : > { %2268 = vst.msk [vmem:[#allocation2 + $0xb4] sm:$0xf] %vm376_vm0, %v2244_v32  ;;  %v4497_v52 = vpop.f32.mrf.mxu2  ;;  %v2055_v32 = vmax.f32 %v2031_v43, 0.0 }
 0x35e   : > { %v4567_v33 = vadd.f32 %v4566_v61, %v4497_v52  ;;  %v4612_v61 = vmul.f32 %v12637_v58, %v12109_v51  ;;  %v2004_v51 = vmul.f32 %v12399_v63, %v1976_v62  ;;  %v12672_v52 = vld [vmem:[#allocation2 + $0xa4] sm:$0xff]  }
 0x360   : > { %v12643_v55 = vadd.f32 %v4567_v33, %v3764_v9  ;;  %v2176_v42 = vpop.permute.xlu0 %2175  ;;  %v5444_v18 = vpop.permute.xlu1 %5443 }
 0x361   : > { %v2221_v23 = vmul.f32 %v2176_v42, %v2053_v28  ;;  %v5499_v30 = vsel %vm2539_vm3, %v12243_v22, %v5444_v18  ;;  %v4861_v50 = vpop.f32.mrf.mxu0  ;;  %v4613_v22 = vmul.f32 %v12637_v58, %v12134_v0  ;;  %v3767_v28 = vadd.f32 %v3766_v46, %v12482_v57  ;;  %v12682_v42 = vld [vmem:[%s13798_s9] ss:$0 sm:$0xff] }
 0x362   : > { %8483 = vmatmul.msk.bf16.gmra.mxu2 %vm2539_vm3, %v5656_v25  ;;  %v5623_v17 = vshrl.u32 %v5499_v30, 16  ;;  %v5626_v12 = vshll.u32 %v5499_v30, 16  ;;  %v4640_v0 = vadd.f32 %v12664_v44, %v4612_v61  ;;  %v5178_v30 = vshll.u32 %v9718_v54, 16 }
 0x363   : > { %v2245_v53 = vpack.c.bf16 %v2221_v23, %v2221_v23  ;;  %v5175_v23 = vshrl.u32 %v9718_v54, 16  ;;  %v4641_v57 = vadd.f32 %v12664_v44, %v4613_v22  ;;  %v5668_v46 = vrot.slane %v5666_v60, 3 }
 0x364   : > { %v12670_v15 = vld [vmem:[#allocation2 + $0xb0] sm:$0xff]   ;;  %v5625_v9 = vrot.slane %v5623_v17, 3  ;;  %v5628_v33 = vrot.slane %v5626_v12, 4  ;;  %4900 = vmatmul.bf16.gmra.mxu0 %v8813_v11  ;;  %v5671_v61 = vrot.slane %v5669_v29, 4  ;;  %v6740_v11 = vrot.slane %v12672_v52, 5 }
 0x365   : > { %2269 = vst.msk [vmem:[#allocation2 + $0xb8] sm:$0xf] %vm376_vm0, %v2245_v53  ;;  %v4500_v34 = vpop.f32.mrf.mxu2  ;;  %v5399_v7 = vshrl.u32 %v12670_v15, 16  ;;  %v5402_v62 = vshll.u32 %v12670_v15, 16  ;;  %v4862_v54 = vadd.f32 %v12682_v42, %v4861_v50  ;;  %v5177_v60 = vrot.slane %v5175_v23, 4 }
 0x366   : > { %v4570_v43 = vadd.f32 %v4569_v39, %v4500_v34  ;;  %v12684_v18 = vor.u32 %v5628_v33, %v5625_v9  ;;  %v2032_v34 = vadd.f32 %v12418_v4, %v2004_v51  ;;  %v5180_v29 = vrot.slane %v5178_v30, 5  ;;  %v4571_v51 = vpop.f32.mrf.mxu3 }
 0x367   : > { %v5401_v25 = vrot.slane %v5399_v7, 4  ;;  %v5404_v19 = vrot.slane %v5402_v62, 5  ;;  %v12698_v7 = vpop.f32.mrf.mxu1  ;;  %v4664_v62 = vmax.f32 %v4640_v0, 0.0  ;;  %v3769_v50 = vadd.f32 %v12646_v40, %v12504_v36 }
 0x368   : > { %v12686_v53 = vadd.f32 %v4570_v43, %v3767_v28  ;;  %v2186_v17 = vpop.permute.xlu0 %2185  ;;  %v2181_v20 = vpop.permute.xlu1 %2180  ;;  %v5630_v39 = vsel %vm2826_vm4, %v12613_v45, %v12684_v18  ;;  %14085 = vst [vmem:[#allocation52_spill] sm:$0xff] %v12698_v7  ;;  %v4665_v43 = vmax.f32 %v4641_v57, 0.0  ;;  %v5477_v57 = vrot.slane %v12670_v15, 5 }
 0x369   : > { %v2223_v12 = vmul.f32 %v2186_v17, %v2055_v32  ;;  %v12693_v9 = vor.u32 %v5404_v19, %v5401_v25  ;;  %v2222_v33 = vmul.f32 %v2181_v20, %v2054_v1  ;;  %5907 = vmatmul.bf16.gmra.mxu1 %v5630_v39  ;;  %v4863_v32 = vpop.f32.mrf.mxu0  ;;  %v12707_v1 = vld [vmem:[#allocation2 + $0xac] sm:$0xff]   ;;  %v12712_v19 = vor.u32 %v5671_v61, %v5668_v46 }
 0x36a   : > { %v4864_v20 = vadd.f32 %v12682_v42, %v4863_v32  ;;  %v4921_v23 = vadd.f32 %v4862_v54, %v4664_v62  ;;  %v2056_v39 = vmax.f32 %v2032_v34, 0.0  ;;  %v13833_v46 = vrot.slane %v12707_v1, 5 }
 0x36b   : > { %v2247_v22 = vpack.c.bf16 %v2223_v12, %v2223_v12  ;;  %v5406_v45 = vsel %vm2376_vm2, %v12524_v37, %v12693_v9  ;;  %v2246_v28 = vpack.c.bf16 %v2222_v33, %v2222_v33  ;;  %v14086_v37 = vrot.slane %v12338_v6, 5 }
 0x36c   : > { %5449 = vrot.lane.b32.xlu1 %v5406_v45, %s10019_s29  ;;  %v4922_v30 = vadd.f32 %v4864_v20, %v4665_v43  ;;  %v12719_v12 = vor.u32 %v5180_v29, %v5177_v60  ;;  %v5673_v6 = vsel %vm2826_vm4, %v12631_v38, %v12712_v19  ;;  %v14087_v33 = vrot.slane %v12502_v31, 5  ;;  %v8814_v45 = vld [vmem:[%s10244_s26 + $0x54] sm:$0xff] }
 0x36d   : > { %2271 = vst.msk [vmem:[#allocation2 + $0xc0] sm:$0xf] %vm376_vm0, %v2247_v22  ;;  %v4502_v25 = vpop.f32.mrf.mxu2  ;;  %v6741_v0 = vsel %vm2513_vm1, %v14086_v37, %v6740_v11  ;;  %v9719_v38 = vld [vmem:[#allocation2 + $0xb4] sm:$0xff]   ;;  %v4614_v29 = vmul.f32 %v12637_v58, %v12173_v35  ;;  %v6743_v31 = vsel %vm2513_vm1, %v6740_v11, %v13833_v46 }
 0x36e   : > { %2270 = vst.msk [vmem:[#allocation2 + $0xbc] sm:$0xf] %vm376_vm0, %v2246_v28  ;;  %v4572_v17 = vadd.f32 %v4571_v51, %v4502_v25  ;;  %v9064_v36 = vpack.c.bf16 %v4922_v30, %v4921_v23  ;;  %v5478_v34 = vsel %vm2513_vm1, %v14087_v33, %v5477_v57  ;;  %v6911_v22 = vshrl.u32 %v6741_v0, 16  ;;  %v14096_v46 = vld [vmem:[#allocation36_spill] sm:$0xff] }
 0x36f   : > { %v5182_v32 = vsel %vm2376_vm2, %v12574_v14, %v12719_v12  ;;  %v6914_v60 = vshll.u32 %v6741_v0, 16  ;;  %v12746_v20 = vpop.f32.mrf.mxu1  ;;  %v4615_v14 = vmul.f32 %v12637_v58, %v12208_v24  ;;  %v5683_v25 = vshrl.u32 %v5478_v34, 16 }
 0x370   : > { %v12721_v40 = vadd.f32 %v4572_v17, %v3769_v50  ;;  %v2191_v61 = vpop.permute.xlu1 %2190  ;;  %9065 = vst [vmem:[%s12727_s12] sm:$0xff] %v9064_v36   ;;  %v6913_v43 = vrot.slane %v6911_v22, 3  ;;  %v5686_v35 = vshll.u32 %v5478_v34, 16  ;;  %v5184_v11 = vshrl.u32 %v9719_v38, 16 }
 0x371   : > { %v2224_v54 = vmul.f32 %v2191_v61, %v2056_v39  ;;  %v4866_v28 = vpop.f32.mrf.mxu0  ;;  %14088 = vst [vmem:[#allocation48_spill] sm:$0xff] %v12746_v20  ;;  %v6916_v37 = vrot.slane %v6914_v60, 4  ;;  %v5187_v30 = vshll.u32 %v9719_v38, 16  ;;  %v4642_v17 = vadd.f32 %v12664_v44, %v4614_v29 }
 0x372   : > { %8484 = vmatmul.msk.bf16.gmra.mxu2 %vm2539_vm3, %v5673_v6  ;;  %v4643_v61 = vadd.f32 %v12664_v44, %v4615_v14  ;;  %v5685_v6 = vrot.slane %v5683_v25, 3  ;;  %v6928_v33 = vshrl.u32 %v6743_v31, 16  ;;  %v4867_v22 = vadd.f32 %v12682_v42, %v4866_v28 }
 0x373   : > { %v2248_v62 = vpack.c.bf16 %v2224_v54, %v2224_v54  ;;  %v6917_v39 = vor.u32 %v6916_v37, %v6913_v43  ;;  %v5688_v54 = vrot.slane %v5686_v35, 4  ;;  %v5189_v60 = vrot.slane %v5187_v30, 5 }
 0x374   : > { %5219 = vrot.lane.b32.xlu1 %v5182_v32, %s10019_s29  ;;  %4905 = vmatmul.bf16.gmra.mxu0 %v8814_v45  ;;  %v5186_v32 = vrot.slane %v5184_v11, 4  ;;  %v4666_v38 = vmax.f32 %v4642_v17, 0.0  ;;  %v6931_v37 = vshll.u32 %v6743_v31, 16  ;;  %v4667_v14 = vmax.f32 %v4643_v61, 0.0 }
 0x375   : > { %v12750_v50 = vpop.f32.mrf.mxu2  ;;  %v12752_v51 = vld [vmem:[#allocation2 + $0xb8] sm:$0xff]   ;;  %2272 = vst.msk [vmem:[#allocation2 + $0xc4] sm:$0xf] %vm376_vm0, %v2248_v62  ;;  %v12762_v45 = vsel %vm2826_vm4, %v12378_v10, %v6917_v39  ;;  %v12770_v28 = vor.u32 %v5688_v54, %v5685_v6  ;;  %v6930_v10 = vrot.slane %v6928_v33, 3 }
 0x376   : > { %v5407_v0 = vshrl.u32 %v12752_v51, 16  ;;  %v5410_v23 = vshll.u32 %v12752_v51, 16  ;;  %v8836_v62 = vld [vmem:[#allocation3 + $0x58] sm:$0xff]  ;;  %14089 = vst [vmem:[#allocation53_spill] sm:$0xff] %v12762_v45  ;;  %v13834_v31 = vrot.slane %v12752_v51, 5  ;;  %v4923_v17 = vadd.f32 %v4867_v22, %v4666_v38  ;;  %v8835_v38 = vld [vmem:[#allocation3 + $0x50] sm:$0xff] }
 0x377   : > { %6429 = vmatpush.bf16.msra.mxu0 %v8836_v62  ;;  %v12781_v30 = vpop.f32.mrf.mxu1  ;;  %v6933_v61 = vrot.slane %v6931_v37, 4  ;;  %v5690_v33 = vsel %vm2826_vm4, %v12712_v19, %v12770_v28 }
 0x378   : > { %v5409_v36 = vrot.slane %v5407_v0, 4  ;;  %v5412_v24 = vrot.slane %v5410_v23, 5  ;;  %14092 = vst [vmem:[#allocation61_spill] sm:$0xff] %v12781_v30  ;;  %v5480_v22 = vsel %vm2513_vm1, %v5477_v57, %v13834_v31 }
 0x379   : > { %v4868_v29 = vpop.f32.mrf.mxu0  ;;  %v12789_v62 = vor.u32 %v6933_v61, %v6930_v10  ;;  %v12818_v61 = vpop.f32.mrf.mxu3 }
 0x37a   : > { %v5413_v34 = vor.u32 %v5412_v24, %v5409_v36  ;;  %v4869_v25 = vadd.f32 %v12682_v42, %v4868_v29  ;;  %v5190_v24 = vor.u32 %v5189_v60, %v5186_v32  ;;  %v4616_v32 = vmul.f32 %v12637_v58, %v12245_v3  ;;  %v8815_v60 = vld [vmem:[%s10244_s26 + $0x5c] sm:$0xff] }
 0x37b   : > { %v12807_v37 = vsel %vm2826_vm4, %v6917_v39, %v12789_v62  ;;  %v4617_v3 = vmul.f32 %v12637_v58, %v12281_v8  ;;  %6430 = vmatpush.bf16.msra.mxu0 %v8835_v38 }
 0x37c   : > { %v5414_v43 = vsel %vm2376_vm2, %v12693_v9, %v5413_v34  ;;  %v12772_v0 = vld [vmem:[#allocation2 + $0xc0] sm:$0xff]   ;;  %v9164_v9 = vunpack.c.h.b16 %v12752_v51  ;;  %v4924_v36 = vadd.f32 %v4869_v25, %v4667_v14  ;;  %v5191_v19 = vsel %vm2376_vm2, %v12719_v12, %v5190_v24  ;;  %14093 = vst [vmem:[#allocation45_spill] sm:$0xff] %v12807_v37 }
 0x37d   : > { %5451 = vrot.lane.b32.xlu0 %v5414_v43, %s10019_s29  ;;  %v12768_v35 = vpop.f32.mrf.mxu2  ;;  %v12774_v23 = vld [vmem:[#allocation2 + $0xc4] sm:$0xf]  ;;  %v12777_v11 = vunpack.c.l.b16 %v12772_v0  ;;  %v5416_v29 = vshrl.u32 %v12772_v0, 16  ;;  %v5419_v43 = vshll.u32 %v12772_v0, 16  ;;  %v5700_v12 = vshrl.u32 %v5480_v22, 16 }
 0x37e   : > { %14090 = vst [vmem:[#allocation41_spill] sm:$0xff] %v12774_v23  ;;  %v9069_v54 = vpack.c.bf16 %v4924_v36, %v4923_v17  ;;  %v5703_v17 = vshll.u32 %v5480_v22, 16  ;;  %v8834_v36 = vld [vmem:[#allocation3 + $0x48] sm:$0xff]  ;;  %v4645_v22 = vadd.f32 %v12664_v44, %v4617_v3 }
 0x37f   : > { %14091 = vst [vmem:[#allocation60_spill] sm:$0xff] %v12777_v11  ;;  %v12784_v6 = vpack.c.b16 %v12777_v11, %v9164_v9  ;;  %v5418_v25 = vrot.slane %v5416_v29, 4  ;;  %v5421_v10 = vrot.slane %v5419_v43, 5  ;;  %v12823_v43 = vpop.f32.mrf.mxu1  ;;  %6431 = vmatpush.bf16.msra.mxu0 %v8834_v36 }
 0x380   : > { %9413 = vst [vmem:[%s12727_s12 + $0x8] sm:$0xff] %v9069_v54   ;;  %v4644_v54 = vadd.f32 %v12664_v44, %v4616_v32  ;;  %v5705_v38 = vrot.slane %v5703_v17, 4  ;;  %v14097_v32 = vld [vmem:[#allocation92_spill] sm:$0xff] }
 0x381   : > { %v4871_v14 = vpop.f32.mrf.mxu0  ;;  %v5193_v15 = vshrl.u32 %v12784_v6, 16  ;;  %v5196_v57 = vshll.u32 %v12784_v6, 16  ;;  %v12816_v39 = vor.u32 %v5421_v10, %v5418_v25  ;;  %14095 = vst [vmem:[#allocation65_spill] sm:$0xff] %v12823_v43  ;;  %v8833_v25 = vld [vmem:[#allocation3 + $0x40] sm:$0xff]  ;;  %v8860_v10 = vld [vmem:[#allocation3 + $0x118] sm:$0xff]  ;;  %v1722_v31 = vadd.f32 %v14097_v32, %v14096_v46  ;;  %v14099_v46 = vld [vmem:[#allocation58_spill] sm:$0xff] }
 0x382   : > { %8485 = vmatmul.msk.bf16.gmra.mxu2 %vm2539_vm3, %v5690_v33  ;;  %v4668_v11 = vmax.f32 %v4644_v54, 0.0  ;;  %v6596_v54 = vshrl.u32 %v14099_v46, 16 }
 0x383   : > { %v5423_v33 = vsel %vm2376_vm2, %v5413_v34, %v12816_v39  ;;  %v5195_v29 = vrot.slane %v5193_v15, 4  ;;  %v5198_v8 = vrot.slane %v5196_v57, 5  ;;  %v4669_v57 = vmax.f32 %v4645_v22, 0.0  ;;  %6432 = vmatpush.bf16.msra.mxu0 %v8833_v25  ;;  %7231 = vmatpush.bf16.msra.mxu2 %v8860_v10 }
 0x384   : > { %4910 = vmatmul.bf16.gmra.mxu0 %v8815_v60  ;;  %5453 = vrot.lane.b32.xlu2 %v5423_v33, %s10019_s29  ;;  %v4872_v60 = vadd.f32 %v12682_v42, %v4871_v14  ;;  %v12838_v14 = vld [vmem:[#allocation2 + $0xb4] sm:$0xff]  }
 0x385   : > { %5221 = vrot.lane.b32.xlu0 %v5191_v19, %s10019_s29  ;;  %v12814_v9 = vpop.f32.mrf.mxu2  ;;  %v5702_v19 = vrot.slane %v5700_v12, 3  ;;  %v12830_v15 = vor.u32 %v5198_v8, %v5195_v29  ;;  %v13836_v12 = vrot.slane %v12772_v0, 5  ;;  %v6599_v29 = vshll.u32 %v14099_v46, 16  ;;  %v14100_v8 = vld [vmem:[#allocation75_spill] sm:$0xff]  ;;  %v12859_v46 = vpop.f32.mrf.mxu3 }
 0x386   : > { %14094 = vst [vmem:[#allocation63_spill] sm:$0xff] %v12814_v9  ;;  %v4925_v17 = vadd.f32 %v4872_v60, %v4668_v11  ;;  %v1977_v22 = vadd.f32 %v14100_v8, %v1722_v31  ;;  %v14101_v31 = vrot.slane %v12752_v51, 5  ;;  %v14102_v60 = vld [vmem:[#allocation37_spill] sm:$0xff]  ;;  %v6598_v51 = vrot.slane %v6596_v54, 4 }
 0x387   : > { %v12835_v3 = vor.u32 %v5705_v38, %v5702_v19  ;;  %v5200_v32 = vsel %vm2376_vm2, %v5190_v24, %v12830_v15  ;;  %v12845_v25 = vpop.f32.mrf.mxu1  ;;  %v6601_v23 = vrot.slane %v6599_v29, 5  ;;  %v12880_v9 = vld [vmem:[#allocation2 + $0xbc] sm:$0xff]  }
 0x388   : > { %v5482_v24 = vsel %vm2513_vm1, %v14101_v31, %v13836_v12  ;;  %v8856_v31 = vld [vmem:[#allocation3 + $0xf8] sm:$0xff]  ;;  %v14104_v12 = vrot.slane %v12707_v1, 5 }
 0x389   : > { %v4873_v34 = vpop.f32.mrf.mxu0  ;;  %v5707_v11 = vsel %vm2826_vm4, %v12770_v28, %v12835_v3  ;;  %v5717_v49 = vshrl.u32 %v5482_v24, 16  ;;  %7158 = vmatpush.bf16.msra.mxu1 %v8856_v31 }
 0x38a   : > { %v4874_v37 = vadd.f32 %v12682_v42, %v4873_v34  ;;  %v9878_v34 = vld [vmem:[#allocation2 + $0x8c] sm:$0xff]  }
 0x38b   : > { %v6613_v19 = vshrl.u32 %v9878_v34, 16  ;;  %v6616_v38 = vshll.u32 %v9878_v34, 16  ;;  %v8816_v34 = vld [vmem:[%s10244_s26 + $0x64] sm:$0xff] }
 0x38c   : > { %v4926_v36 = vadd.f32 %v4874_v37, %v4669_v57  ;;  %5223 = vrot.lane.b32.xlu2 %v5200_v32, %s10019_s29  ;;  %v6744_v37 = vrot.slane %v12838_v14, 5  ;;  %v4618_v57 = vmul.f32 %v12637_v58, %v14102_v60  ;;  %v14103_v32 = vld [vmem:[#allocation18_spill] sm:$0xff]  ;;  %v2005_v60 = vmul.f32 %v12399_v63, %v1977_v22 }
 0x38d   : > { %v12833_v33 = vpop.f32.mrf.mxu2  ;;  %v4619_v28 = vmul.f32 %v12637_v58, %v14103_v32  ;;  %v6615_v32 = vrot.slane %v6613_v19, 4  ;;  %v6618_v54 = vrot.slane %v6616_v38, 5  ;;  %v12882_v19 = vor.u32 %v6601_v23, %v6598_v51  ;;  %v12900_v51 = vpop.f32.mrf.mxu3 }
 0x38e   : > { %14098 = vst [vmem:[#allocation9_spill] sm:$0xff] %v12833_v33  ;;  %v9074_v10 = vpack.c.bf16 %v4926_v36, %v4925_v17  ;;  %v9879_v17 = vld [vmem:[#allocation2 + $0x94] sm:$0xff]   ;;  %v6745_v45 = vsel %vm2513_vm1, %v14104_v12, %v6744_v37  ;;  %v4646_v33 = vadd.f32 %v12664_v44, %v4618_v57  ;;  %v12876_v12 = vld [vmem:[#allocation2 + $0x9c] sm:$0xff]   ;;  %v12886_v57 = vadd.f32 %v12418_v4, %v2005_v60 }
 0x38f   : > { %v6622_v36 = vshrl.u32 %v9879_v17, 16  ;;  %v6625_v8 = vshll.u32 %v9879_v17, 16  ;;  %v8880_v17 = vld [vmem:[%s13797_s8 + $0x38] sm:$0xff]  ;;  %v6945_v29 = vshrl.u32 %v6745_v45, 16  ;;  %v6948_v5 = vshll.u32 %v6745_v45, 16  ;;  %14106 = vst [vmem:[#allocation80_spill] sm:$0xff] %v12900_v51 }
 0x390   : > { %9414 = vst [vmem:[%s12727_s12 + $0x10] sm:$0xff] %v9074_v10   ;;  %7564 = vmatpush.bf16.msra.mxu3 %v8880_v17  ;;  %v4647_v38 = vadd.f32 %v12664_v44, %v4619_v28  ;;  %v5719_v45 = vrot.slane %v5717_v49, 3  ;;  %v4670_v17 = vmax.f32 %v4646_v33, 0.0  ;;  %v13837_v23 = vrot.slane %v12880_v9, 5  ;;  %v12895_v28 = vpop.f32.mrf.mxu1 }
 0x391   : > { %v4876_v43 = vpop.f32.mrf.mxu0  ;;  %v6624_v22 = vrot.slane %v6622_v36, 4  ;;  %v6947_v36 = vrot.slane %v6945_v29, 3  ;;  %14105 = vst [vmem:[#allocation49_spill] sm:$0xff] %v12895_v28  ;;  %v6652_v33 = vshll.u32 %v12707_v1, 16 }
 0x392   : > { %8486 = vmatmul.msk.bf16.gmra.mxu2 %vm2539_vm3, %v5707_v11  ;;  %v5720_v11 = vshll.u32 %v5482_v24, 16  ;;  %v6627_v24 = vrot.slane %v6625_v8, 5  ;;  %v6950_v8 = vrot.slane %v6948_v5, 4  ;;  %v4877_v49 = vadd.f32 %v12682_v42, %v4876_v43 }
 0x393   : > { %v5446_v10 = vpop.permute.xlu2 %5445  ;;  %v6649_v5 = vshrl.u32 %v12707_v1, 16 }
 0x394   : > { %v5501_v63 = vsel %vm2539_vm3, %v12876_v12, %v5446_v10  ;;  %4915 = vmatmul.bf16.gmra.mxu0 %v8816_v34  ;;  %v5722_v31 = vrot.slane %v5720_v11, 4  ;;  %6702 = vrot.lane.b32.xlu2 %v12882_v19, %s10019_s29  ;;  %v12890_v10 = vor.u32 %v6618_v54, %v6615_v32  ;;  %v12892_v34 = vor.u32 %v6627_v24, %v6624_v22  ;;  %v9881_v22 = vld [vmem:[#allocation2 + $0x90] sm:$0xff]  }
 0x395   : > { %v12873_v30 = vpop.f32.mrf.mxu2  ;;  %v5640_v20 = vshrl.u32 %v5501_v63, 16  ;;  %v5643_v13 = vshll.u32 %v5501_v63, 16  ;;  %v6747_v32 = vsel %vm2513_vm1, %v6744_v37, %v13837_v23  ;;  %v6640_v24 = vshrl.u32 %v12672_v52, 16 }
 0x396   : > { %v12902_v11 = vor.u32 %v5722_v31, %v5719_v45  ;;  %v6962_v63 = vshrl.u32 %v6747_v32, 16  ;;  %v6629_v37 = vsel %vm2376_vm2, %v12890_v10, %v12892_v34  ;;  %v4927_v45 = vadd.f32 %v4877_v49, %v4670_v17 }
 0x397   : > { %v5642_v7 = vrot.slane %v5640_v20, 3  ;;  %v5645_v21 = vrot.slane %v5643_v13, 4  ;;  %v4671_v20 = vmax.f32 %v4647_v38, 0.0  ;;  %v6951_v13 = vor.u32 %v6950_v8, %v6947_v36 }
 0x398   : > { %v6643_v38 = vshll.u32 %v12672_v52, 16  ;;  %v6654_v8 = vrot.slane %v6652_v33, 5  ;;  %v6965_v23 = vshll.u32 %v6747_v32, 16  ;;  %v6642_v52 = vrot.slane %v6640_v24, 4 }
 0x399   : > { %v12898_v4 = vor.u32 %v5645_v21, %v5642_v7  ;;  %v4878_v60 = vpop.f32.mrf.mxu0  ;;  %v12917_v29 = vsel %vm2826_vm4, %v12789_v62, %v6951_v13  ;;  %v6651_v62 = vrot.slane %v6649_v5, 4  ;;  %v5216_v5 = vpop.permute.xlu1 %5215  ;;  %v2057_v24 = vmax.f32 %v12886_v57, 0.0  ;;  %v8879_v57 = vld [vmem:[%s13797_s8 + $0x30] sm:$0xff] }
 0x39a   : > { %v4879_v54 = vadd.f32 %v12682_v42, %v4878_v60  ;;  %14108 = vst [vmem:[#allocation33_spill] sm:$0xff] %v12917_v29  ;;  %v6964_v60 = vrot.slane %v6962_v63, 3  ;;  %v6645_v17 = vrot.slane %v6643_v38, 5  ;;  %v6967_v49 = vrot.slane %v6965_v23, 4  ;;  %v14109_v63 = vld [vmem:[#allocation57_spill] sm:$0xff]  ;;  %7565 = vmatpush.bf16.msra.mxu3 %v8879_v57 }
 0x39b   : > { %v5214_v21 = vpop.permute.xlu2 %5213  ;;  %v5647_v7 = vsel %vm2826_vm4, %v12684_v18, %v12898_v4  ;;  %v12933_v32 = vor.u32 %v6654_v8, %v6651_v62  ;;  %v14112_v8 = vld [vmem:[#allocation78_spill] sm:$0xff] }
 0x39c   : > { %v5275_v1 = vsel %vm2539_vm3, %v9881_v22, %v5214_v21  ;;  %5912 = vmatmul.bf16.gmra.mxu1 %v5647_v7  ;;  %v4928_v31 = vadd.f32 %v4879_v54, %v4671_v20  ;;  %6708 = vrot.lane.b32.xlu2 %v6629_v37, %s10019_s29  ;;  %v5724_v22 = vsel %vm2826_vm4, %v12835_v3, %v12902_v11  ;;  %v14110_v37 = vld [vmem:[#allocation47_spill] sm:$0xff] }
 0x39d   : > { %v12910_v43 = vpop.f32.mrf.mxu2  ;;  %v6117_v18 = vshrl.u32 %v5275_v1, 16  ;;  %v6120_v36 = vshll.u32 %v5275_v1, 16  ;;  %v12935_v54 = vor.u32 %v6967_v49, %v6964_v60  ;;  %v4620_v1 = vmul.f32 %v12637_v58, %v14109_v63  ;;  %v8855_v60 = vld [vmem:[#allocation3 + $0xf0] sm:$0xff]  ;;  %v14114_v63 = vld [vmem:[#allocation38_spill] sm:$0xff] }
 0x39e   : > { %14107 = vst [vmem:[#allocation29_spill] sm:$0xff] %v12910_v43  ;;  %v9079_v43 = vpack.c.bf16 %v4928_v31, %v4927_v45  ;;  %v4621_v3 = vmul.f32 %v12637_v58, %v14110_v37  ;;  %7159 = vmatpush.bf16.msra.mxu1 %v8855_v60  ;;  %v14115_v37 = vld [vmem:[#allocation94_spill] sm:$0xff] }
 0x39f   : > { %v6119_v21 = vrot.slane %v6117_v18, 3  ;;  %v6122_v7 = vrot.slane %v6120_v36, 4  ;;  %v12947_v18 = vor.u32 %v6645_v17, %v6642_v52  ;;  %v12949_v36 = vpop.f32.mrf.mxu3  ;;  %v4648_v52 = vadd.f32 %v12664_v44, %v4620_v1 }
 0x3a0   : > { %9415 = vst [vmem:[%s12727_s12 + $0x18] sm:$0xff] %v9079_v43   ;;  %v4649_v49 = vadd.f32 %v12664_v44, %v4621_v3 }
 0x3a1   : > { %v12931_v20 = vor.u32 %v6122_v7, %v6119_v21  ;;  %v4881_v33 = vpop.f32.mrf.mxu0  ;;  %14111 = vst [vmem:[#allocation15_spill] sm:$0xff] %v12949_v36  ;;  %v9882_v21 = vld [vmem:[#allocation2 + $0x98] sm:$0xff]  }
 0x3a2   : > { %8487 = vmatmul.msk.bf16.gmra.mxu2 %vm2539_vm3, %v5724_v22  ;;  %v5278_v7 = vsel %vm2539_vm3, %v9882_v21, %v5216_v5  ;;  %v6656_v22 = vsel %vm2376_vm2, %v12947_v18, %v12933_v32  ;;  %v4882_v5 = vadd.f32 %v12682_v42, %v4881_v33  ;;  %v12977_v21 = vld [vmem:[#allocation2 + $0x7c] sm:$0xff]  }
 0x3a3   : > { %v5893_v45 = vpop.f32.mrf.mxu1  ;;  %v6124_v23 = vsel %vm2826_vm4, %v12563_v41, %v12931_v20  ;;  %v2196_v38 = vpop.permute.xlu2 %2195  ;;  %v12958_v41 = vsel %vm2826_vm4, %v6951_v13, %v12935_v54  ;;  %v6134_v13 = vshrl.u32 %v5278_v7, 16  ;;  %v13838_v57 = vrot.slane %v12977_v21, 5 }
 0x3a4   : > { %6389 = vmatmul.bf16.gmra.mxu3 %v6124_v23  ;;  %v2225_v62 = vmul.f32 %v2196_v38, %v2057_v24  ;;  %8538 = vmatmul.msk.bf16.vlgmr.msra.gmra.mxu0 %vm2539_vm3, %v14112_v8  ;;  %14113 = vst [vmem:[#allocation69_spill] sm:$0xff] %v12958_v41  ;;  %v4672_v23 = vmax.f32 %v4648_v52, 0.0  ;;  %v4673_v38 = vmax.f32 %v4649_v49, 0.0  ;;  %v14118_v8 = vld [vmem:[#allocation79_spill] sm:$0xff]  ;;  %v6667_v52 = vshrl.u32 %v12880_v9, 16 }
 0x3a5   : > { %v5962_v31 = vpop.f32.mrf.mxu2  ;;  %6714 = vrot.lane.b32.xlu2 %v6656_v22, %s10019_s29  ;;  %v6670_v49 = vshll.u32 %v12880_v9, 16 }
 0x3a6   : > { %v12945_v43 = vadd.f32 %v5962_v31, %v5893_v45  ;;  %v2249_v17 = vpack.c.bf16 %v2225_v62, %v2225_v62  ;;  %v1724_v45 = vadd.f32 %v14115_v37, %v14114_v63  ;;  %v6137_v31 = vshll.u32 %v5278_v7, 16 }
 0x3a7   : > { %v6136_v7 = vrot.slane %v6134_v13, 3  ;;  %v4929_v22 = vadd.f32 %v4882_v5, %v4672_v23  ;;  %v6365_v63 = vpop.f32.mrf.mxu3  ;;  %v9884_v13 = vld [vmem:[%s13792_s3] ss:$0 sm:$0xff]  ;;  %v14119_v5 = vld [vmem:[#allocation32_spill] sm:$0xff] }
 0x3a8   : > { %2273 = vst.msk [vmem:[#allocation2 + $0xc8] sm:$0xf] %vm376_vm0, %v2249_v17  ;;  %v1978_v60 = vadd.f32 %v14118_v8, %v1724_v45  ;;  %v6139_v33 = vrot.slane %v6137_v31, 4  ;;  %v14120_v23 = vrot.slane %v14119_v5, 5 }
 0x3a9   : > { %v4883_v24 = vpop.f32.mrf.mxu0 }
 0x3aa   : > { %v4884_v1 = vadd.f32 %v12682_v42, %v4883_v24  ;;  %v12986_v45 = vor.u32 %v6139_v33, %v6136_v7  ;;  %v2006_v31 = vmul.f32 %v9884_v13, %v1978_v60  ;;  %v4623_v33 = vmul.f32 %v12637_v58, %v12463_v47 }
 0x3ab   : > { %v12972_v62 = vpop.f32.mrf.mxu1  ;;  %v5218_v8 = vpop.permute.xlu2 %5217 }
 0x3ac   : > { %14116 = vst [vmem:[#allocation56_spill] sm:$0xff] %v12972_v62  ;;  %v4930_v17 = vadd.f32 %v4884_v1, %v4673_v38  ;;  %v5236_v38 = vsel %vm2513_vm1, %v14120_v23, %v13838_v57  ;;  %v6141_v5 = vsel %vm2826_vm4, %v12931_v20, %v12986_v45  ;;  %v9885_v23 = vld [vmem:[#allocation2 + $0xa0] sm:$0xff]  }
 0x3ad   : > { %v12974_v3 = vpop.f32.mrf.mxu2  ;;  %v9886_v20 = vld [vmem:[%s13793_s4] ss:$0 sm:$0xff] }
 0x3ae   : > { %14117 = vst [vmem:[#allocation87_spill] sm:$0xff] %v12974_v3  ;;  %v9084_v37 = vpack.c.bf16 %v4930_v17, %v4929_v22  ;;  %v4622_v3 = vmul.f32 %v12637_v58, %v12444_v27  ;;  %v6669_v22 = vrot.slane %v6667_v52, 4  ;;  %v6672_v17 = vrot.slane %v6670_v49, 5 }
 0x3af   : > { %v12982_v24 = vld [vmem:[#allocation2 + $0xc4] sm:$0xff]   ;;  %v5281_v52 = vsel %vm2539_vm3, %v9885_v23, %v5218_v8  ;;  %v2034_v41 = vadd.f32 %v9886_v20, %v2006_v31  ;;  %v6075_v8 = vshrl.u32 %v5236_v38, 16  ;;  %v13027_v36 = vpop.f32.mrf.mxu3 }
 0x3b0   : > { %9416 = vst [vmem:[%s12727_s12 + $0x20] sm:$0xff] %v9084_v37   ;;  %v6676_v27 = vshrl.u32 %v12982_v24, 16  ;;  %v6679_v7 = vshll.u32 %v12982_v24, 16  ;;  %v5958_v37 = vadd.f32 %v12873_v30, %v12845_v25  ;;  %v4650_v47 = vadd.f32 %v12664_v44, %v4622_v3  ;;  %v14121_v25 = vld [vmem:[#allocation84_spill] sm:$0xff] }
 0x3b1   : > { %v4886_v1 = vpop.f32.mrf.mxu0  ;;  %v6151_v3 = vshrl.u32 %v5281_v52, 16  ;;  %14123 = vst [vmem:[#allocation35_spill] sm:$0xff] %v13027_v36 }
 0x3b2   : > { %v6678_v62 = vrot.slane %v6676_v27, 4  ;;  %v6681_v28 = vrot.slane %v6679_v7, 5  ;;  %v6154_v7 = vshll.u32 %v5281_v52, 16  ;;  %v13025_v20 = vadd.f32 %v6365_v63, %v5958_v37 }
 0x3b3   : > { %v5898_v60 = vpop.f32.mrf.mxu1  ;;  %v5448_v57 = vpop.permute.xlu0 %5447  ;;  %v6077_v37 = vrot.slane %v6075_v8, 3 }
 0x3b4   : > { %6394 = vmatmul.bf16.gmra.mxu3 %v6141_v5  ;;  %v5503_v30 = vsel %vm2539_vm3, %v12537_v16, %v5448_v57  ;;  %8539 = vmatmul.msk.bf16.gmra.mxu0 %vm2539_vm3, %v14121_v25  ;;  %v13017_v5 = vor.u32 %v6672_v17, %v6669_v22  ;;  %v13019_v27 = vor.u32 %v6681_v28, %v6678_v62  ;;  %v6078_v57 = vshll.u32 %v5236_v38, 16 }
 0x3b5   : > { %v5967_v13 = vpop.f32.mrf.mxu2  ;;  %v5660_v23 = vshll.u32 %v5503_v30, 16  ;;  %v4651_v16 = vadd.f32 %v12664_v44, %v4623_v33  ;;  %14122 = vst [vmem:[#allocation71_spill] sm:$0xff] %v13025_v20  ;;  %v4887_v22 = vadd.f32 %v12682_v42, %v4886_v1  ;;  %v4674_v28 = vmax.f32 %v4650_v47, 0.0 }
 0x3b6   : > { %v13007_v49 = vadd.f32 %v5967_v13, %v5898_v60  ;;  %v8859_v60 = vld [vmem:[#allocation3 + $0x110] sm:$0xff]  ;;  %v5657_v13 = vshrl.u32 %v5503_v30, 16  ;;  %v6683_v31 = vsel %vm2376_vm2, %v13017_v5, %v13019_v27  ;;  %v2058_v38 = vmax.f32 %v2034_v41, 0.0 }
 0x3b7   : > { %7232 = vmatpush.bf16.msra.mxu2 %v8859_v60  ;;  %v5662_v29 = vrot.slane %v5660_v23, 4  ;;  %6720 = vrot.lane.b32.xlu2 %v6683_v31, %s10019_s29  ;;  %v6153_v33 = vrot.slane %v6151_v3, 3  ;;  %v6156_v52 = vrot.slane %v6154_v7, 4  ;;  %v4675_v30 = vmax.f32 %v4651_v16, 0.0 }
 0x3b8   : > { %v5659_v25 = vrot.slane %v5657_v13, 3  ;;  %v6080_v1 = vrot.slane %v6078_v57, 4  ;;  %v4931_v23 = vadd.f32 %v4887_v22, %v4674_v28  ;;  %v14124_v57 = vrot.slane %v12977_v21, 5 }
 0x3b9   : > { %v4888_v17 = vpop.f32.mrf.mxu0  ;;  %v13040_v3 = vor.u32 %v6156_v52, %v6153_v33  ;;  %v4624_v28 = vmul.f32 %v12637_v58, %v12492_v26  ;;  %v6370_v33 = vpop.f32.mrf.mxu3 }
 0x3ba   : > { %v13031_v62 = vor.u32 %v5662_v29, %v5659_v25  ;;  %v4889_v60 = vadd.f32 %v12682_v42, %v4888_v17  ;;  %v13037_v29 = vld [vmem:[#allocation2 + $0x84] sm:$0xff]   ;;  %v13042_v25 = vor.u32 %v6080_v1, %v6077_v37  ;;  %v5322_v37 = vld [vmem:[#allocation2 + $0xd0] sm:$0x1] }
 0x3bb   : > { %v2201_v13 = vpop.permute.xlu0 %2200  ;;  %v13839_v41 = vrot.slane %v13037_v29, 5  ;;  %v8854_v17 = vld [vmem:[#allocation3 + $0xe8] sm:$0xff]  ;;  %v6158_v52 = vsel %vm2826_vm4, %v12986_v45, %v13040_v3  ;;  %v5460_v1 = vunpack.c.l.b16 %v5322_v37  ;;  %v13070_v45 = vadd.f32 %v6370_v33, %v12945_v43 }
 0x3bc   : > { %v5664_v63 = vsel %vm2826_vm4, %v12898_v4, %v13031_v62  ;;  %v4932_v31 = vadd.f32 %v4889_v60, %v4675_v30  ;;  %v2226_v47 = vmul.f32 %v2201_v13, %v2058_v38  ;;  %v8878_v4 = vld [vmem:[%s13797_s8 + $0x28] sm:$0xff]  ;;  %v4625_v38 = vmul.f32 %v12637_v58, %v12519_v2  ;;  %7160 = vmatpush.bf16.msra.mxu1 %v8854_v17 }
 0x3bd   : > { %5917 = vmatmul.bf16.gmra.mxu1 %v5664_v63  ;;  %v5238_v22 = vsel %vm2513_vm1, %v14124_v57, %v13839_v41  ;;  %7566 = vmatpush.bf16.msra.mxu3 %v8878_v4  ;;  %v14125_v30 = vld [vmem:[#allocation82_spill] sm:$0xff]  ;;  %v13065_v26 = vpop.f32.mrf.mxu2  ;;  %v4652_v2 = vadd.f32 %v12664_v44, %v4624_v28  ;;  %14127 = vst [vmem:[#allocation73_spill] sm:$0xff] %v13070_v45  ;;  %v14131_v41 = vrot.slane %v12772_v0, 5 }
 0x3be   : > { %v9089_v7 = vpack.c.bf16 %v4932_v31, %v4931_v23  ;;  %v2250_v16 = vpack.c.bf16 %v2226_v47, %v2226_v47  ;;  %v6082_v21 = vsel %vm2826_vm4, %v14125_v30, %v13042_v25  ;;  %v6092_v60 = vshrl.u32 %v5238_v22, 16  ;;  %14126 = vst [vmem:[#allocation89_spill] sm:$0xff] %v13065_v26  ;;  %v13075_v47 = vld [vmem:[#allocation2 + $0xc4] sm:$0xf0]   ;;  %v13081_v30 = vld [vmem:[#allocation2 + $0x8c] sm:$0xff]  }
 0x3bf   : > { %v6095_v13 = vshll.u32 %v5238_v22, 16  ;;  %v4653_v63 = vadd.f32 %v12664_v44, %v4625_v38  ;;  %14129 = vst [vmem:[#allocation66_spill] sm:$0xff] %v13075_v47  ;;  %v4676_v43 = vmax.f32 %v4652_v2, 0.0  ;;  %v5461_v45 = vpack.c.b16 %v5460_v1, %v5460_v1 }
 0x3c0   : > { %9417 = vst [vmem:[%s12727_s12 + $0x28] sm:$0xff] %v9089_v7   ;;  %v6094_v7 = vrot.slane %v6092_v60, 3  ;;  %v13084_v60 = vpop.f32.mrf.mxu1 }
 0x3c1   : > { %2274 = vst.msk [vmem:[#allocation2 + $0xcc] sm:$0xf] %vm376_vm0, %v2250_v16  ;;  %v4891_v8 = vpop.f32.mrf.mxu0  ;;  %v9888_v16 = vld [vmem:[#allocation2 + $0x84] sm:$0xff]   ;;  %v4677_v33 = vmax.f32 %v4653_v63, 0.0  ;;  %v13089_v36 = vpop.f32.mrf.mxu3  ;;  %v5485_v1 = vrot.slane %v5461_v45, 5 }
 0x3c2   : > { %v4892_v23 = vadd.f32 %v12682_v42, %v4891_v8  ;;  %v6604_v17 = vshrl.u32 %v9888_v16, 16  ;;  %v6607_v4 = vshll.u32 %v9888_v16, 16  ;;  %14130 = vst [vmem:[#allocation23_spill] sm:$0xff] %v13084_v60 }
 0x3c4   : > { %6399 = vmatmul.bf16.gmra.mxu3 %v6158_v52  ;;  %8540 = vmatmul.msk.bf16.gmra.mxu0 %vm2539_vm3, %v6082_v21  ;;  %v6097_v52 = vrot.slane %v6095_v13, 4  ;;  %v4933_v13 = vadd.f32 %v4892_v23, %v4676_v43  ;;  %v6609_v60 = vrot.slane %v6607_v4, 5  ;;  %v14132_v23 = vrot.slane %v13081_v30, 5  ;;  %v9890_v4 = vld [vmem:[#allocation2 + $0x9c] sm:$0xff]  }
 0x3c5   : > { %v6631_v43 = vshrl.u32 %v9890_v4, 16 }
 0x3c8   : > { %v13073_v31 = vld [vmem:[#allocation2 + $0xc8] sm:$0xff]  }
 0x3c9   : > { %14128 = vst [vmem:[#allocation21_spill] sm:$0xff] %v13073_v31  ;;  %v4893_v57 = vpop.f32.mrf.mxu0  ;;  %v5425_v22 = vshrl.u32 %v13073_v31, 16  ;;  %v5428_v28 = vshll.u32 %v13073_v31, 16  ;;  %v5483_v38 = vrot.slane %v13073_v31, 5  ;;  %v6606_v31 = vrot.slane %v6604_v17, 4 }
 0x3ca   : > { %v4894_v8 = vadd.f32 %v12682_v42, %v4893_v57 }
 0x3cb   : > { %v5427_v37 = vrot.slane %v5425_v22, 4  ;;  %v5430_v16 = vrot.slane %v5428_v28, 5  ;;  %v5484_v26 = vsel %vm2513_vm1, %v14131_v41, %v5483_v38  ;;  %v13094_v41 = vor.u32 %v6097_v52, %v6094_v7  ;;  %v5972_v28 = vpop.f32.mrf.mxu2  ;;  %v8857_v52 = vld [vmem:[#allocation3 + $0x100] sm:$0xff] }
 0x3cc   : > { %v4934_v2 = vadd.f32 %v4894_v8, %v4677_v33  ;;  %v5734_v63 = vshrl.u32 %v5484_v26, 16  ;;  %v5737_v57 = vshll.u32 %v5484_v26, 16  ;;  %v14133_v22 = vrot.slane %v13037_v29, 5  ;;  %v8858_v8 = vld [vmem:[#allocation3 + $0x108] sm:$0xff] }
 0x3cd   : > { %v5431_v20 = vor.u32 %v5430_v16, %v5427_v37  ;;  %v6634_v33 = vshll.u32 %v9890_v4, 16  ;;  %v6748_v29 = vrot.slane %v12982_v24, 5  ;;  %v6610_v7 = vor.u32 %v6609_v60, %v6606_v31  ;;  %7233 = vmatpush.bf16.msra.mxu2 %v8858_v8 }
 0x3ce   : > { %v9094_v47 = vpack.c.bf16 %v4934_v2, %v4933_v13  ;;  %v5736_v21 = vrot.slane %v5734_v63, 3  ;;  %v5739_v51 = vrot.slane %v5737_v57, 4  ;;  %v5240_v26 = vsel %vm2513_vm1, %v14133_v22, %v14132_v23  ;;  %v14135_v13 = vld [vmem:[#allocation43_spill] sm:$0xff] }
 0x3cf   : > { %5457 = vrot.lane.b32.xlu0 %v5431_v20, %s10019_s29  ;;  %v5432_v0 = vsel %vm2376_vm2, %v12816_v39, %v5431_v20  ;;  %v4626_v39 = vmul.f32 %v12637_v58, %v12554_v48  ;;  %v4627_v20 = vmul.f32 %v12637_v58, %v12583_v56  ;;  %v6099_v48 = vsel %vm2826_vm4, %v13042_v25, %v13094_v41 }
 0x3d0   : > { %9418 = vst [vmem:[%s12727_s12 + $0x30] sm:$0xff] %v9094_v47   ;;  %5455 = vrot.lane.b32.xlu1 %v5432_v0, %s10019_s29  ;;  %v13103_v17 = vor.u32 %v5739_v51, %v5736_v21  ;;  %v6109_v51 = vshrl.u32 %v5240_v26, 16  ;;  %v5486_v56 = vsel %vm2513_vm1, %v5483_v38, %v5485_v1  ;;  %v6112_v58 = vshll.u32 %v5240_v26, 16  ;;  %v6375_v0 = vpop.f32.mrf.mxu3  ;;  %v8853_v26 = vld [vmem:[#allocation3 + $0xe0] sm:$0xff] }
 0x3d1   : > { %v4896_v45 = vpop.f32.mrf.mxu0  ;;  %v14134_v37 = vrot.slane %v12880_v9, 5  ;;  %v6633_v60 = vrot.slane %v6631_v43, 4  ;;  %v6636_v16 = vrot.slane %v6634_v33, 5  ;;  %v6835_v2 = vshrl.u32 %v14135_v13, 16  ;;  %7234 = vmatpush.bf16.msra.mxu2 %v8857_v52  ;;  %7161 = vmatpush.bf16.msra.mxu1 %v8853_v26 }
 0x3d2   : > { %v5741_v47 = vsel %vm2826_vm4, %v12902_v11, %v13103_v17  ;;  %v4654_v63 = vadd.f32 %v12664_v44, %v4626_v39  ;;  %v4655_v25 = vadd.f32 %v12664_v44, %v4627_v20  ;;  %v6611_v9 = vsel %vm2376_vm2, %v12882_v19, %v6610_v7  ;;  %v13145_v20 = vld [vmem:[#allocation2 + $0x94] sm:$0xff]  }
 0x3d3   : > { %8488 = vmatmul.msk.bf16.gmra.mxu2 %vm2539_vm3, %v5741_v47  ;;  %v6749_v11 = vsel %vm2513_vm1, %v14134_v37, %v6748_v29  ;;  %v5751_v1 = vshrl.u32 %v5486_v56, 16  ;;  %v5754_v23 = vshll.u32 %v5486_v56, 16  ;;  %v6111_v22 = vrot.slane %v6109_v51, 3  ;;  %v6518_v37 = vld [vmem:[#allocation2 + $0xd8] sm:$0xf] }
 0x3d4   : > { %8541 = vmatmul.msk.bf16.gmra.mxu0 %vm2539_vm3, %v6099_v48  ;;  %v6979_v38 = vshrl.u32 %v6749_v11, 16  ;;  %v6982_v57 = vshll.u32 %v6749_v11, 16  ;;  %v6114_v4 = vrot.slane %v6112_v58, 4  ;;  %v13136_v44 = vadd.f32 %v6375_v0, %v13007_v49  ;;  %v13151_v48 = vpop.f32.mrf.mxu2  ;;  %v13166_v0 = vld [vmem:[#allocation2 + $0xac] sm:$0xff]  }
 0x3d5   : > { %v4897_v8 = vadd.f32 %v12682_v42, %v4896_v45  ;;  %v13141_v19 = vor.u32 %v6636_v16, %v6633_v60  ;;  %v6620_v39 = vsel %vm2376_vm2, %v6610_v7, %v12890_v10  ;;  %v5241_v47 = vrot.slane %v13145_v20, 5  ;;  %v9491_v7 = vld [vmem:[#allocation2 + $0xd0] sm:$0xff]  }
 0x3d6   : > { %v5903_v21 = vpop.f32.mrf.mxu1  ;;  %v6981_v43 = vrot.slane %v6979_v38, 3  ;;  %v6984_v33 = vrot.slane %v6982_v57, 4  ;;  %v4678_v51 = vmax.f32 %v4654_v63, 0.0  ;;  %v4679_v49 = vmax.f32 %v4655_v25, 0.0 }
 0x3d7   : > { %v13123_v31 = vadd.f32 %v5972_v28, %v5903_v21  ;;  %v8877_v28 = vld [vmem:[%s13797_s8 + $0x20] sm:$0xff]  ;;  %6704 = vrot.lane.b32.xlu0 %v6611_v9, %s10019_s29  ;;  %v6658_v21 = vshrl.u32 %v12838_v14, 16  ;;  %v5753_v56 = vrot.slane %v5751_v1, 3  ;;  %v5756_v58 = vrot.slane %v5754_v23, 4 }
 0x3d8   : > { %5225 = vrot.lane.b32.xlu1 %v12830_v15, %s10019_s29  ;;  %7567 = vmatpush.bf16.msra.mxu3 %v8877_v28  ;;  %v13149_v45 = vor.u32 %v6984_v33, %v6981_v43  ;;  %v6661_v10 = vshll.u32 %v12838_v14, 16  ;;  %v13157_v16 = vor.u32 %v6114_v4, %v6111_v22  ;;  %v9212_v63 = vunpack.c.h.b16 %v9491_v7 }
 0x3d9   : > { %v4898_v52 = vpop.f32.mrf.mxu0  ;;  %v13159_v25 = vunpack.c.l.b16 %v6518_v37  ;;  %v14136_v9 = vrot.slane %v13081_v30, 5  ;;  %v5757_v4 = vor.u32 %v5756_v58, %v5753_v56  ;;  %v6660_v43 = vrot.slane %v6658_v21, 4 }
 0x3da   : > { %v4899_v15 = vadd.f32 %v12682_v42, %v4898_v52  ;;  %v13164_v38 = vsel %vm2826_vm4, %v12935_v54, %v13149_v45  ;;  %v4935_v42 = vadd.f32 %v4897_v8, %v4678_v51  ;;  %v6638_v54 = vsel %vm2376_vm2, %v12892_v34, %v13141_v19  ;;  %v13181_v8 = vld [vmem:[#allocation2 + $0xcc] sm:$0xff]   ;;  %v13189_v34 = vld [vmem:[%s13795_s6] ss:$0 sm:$0xff] }
 0x3db   : > { %v5242_v1 = vsel %vm2513_vm1, %v14136_v9, %v5241_v47  ;;  %v13179_v26 = vpack.c.b16 %v13159_v25, %v9212_v63  ;;  %v6663_v33 = vrot.slane %v6661_v10, 5  ;;  %v6838_v21 = vshll.u32 %v14135_v13, 16 }
 0x3dc   : > { %v4936_v57 = vadd.f32 %v4899_v15, %v4679_v49  ;;  %v4628_v15 = vmul.f32 %v13189_v34, %v12617_v59  ;;  %v6126_v56 = vshrl.u32 %v5242_v1, 16  ;;  %v6129_v58 = vshll.u32 %v5242_v1, 16 }
 0x3dd   : > { %v6694_v49 = vshrl.u32 %v13179_v26, 16  ;;  %v6697_v52 = vshll.u32 %v13179_v26, 16  ;;  %v4629_v10 = vmul.f32 %v13189_v34, %v12643_v55  ;;  %v6685_v59 = vshrl.u32 %v13181_v8, 16 }
 0x3de   : > { %v13155_v11 = vpop.f32.mrf.mxu1  ;;  %v5450_v60 = vpop.permute.xlu1 %5449  ;;  %v9099_v28 = vpack.c.bf16 %v4936_v57, %v4935_v42  ;;  %v5758_v42 = vsel %vm2826_vm4, %v13103_v17, %v5757_v4  ;;  %v6664_v57 = vor.u32 %v6663_v33, %v6660_v43  ;;  %v6116_v55 = vsel %vm2826_vm4, %v13094_v41, %v13157_v16 }
 0x3df   : > { %v5505_v14 = vsel %vm2539_vm3, %v13166_v0, %v5450_v60  ;;  %6710 = vrot.lane.b32.xlu0 %v6638_v54, %s10019_s29  ;;  %v6696_v60 = vrot.slane %v6694_v49, 4  ;;  %v6699_v63 = vrot.slane %v6697_v52, 5  ;;  %v13213_v1 = vrot.slane %v6835_v2, 3  ;;  %v9894_v54 = vld [vmem:[#allocation2 + $0xa8] sm:$0xff]  }
 0x3e0   : > { %v5674_v23 = vshrl.u32 %v5505_v14, 16  ;;  %v5677_v22 = vshll.u32 %v5505_v14, 16  ;;  %9419 = vst [vmem:[%s12727_s12 + $0x38] sm:$0xff] %v9099_v28   ;;  %6706 = vrot.lane.b32.xlu1 %v6620_v39, %s10019_s29  ;;  %v6688_v39 = vshll.u32 %v13181_v8, 16  ;;  %v13219_v4 = vrot.slane %v6838_v21, 4 }
 0x3e1   : > { %v4901_v37 = vpop.f32.mrf.mxu0  ;;  %v13215_v17 = vor.u32 %v6699_v63, %v6696_v60  ;;  %v6128_v41 = vrot.slane %v6126_v56, 3  ;;  %v6131_v43 = vrot.slane %v6129_v58, 4  ;;  %v6665_v49 = vsel %vm2376_vm2, %v12933_v32, %v6664_v57  ;;  %v13241_v63 = vld [vmem:[%s13798_s9] ss:$0 sm:$0xff] }
 0x3e2   : > { %v5676_v51 = vrot.slane %v5674_v23, 3  ;;  %v5679_v30 = vrot.slane %v5677_v22, 4  ;;  %v5977_v23 = vpop.f32.mrf.mxu2  ;;  %v6687_v21 = vrot.slane %v6685_v59, 4  ;;  %v6690_v56 = vrot.slane %v6688_v39, 5 }
 0x3e3   : > { %8489 = vmatmul.msk.bf16.gmra.mxu2 %vm2539_vm3, %v5758_v42  ;;  %6726 = vrot.lane.b32.xlu2 %v13215_v17, %s10019_s29  ;;  %v4902_v42 = vadd.f32 %v13241_v63, %v4901_v37  ;;  %v6841_v32 = vor.u32 %v13219_v4, %v13213_v1 }
 0x3e4   : > { %v13198_v7 = vor.u32 %v5679_v30, %v5676_v51  ;;  %8542 = vmatmul.msk.bf16.gmra.mxu0 %vm2539_vm3, %v6116_v55  ;;  %v6519_v30 = vld [vmem:[#allocation2 + $0xdc] sm:$0x1]  ;;  %v13254_v37 = vor.u32 %v6690_v56, %v6687_v21 }
 0x3e6   : > { %v5220_v14 = vpop.permute.xlu1 %5219  ;;  %v5681_v9 = vsel %vm2826_vm4, %v13031_v62, %v13198_v7  ;;  %v5908_v22 = vpop.f32.mrf.mxu1  ;;  %v13224_v62 = vld [vmem:[%s13796_s7] ss:$0 sm:$0xff]  ;;  %v6692_v21 = vsel %vm2376_vm2, %v13019_v27, %v13254_v37 }
 0x3e7   : > { %v5284_v28 = vsel %vm2539_vm3, %v9894_v54, %v5220_v14  ;;  %5922 = vmatmul.bf16.gmra.mxu1 %v5681_v9  ;;  %v4656_v13 = vadd.f32 %v13224_v62, %v4628_v15  ;;  %v13227_v2 = vadd.f32 %v5977_v23, %v5908_v22  ;;  %v4657_v52 = vadd.f32 %v13224_v62, %v4629_v10  ;;  %v13256_v22 = vpop.f32.mrf.mxu3 }
 0x3e8   : > { %v6168_v33 = vshrl.u32 %v5284_v28, 16  ;;  %v6171_v51 = vshll.u32 %v5284_v28, 16  ;;  %6716 = vrot.lane.b32.xlu0 %v6665_v49, %s10019_s29  ;;  %v6647_v15 = vsel %vm2376_vm2, %v13141_v19, %v12947_v18  ;;  %v6729_v10 = vunpack.c.l.b16 %v6519_v30 }
 0x3e9   : > { %6712 = vrot.lane.b32.xlu1 %v6647_v15, %s10019_s29  ;;  %v4903_v39 = vpop.f32.mrf.mxu0  ;;  %v13249_v14 = vor.u32 %v6131_v43, %v6128_v41  ;;  %v6750_v18 = vrot.slane %v13181_v8, 5  ;;  %v6752_v19 = vrot.slane %v13179_v26, 5  ;;  %v4680_v55 = vmax.f32 %v4656_v13, 0.0 }
 0x3ea   : > { %v6170_v58 = vrot.slane %v6168_v33, 3  ;;  %v6173_v60 = vrot.slane %v6171_v51, 4  ;;  %v4681_v9 = vmax.f32 %v4657_v52, 0.0  ;;  %v4904_v23 = vadd.f32 %v13241_v63, %v4903_v39  ;;  %v13266_v33 = vld [vmem:[#allocation2 + $0xb4] sm:$0xff]  }
 0x3eb   : > { %v5243_v54 = vrot.slane %v12876_v12, 5  ;;  %v6751_v8 = vsel %vm2513_vm1, %v6748_v29, %v6750_v18  ;;  %v6753_v26 = vsel %vm2513_vm1, %v6750_v18, %v6752_v19  ;;  %v4937_v28 = vadd.f32 %v4902_v42, %v4680_v55  ;;  %v8876_v39 = vld [vmem:[%s13797_s8 + $0x18] sm:$0xff] }
 0x3ec   : > { %v13247_v59 = vor.u32 %v6173_v60, %v6170_v58  ;;  %v4938_v4 = vadd.f32 %v4904_v23, %v4681_v9  ;;  %v6996_v43 = vshrl.u32 %v6751_v8, 16  ;;  %v6730_v13 = vpack.c.b16 %v6729_v10, %v6729_v10  ;;  %v8852_v10 = vld [vmem:[#allocation3 + $0xd8] sm:$0xff]  ;;  %7568 = vmatpush.bf16.msra.mxu3 %v8876_v39 }
 0x3ed   : > { %v6674_v51 = vsel %vm2376_vm2, %v6664_v57, %v13017_v5  ;;  %v6999_v24 = vshll.u32 %v6751_v8, 16  ;;  %v7013_v30 = vshrl.u32 %v6753_v26, 16  ;;  %v7016_v15 = vshll.u32 %v6753_v26, 16  ;;  %v14137_v26 = vld [vmem:[#allocation16_spill] sm:$0xff]  ;;  %7162 = vmatpush.bf16.msra.mxu1 %v8852_v10 }
 0x3ee   : > { %v6175_v1 = vsel %vm2826_vm4, %v13040_v3, %v13247_v59  ;;  %v9104_v29 = vpack.c.bf16 %v4938_v4, %v4937_v28  ;;  %v6998_v56 = vrot.slane %v6996_v43, 3  ;;  %v4630_v42 = vmul.f32 %v13189_v34, %v12686_v53 }
 0x3ef   : > { %v5452_v41 = vpop.permute.xlu0 %5451  ;;  %6404 = vmatmul.bf16.gmra.mxu3 %v6175_v1  ;;  %v7001_v58 = vrot.slane %v6999_v24, 4  ;;  %v7015_v60 = vrot.slane %v7013_v30, 3  ;;  %v6754_v27 = vrot.slane %v6730_v13, 5  ;;  %v4631_v18 = vmul.f32 %v13189_v34, %v12721_v40  ;;  %v5454_v1 = vpop.permute.xlu2 %5453 }
 0x3f0   : > { %v5507_v3 = vsel %vm2539_vm3, %v13266_v33, %v5452_v41  ;;  %6722 = vrot.lane.b32.xlu0 %v6692_v21, %s10019_s29  ;;  %9420 = vst [vmem:[%s12727_s12 + $0x40] sm:$0xff] %v9104_v29   ;;  %v5244_v53 = vsel %vm2513_vm1, %v5241_v47, %v5243_v54  ;;  %v7018_v23 = vrot.slane %v7016_v15, 4  ;;  %v6850_v28 = vsel %vm2826_vm4, %v6841_v32, %v14137_v26  ;;  %v6380_v4 = vpop.f32.mrf.mxu3 }
 0x3f1   : > { %v5691_v49 = vshrl.u32 %v5507_v3, 16  ;;  %v5694_v52 = vshll.u32 %v5507_v3, 16  ;;  %6718 = vrot.lane.b32.xlu1 %v6674_v51, %s10019_s29  ;;  %v4906_v55 = vpop.f32.mrf.mxu0  ;;  %v7002_v9 = vor.u32 %v7001_v58, %v6998_v56  ;;  %v6133_v40 = vsel %vm2826_vm4, %v13157_v16, %v13249_v14  ;;  %v9898_v51 = vld [vmem:[#allocation2 + $0xb0] sm:$0xff]  }
 0x3f2   : > { %v7019_v47 = vor.u32 %v7018_v23, %v7015_v60  ;;  %v6755_v41 = vsel %vm2513_vm1, %v6752_v19, %v6754_v27  ;;  %v4658_v43 = vadd.f32 %v13224_v62, %v4630_v42  ;;  %v6143_v3 = vshrl.u32 %v5244_v53, 16  ;;  %v14139_v23 = vld [vmem:[#allocation52_spill] sm:$0xff] }
 0x3f3   : > { %v5693_v5 = vrot.slane %v5691_v49, 3  ;;  %v5696_v57 = vrot.slane %v5694_v52, 4  ;;  %8598 = vmatmul.msk.bf16.vlgmr.msra.gmra.mxu2 %vm2539_vm3, %v6850_v28  ;;  %v13300_v20 = vsel %vm2826_vm4, %v13149_v45, %v7002_v9  ;;  %v4659_v45 = vadd.f32 %v13224_v62, %v4631_v18 }
 0x3f4   : > { %8543 = vmatmul.msk.bf16.gmra.mxu0 %vm2539_vm3, %v6133_v40  ;;  %v13311_v24 = vsel %vm2826_vm4, %v7002_v9, %v7019_v47  ;;  %v7030_v19 = vshrl.u32 %v6755_v41, 16  ;;  %v6146_v49 = vshll.u32 %v5244_v53, 16  ;;  %v7033_v52 = vshll.u32 %v6755_v41, 16  ;;  %v14138_v9 = vld [vmem:[#allocation26_spill] sm:$0xff] }
 0x3f5   : > { %v13290_v8 = vor.u32 %v5696_v57, %v5693_v5  ;;  %v5509_v21 = vsel %vm2539_vm3, %v12784_v6, %v5454_v1  ;;  %v6701_v56 = vsel %vm2376_vm2, %v13254_v37, %v13215_v17  ;;  %v13321_v42 = vadd.f32 %v6380_v4, %v13123_v31  ;;  %v14140_v4 = vld [vmem:[#allocation19_spill] sm:$0xff] }
 0x3f6   : > { %v7032_v58 = vrot.slane %v7030_v19, 3  ;;  %v7035_v5 = vrot.slane %v7033_v52, 4  ;;  %v4575_v57 = vadd.f32 %v12818_v61, %v12750_v50  ;;  %v4577_v10 = vadd.f32 %v12859_v46, %v12768_v35  ;;  %v14141_v50 = vld [vmem:[#allocation48_spill] sm:$0xff] }
 0x3f7   : > { %v5222_v13 = vpop.permute.xlu0 %5221  ;;  %v5698_v32 = vsel %vm2826_vm4, %v13198_v7, %v13290_v8  ;;  %v4907_v7 = vadd.f32 %v13241_v63, %v4906_v55  ;;  %v4682_v39 = vmax.f32 %v4658_v43, 0.0  ;;  %v4683_v27 = vmax.f32 %v4659_v45, 0.0  ;;  %v5224_v35 = vpop.permute.xlu2 %5223  ;;  %v9899_v19 = vld [vmem:[#allocation2 + $0xb8] sm:$0xff]  }
 0x3f8   : > { %v5287_v16 = vsel %vm2539_vm3, %v9898_v51, %v5222_v13  ;;  %5927 = vmatmul.bf16.gmra.mxu1 %v5698_v32  ;;  %v5708_v55 = vshrl.u32 %v5509_v21, 16  ;;  %v5711_v17 = vshll.u32 %v5509_v21, 16  ;;  %v3772_v31 = vadd.f32 %v14139_v23, %v14138_v9  ;;  %v13337_v13 = vpop.f32.mrf.mxu3  ;;  %v14143_v9 = vld [vmem:[#allocation63_spill] sm:$0xff]  ;;  %v14144_v23 = vld [vmem:[#allocation80_spill] sm:$0xff] }
 0x3f9   : > { %v6185_v30 = vshrl.u32 %v5287_v16, 16  ;;  %v6188_v29 = vshll.u32 %v5287_v16, 16  ;;  %6724 = vrot.lane.b32.xlu1 %v6701_v56, %s10019_s29  ;;  %v4908_v18 = vpop.f32.mrf.mxu0  ;;  %v6145_v1 = vrot.slane %v6143_v3, 3  ;;  %v6148_v26 = vrot.slane %v6146_v49, 4  ;;  %v9900_v49 = vld [vmem:[#allocation2 + $0xa4] sm:$0xff]  }
 0x3fa   : > { %v4909_v53 = vadd.f32 %v13241_v63, %v4908_v18  ;;  %v7036_v28 = vor.u32 %v7035_v5, %v7032_v58  ;;  %v3774_v61 = vadd.f32 %v14141_v50, %v14140_v4  ;;  %v4939_v46 = vadd.f32 %v4907_v7, %v4682_v39  ;;  %v8875_v39 = vld [vmem:[%s13797_s8 + $0x10] sm:$0xff] }
 0x3fb   : > { %v6187_v60 = vrot.slane %v6185_v30, 3  ;;  %v6190_v15 = vrot.slane %v6188_v29, 4  ;;  %v4604_v43 = vadd.f32 %v4575_v57, %v3772_v31  ;;  %v5710_v51 = vrot.slane %v5708_v55, 3  ;;  %7569 = vmatpush.bf16.msra.mxu3 %v8875_v39  ;;  %v14151_v39 = vld [vmem:[#allocation42_spill] sm:$0xff] }
 0x3fc   : > { %v4940_v40 = vadd.f32 %v4909_v53, %v4683_v27  ;;  %v13340_v32 = vsel %vm2826_vm4, %v7019_v47, %v7036_v28  ;;  %v4605_v3 = vadd.f32 %v4577_v10, %v3774_v61  ;;  %v5713_v16 = vrot.slane %v5711_v17, 4 }
 0x3fd   : > { %v13327_v37 = vor.u32 %v6190_v15, %v6187_v60  ;;  %v5290_v30 = vsel %vm2539_vm3, %v9899_v19, %v5224_v35  ;;  %v6149_v29 = vor.u32 %v6148_v26, %v6145_v1  ;;  %v5245_v52 = vrot.slane %v9900_v49, 5  ;;  %v8851_v60 = vld [vmem:[#allocation3 + $0xd0] sm:$0xff]  ;;  %v14145_v1 = vld [vmem:[#allocation9_spill] sm:$0xff] }
 0x3fe   : > { %v9109_v45 = vpack.c.bf16 %v4940_v40, %v4939_v46  ;;  %v4633_v7 = vmul.f32 %v13189_v34, %v4605_v3  ;;  %v13346_v56 = vor.u32 %v5713_v16, %v5710_v51  ;;  %v6202_v47 = vshrl.u32 %v5290_v30, 16  ;;  %v14142_v15 = vld [vmem:[#allocation55_spill] sm:$0xff]  ;;  %7163 = vmatpush.bf16.msra.mxu1 %v8851_v60  ;;  %v14147_v40 = vld [vmem:[#allocation46_spill] sm:$0xff]  ;;  %v14149_v51 = vld [vmem:[#allocation20_spill] sm:$0xff]  ;;  %v13384_v60 = vpop.f32.mrf.mxu1 }
 0x3ff   : > { %v6192_v41 = vsel %vm2826_vm4, %v13247_v59, %v13327_v37  ;;  %v4632_v59 = vmul.f32 %v13189_v34, %v4604_v43  ;;  %v6205_v58 = vshll.u32 %v5290_v30, 16  ;;  %v6150_v5 = vsel %vm2826_vm4, %v13249_v14, %v6149_v29  ;;  %v14146_v26 = vld [vmem:[#allocation15_spill] sm:$0xff]  ;;  %v14150_v16 = vld [vmem:[#allocation65_spill] sm:$0xff] }
 0x400   : > { %6409 = vmatmul.bf16.gmra.mxu3 %v6192_v41  ;;  %9421 = vst [vmem:[%s12727_s12 + $0x48] sm:$0xff] %v9109_v45   ;;  %v5715_v57 = vsel %vm2826_vm4, %v13290_v8, %v13346_v56  ;;  %v5246_v10 = vsel %vm2513_vm1, %v5243_v54, %v5245_v52  ;;  %v6204_v27 = vrot.slane %v6202_v47, 3  ;;  %v4661_v55 = vadd.f32 %v13224_v62, %v4633_v7  ;;  %v6385_v17 = vpop.f32.mrf.mxu3  ;;  %v14148_v41 = vld [vmem:[#allocation61_spill] sm:$0xff]  ;;  %v13382_v7 = vpop.f32.mrf.mxu2 }
 0x401   : > { %v4911_v21 = vpop.f32.mrf.mxu0  ;;  %v6207_v18 = vrot.slane %v6205_v58, 4  ;;  %v4660_v14 = vadd.f32 %v13224_v62, %v4632_v59  ;;  %v6160_v53 = vshrl.u32 %v5246_v10, 16  ;;  %v6163_v8 = vshll.u32 %v5246_v10, 16 }
 0x402   : > { %v4912_v12 = vadd.f32 %v13241_v63, %v4911_v21  ;;  %v13366_v54 = vadd.f32 %v6385_v17, %v13227_v2  ;;  %v4580_v31 = vadd.f32 %v14144_v23, %v14143_v9  ;;  %v4582_v28 = vadd.f32 %v14146_v26, %v14145_v1 }
 0x403   : > { %8599 = vmatmul.msk.bf16.gmra.mxu2 %vm2539_vm3, %v14142_v15  ;;  %v13372_v50 = vor.u32 %v6207_v18, %v6204_v27  ;;  %v4684_v61 = vmax.f32 %v4660_v14, 0.0  ;;  %v4685_v35 = vmax.f32 %v4661_v55, 0.0  ;;  %v3777_v43 = vadd.f32 %v14148_v41, %v14147_v40  ;;  %v14152_v40 = vld [vmem:[#allocation44_spill] sm:$0xff] }
 0x404   : > { %8544 = vmatmul.msk.bf16.gmra.mxu0 %vm2539_vm3, %v6150_v5  ;;  %v6162_v3 = vrot.slane %v6160_v53, 3  ;;  %v6165_v2 = vrot.slane %v6163_v8, 4  ;;  %v3779_v45 = vadd.f32 %v14150_v16, %v14149_v51  ;;  %v5247_v15 = vrot.slane %v13166_v0, 5 }
 0x405   : > { %v4941_v19 = vadd.f32 %v4912_v12, %v4684_v61  ;;  %v6209_v49 = vsel %vm2826_vm4, %v13327_v37, %v13372_v50  ;;  %v4606_v59 = vadd.f32 %v4580_v31, %v3777_v43  ;;  %v8850_v31 = vld [vmem:[#allocation3 + $0xc8] sm:$0xff] }
 0x406   : > { %v4607_v21 = vadd.f32 %v4582_v28, %v3779_v45  ;;  %v6166_v58 = vor.u32 %v6165_v2, %v6162_v3  ;;  %v5248_v27 = vsel %vm2513_vm1, %v5245_v52, %v5247_v15  ;;  %v8874_v52 = vld [vmem:[%s13797_s8 + $0x8] sm:$0xff]  ;;  %7164 = vmatpush.bf16.msra.mxu1 %v8850_v31 }
 0x407   : > { %v6177_v55 = vshrl.u32 %v5248_v27, 16  ;;  %v6180_v0 = vshll.u32 %v5248_v27, 16  ;;  %7570 = vmatpush.bf16.msra.mxu3 %v8874_v52 }
 0x408   : > { %5932 = vmatmul.bf16.gmra.mxu1 %v5715_v57  ;;  %v4634_v57 = vmul.f32 %v13189_v34, %v4606_v59  ;;  %v4635_v10 = vmul.f32 %v13189_v34, %v4607_v21  ;;  %v6167_v37 = vsel %vm2826_vm4, %v6149_v29, %v6166_v58  ;;  %v5982_v17 = vpop.f32.mrf.mxu2  ;;  %v14153_v59 = vld [vmem:[#allocation53_spill] sm:$0xff] }
 0x409   : > { %v4913_v4 = vpop.f32.mrf.mxu0  ;;  %v6179_v1 = vrot.slane %v6177_v55, 3 }
 0x40a   : > { %v4914_v46 = vadd.f32 %v13241_v63, %v4913_v4  ;;  %v4662_v18 = vadd.f32 %v13224_v62, %v4634_v57  ;;  %v4663_v14 = vadd.f32 %v13224_v62, %v4635_v10  ;;  %v6182_v62 = vrot.slane %v6180_v0, 4  ;;  %v13402_v4 = vpop.f32.mrf.mxu3  ;;  %v8849_v10 = vld [vmem:[#allocation3 + $0xc0] sm:$0xff] }
 0x40b   : > { %7165 = vmatpush.bf16.msra.mxu1 %v8849_v10 }
 0x40c   : > { %v4942_v30 = vadd.f32 %v4914_v46, %v4685_v35  ;;  %v4686_v9 = vmax.f32 %v4662_v18, 0.0  ;;  %v4687_v23 = vmax.f32 %v4663_v14, 0.0  ;;  %v6183_v35 = vor.u32 %v6182_v62, %v6179_v1 }
 0x40d   : > { %v5249_v46 = vrot.slane %v13266_v33, 5  ;;  %v5251_v33 = vrot.slane %v12784_v6, 5  ;;  %v8873_v6 = vld [vmem:[%s13797_s8] sm:$0xff] }
 0x40e   : > { %v9114_v47 = vpack.c.bf16 %v4942_v30, %v4941_v19  ;;  %7571 = vmatpush.bf16.msra.mxu3 %v8873_v6 }
 0x40f   : > { %v5250_v41 = vsel %vm2513_vm1, %v5247_v15, %v5249_v46 }
 0x410   : > { %6414 = vmatmul.bf16.gmra.mxu3 %v6209_v49  ;;  %9422 = vst [vmem:[%s12727_s12 + $0x50] sm:$0xff] %v9114_v47   ;;  %v6194_v2 = vshrl.u32 %v5250_v41, 16  ;;  %v6197_v51 = vshll.u32 %v5250_v41, 16  ;;  %v13413_v19 = vpop.f32.mrf.mxu2  ;;  %v5252_v47 = vsel %vm2513_vm1, %v5249_v46, %v5251_v33 }
 0x411   : > { %v4916_v5 = vpop.f32.mrf.mxu0  ;;  %v6214_v57 = vshll.u32 %v5252_v47, 16 }
 0x412   : > { %v4917_v53 = vadd.f32 %v13241_v63, %v4916_v5  ;;  %v6196_v16 = vrot.slane %v6194_v2, 3  ;;  %v6199_v45 = vrot.slane %v6197_v51, 4  ;;  %v6211_v5 = vshrl.u32 %v5252_v47, 16  ;;  %v14158_v51 = vld [vmem:[#allocation60_spill] sm:$0xff] }
 0x413   : > { %8600 = vmatmul.msk.bf16.gmra.mxu2 %vm2539_vm3, %v14151_v39  ;;  %v6216_v14 = vrot.slane %v6214_v57, 4 }
 0x414   : > { %8545 = vmatmul.msk.bf16.gmra.mxu0 %vm2539_vm3, %v6167_v37  ;;  %v4943_v26 = vadd.f32 %v4917_v53, %v4686_v9  ;;  %v6200_v30 = vor.u32 %v6199_v45, %v6196_v16  ;;  %v6213_v18 = vrot.slane %v6211_v5, 3  ;;  %v5081_v16 = vpack.c.b16 %v14158_v51, %v14158_v51 }
 0x416   : > { %v6201_v21 = vsel %vm2826_vm4, %v6183_v35, %v6200_v30  ;;  %v6217_v0 = vor.u32 %v6216_v14, %v6213_v18 }
 0x418   : > { %v5987_v15 = vpop.f32.mrf.mxu2  ;;  %v6218_v31 = vsel %vm2826_vm4, %v6200_v30, %v6217_v0 }
 0x419   : > { %v5913_v8 = vpop.f32.mrf.mxu1  ;;  %v4918_v34 = vpop.f32.mrf.mxu0 }
 0x41a   : > { %v5983_v12 = vadd.f32 %v5982_v17, %v5913_v8  ;;  %v4919_v29 = vadd.f32 %v13241_v63, %v4918_v34  ;;  %v6184_v63 = vsel %vm2826_vm4, %v6166_v58, %v6183_v35  ;;  %v5018_v58 = vld [vmem:[#allocation2 + $0xc4] sm:$0x1]  ;;  %v14155_v34 = vld [vmem:[#allocation66_spill] sm:$0xff] }
 0x41b   : > { %v5228_v39 = vunpack.c.l.b16 %v5018_v58  ;;  %v14154_v8 = vld [vmem:[#allocation41_spill] sm:$0xff] }
 0x41c   : > { %v4944_v28 = vadd.f32 %v4919_v29, %v4687_v23  ;;  %v14156_v29 = vld [vmem:[#allocation45_spill] sm:$0xff] }
 0x41d   : > { %v5229_v55 = vpack.c.b16 %v5228_v39, %v5228_v39 }
 0x41e   : > { %v9119_v61 = vpack.c.bf16 %v4944_v28, %v4943_v26  ;;  %v14157_v26 = vld [vmem:[#allocation21_spill] sm:$0xff] }
 0x41f   : > { %v5253_v17 = vrot.slane %v5229_v55, 5  ;;  %v9168_v28 = vunpack.c.h.b16 %v14157_v26 }
 0x420   : > { %9423 = vst [vmem:[%s12727_s12 + $0x58] sm:$0xff] %v9119_v61   ;;  %v13428_v53 = vpop.f32.mrf.mxu2 }
 0x421   : > { %v13416_v49 = vpop.f32.mrf.mxu1  ;;  %v5254_v62 = vsel %vm2513_vm1, %v5251_v33, %v5253_v17  ;;  %v5333_v2 = vpack.c.b16 %v9168_v28, %v9168_v28 }
 0x422   : > { %v6228_v46 = vshrl.u32 %v5254_v62, 16 }
 0x423   : > { %8601 = vmatmul.msk.bf16.gmra.mxu2 %vm2539_vm3, %v14152_v40  ;;  %v6231_v40 = vshll.u32 %v5254_v62, 16  ;;  %v14160_v62 = vld [vmem:[#allocation40_spill] sm:$0xff] }
 0x424   : > { %8546 = vmatmul.msk.bf16.gmra.mxu0 %vm2539_vm3, %v6184_v63  ;;  %v6230_v47 = vrot.slane %v6228_v46, 3  ;;  %v14161_v26 = vunpack.c.l.b16 %v14160_v62 }
 0x425   : > { %v6233_v58 = vrot.slane %v6231_v40, 4 }
 0x427   : > { %v6390_v43 = vpop.f32.mrf.mxu3 }
 0x428   : > { %v13411_v3 = vadd.f32 %v6390_v43, %v5983_v12  ;;  %v9912_v12 = vor.u32 %v14155_v34, %v14154_v8  ;;  %v14159_v8 = vld [vmem:[#allocation33_spill] sm:$0xff] }
 0x42f   : > { %v13439_v43 = vpop.f32.mrf.mxu3 }
 0x433   : > { %8602 = vmatmul.msk.bf16.gmra.mxu2 %vm2539_vm3, %v14153_v59  ;;  %v5992_v59 = vpop.f32.mrf.mxu2 }
 0x434   : > { %8547 = vmatmul.msk.bf16.gmra.mxu0 %vm2539_vm3, %v6201_v21 }
 0x437   : > { %v6395_v17 = vpop.f32.mrf.mxu3 }
 0x43a   : > { %v5918_v37 = vpop.f32.mrf.mxu1 }
 0x43b   : > { %v13426_v27 = vadd.f32 %v5987_v15, %v5918_v37  ;;  %v6234_v37 = vor.u32 %v6233_v58, %v6230_v47  ;;  %v14162_v47 = vld [vmem:[#allocation69_spill] sm:$0xff] }
 0x43d   : > { %v6235_v34 = vsel %vm2826_vm4, %v6217_v0, %v6234_v37  ;;  %v9482_v37 = vld [vmem:[#allocation2 + $0x88] sm:$0xff]  }
 0x43f   : > { %v13465_v40 = vpop.f32.mrf.mxu3 }
 0x441   : > { %v5458_v63 = vpop.permute.xlu0 %5457 }
 0x442   : > { %v5456_v9 = vpop.permute.xlu1 %5455  ;;  %v5515_v33 = vsel %vm2539_vm3, %v5333_v2, %v5458_v63 }
 0x443   : > { %v5512_v23 = vsel %vm2539_vm3, %v9912_v12, %v5456_v9  ;;  %8603 = vmatmul.msk.bf16.gmra.mxu2 %vm2539_vm3, %v14156_v29  ;;  %v5742_v57 = vshrl.u32 %v5515_v33, 16  ;;  %v5745_v10 = vshll.u32 %v5515_v33, 16  ;;  %v13453_v12 = vpop.f32.mrf.mxu2  ;;  %v6494_v9 = vld [vmem:[#allocation2 + $0x78] sm:$0x8] }
 0x444   : > { %v5725_v52 = vshrl.u32 %v5512_v23, 16  ;;  %v5728_v1 = vshll.u32 %v5512_v23, 16  ;;  %8548 = vmatmul.msk.bf16.gmra.mxu0 %vm2539_vm3, %v6218_v31  ;;  %v6545_v31 = vunpack.c.l.b16 %v6494_v9 }
 0x445   : > { %v5744_v14 = vrot.slane %v5742_v57, 3  ;;  %v5747_v55 = vrot.slane %v5745_v10, 4 }
 0x446   : > { %v5727_v61 = vrot.slane %v5725_v52, 3  ;;  %v5730_v35 = vrot.slane %v5728_v1, 4  ;;  %v13455_v52 = vpop.f32.mrf.mxu1  ;;  %v6703_v1 = vpop.permute.xlu2 %6702  ;;  %v6570_v28 = vpack.c.b16 %v14161_v26, %v6545_v31 }
 0x447   : > { %v5748_v23 = vor.u32 %v5747_v55, %v5744_v14 }
 0x448   : > { %v5731_v41 = vor.u32 %v5730_v35, %v5727_v61  ;;  %v9901_v61 = vld [vmem:[#allocation2 + $0x80] sm:$0xff]   ;;  %v13462_v35 = vadd.f32 %v6395_v17, %v13426_v27  ;;  %v6758_v46 = vsel %vm2539_vm3, %v6570_v28, %v6703_v1 }
 0x449   : > { %v6705_v29 = vpop.permute.xlu0 %6704 }
 0x44a   : > { %v5226_v45 = vpop.permute.xlu1 %5225  ;;  %v5732_v30 = vsel %vm2826_vm4, %v13346_v56, %v5731_v41  ;;  %v6761_v0 = vsel %vm2539_vm3, %v9901_v61, %v6705_v29  ;;  %v9483_v61 = vld [vmem:[#allocation2 + $0x90] sm:$0xff]  }
 0x44b   : > { %v5293_v21 = vsel %vm2539_vm3, %v5081_v16, %v5226_v45  ;;  %5937 = vmatmul.bf16.gmra.mxu1 %v5732_v30  ;;  %v6826_v63 = vshrl.u32 %v6761_v0, 16  ;;  %v6829_v2 = vshll.u32 %v6761_v0, 16  ;;  %v5997_v51 = vpop.f32.mrf.mxu2  ;;  %v8861_v16 = vld [vmem:[%s10244_s26 + $0x6c] sm:$0xff]  ;;  %v6819_v45 = vshrl.u32 %v6758_v46, 16 }
 0x44c   : > { %v6219_v15 = vshrl.u32 %v5293_v21, 16  ;;  %v6222_v5 = vshll.u32 %v5293_v21, 16 }
 0x44d   : > { %v6828_v33 = vrot.slane %v6826_v63, 3  ;;  %v6831_v21 = vrot.slane %v6829_v2, 4  ;;  %v6821_v27 = vrot.slane %v6819_v45, 3 }
 0x44e   : > { %v6221_v39 = vrot.slane %v6219_v15, 3  ;;  %v6224_v6 = vrot.slane %v6222_v5, 4  ;;  %v6400_v5 = vpop.f32.mrf.mxu3  ;;  %v6709_v26 = vpop.permute.xlu2 %6708 }
 0x44f   : > { %v6832_v15 = vor.u32 %v6831_v21, %v6828_v33  ;;  %v6767_v0 = vsel %vm2539_vm3, %v9483_v61, %v6709_v26 }
 0x450   : > { %v6225_v18 = vor.u32 %v6224_v6, %v6221_v39  ;;  %v6868_v45 = vshrl.u32 %v6767_v0, 16 }
 0x452   : > { %v6226_v56 = vsel %vm2826_vm4, %v13372_v50, %v6225_v18  ;;  %v5749_v50 = vsel %vm2826_vm4, %v5731_v41, %v5748_v23  ;;  %v6822_v41 = vshll.u32 %v6758_v46, 16  ;;  %v6707_v10 = vpop.permute.xlu1 %6706 }
 0x453   : > { %6419 = vmatmul.bf16.gmra.mxu3 %v6226_v56  ;;  %8604 = vmatmul.msk.bf16.gmra.mxu2 %vm2539_vm3, %v14159_v8  ;;  %v13470_v39 = vpop.f32.mrf.mxu2  ;;  %v6764_v14 = vsel %vm2539_vm3, %v9482_v37, %v6707_v10  ;;  %v8862_v8 = vld [vmem:[%s10244_s26 + $0x74] sm:$0xff] }
 0x454   : > { %8549 = vmatmul.msk.bf16.gmra.mxu0 %vm2539_vm3, %v6235_v34  ;;  %v6824_v58 = vrot.slane %v6822_v41, 4  ;;  %v6851_v56 = vshrl.u32 %v6764_v14, 16  ;;  %v6854_v17 = vshll.u32 %v6764_v14, 16 }
 0x456   : > { %v6825_v57 = vor.u32 %v6824_v58, %v6821_v27  ;;  %v13479_v9 = vpop.f32.mrf.mxu3  ;;  %v6853_v23 = vrot.slane %v6851_v56, 3  ;;  %v6856_v29 = vrot.slane %v6854_v17, 4  ;;  %v6711_v27 = vpop.permute.xlu0 %6710  ;;  %v9484_v58 = vld [vmem:[#allocation2 + $0x98] sm:$0xff]  }
 0x458   : > { %v6833_v18 = vsel %vm2826_vm4, %v6825_v57, %v6832_v15  ;;  %v6770_v57 = vsel %vm2539_vm3, %v9484_v58, %v6711_v27 }
 0x459   : > { %v6885_v37 = vshrl.u32 %v6770_v57, 16 }
 0x45b   : > { %5942 = vmatmul.bf16.gmra.mxu1 %v5749_v50  ;;  %v6002_v31 = vpop.f32.mrf.mxu2  ;;  %v6857_v50 = vor.u32 %v6856_v29, %v6853_v23  ;;  %v6887_v56 = vrot.slane %v6885_v37, 3  ;;  %v6713_v23 = vpop.permute.xlu1 %6712 }
 0x45d   : > { %v6858_v28 = vsel %vm2826_vm4, %v6832_v15, %v6857_v50 }
 0x463   : > { %8605 = vmatmul.msk.bf16.gmra.mxu2 %vm2539_vm3, %v14162_v47  ;;  %7572 = vmatmul.bf16.vlgmr.msra.gmra.mxu3 %v8861_v16  ;;  %v13485_v46 = vpop.f32.mrf.mxu2  ;;  %v8863_v16 = vld [vmem:[%s10244_s26 + $0x7c] sm:$0xff] }
 0x464   : > { %v5923_v30 = vpop.f32.mrf.mxu1  ;;  %14163 = vst [vmem:[#allocation68_spill] sm:$0xff] %v13485_v46 }
 0x465   : > { %v5993_v55 = vadd.f32 %v5992_v59, %v5923_v30 }
 0x467   : > { %v13477_v34 = vadd.f32 %v6400_v5, %v5993_v55  ;;  %v8864_v55 = vld [vmem:[%s10244_s26 + $0x84] sm:$0xff] }
 0x46b   : > { %7166 = vmatmul.bf16.vlgmr.msra.gmra.mxu1 %v6833_v18  ;;  %v13496_v33 = vpop.f32.mrf.mxu2  ;;  %v6888_v18 = vshll.u32 %v6770_v57, 16  ;;  %v13519_v57 = vpop.f32.mrf.mxu0 }
 0x46c   : > { %v13472_v6 = vpop.f32.mrf.mxu1 }
 0x46d   : > { %v6890_v17 = vrot.slane %v6888_v18, 4 }
 0x472   : > { %v6405_v62 = vpop.f32.mrf.mxu3 }
 0x473   : > { %8606 = vmatmul.msk.bf16.gmra.mxu2 %vm2539_vm3, %v13164_v38  ;;  %7577 = vmatmul.bf16.gmra.mxu3 %v8862_v8  ;;  %v6871_v38 = vshll.u32 %v6767_v0, 16  ;;  %v13502_v14 = vpop.f32.mrf.mxu2  ;;  %v6891_v8 = vor.u32 %v6890_v17, %v6887_v56 }
 0x475   : > { %v5928_v1 = vpop.f32.mrf.mxu1  ;;  %v6873_v30 = vrot.slane %v6871_v38, 4  ;;  %v9486_v38 = vld [vmem:[#allocation2 + $0xa8] sm:$0xff]  }
 0x476   : > { %v5998_v59 = vadd.f32 %v5997_v51, %v5928_v1  ;;  %v6870_v51 = vrot.slane %v6868_v45, 3 }
 0x478   : > { %v13489_v2 = vadd.f32 %v6405_v62, %v5998_v59  ;;  %v6874_v47 = vor.u32 %v6873_v30, %v6870_v51  ;;  %v8865_v59 = vld [vmem:[%s10244_s26 + $0x8c] sm:$0xff]  ;;  %v8866_v30 = vld [vmem:[%s10244_s26 + $0x94] sm:$0xff] }
 0x47a   : > { %v13492_v41 = vpop.f32.mrf.mxu3  ;;  %v6875_v5 = vsel %vm2826_vm4, %v6857_v50, %v6874_v47  ;;  %v6892_v1 = vsel %vm2826_vm4, %v6874_v47, %v6891_v8 }
 0x47b   : > { %7171 = vmatmul.bf16.gmra.mxu1 %v6858_v28  ;;  %14164 = vst [vmem:[#allocation50_spill] sm:$0xff] %v13492_v41  ;;  %v13507_v29 = vpop.f32.mrf.mxu2 }
 0x47d   : > { %v13487_v63 = vpop.f32.mrf.mxu1 }
 0x483   : > { %8607 = vmatmul.msk.bf16.gmra.mxu2 %vm2539_vm3, %v13300_v20  ;;  %7582 = vmatmul.bf16.gmra.mxu3 %v8863_v16  ;;  %v6410_v10 = vpop.f32.mrf.mxu3  ;;  %v13512_v0 = vpop.f32.mrf.mxu2 }
 0x484   : > { %v6715_v16 = vpop.permute.xlu2 %6714 }
 0x485   : > { %v5933_v21 = vpop.f32.mrf.mxu1  ;;  %v6776_v51 = vsel %vm2539_vm3, %v9486_v38, %v6715_v16  ;;  %v9488_v16 = vld [vmem:[#allocation2 + $0xb8] sm:$0xff]  }
 0x486   : > { %v6003_v15 = vadd.f32 %v6002_v31, %v5933_v21  ;;  %v9485_v31 = vld [vmem:[#allocation2 + $0xa0] sm:$0xff]   ;;  %v6919_v21 = vshrl.u32 %v6776_v51, 16  ;;  %v6922_v47 = vshll.u32 %v6776_v51, 16 }
 0x487   : > { %v6773_v50 = vsel %vm2539_vm3, %v9485_v31, %v6713_v23 }
 0x488   : > { %v13500_v20 = vadd.f32 %v6410_v10, %v6003_v15  ;;  %v6902_v62 = vshrl.u32 %v6773_v50, 16  ;;  %v6905_v26 = vshll.u32 %v6773_v50, 16  ;;  %v6921_v27 = vrot.slane %v6919_v21, 3  ;;  %v13530_v50 = vpop.f32.mrf.mxu0 }
 0x489   : > { %v6924_v58 = vrot.slane %v6922_v47, 4 }
 0x48a   : > { %14165 = vst [vmem:[#allocation91_spill] sm:$0xff] %v13500_v20  ;;  %v6904_v28 = vrot.slane %v6902_v62, 3  ;;  %v6907_v61 = vrot.slane %v6905_v26, 4 }
 0x48b   : > { %7176 = vmatmul.bf16.gmra.mxu1 %v6875_v5  ;;  %v6925_v15 = vor.u32 %v6924_v58, %v6921_v27  ;;  %v6717_v5 = vpop.permute.xlu0 %6716  ;;  %v13521_v10 = vpop.f32.mrf.mxu2 }
 0x48c   : > { %v13523_v37 = vpop.f32.mrf.mxu3 }
 0x48d   : > { %14166 = vst [vmem:[#allocation76_spill] sm:$0xff] %v13523_v37  ;;  %v13528_v23 = vpop.f32.mrf.mxu1 }
 0x48e   : > { %14167 = vst [vmem:[#allocation22_spill] sm:$0xff] %v13528_v23 }
 0x493   : > { %8608 = vmatmul.msk.bf16.gmra.mxu2 %vm2539_vm3, %v13311_v24  ;;  %7587 = vmatmul.bf16.gmra.mxu3 %v8864_v55  ;;  %v6908_v24 = vor.u32 %v6907_v61, %v6904_v28  ;;  %v13532_v62 = vpop.f32.mrf.mxu2  ;;  %v6719_v28 = vpop.permute.xlu1 %6718 }
 0x494   : > { %v6415_v26 = vpop.f32.mrf.mxu3  ;;  %v6782_v38 = vsel %vm2539_vm3, %v9488_v16, %v6719_v28  ;;  %v6721_v28 = vpop.permute.xlu2 %6720 }
 0x495   : > { %v6909_v45 = vsel %vm2826_vm4, %v6891_v8, %v6908_v24  ;;  %v6926_v18 = vsel %vm2826_vm4, %v6908_v24, %v6925_v15  ;;  %v8867_v8 = vld [vmem:[%s10244_s26 + $0x9c] sm:$0xff]  ;;  %v6953_v21 = vshrl.u32 %v6782_v38, 16  ;;  %v6956_v47 = vshll.u32 %v6782_v38, 16  ;;  %v8869_v38 = vld [vmem:[%s10244_s26 + $0xac] sm:$0xff] }
 0x49b   : > { %7181 = vmatmul.bf16.gmra.mxu1 %v6892_v1  ;;  %v13541_v27 = vpop.f32.mrf.mxu2 }
 0x49c   : > { %v6417_v58 = vpop.f32.mrf.mxu3 }
 0x4a3   : > { %8609 = vmatmul.msk.bf16.gmra.mxu2 %vm2539_vm3, %v13340_v32  ;;  %7592 = vmatmul.bf16.gmra.mxu3 %v8865_v59  ;;  %v9487_v32 = vld [vmem:[#allocation2 + $0xb0] sm:$0xff]  }
 0x4a4   : > { %v6779_v55 = vsel %vm2539_vm3, %v9487_v32, %v6717_v5  ;;  %v8868_v5 = vld [vmem:[%s10244_s26 + $0xa4] sm:$0xff] }
 0x4a5   : > { %v6936_v56 = vshrl.u32 %v6779_v55, 16  ;;  %v6939_v17 = vshll.u32 %v6779_v55, 16  ;;  %v6958_v55 = vrot.slane %v6956_v47, 4 }
 0x4a7   : > { %v6938_v31 = vrot.slane %v6936_v56, 3  ;;  %v6941_v1 = vrot.slane %v6939_v17, 4 }
 0x4a9   : > { %v6942_v59 = vor.u32 %v6941_v1, %v6938_v31  ;;  %v13549_v31 = vpop.f32.mrf.mxu2 }
 0x4ab   : > { %7186 = vmatmul.bf16.gmra.mxu1 %v6909_v45  ;;  %v6943_v45 = vsel %vm2826_vm4, %v6925_v15, %v6942_v59 }
 0x4b3   : > { %7597 = vmatmul.bf16.gmra.mxu3 %v8866_v30  ;;  %v13539_v30 = vpop.f32.mrf.mxu0 }
 0x4bb   : > { %7191 = vmatmul.bf16.gmra.mxu1 %v6926_v18 }
 0x4c3   : > { %7602 = vmatmul.bf16.gmra.mxu3 %v8867_v8  ;;  %v13547_v8 = vpop.f32.mrf.mxu0 }
 0x4c8   : > { %v5938_v61 = vpop.f32.mrf.mxu1 }
 0x4c9   : > { %v6008_v24 = vadd.f32 %v13496_v33, %v5938_v61  ;;  %v6955_v33 = vrot.slane %v6953_v21, 3 }
 0x4cb   : > { %v13537_v51 = vadd.f32 %v6415_v26, %v6008_v24  ;;  %7196 = vmatmul.bf16.gmra.mxu1 %v6943_v45  ;;  %v6959_v56 = vor.u32 %v6958_v55, %v6955_v33 }
 0x4cd   : > { %14168 = vst [vmem:[#allocation10_spill] sm:$0xff] %v13537_v51  ;;  %v6960_v61 = vsel %vm2826_vm4, %v6942_v59, %v6959_v56 }
 0x4d0   : > { %v5940_v32 = vpop.f32.mrf.mxu1 }
 0x4d1   : > { %v6010_v18 = vadd.f32 %v13502_v14, %v5940_v32  ;;  %v9489_v14 = vld [vmem:[#allocation2 + $0xc0] sm:$0xff]  }
 0x4d2   : > { %v6785_v16 = vsel %vm2539_vm3, %v9489_v14, %v6721_v28  ;;  %v14172_v28 = vld [vmem:[#allocation71_spill] sm:$0xff] }
 0x4d3   : > { %v13545_v15 = vadd.f32 %v6417_v58, %v6010_v18  ;;  %7607 = vmatmul.bf16.gmra.mxu3 %v8868_v5  ;;  %v6970_v21 = vshrl.u32 %v6785_v16, 16  ;;  %v6973_v47 = vshll.u32 %v6785_v16, 16  ;;  %v13557_v5 = vpop.f32.mrf.mxu0  ;;  %v13560_v18 = vpop.f32.mrf.mxu2  ;;  %v9490_v16 = vld [vmem:[#allocation2 + $0xc8] sm:$0xff]  }
 0x4d5   : > { %14169 = vst [vmem:[#allocation59_spill] sm:$0xff] %v13545_v15  ;;  %v6972_v59 = vrot.slane %v6970_v21, 3  ;;  %v6975_v33 = vrot.slane %v6973_v47, 4  ;;  %v13576_v47 = vld [vmem:[%s13795_s6] ss:$0 sm:$0xff] }
 0x4d6   : > { %v6420_v17 = vpop.f32.mrf.mxu3 }
 0x4d8   : > { %v5943_v1 = vpop.f32.mrf.mxu1 }
 0x4d9   : > { %v6013_v26 = vadd.f32 %v13507_v29, %v5943_v1  ;;  %v6723_v1 = vpop.permute.xlu0 %6722 }
 0x4db   : > { %v13553_v24 = vadd.f32 %v6420_v17, %v6013_v26  ;;  %7201 = vmatmul.bf16.gmra.mxu1 %v6960_v61  ;;  %v6976_v17 = vor.u32 %v6975_v33, %v6972_v59  ;;  %v6435_v61 = vadd.f32 %v13519_v57, %v14172_v28  ;;  %v13578_v57 = vpop.f32.mrf.mxu2  ;;  %v8870_v28 = vld [vmem:[%s10244_s26 + $0xb4] sm:$0xff] }
 0x4dd   : > { %14170 = vst [vmem:[#allocation24_spill] sm:$0xff] %v13553_v24  ;;  %v14174_v24 = vld [vmem:[#allocation29_spill] sm:$0xff] }
 0x4de   : > { %v6422_v45 = vpop.f32.mrf.mxu3 }
 0x4e0   : > { %v5945_v58 = vpop.f32.mrf.mxu1 }
 0x4e1   : > { %v6015_v32 = vadd.f32 %v13512_v0, %v5945_v58  ;;  %v6977_v0 = vsel %vm2826_vm4, %v6959_v56, %v6976_v17  ;;  %v14173_v58 = vld [vmem:[#allocation49_spill] sm:$0xff]  ;;  %v14175_v56 = vld [vmem:[#allocation35_spill] sm:$0xff] }
 0x4e3   : > { %v13562_v29 = vadd.f32 %v6422_v45, %v6015_v32  ;;  %7612 = vmatmul.bf16.gmra.mxu3 %v8869_v38  ;;  %v5960_v45 = vadd.f32 %v14174_v24, %v14173_v58  ;;  %v13570_v32 = vpop.f32.mrf.mxu0  ;;  %v6788_v38 = vsel %vm2539_vm3, %v9490_v16, %v6723_v1  ;;  %v13585_v1 = vld [vmem:[%s13796_s7] ss:$0 sm:$0xff]  ;;  %v13599_v51 = vpop.f32.mrf.mxu2 }
 0x4e4   : > { %v6990_v59 = vshll.u32 %v6788_v38, 16 }
 0x4e5   : > { %14171 = vst [vmem:[#allocation72_spill] sm:$0xff] %v13562_v29 }
 0x4e6   : > { %v7573_v55 = vpop.f32.mrf.mxu3  ;;  %v6992_v58 = vrot.slane %v6990_v59, 4 }
 0x4e8   : > { %v7167_v26 = vpop.f32.mrf.mxu1 }
 0x4e9   : > { %v7237_v14 = vadd.f32 %v13521_v10, %v7167_v26  ;;  %v6987_v10 = vshrl.u32 %v6788_v38, 16  ;;  %v6368_v26 = vadd.f32 %v14175_v56, %v5960_v45  ;;  %v13594_v45 = vld [vmem:[%s13798_s9] ss:$0 sm:$0xff] }
 0x4eb   : > { %v7296_v21 = vadd.f32 %v7237_v14, %v6435_v61  ;;  %7206 = vmatmul.bf16.gmra.mxu1 %v6977_v0  ;;  %v6437_v14 = vadd.f32 %v13530_v50, %v6368_v26  ;;  %v6989_v0 = vrot.slane %v6987_v10, 3  ;;  %v13596_v56 = vpop.f32.mrf.mxu0  ;;  %v7574_v10 = vadd.f32 %v13594_v45, %v7573_v55  ;;  %v6725_v26 = vpop.permute.xlu1 %6724  ;;  %v9902_v55 = vld [vmem:[#allocation2 + $0xd0] sm:$0xff]  }
 0x4ed   : > { %v7324_v24 = vmul.f32 %v13576_v47, %v7296_v21  ;;  %v6993_v15 = vor.u32 %v6992_v58, %v6989_v0  ;;  %v14177_v0 = vld [vmem:[#allocation56_spill] sm:$0xff]  ;;  %v14178_v58 = vld [vmem:[#allocation87_spill] sm:$0xff] }
 0x4ee   : > { %v7575_v33 = vpop.f32.mrf.mxu3 }
 0x4ef   : > { %v7352_v38 = vadd.f32 %v13585_v1, %v7324_v24 }
 0x4f0   : > { %v7169_v61 = vpop.f32.mrf.mxu1 }
 0x4f1   : > { %v7239_v16 = vadd.f32 %v13532_v62, %v7169_v61  ;;  %v7376_v62 = vmax.f32 %v7352_v38, 0.0  ;;  %v14176_v61 = vld [vmem:[#allocation73_spill] sm:$0xff]  ;;  %v6994_v38 = vsel %vm2826_vm4, %v6976_v17, %v6993_v15  ;;  %v13617_v17 = vpop.f32.mrf.mxu2 }
 0x4f2   : > { %v6440_v37 = vadd.f32 %v13539_v30, %v14176_v61 }
 0x4f3   : > { %v7297_v21 = vadd.f32 %v7239_v16, %v6437_v14  ;;  %7617 = vmatmul.bf16.gmra.mxu3 %v8870_v28  ;;  %v7576_v28 = vadd.f32 %v13594_v45, %v7575_v33  ;;  %v7633_v46 = vadd.f32 %v7574_v10, %v7376_v62 }
 0x4f5   : > { %v7325_v29 = vmul.f32 %v13576_v47, %v7297_v21  ;;  %v5965_v21 = vadd.f32 %v14178_v58, %v14177_v0  ;;  %v8871_v0 = vld [vmem:[%s10244_s26 + $0xbc] sm:$0xff] }
 0x4f6   : > { %v7578_v50 = vpop.f32.mrf.mxu3 }
 0x4f7   : > { %v7353_v59 = vadd.f32 %v13585_v1, %v7325_v29  ;;  %v6791_v29 = vsel %vm2539_vm3, %v9902_v55, %v6725_v26  ;;  %v6373_v41 = vadd.f32 %v13089_v36, %v5965_v21  ;;  %v7579_v21 = vadd.f32 %v13594_v45, %v7578_v50 }
 0x4f8   : > { %v7172_v24 = vpop.f32.mrf.mxu1  ;;  %v7007_v61 = vshll.u32 %v6791_v29, 16 }
 0x4f9   : > { %v7377_v14 = vmax.f32 %v7353_v59, 0.0  ;;  %v7242_v16 = vadd.f32 %v13541_v27, %v7172_v24  ;;  %v7004_v59 = vshrl.u32 %v6791_v29, 16  ;;  %v13612_v27 = vpop.f32.mrf.mxu0  ;;  %v6442_v62 = vadd.f32 %v13547_v8, %v6373_v41  ;;  %v6727_v8 = vpop.permute.xlu2 %6726 }
 0x4fa   : > { %v13635_v50 = vpop.f32.mrf.mxu2 }
 0x4fb   : > { %v7634_v23 = vadd.f32 %v7576_v28, %v7377_v14  ;;  %v7298_v20 = vadd.f32 %v7242_v16, %v6440_v37  ;;  %7211 = vmatmul.bf16.gmra.mxu1 %v6994_v38  ;;  %v7006_v10 = vrot.slane %v7004_v59, 3  ;;  %v6445_v38 = vadd.f32 %v13557_v5, %v13136_v44 }
 0x4fd   : > { %v9216_v30 = vpack.c.bf16 %v7634_v23, %v7633_v46  ;;  %v7326_v24 = vmul.f32 %v13576_v47, %v7298_v20  ;;  %v7009_v46 = vrot.slane %v7007_v61, 4  ;;  %v6582_v20 = vpack.c.b16 %v13159_v25, %v13159_v25  ;;  %v14179_v61 = vld [vmem:[#allocation23_spill] sm:$0xff]  ;;  %v14180_v25 = vld [vmem:[#allocation89_spill] sm:$0xff] }
 0x4fe   : > { %v7580_v33 = vpop.f32.mrf.mxu3 }
 0x4ff   : > { %9542 = vst [vmem:[%s12727_s12 + $0x60] sm:$0xff] %v9216_v30   ;;  %v7354_v23 = vadd.f32 %v13585_v1, %v7326_v24  ;;  %v7010_v14 = vor.u32 %v7009_v46, %v7006_v10  ;;  %v7581_v30 = vadd.f32 %v13594_v45, %v7580_v33  ;;  %v5970_v24 = vadd.f32 %v14180_v25, %v14179_v61 }
 0x500   : > { %v7174_v58 = vpop.f32.mrf.mxu1 }
 0x501   : > { %v7244_v37 = vadd.f32 %v13549_v31, %v7174_v58  ;;  %v7378_v16 = vmax.f32 %v7354_v23, 0.0  ;;  %v13629_v55 = vpop.f32.mrf.mxu0  ;;  %v6794_v58 = vsel %vm2539_vm3, %v6582_v20, %v6727_v8 }
 0x502   : > { %v7021_v10 = vshrl.u32 %v6794_v58, 16  ;;  %v7024_v46 = vshll.u32 %v6794_v58, 16 }
 0x503   : > { %v7299_v26 = vadd.f32 %v7244_v37, %v6442_v62  ;;  %7622 = vmatmul.bf16.gmra.mxu3 %v8871_v0  ;;  %v7011_v0 = vsel %vm2826_vm4, %v6993_v15, %v7010_v14  ;;  %v7635_v62 = vadd.f32 %v7579_v21, %v7378_v16 }
 0x504   : > { %v7023_v20 = vrot.slane %v7021_v10, 3  ;;  %v7026_v16 = vrot.slane %v7024_v46, 4 }
 0x505   : > { %v7327_v36 = vmul.f32 %v13576_v47, %v7299_v26  ;;  %v8872_v26 = vld [vmem:[%s10244_s26 + $0xc4] sm:$0xff]  ;;  %s9786_s26 = smul.u32 192, %s10097_s17 }
 0x506   : > { %v7583_v28 = vpop.f32.mrf.mxu3 }
 0x507   : > { %v7355_v41 = vadd.f32 %v13585_v1, %v7327_v36  ;;  %v7584_v61 = vadd.f32 %v13594_v45, %v7583_v28  ;;  %s7717_s20 = scalar_lea.hbm %s13799_s10, %s9786_s26 }
 0x508   : > { %v7177_v31 = vpop.f32.mrf.mxu1  ;;  %s7720_s17 = sshll.u32 %s7717_s20, 4  ;;  %s7721_s17 = int_to_ptr.hbm [resolvable:$true] %s7720_s17 }
 0x509   : > { %v7379_v29 = vmax.f32 %v7355_v41, 0.0  ;;  %v7247_v59 = vadd.f32 %v13560_v18, %v7177_v31  ;;  %v6378_v18 = vadd.f32 %v13256_v22, %v5970_v24  ;;  %v6456_v21 = vpop.f32.mrf.mxu0  ;;  %v7027_v22 = vor.u32 %v7026_v16, %v7023_v20  ;;  %s9957_s25 = sshra.s32 %s7721_s17, 4  ;;  %s9958_s25 = int_to_ptr.hbm [resolvable:$true] %s9957_s25 }
 0x50a   : > { %s9959_s5 = scalar_lea.hbm %s9958_s25, 192  ;;  %p9964_p3 = scmp.lt.s32.totalorder %s9958_s25, %s13799_s10 }
 0x50b   : > { %v7636_v44 = vadd.f32 %v7581_v30, %v7379_v29  ;;  %v7300_v5 = vadd.f32 %v7247_v59, %v6445_v38  ;;  %7216 = vmatmul.bf16.gmra.mxu1 %v7011_v0  ;;  %v6447_v41 = vadd.f32 %v13570_v32, %v6378_v18  ;;  %v7258_v38 = vpop.f32.mrf.mxu2  ;;  %p9960_p0 = scmp.ne.s32.totalorder %s9958_s25, %s9959_s5  ;;  %p9965_p4 = scmp.lt.s32.totalorder %s9963_s28, %s9959_s5 }
 0x50d   : > { %v9221_v37 = vpack.c.bf16 %v7636_v44, %v7635_v62  ;;  %v7328_v23 = vmul.f32 %v13576_v47, %v7300_v5  ;;  %v7028_v62 = vsel %vm2826_vm4, %v7010_v14, %v7027_v22  ;;  %v5975_v44 = vadd.f32 %v13151_v48, %v13155_v11  ;;  %p9961_p1 = pnand %p9960_p0, %p10114_p5  ;;  %p9966_p7 = por %p9965_p4, %p9964_p3 }
 0x50e   : > { %v7585_v33 = vpop.f32.mrf.mxu3  ;;  %v5980_v22 = vadd.f32 %v13382_v7, %v13384_v60 }
 0x50f   : > { %9543 = vst [vmem:[%s12727_s12 + $0x68] sm:$0xff] %v9221_v37   ;;  %v7356_v8 = vadd.f32 %v13585_v1, %v7328_v23  ;;  %v7586_v0 = vadd.f32 %v13594_v45, %v7585_v33  ;;  %p9962_p2 = pneg %p9961_p1 }
 0x510   : > { %v7179_v36 = vpop.f32.mrf.mxu1 }
 0x511   : > { %v7249_v15 = vadd.f32 %v13578_v57, %v7179_v36  ;;  %v7380_v59 = vmax.f32 %v7356_v8, 0.0  ;;  %v6450_v57 = vadd.f32 %v13596_v56, %v13321_v42  ;;  %v6459_v10 = vpop.f32.mrf.mxu0  ;;  %v6383_v42 = vadd.f32 %v13337_v13, %v5975_v44  ;;  %p9967_p8 = pnand %p9966_p7, %p9962_p2 }
 0x513   : > { %v7301_v31 = vadd.f32 %v7249_v15, %v6447_v41  ;;  %7627 = vmatmul.bf16.gmra.mxu3 %v8872_v26  ;;  %v7637_v5 = vadd.f32 %v7584_v61, %v7380_v59  ;;  %v7261_v18 = vpop.f32.mrf.mxu2 }
 0x515   : > { %v7329_v29 = vmul.f32 %v13576_v47, %v7301_v31 }
 0x516   : > { %v7588_v30 = vpop.f32.mrf.mxu3 }
 0x517   : > { %v7357_v25 = vadd.f32 %v13585_v1, %v7329_v29  ;;  %v7589_v20 = vadd.f32 %v13594_v45, %v7588_v30 }
 0x518   : > { %v7182_v32 = vpop.f32.mrf.mxu1 }
 0x519   : > { %v7381_v24 = vmax.f32 %v7357_v25, 0.0  ;;  %v7252_v58 = vadd.f32 %v13599_v51, %v7182_v32  ;;  %v6452_v51 = vadd.f32 %v13612_v27, %v6383_v42  ;;  %v6461_v41 = vpop.f32.mrf.mxu0  ;;  %v6455_v27 = vadd.f32 %v13629_v55, %v13366_v54 }
 0x51b   : > { %v7638_v37 = vadd.f32 %v7586_v0, %v7381_v24  ;;  %v7302_v28 = vadd.f32 %v7252_v58, %v6450_v57  ;;  %7221 = vmatmul.bf16.gmra.mxu1 %v7028_v62  ;;  %v7263_v16 = vpop.f32.mrf.mxu2  ;;  %v6388_v57 = vadd.f32 %v13402_v4, %v5980_v22 }
 0x51d   : > { %v9226_v46 = vpack.c.bf16 %v7638_v37, %v7637_v5  ;;  %v7330_v56 = vmul.f32 %v13576_v47, %v7302_v28  ;;  %v6457_v54 = vadd.f32 %v6456_v21, %v6388_v57 }
 0x51e   : > { %v7590_v23 = vpop.f32.mrf.mxu3 }
 0x51f   : > { %9544 = vst [vmem:[%s12727_s12 + $0x70] sm:$0xff] %v9226_v46   ;;  %v7358_v48 = vadd.f32 %v13585_v1, %v7330_v56  ;;  %v6460_v46 = vadd.f32 %v6459_v10, %v13411_v3 }
 0x520   : > { %v7184_v33 = vpop.f32.mrf.mxu1 }
 0x521   : > { %v7254_v14 = vadd.f32 %v13617_v17, %v7184_v33  ;;  %v7382_v15 = vmax.f32 %v7358_v48, 0.0  ;;  %v7591_v17 = vadd.f32 %v13594_v45, %v7590_v23  ;;  %v6464_v55 = vpop.f32.mrf.mxu0  ;;  %v5985_v48 = vadd.f32 %v13413_v19, %v13416_v49 }
 0x522   : > { %v6465_v22 = vadd.f32 %v6464_v55, %v13462_v35 }
 0x523   : > { %v7303_v11 = vadd.f32 %v7254_v14, %v6452_v51  ;;  %v7639_v59 = vadd.f32 %v7589_v20, %v7382_v15  ;;  %v7266_v62 = vpop.f32.mrf.mxu2 }
 0x525   : > { %v7331_v26 = vmul.f32 %v13576_v47, %v7303_v11 }
 0x526   : > { %v7593_v36 = vpop.f32.mrf.mxu3 }
 0x527   : > { %v7359_v13 = vadd.f32 %v13585_v1, %v7331_v26  ;;  %v7594_v37 = vadd.f32 %v13594_v45, %v7593_v36  ;;  %v6393_v36 = vadd.f32 %v13439_v43, %v5985_v48 }
 0x528   : > { %v7187_v8 = vpop.f32.mrf.mxu1 }
 0x529   : > { %v7383_v31 = vmax.f32 %v7359_v13, 0.0  ;;  %v7257_v29 = vadd.f32 %v13635_v50, %v7187_v8  ;;  %v6466_v42 = vpop.f32.mrf.mxu0  ;;  %v6462_v10 = vadd.f32 %v6461_v41, %v6393_v36 }
 0x52b   : > { %v7640_v61 = vadd.f32 %v7591_v17, %v7383_v31  ;;  %v7304_v25 = vadd.f32 %v7257_v29, %v6455_v27  ;;  %v7268_v14 = vpop.f32.mrf.mxu2 }
 0x52d   : > { %v9231_v32 = vpack.c.bf16 %v7640_v61, %v7639_v59  ;;  %v7332_v24 = vmul.f32 %v13576_v47, %v7304_v25  ;;  %v5990_v61 = vadd.f32 %v13428_v53, %v13455_v52 }
 0x52e   : > { %v7595_v30 = vpop.f32.mrf.mxu3 }
 0x52f   : > { %9545 = vst [vmem:[%s12727_s12 + $0x78] sm:$0xff] %v9231_v32   ;;  %v7360_v50 = vadd.f32 %v13585_v1, %v7332_v24  ;;  %v7596_v21 = vadd.f32 %v13594_v45, %v7595_v30 }
 0x530   : > { %v7189_v0 = vpop.f32.mrf.mxu1 }
 0x531   : > { %v7259_v58 = vadd.f32 %v7258_v38, %v7189_v0  ;;  %v7384_v5 = vmax.f32 %v7360_v50, 0.0  ;;  %v6469_v8 = vpop.f32.mrf.mxu0  ;;  %v6398_v0 = vadd.f32 %v13465_v40, %v5990_v61 }
 0x533   : > { %v7305_v44 = vadd.f32 %v7259_v58, %v6457_v54  ;;  %v7641_v56 = vadd.f32 %v7594_v37, %v7384_v5  ;;  %v7271_v31 = vpop.f32.mrf.mxu2  ;;  %v6467_v55 = vadd.f32 %v6466_v42, %v6398_v0  ;;  %v5995_v42 = vadd.f32 %v13453_v12, %v13472_v6 }
 0x535   : > { %v7333_v7 = vmul.f32 %v13576_v47, %v7305_v44 }
 0x536   : > { %v7598_v60 = vpop.f32.mrf.mxu3 }
 0x537   : > { %v7361_v4 = vadd.f32 %v13585_v1, %v7333_v7  ;;  %v7599_v19 = vadd.f32 %v13594_v45, %v7598_v60 }
 0x538   : > { %v7192_v28 = vpop.f32.mrf.mxu1 }
 0x539   : > { %v7385_v23 = vmax.f32 %v7361_v4, 0.0  ;;  %v7262_v38 = vadd.f32 %v7261_v18, %v7192_v28  ;;  %v6471_v54 = vpop.f32.mrf.mxu0  ;;  %v6470_v4 = vadd.f32 %v6469_v8, %v13477_v34 }
 0x53b   : > { %v7642_v33 = vadd.f32 %v7596_v21, %v7385_v23  ;;  %v7306_v51 = vadd.f32 %v7262_v38, %v6460_v46  ;;  %v7273_v50 = vpop.f32.mrf.mxu2 }
 0x53d   : > { %v9236_v11 = vpack.c.bf16 %v7642_v33, %v7641_v56  ;;  %v7334_v15 = vmul.f32 %v13576_v47, %v7306_v51 }
 0x53e   : > { %v7600_v26 = vpop.f32.mrf.mxu3 }
 0x53f   : > { %9546 = vst [vmem:[%s12727_s12 + $0x80] sm:$0xff] %v9236_v11   ;;  %v7362_v18 = vadd.f32 %v13585_v1, %v7334_v15  ;;  %v7601_v41 = vadd.f32 %v13594_v45, %v7600_v26  ;;  %v6403_v11 = vadd.f32 %v13479_v9, %v5995_v42 }
 0x540   : > { %v7194_v3 = vpop.f32.mrf.mxu1 }
 0x541   : > { %v7264_v20 = vadd.f32 %v7263_v16, %v7194_v3  ;;  %v7386_v29 = vmax.f32 %v7362_v18, 0.0  ;;  %v6474_v28 = vpop.f32.mrf.mxu0  ;;  %v6472_v36 = vadd.f32 %v6471_v54, %v6403_v11 }
 0x543   : > { %v7307_v13 = vadd.f32 %v7264_v20, %v6462_v10  ;;  %v7643_v25 = vadd.f32 %v7599_v19, %v7386_v29  ;;  %v7276_v38 = vpop.f32.mrf.mxu2 }
 0x545   : > { %v7335_v27 = vmul.f32 %v13576_v47, %v7307_v13 }
 0x546   : > { %v7603_v17 = vpop.f32.mrf.mxu3 }
 0x547   : > { %v7363_v49 = vadd.f32 %v13585_v1, %v7335_v27  ;;  %v7604_v5 = vadd.f32 %v13594_v45, %v7603_v17 }
 0x548   : > { %v7197_v43 = vpop.f32.mrf.mxu1 }
 0x549   : > { %v7387_v59 = vmax.f32 %v7363_v49, 0.0  ;;  %v7267_v16 = vadd.f32 %v7266_v62, %v7197_v43  ;;  %v6476_v3 = vpop.f32.mrf.mxu0  ;;  %v6000_v49 = vadd.f32 %v13470_v39, %v13487_v63 }
 0x54b   : > { %v7644_v32 = vadd.f32 %v7601_v41, %v7387_v59  ;;  %v7308_v30 = vadd.f32 %v7267_v16, %v6465_v22  ;;  %v7278_v18 = vpop.f32.mrf.mxu2 }
 0x54d   : > { %v9241_v57 = vpack.c.bf16 %v7644_v32, %v7643_v25  ;;  %v7336_v58 = vmul.f32 %v13576_v47, %v7308_v30  ;;  %v14181_v32 = vld [vmem:[#allocation50_spill] sm:$0xff] }
 0x54e   : > { %v7605_v24 = vpop.f32.mrf.mxu3  ;;  %v6408_v30 = vadd.f32 %v14181_v32, %v6000_v49 }
 0x54f   : > { %9547 = vst [vmem:[%s12727_s12 + $0x88] sm:$0xff] %v9241_v57   ;;  %v7364_v62 = vadd.f32 %v13585_v1, %v7336_v58  ;;  %v7606_v23 = vadd.f32 %v13594_v45, %v7605_v24 }
 0x550   : > { %v7199_v35 = vpop.f32.mrf.mxu1  ;;  %v6477_v24 = vadd.f32 %v6476_v3, %v6408_v30 }
 0x551   : > { %v7269_v44 = vadd.f32 %v7268_v14, %v7199_v35  ;;  %v7388_v60 = vmax.f32 %v7364_v62, 0.0  ;;  %v6479_v41 = vpop.f32.mrf.mxu0 }
 0x553   : > { %v7309_v7 = vadd.f32 %v7269_v44, %v6467_v55  ;;  %v7645_v56 = vadd.f32 %v7604_v5, %v7388_v60  ;;  %v7281_v61 = vpop.f32.mrf.mxu2 }
 0x555   : > { %v7337_v53 = vmul.f32 %v13576_v47, %v7309_v7 }
 0x556   : > { %v7608_v52 = vpop.f32.mrf.mxu3 }
 0x557   : > { %v7365_v40 = vadd.f32 %v13585_v1, %v7337_v53  ;;  %v7609_v8 = vadd.f32 %v13594_v45, %v7608_v52  ;;  %v14182_v53 = vld [vmem:[#allocation91_spill] sm:$0xff] }
 0x558   : > { %v7202_v37 = vpop.f32.mrf.mxu1  ;;  %v6480_v52 = vadd.f32 %v6479_v41, %v14182_v53 }
 0x559   : > { %v7389_v46 = vmax.f32 %v7365_v40, 0.0  ;;  %v7272_v21 = vadd.f32 %v7271_v31, %v7202_v37  ;;  %v6475_v31 = vadd.f32 %v6474_v28, %v13489_v2  ;;  %v14183_v37 = vld [vmem:[#allocation22_spill] sm:$0xff] }
 0x55b   : > { %v7646_v33 = vadd.f32 %v7606_v23, %v7389_v46  ;;  %v7310_v51 = vadd.f32 %v7272_v21, %v6470_v4  ;;  %v7283_v62 = vpop.f32.mrf.mxu2  ;;  %v14184_v4 = vld [vmem:[#allocation68_spill] sm:$0xff] }
 0x55c   : > { %v6005_v28 = vadd.f32 %v14184_v4, %v14183_v37 }
 0x55d   : > { %v9246_v14 = vpack.c.bf16 %v7646_v33, %v7645_v56  ;;  %v7338_v26 = vmul.f32 %v13576_v47, %v7310_v51  ;;  %v14185_v56 = vld [vmem:[#allocation76_spill] sm:$0xff] }
 0x55e   : > { %v7610_v48 = vpop.f32.mrf.mxu3  ;;  %v6413_v33 = vadd.f32 %v14185_v56, %v6005_v28 }
 0x55f   : > { %9548 = vst [vmem:[%s12727_s12 + $0x90] sm:$0xff] %v9246_v14   ;;  %v7366_v10 = vadd.f32 %v13585_v1, %v7338_v26  ;;  %v7611_v29 = vadd.f32 %v13594_v45, %v7610_v48 }
 0x560   : > { %v7204_v34 = vpop.f32.mrf.mxu1 }
 0x561   : > { %v7274_v15 = vadd.f32 %v7273_v50, %v7204_v34  ;;  %v7390_v13 = vmax.f32 %v7366_v10, 0.0  ;;  %v6481_v50 = vpop.f32.mrf.mxu0 }
 0x562   : > { %v6482_v48 = vadd.f32 %v6481_v50, %v6413_v33 }
 0x563   : > { %v7311_v20 = vadd.f32 %v7274_v15, %v6472_v36  ;;  %v7647_v43 = vadd.f32 %v7609_v8, %v7390_v13  ;;  %v7286_v34 = vpop.f32.mrf.mxu2 }
 0x565   : > { %v7339_v12 = vmul.f32 %v13576_v47, %v7311_v20 }
 0x566   : > { %v7613_v6 = vpop.f32.mrf.mxu3 }
 0x567   : > { %v7367_v9 = vadd.f32 %v13585_v1, %v7339_v12  ;;  %v7614_v55 = vadd.f32 %v13594_v45, %v7613_v6 }
 0x568   : > { %v7207_v27 = vpop.f32.mrf.mxu1 }
 0x569   : > { %v7391_v17 = vmax.f32 %v7367_v9, 0.0  ;;  %v7277_v19 = vadd.f32 %v7276_v38, %v7207_v27  ;;  %v6484_v11 = vpop.f32.mrf.mxu0  ;;  %v14186_v9 = vld [vmem:[#allocation10_spill] sm:$0xff] }
 0x56a   : > { %v6485_v27 = vadd.f32 %v6484_v11, %v14186_v9 }
 0x56b   : > { %v7648_v22 = vadd.f32 %v7611_v29, %v7391_v17  ;;  %v7312_v59 = vadd.f32 %v7277_v19, %v6475_v31 }
 0x56d   : > { %v9251_v16 = vpack.c.bf16 %v7648_v22, %v7647_v43  ;;  %v7340_v57 = vmul.f32 %v13576_v47, %v7312_v59  ;;  %v7288_v43 = vpop.f32.mrf.mxu2 }
 0x56e   : > { %v7615_v25 = vpop.f32.mrf.mxu3 }
 0x56f   : > { %9549 = vst [vmem:[%s12727_s12 + $0x98] sm:$0xff] %v9251_v16   ;;  %v7368_v54 = vadd.f32 %v13585_v1, %v7340_v57  ;;  %v7616_v5 = vadd.f32 %v13594_v45, %v7615_v25  ;;  %v14187_v16 = vld [vmem:[#allocation59_spill] sm:$0xff] }
 0x570   : > { %v7209_v2 = vpop.f32.mrf.mxu1 }
 0x571   : > { %v7279_v0 = vadd.f32 %v7278_v18, %v7209_v2  ;;  %v7392_v35 = vmax.f32 %v7368_v54, 0.0  ;;  %v6486_v17 = vpop.f32.mrf.mxu0 }
 0x573   : > { %v7313_v58 = vadd.f32 %v7279_v0, %v6477_v24  ;;  %v7649_v46 = vadd.f32 %v7614_v55, %v7392_v35  ;;  %v14188_v55 = vld [vmem:[#allocation24_spill] sm:$0xff] }
 0x575   : > { %v7341_v39 = vmul.f32 %v13576_v47, %v7313_v58  ;;  %v7291_v0 = vpop.f32.mrf.mxu2 }
 0x576   : > { %v7618_v63 = vpop.f32.mrf.mxu3 }
 0x577   : > { %v7369_v44 = vadd.f32 %v13585_v1, %v7341_v39  ;;  %v7619_v20 = vadd.f32 %v13594_v45, %v7618_v63 }
 0x578   : > { %v7212_v7 = vpop.f32.mrf.mxu1 }
 0x579   : > { %v7393_v60 = vmax.f32 %v7369_v44, 0.0  ;;  %v7282_v40 = vadd.f32 %v7281_v61, %v7212_v7  ;;  %v6487_v61 = vadd.f32 %v6486_v17, %v14187_v16  ;;  %v6489_v2 = vpop.f32.mrf.mxu0 }
 0x57a   : > { %v6490_v44 = vadd.f32 %v6489_v2, %v14188_v55 }
 0x57b   : > { %v7650_v23 = vadd.f32 %v7616_v5, %v7393_v60  ;;  %v7314_v21 = vadd.f32 %v7282_v40, %v6480_v52 }
 0x57d   : > { %v9256_v38 = vpack.c.bf16 %v7650_v23, %v7649_v46  ;;  %v7342_v51 = vmul.f32 %v13576_v47, %v7314_v21  ;;  %v7293_v4 = vpop.f32.mrf.mxu2  ;;  %v14189_v46 = vld [vmem:[#allocation72_spill] sm:$0xff] }
 0x57e   : > { %v7620_v42 = vpop.f32.mrf.mxu3 }
 0x57f   : > { %9550 = vst [vmem:[%s12727_s12 + $0xa0] sm:$0xff] %v9256_v38   ;;  %v7370_v36 = vadd.f32 %v13585_v1, %v7342_v51  ;;  %v7621_v8 = vadd.f32 %v13594_v45, %v7620_v42 }
 0x580   : > { %v7214_v14 = vpop.f32.mrf.mxu1 }
 0x581   : > { %v7284_v26 = vadd.f32 %v7283_v62, %v7214_v14  ;;  %v7394_v10 = vmax.f32 %v7370_v36, 0.0  ;;  %v6491_v40 = vpop.f32.mrf.mxu0 }
 0x582   : > { %v6492_v23 = vadd.f32 %v6491_v40, %v14189_v46 }
 0x583   : > { %v7315_v15 = vadd.f32 %v7284_v26, %v6482_v48  ;;  %v7651_v29 = vadd.f32 %v7619_v20, %v7394_v10 }
 0x585   : > { %v7343_v3 = vmul.f32 %v13576_v47, %v7315_v15 }
 0x586   : > { %v7623_v6 = vpop.f32.mrf.mxu3 }
 0x587   : > { %v7371_v18 = vadd.f32 %v13585_v1, %v7343_v3  ;;  %v7624_v58 = vadd.f32 %v13594_v45, %v7623_v6 }
 0x588   : > { %v7217_v12 = vpop.f32.mrf.mxu1 }
 0x589   : > { %v7395_v13 = vmax.f32 %v7371_v18, 0.0  ;;  %v7287_v31 = vadd.f32 %v7286_v34, %v7217_v12 }
 0x58b   : > { %v7652_v19 = vadd.f32 %v7621_v8, %v7395_v13  ;;  %v7316_v49 = vadd.f32 %v7287_v31, %v6485_v27 }
 0x58d   : > { %v9261_v22 = vpack.c.bf16 %v7652_v19, %v7651_v29  ;;  %v7344_v59 = vmul.f32 %v13576_v47, %v7316_v49 }
 0x58e   : > { %v7625_v32 = vpop.f32.mrf.mxu3 }
 0x58f   : > { %9551 = vst [vmem:[%s12727_s12 + $0xa8] sm:$0xff] %v9261_v22   ;;  %v7372_v30 = vadd.f32 %v13585_v1, %v7344_v59  ;;  %v7626_v35 = vadd.f32 %v13594_v45, %v7625_v32 }
 0x590   : > { %v7219_v41 = vpop.f32.mrf.mxu1 }
 0x591   : > { %v7289_v25 = vadd.f32 %v7288_v43, %v7219_v41  ;;  %v7396_v54 = vmax.f32 %v7372_v30, 0.0 }
 0x593   : > { %v7317_v57 = vadd.f32 %v7289_v25, %v6487_v61  ;;  %v7653_v7 = vadd.f32 %v7624_v58, %v7396_v54 }
 0x595   : > { %v7345_v24 = vmul.f32 %v13576_v47, %v7317_v57 }
 0x596   : > { %v7628_v60 = vpop.f32.mrf.mxu3 }
 0x597   : > { %v7373_v39 = vadd.f32 %v13585_v1, %v7345_v24  ;;  %v7629_v14 = vadd.f32 %v13594_v45, %v7628_v60 }
 0x598   : > { %v7222_v63 = vpop.f32.mrf.mxu1 }
 0x599   : > { %v7397_v50 = vmax.f32 %v7373_v39, 0.0  ;;  %v7292_v62 = vadd.f32 %v7291_v0, %v7222_v63 }
 0x59b   : > { %v7654_v53 = vadd.f32 %v7626_v35, %v7397_v50  ;;  %v7318_v52 = vadd.f32 %v7292_v62, %v6490_v44 }
 0x59d   : > { %v9266_v5 = vpack.c.bf16 %v7654_v53, %v7653_v7  ;;  %v7346_v37 = vmul.f32 %v13576_v47, %v7318_v52 }
 0x59e   : > { %v7630_v33 = vpop.f32.mrf.mxu3 }
 0x59f   : > { %9552 = vst [vmem:[%s12727_s12 + $0xb0] sm:$0xff] %v9266_v5   ;;  %v7374_v38 = vadd.f32 %v13585_v1, %v7346_v37  ;;  %v7631_v26 = vadd.f32 %v13594_v45, %v7630_v33 }
 0x5a0   : > { %v7224_v28 = vpop.f32.mrf.mxu1 }
 0x5a1   : > { %v7294_v21 = vadd.f32 %v7293_v4, %v7224_v28  ;;  %v7398_v51 = vmax.f32 %v7374_v38, 0.0 }
 0x5a3   : > { %v7319_v42 = vadd.f32 %v7294_v21, %v6492_v23  ;;  %v7655_v34 = vadd.f32 %v7629_v14, %v7398_v51 }
 0x5a5   : > { %v7347_v56 = vmul.f32 %v13576_v47, %v7319_v42 }
 0x5a7   : > { %v7375_v48 = vadd.f32 %v13585_v1, %v7347_v56 }
 0x5a9   : > { %v7399_v11 = vmax.f32 %v7375_v48, 0.0 }
 0x5ab   : > { %v7656_v36 = vadd.f32 %v7631_v26, %v7399_v11 }
 0x5ad   : > { %v9271_v47 = vpack.c.bf16 %v7656_v36, %v7655_v34 }
 0x5af   : > { %9553 = vst [vmem:[%s12727_s12 + $0xb8] sm:$0xff] %v9271_v47  }
 0x5b0   : > { %9970 = shalt.err (!%p9967_p8)
}
 0x5b1   : > { %s10020_s30 = smov 4  }
 0x5b2   : > { %9791 = dma.vmem_to_hbm [thread:$0]  (%p10114_p5), %s7719_s21, 3072, %s7721_s17, %s7706_s27, %s10019_s29, %s10019_s29, %s10020_s30  }
 0x5b3 PF: > { %p9803_p9 = scmp.ge.s32.totalorder %s10013_s16, 2  ;;  %s7735_s12 = sand.u32 1, %s10001_s13  }
 0x5b4   : > { %s7736_s25 = scalar_lea.sflag [#allocation5], %s7735_s12 }
 0x5b5   : > { %p9798_p10 = pnand %p9803_p9, %p10118_p6 }
 0x5b7   : > { %p9799_p11 = pneg %p9798_p10 }
 0x5b9   : > { %9992 = dma.done.wait (%p9799_p11), %s7736_s25, 3072  }
 0x5ba   : > { %9994 = vsyncadd (%p9799_p11), %s7736_s25, 4294964224  ;;  %p21_p12 = scmp.ge.s32.totalorder %s10101_s19, 4   ;;  %s14190_s13 = smov %s10005_s14 }
 0x5bb   : > { %s14191_s14 = smov %s10009_s15  ;;  %s14192_s15 = smov %s10112_s22 }
 0x5bc   : > { %s14193_s16 = smov %s10101_s19  ;;  %23 = sbr.rel (!%p21_p12) target bundleno = 6 (0x6), region = 104 }
 0x5c1   :  { %7742 = vsyncpa [#allocation4], 1 }
 0x5c2   :  { %7744 = vsyncpa [#allocation4 + $0x1], 1 }
 0x5c3   :  { %7745 = vsyncpa [#allocation5], 1 }
 0x5c4   :  { %7747 = vsyncpa [#allocation5 + $0x1], 1 }

</bundles_post_ra>
